<compile_context>
chip_gen: v6e
topology: v6e:2x2x1
jax: 0.10.0
libtpu: 0.0.40
codegen_flags: <defaults>
</compile_context>

<pallas_src>
import functools

import jax
import jax.numpy as jnp
from jax.experimental import pallas as pl
from jax.experimental.pallas import tpu as pltpu

BN_EPS = 1e-5
MAX_TILE_M = 512                  # rows per grid step for the matmul kernels
MAX_TILE_R = 256                  # rows per grid step for the BN-apply kernel
VMEM_LIMIT = 32 * 1024 * 1024     # fits v7x (64 MiB phys) and raises v5e's 16 MiB default


def _compiler_params():
    # M-tiles are fully independent -> "parallel" lets Mosaic shard the grid
    # across both TensorCores on v7x (harmless on single-TC v5e/v6e).
    return pltpu.CompilerParams(
        dimension_semantics=("parallel",),
        vmem_limit_bytes=VMEM_LIMIT,
    )


# ------------------------------ Pallas kernels -------------------------------

def _mm_bias_stats_kernel(m_total, p_ref, w_ref, b_ref, y_ref, sum_ref, sq_ref):
    # conv-as-matmul: bf16 x bf16 -> f32 on the MXU, + conv bias.
    y = jnp.dot(p_ref[...], w_ref[...], preferred_element_type=jnp.float32)
    y = y + b_ref[...]
    y_ref[...] = y

    # Per-tile BatchNorm partial sums so global batch statistics survive
    # M-tiling.  Mask garbage rows of a partial boundary tile (never taken at
    # the demo shapes; kept for robustness at arbitrary resolutions).
    tile_m = y.shape[0]
    if m_total % tile_m == 0:
        ym = y
    else:
        rows = (pl.program_id(0) * tile_m
                + jax.lax.broadcasted_iota(jnp.int32, (tile_m, 1), 0))
        ym = jnp.where(rows < m_total, y, 0.0)
    sum_ref[...] = jnp.sum(ym, axis=0, keepdims=True).reshape(sum_ref.shape)
    sq_ref[...] = jnp.sum(ym * ym, axis=0, keepdims=True).reshape(sq_ref.shape)


def _mm_bias_kernel(p_ref, w_ref, b_ref, o_ref):
    o_ref[...] = (jnp.dot(p_ref[...], w_ref[...],
                          preferred_element_type=jnp.float32) + b_ref[...])


def _bn_relu_kernel(y_ref, scale_ref, shift_ref, o_ref):
    # Folded BatchNorm (per-channel affine) + ReLU; f32 math, bf16 store.
    o_ref[...] = jnp.maximum(
        y_ref[...] * scale_ref[...] + shift_ref[...], 0.0).astype(o_ref.dtype)


# ------------------------------ kernel wrappers -------------------------------

def matmul_bias_stats(patches, w_mat, bias):
    """Tiled (matmul + bias) with per-tile BN partial sums.

    patches: [M, K] bf16, w_mat: [K, C] bf16, bias: [C] f32.
    Returns y [M, C] f32, sums [nt, C] f32, sqs [nt, C] f32.
    """
    M, K = patches.shape
    C = w_mat.shape[1]
    tm = M if M <= MAX_TILE_M else MAX_TILE_M
    nt = pl.cdiv(M, tm)
    y, sums, sqs = pl.pallas_call(
        functools.partial(_mm_bias_stats_kernel, M),
        out_shape=(
            jax.ShapeDtypeStruct((M, C), jnp.float32),
            jax.ShapeDtypeStruct((nt, 1, C), jnp.float32),
            jax.ShapeDtypeStruct((nt, 1, C), jnp.float32),
        ),
        grid=(nt,),
        in_specs=[
            pl.BlockSpec((tm, K), lambda i: (i, 0)),
            pl.BlockSpec((K, C), lambda i: (0, 0)),       # weights stay resident
            pl.BlockSpec((1, C), lambda i: (0, 0)),
        ],
        out_specs=(
            pl.BlockSpec((tm, C), lambda i: (i, 0)),
            pl.BlockSpec((1, 1, C), lambda i: (i, 0, 0)),
            pl.BlockSpec((1, 1, C), lambda i: (i, 0, 0)),
        ),
        compiler_params=_compiler_params(),
    )(patches, w_mat, bias.reshape(1, C).astype(jnp.float32))
    return y, sums.reshape(nt, C), sqs.reshape(nt, C)


def matmul_bias(patches, w_mat, bias):
    M, K = patches.shape
    C = w_mat.shape[1]
    tm = M if M <= MAX_TILE_M else MAX_TILE_M
    nt = pl.cdiv(M, tm)
    return pl.pallas_call(
        _mm_bias_kernel,
        out_shape=jax.ShapeDtypeStruct((M, C), jnp.float32),
        grid=(nt,),
        in_specs=[
            pl.BlockSpec((tm, K), lambda i: (i, 0)),
            pl.BlockSpec((K, C), lambda i: (0, 0)),
            pl.BlockSpec((1, C), lambda i: (0, 0)),
        ],
        out_specs=pl.BlockSpec((tm, C), lambda i: (i, 0)),
        compiler_params=_compiler_params(),
    )(patches, w_mat, bias.reshape(1, C).astype(jnp.float32))


def bn_relu_apply(y2d, scale_cols, shift_cols):
    """BN + ReLU on the conv output viewed as [N*H_out, W_out*C].

    The [rows, W*C] view keeps loads/stores lane-dense even when C < 128
    (the biggest measured store-path lever); output is bf16.
    """
    R, Wd = y2d.shape
    tr = R if R <= MAX_TILE_R else MAX_TILE_R
    nt = pl.cdiv(R, tr)
    return pl.pallas_call(
        _bn_relu_kernel,
        out_shape=jax.ShapeDtypeStruct((R, Wd), jnp.bfloat16),
        grid=(nt,),
        in_specs=[
            pl.BlockSpec((tr, Wd), lambda i: (i, 0)),
            pl.BlockSpec((1, Wd), lambda i: (0, 0)),
            pl.BlockSpec((1, Wd), lambda i: (0, 0)),
        ],
        out_specs=pl.BlockSpec((tr, Wd), lambda i: (i, 0)),
        compiler_params=_compiler_params(),
    )(y2d, scale_cols.reshape(1, Wd), shift_cols.reshape(1, Wd))


# --------------------------- conv / convt plumbing ----------------------------

def _bn_fold(sums, sqs, count, gamma, beta, phases=1):
    """Fold per-tile partial sums into per-channel BN scale/shift."""
    s = sums.sum(axis=0)
    q = sqs.sum(axis=0)
    if phases > 1:                       # sub-pixel phases share channel stats
        c = s.shape[0] // phases
        s = s.reshape(phases, c).sum(axis=0)
        q = q.reshape(phases, c).sum(axis=0)
    mean = s / count
    var = q / count - mean * mean        # biased variance (training-mode BN)
    inv = jax.lax.rsqrt(var + BN_EPS)
    scale = gamma * inv
    shift = beta - mean * scale
    return scale, shift


def _im2col(x, stride, H_out, W_out):
    # x: [N, H, W, C] bf16  ->  [N*H_out*W_out, 9*C]   (tap order: ky, kx, c)
    N, H, W, C = x.shape
    xp = jnp.pad(x, ((0, 0), (1, 1), (1, 1), (0, 0)))
    taps = []
    for dy in range(3):
        for dx in range(3):
            taps.append(xp[:, dy:dy + stride * (H_out - 1) + 1:stride,
                              dx:dx + stride * (W_out - 1) + 1:stride, :])
    p = jnp.stack(taps, axis=3)          # [N, H_out, W_out, 9, C]
    return p.reshape(N * H_out * W_out, 9 * C)
    # TODO(synk): HBM-materialized im2col is ~9x read amplification on the
    # activation; an in-kernel halo-block im2col would remove it.


def conv_bn_relu(x, w, b, gamma, beta, stride):
    # w: [C_out, C_in, 3, 3] (PyTorch Conv2d layout), padding=1.
    N, H, W, C_in = x.shape
    C_out = w.shape[0]
    H_out = (H - 1) // stride + 1
    W_out = (W - 1) // stride + 1
    patches = _im2col(x.astype(jnp.bfloat16), stride, H_out, W_out)
    w_mat = jnp.transpose(w, (2, 3, 1, 0)).reshape(9 * C_in, C_out)
    y, sums, sqs = matmul_bias_stats(patches, w_mat.astype(jnp.bfloat16), b)
    M = N * H_out * W_out
    scale, shift = _bn_fold(sums, sqs, M, gamma, beta)
    a = bn_relu_apply(y.reshape(N * H_out, W_out * C_out),
                      jnp.tile(scale, W_out), jnp.tile(shift, W_out))
    return a.reshape(N, H_out, W_out, C_out)


def _convt_subpixel(x, wt):
    """Sub-pixel decomposition of ConvTranspose2d(k=3, s=2, p=1, op=1).

    Each output pixel (2m+py, 2n+px) depends only on the 2x2 input
    neighbourhood {(m,n)..(m+1,n+1)}, so the matmul runs on the un-dilated
    input (~4x fewer FLOPs / VMEM than the zero-dilation formulation).
    wt: [C_in, C_out, 3, 3] (PyTorch ConvTranspose2d layout).
    Returns patches [N*H*W, 4*C_in] bf16-compatible and w_mat [4*C_in, 4*C_out]
    whose output columns are ordered (phase = py*2+px, c_out).
    """
    N, H, W, C_in = x.shape
    C_out = wt.shape[1]
    xp = jnp.pad(x, ((0, 0), (0, 1), (0, 1), (0, 0)))
    taps = [xp[:, dy:dy + H, dx:dx + W, :] for dy in (0, 1) for dx in (0, 1)]
    patches = jnp.stack(taps, axis=3).reshape(N * H * W, 4 * C_in)

    wall = jnp.zeros((4, C_in, 4, C_out), wt.dtype)   # [tap, ci, phase, co]
    # phase (0,0): out[2m,2n]     = x[m,n] w[1,1]
    wall = wall.at[0, :, 0, :].set(wt[:, :, 1, 1])
    # phase (0,1): out[2m,2n+1]   = x[m,n+1] w[1,0] + x[m,n] w[1,2]
    wall = wall.at[1, :, 1, :].set(wt[:, :, 1, 0])
    wall = wall.at[0, :, 1, :].set(wt[:, :, 1, 2])
    # phase (1,0): out[2m+1,2n]   = x[m+1,n] w[0,1] + x[m,n] w[2,1]
    wall = wall.at[2, :, 2, :].set(wt[:, :, 0, 1])
    wall = wall.at[0, :, 2, :].set(wt[:, :, 2, 1])
    # phase (1,1): out[2m+1,2n+1] = x[m+1,n+1] w[0,0] + x[m+1,n] w[0,2]
    #                             + x[m,n+1]   w[2,0] + x[m,n]   w[2,2]
    wall = wall.at[3, :, 3, :].set(wt[:, :, 0, 0])
    wall = wall.at[2, :, 3, :].set(wt[:, :, 0, 2])
    wall = wall.at[1, :, 3, :].set(wt[:, :, 2, 0])
    wall = wall.at[0, :, 3, :].set(wt[:, :, 2, 2])
    return patches, wall.reshape(4 * C_in, 4 * C_out)


def _pixel_shuffle(y4, N, H, W, C_out):
    # [N*H*W, 4*C_out] (phase-major columns) -> [N, 2H, 2W, C_out]
    y = y4.reshape(N, H, W, 2, 2, C_out)
    return jnp.transpose(y, (0, 1, 3, 2, 4, 5)).reshape(N, 2 * H, 2 * W, C_out)


def convt_bn_relu(x, wt, b, gamma, beta):
    N, H, W, C_in = x.shape
    C_out = wt.shape[1]
    patches, w_mat = _convt_subpixel(x.astype(jnp.bfloat16), wt)
    y, sums, sqs = matmul_bias_stats(patches, w_mat.astype(jnp.bfloat16),
                                     jnp.tile(b, 4))
    count = 4 * N * H * W                 # output positions per channel
    scale, shift = _bn_fold(sums, sqs, count, gamma, beta, phases=4)
    scale4 = jnp.tile(scale, 4)
    shift4 = jnp.tile(shift, 4)
    a4 = bn_relu_apply(y.reshape(N * H, W * 4 * C_out),
                       jnp.tile(scale4, W), jnp.tile(shift4, W))
    return _pixel_shuffle(a4.reshape(N * H * W, 4 * C_out), N, H, W, C_out)


def convt_out(x, wt, b):
    # Final ConvTranspose2d: no BN / ReLU, f32 output.
    N, H, W, C_in = x.shape
    C_out = wt.shape[1]
    patches, w_mat = _convt_subpixel(x.astype(jnp.bfloat16), wt)
    y = matmul_bias(patches, w_mat.astype(jnp.bfloat16), jnp.tile(b, 4))
    return _pixel_shuffle(y, N, H, W, C_out)


# --------------------------- parameters & forward -----------------------------

ENCODER_CFG = [(3, 16, 2), (16, 32, 2), (32, 32, 1), (32, 64, 2),
               (64, 64, 1), (64, 64, 1), (64, 128, 2), (128, 128, 1),
               (128, 128, 1)]
DECODER_CFG = [('convt', 128, 64), ('conv', 64, 64),
               ('convt', 64, 32), ('conv', 32, 32),
               ('convt', 32, 16), ('conv', 16, 16)]


def init_params(num_classes=2, seed=42):
    key = jax.random.PRNGKey(seed)

    def nxt():
        nonlocal key
        key, k = jax.random.split(key)
        return k

    layers = []
    for cin, cout, stride in ENCODER_CFG:
        layers.append(dict(
            type='conv', stride=stride,
            w=0.1 * jax.random.normal(nxt(), (cout, cin, 3, 3), jnp.float32),
            b=0.01 * jax.random.normal(nxt(), (cout,), jnp.float32),
            gamma=jnp.ones((cout,), jnp.float32),
            beta=jnp.zeros((cout,), jnp.float32)))
    for kind, cin, cout in DECODER_CFG:
        if kind == 'convt':
            w = 0.1 * jax.random.normal(nxt(), (cin, cout, 3, 3), jnp.float32)
        else:
            w = 0.1 * jax.random.normal(nxt(), (cout, cin, 3, 3), jnp.float32)
        layers.append(dict(
            type=kind, stride=1, w=w,
            b=0.01 * jax.random.normal(nxt(), (cout,), jnp.float32),
            gamma=jnp.ones((cout,), jnp.float32),
            beta=jnp.zeros((cout,), jnp.float32)))
    # Final ConvTranspose2d(16 -> num_classes): no BN, no ReLU.
    layers.append(dict(
        type='convt_out',
        w=0.1 * jax.random.normal(nxt(), (16, num_classes, 3, 3), jnp.float32),
        b=0.01 * jax.random.normal(nxt(), (num_classes,), jnp.float32)))
    return layers


def simple_enet_forward(layers, x_nchw):
    x = jnp.transpose(x_nchw, (0, 2, 3, 1)).astype(jnp.bfloat16)   # NCHW -> NHWC
    for L in layers:
        if L['type'] == 'conv':
            x = conv_bn_relu(x, L['w'], L['b'], L['gamma'], L['beta'], L['stride'])
        elif L['type'] == 'convt':
            x = convt_bn_relu(x, L['w'], L['b'], L['gamma'], L['beta'])
        else:  # 'convt_out'
            x = convt_out(x, L['w'], L['b'])
    # TODO(synk): at toy resolutions the model is launch-bound; fusing adjacent
    # layers at one resolution into a single grid would amortize call overhead.
    return jnp.transpose(x, (0, 3, 1, 2))   # NHWC -> NCHW, f32


# --------------------------------- main ----------------------------------------

if __name__ == "__main__":
    layers = init_params(num_classes=2, seed=42)
    x = jax.random.normal(jax.random.PRNGKey(0), (2, 3, 32, 32), jnp.float32)

    fwd = jax.jit(lambda inp: simple_enet_forward(layers, inp))
    out = fwd(x)
    jax.block_until_ready(out)

    assert out.shape == (2, 2, 32, 32), out.shape
    assert out.dtype == jnp.float32, out.dtype
    assert bool(jnp.all(jnp.isfinite(out)))
    print("KERNEL_OK")
</pallas_src>

<mosaic_0001>
module attributes {stable_mosaic.version = 11 : i64} {
  func.func @_mm_bias_stats_kernel(%arg0: i32, %arg1: memref<512x27xbf16, #tpu.memory_space<vmem>>, %arg2: memref<27x16xbf16, #tpu.memory_space<vmem>>, %arg3: memref<1x16xf32, #tpu.memory_space<vmem>>, %arg4: memref<512x16xf32, #tpu.memory_space<vmem>>, %arg5: memref<1x1x16xf32, #tpu.memory_space<vmem>>, %arg6: memref<1x1x16xf32, #tpu.memory_space<vmem>>) attributes {dimension_semantics = [#tpu.dimension_semantics<parallel>], iteration_bounds = array<i64: 1>, scalar_prefetch = 0 : i64, scratch_operands = 0 : i64, tpu.core_type = #tpu.core_type<tc>, window_params = [{transform_indices = @transform_0, window_bounds = array<i64: 512, 27>}, {pipeline_mode = #tpu.pipeline_mode<synchronous>, transform_indices = @transform_1, window_bounds = array<i64: 27, 16>}, {pipeline_mode = #tpu.pipeline_mode<synchronous>, transform_indices = @transform_2, window_bounds = array<i64: 1, 16>}, {transform_indices = @transform_3, window_bounds = array<i64: 512, 16>}, {transform_indices = @transform_4, window_bounds = array<i64: 1, 1, 16>}, {transform_indices = @transform_5, window_bounds = array<i64: 1, 1, 16>}]} {
    %c0 = arith.constant 0 : index
    %c0_0 = arith.constant 0 : index
    %0 = vector.load %arg1[%c0, %c0_0] : memref<512x27xbf16, #tpu.memory_space<vmem>>, vector<512x27xbf16>
    %c0_1 = arith.constant 0 : index
    %c0_2 = arith.constant 0 : index
    %1 = vector.load %arg2[%c0_1, %c0_2] : memref<27x16xbf16, #tpu.memory_space<vmem>>, vector<27x16xbf16>
    %cst = arith.constant dense<0.000000e+00> : vector<512x16xf32>
    %2 = tpu.matmul %0, %1, %cst {dimension_numbers = #tpu.dot_dimension_numbers<[1], [0], [0], [1], [0, 0, 1, 1], [], []>} : vector<512x27xbf16>, vector<27x16xbf16>, vector<512x16xf32> -> vector<512x16xf32>
    %c0_3 = arith.constant 0 : index
    %c0_4 = arith.constant 0 : index
    %3 = vector.load %arg3[%c0_3, %c0_4] : memref<1x16xf32, #tpu.memory_space<vmem>>, vector<1x16xf32>
    %4 = vector.broadcast %3 : vector<1x16xf32> to vector<512x16xf32>
    %5 = arith.addf %2, %4 : vector<512x16xf32>
    %c0_5 = arith.constant 0 : index
    %c0_6 = arith.constant 0 : index
    %6 = vector.load %arg4[%c0_5, %c0_6] : memref<512x16xf32, #tpu.memory_space<vmem>>, vector<512x16xf32>
    tpu.vector_store %arg4[%c0_5, %c0_6], %5 {strides = array<i32>} : memref<512x16xf32, #tpu.memory_space<vmem>>, vector<512x16xf32>,
    %cst_7 = arith.constant dense<0.000000e+00> : vector<16xf32>
    %7 = vector.multi_reduction <add>, %5, %cst_7 [0] : vector<512x16xf32> to vector<16xf32>
    %8 = vector.shape_cast %7 : vector<16xf32> to vector<1x16xf32>
    %9 = vector.shape_cast %8 : vector<1x16xf32> to vector<1x1x16xf32>
    %c0_8 = arith.constant 0 : index
    %c0_9 = arith.constant 0 : index
    %c0_10 = arith.constant 0 : index
    %10 = vector.load %arg5[%c0_8, %c0_9, %c0_10] : memref<1x1x16xf32, #tpu.memory_space<vmem>>, vector<1x1x16xf32>
    tpu.vector_store %arg5[%c0_8, %c0_9, %c0_10], %9 {strides = array<i32>} : memref<1x1x16xf32, #tpu.memory_space<vmem>>, vector<1x1x16xf32>,
    %11 = arith.mulf %5, %5 : vector<512x16xf32>
    %cst_11 = arith.constant dense<0.000000e+00> : vector<16xf32>
    %12 = vector.multi_reduction <add>, %11, %cst_11 [0] : vector<512x16xf32> to vector<16xf32>
    %13 = vector.shape_cast %12 : vector<16xf32> to vector<1x16xf32>
    %14 = vector.shape_cast %13 : vector<1x16xf32> to vector<1x1x16xf32>
    %c0_12 = arith.constant 0 : index
    %c0_13 = arith.constant 0 : index
    %c0_14 = arith.constant 0 : index
    %15 = vector.load %arg6[%c0_12, %c0_13, %c0_14] : memref<1x1x16xf32, #tpu.memory_space<vmem>>, vector<1x1x16xf32>
    tpu.vector_store %arg6[%c0_12, %c0_13, %c0_14], %14 {strides = array<i32>} : memref<1x1x16xf32, #tpu.memory_space<vmem>>, vector<1x1x16xf32>,
    return
  }
  func.func @transform_0(%arg0: i32) -> (i32, i32) {
    %c0_i32 = arith.constant 0 : i32
    %c0_i32_0 = arith.constant 0 : i32
    return %arg0, %c0_i32 : i32, i32
  }
  func.func @transform_1(%arg0: i32) -> (i32, i32) {
    %c0_i32 = arith.constant 0 : i32
    %c0_i32_0 = arith.constant 0 : i32
    %c0_i32_1 = arith.constant 0 : i32
    return %c0_i32, %c0_i32_0 : i32, i32
  }
  func.func @transform_2(%arg0: i32) -> (i32, i32) {
    %c0_i32 = arith.constant 0 : i32
    %c0_i32_0 = arith.constant 0 : i32
    %c0_i32_1 = arith.constant 0 : i32
    return %c0_i32, %c0_i32_0 : i32, i32
  }
  func.func @transform_3(%arg0: i32) -> (i32, i32) {
    %c0_i32 = arith.constant 0 : i32
    %c0_i32_0 = arith.constant 0 : i32
    return %arg0, %c0_i32 : i32, i32
  }
  func.func @transform_4(%arg0: i32) -> (i32, i32, i32) {
    %c0_i32 = arith.constant 0 : i32
    %c0_i32_0 = arith.constant 0 : i32
    %c0_i32_1 = arith.constant 0 : i32
    return %arg0, %c0_i32, %c0_i32_0 : i32, i32, i32
  }
  func.func @transform_5(%arg0: i32) -> (i32, i32, i32) {
    %c0_i32 = arith.constant 0 : i32
    %c0_i32_0 = arith.constant 0 : i32
    %c0_i32_1 = arith.constant 0 : i32
    return %arg0, %c0_i32, %c0_i32_0 : i32, i32, i32
  }
}

module attributes {stable_mosaic.version = 11 : i64} {
  func.func @_bn_relu_kernel(%arg0: i32, %arg1: memref<32x256xf32, #tpu.memory_space<vmem>>, %arg2: memref<1x256xf32, #tpu.memory_space<vmem>>, %arg3: memref<1x256xf32, #tpu.memory_space<vmem>>, %arg4: memref<32x256xbf16, #tpu.memory_space<vmem>>) attributes {dimension_semantics = [#tpu.dimension_semantics<parallel>], iteration_bounds = array<i64: 1>, scalar_prefetch = 0 : i64, scratch_operands = 0 : i64, tpu.core_type = #tpu.core_type<tc>, window_params = [{transform_indices = @transform_0, window_bounds = array<i64: 32, 256>}, {pipeline_mode = #tpu.pipeline_mode<synchronous>, transform_indices = @transform_1, window_bounds = array<i64: 1, 256>}, {pipeline_mode = #tpu.pipeline_mode<synchronous>, transform_indices = @transform_2, window_bounds = array<i64: 1, 256>}, {transform_indices = @transform_3, window_bounds = array<i64: 32, 256>}]} {
    %c0 = arith.constant 0 : index
    %c0_0 = arith.constant 0 : index
    %0 = vector.load %arg1[%c0, %c0_0] : memref<32x256xf32, #tpu.memory_space<vmem>>, vector<32x256xf32>
    %c0_1 = arith.constant 0 : index
    %c0_2 = arith.constant 0 : index
    %1 = vector.load %arg2[%c0_1, %c0_2] : memref<1x256xf32, #tpu.memory_space<vmem>>, vector<1x256xf32>
    %2 = vector.broadcast %1 : vector<1x256xf32> to vector<32x256xf32>
    %3 = arith.mulf %0, %2 : vector<32x256xf32>
    %c0_3 = arith.constant 0 : index
    %c0_4 = arith.constant 0 : index
    %4 = vector.load %arg3[%c0_3, %c0_4] : memref<1x256xf32, #tpu.memory_space<vmem>>, vector<1x256xf32>
    %5 = vector.broadcast %4 : vector<1x256xf32> to vector<32x256xf32>
    %6 = arith.addf %3, %5 : vector<32x256xf32>
    %cst = arith.constant 0.000000e+00 : f32
    %7 = vector.broadcast %cst : f32 to vector<32x256xf32>
    %8 = arith.maximumf %6, %7 : vector<32x256xf32>
    %9 = arith.truncf %8 : vector<32x256xf32> to vector<32x256xbf16>
    %c0_5 = arith.constant 0 : index
    %c0_6 = arith.constant 0 : index
    %10 = vector.load %arg4[%c0_5, %c0_6] : memref<32x256xbf16, #tpu.memory_space<vmem>>, vector<32x256xbf16>
    tpu.vector_store %arg4[%c0_5, %c0_6], %9 {strides = array<i32>} : memref<32x256xbf16, #tpu.memory_space<vmem>>, vector<32x256xbf16>,
    return
  }
  func.func @transform_0(%arg0: i32) -> (i32, i32) {
    %c0_i32 = arith.constant 0 : i32
    %c0_i32_0 = arith.constant 0 : i32
    return %arg0, %c0_i32 : i32, i32
  }
  func.func @transform_1(%arg0: i32) -> (i32, i32) {
    %c0_i32 = arith.constant 0 : i32
    %c0_i32_0 = arith.constant 0 : i32
    %c0_i32_1 = arith.constant 0 : i32
    return %c0_i32, %c0_i32_0 : i32, i32
  }
  func.func @transform_2(%arg0: i32) -> (i32, i32) {
    %c0_i32 = arith.constant 0 : i32
    %c0_i32_0 = arith.constant 0 : i32
    %c0_i32_1 = arith.constant 0 : i32
    return %c0_i32, %c0_i32_0 : i32, i32
  }
  func.func @transform_3(%arg0: i32) -> (i32, i32) {
    %c0_i32 = arith.constant 0 : i32
    %c0_i32_0 = arith.constant 0 : i32
    return %arg0, %c0_i32 : i32, i32
  }
}

module attributes {stable_mosaic.version = 11 : i64} {
  func.func @_mm_bias_stats_kernel(%arg0: i32, %arg1: memref<128x144xbf16, #tpu.memory_space<vmem>>, %arg2: memref<144x32xbf16, #tpu.memory_space<vmem>>, %arg3: memref<1x32xf32, #tpu.memory_space<vmem>>, %arg4: memref<128x32xf32, #tpu.memory_space<vmem>>, %arg5: memref<1x1x32xf32, #tpu.memory_space<vmem>>, %arg6: memref<1x1x32xf32, #tpu.memory_space<vmem>>) attributes {dimension_semantics = [#tpu.dimension_semantics<parallel>], iteration_bounds = array<i64: 1>, scalar_prefetch = 0 : i64, scratch_operands = 0 : i64, tpu.core_type = #tpu.core_type<tc>, window_params = [{transform_indices = @transform_0, window_bounds = array<i64: 128, 144>}, {pipeline_mode = #tpu.pipeline_mode<synchronous>, transform_indices = @transform_1, window_bounds = array<i64: 144, 32>}, {pipeline_mode = #tpu.pipeline_mode<synchronous>, transform_indices = @transform_2, window_bounds = array<i64: 1, 32>}, {transform_indices = @transform_3, window_bounds = array<i64: 128, 32>}, {transform_indices = @transform_4, window_bounds = array<i64: 1, 1, 32>}, {transform_indices = @transform_5, window_bounds = array<i64: 1, 1, 32>}]} {
    %c0 = arith.constant 0 : index
    %c0_0 = arith.constant 0 : index
    %0 = vector.load %arg1[%c0, %c0_0] : memref<128x144xbf16, #tpu.memory_space<vmem>>, vector<128x144xbf16>
    %c0_1 = arith.constant 0 : index
    %c0_2 = arith.constant 0 : index
    %1 = vector.load %arg2[%c0_1, %c0_2] : memref<144x32xbf16, #tpu.memory_space<vmem>>, vector<144x32xbf16>
    %cst = arith.constant dense<0.000000e+00> : vector<128x32xf32>
    %2 = tpu.matmul %0, %1, %cst {dimension_numbers = #tpu.dot_dimension_numbers<[1], [0], [0], [1], [0, 0, 1, 1], [], []>} : vector<128x144xbf16>, vector<144x32xbf16>, vector<128x32xf32> -> vector<128x32xf32>
    %c0_3 = arith.constant 0 : index
    %c0_4 = arith.constant 0 : index
    %3 = vector.load %arg3[%c0_3, %c0_4] : memref<1x32xf32, #tpu.memory_space<vmem>>, vector<1x32xf32>
    %4 = vector.broadcast %3 : vector<1x32xf32> to vector<128x32xf32>
    %5 = arith.addf %2, %4 : vector<128x32xf32>
    %c0_5 = arith.constant 0 : index
    %c0_6 = arith.constant 0 : index
    %6 = vector.load %arg4[%c0_5, %c0_6] : memref<128x32xf32, #tpu.memory_space<vmem>>, vector<128x32xf32>
    tpu.vector_store %arg4[%c0_5, %c0_6], %5 {strides = array<i32>} : memref<128x32xf32, #tpu.memory_space<vmem>>, vector<128x32xf32>,
    %cst_7 = arith.constant dense<0.000000e+00> : vector<32xf32>
    %7 = vector.multi_reduction <add>, %5, %cst_7 [0] : vector<128x32xf32> to vector<32xf32>
    %8 = vector.shape_cast %7 : vector<32xf32> to vector<1x32xf32>
    %9 = vector.shape_cast %8 : vector<1x32xf32> to vector<1x1x32xf32>
    %c0_8 = arith.constant 0 : index
    %c0_9 = arith.constant 0 : index
    %c0_10 = arith.constant 0 : index
    %10 = vector.load %arg5[%c0_8, %c0_9, %c0_10] : memref<1x1x32xf32, #tpu.memory_space<vmem>>, vector<1x1x32xf32>
    tpu.vector_store %arg5[%c0_8, %c0_9, %c0_10], %9 {strides = array<i32>} : memref<1x1x32xf32, #tpu.memory_space<vmem>>, vector<1x1x32xf32>,
    %11 = arith.mulf %5, %5 : vector<128x32xf32>
    %cst_11 = arith.constant dense<0.000000e+00> : vector<32xf32>
    %12 = vector.multi_reduction <add>, %11, %cst_11 [0] : vector<128x32xf32> to vector<32xf32>
    %13 = vector.shape_cast %12 : vector<32xf32> to vector<1x32xf32>
    %14 = vector.shape_cast %13 : vector<1x32xf32> to vector<1x1x32xf32>
    %c0_12 = arith.constant 0 : index
    %c0_13 = arith.constant 0 : index
    %c0_14 = arith.constant 0 : index
    %15 = vector.load %arg6[%c0_12, %c0_13, %c0_14] : memref<1x1x32xf32, #tpu.memory_space<vmem>>, vector<1x1x32xf32>
    tpu.vector_store %arg6[%c0_12, %c0_13, %c0_14], %14 {strides = array<i32>} : memref<1x1x32xf32, #tpu.memory_space<vmem>>, vector<1x1x32xf32>,
    return
  }
  func.func @transform_0(%arg0: i32) -> (i32, i32) {
    %c0_i32 = arith.constant 0 : i32
    %c0_i32_0 = arith.constant 0 : i32
    return %arg0, %c0_i32 : i32, i32
  }
  func.func @transform_1(%arg0: i32) -> (i32, i32) {
    %c0_i32 = arith.constant 0 : i32
    %c0_i32_0 = arith.constant 0 : i32
    %c0_i32_1 = arith.constant 0 : i32
    return %c0_i32, %c0_i32_0 : i32, i32
  }
  func.func @transform_2(%arg0: i32) -> (i32, i32) {
    %c0_i32 = arith.constant 0 : i32
    %c0_i32_0 = arith.constant 0 : i32
    %c0_i32_1 = arith.constant 0 : i32
    return %c0_i32, %c0_i32_0 : i32, i32
  }
  func.func @transform_3(%arg0: i32) -> (i32, i32) {
    %c0_i32 = arith.constant 0 : i32
    %c0_i32_0 = arith.constant 0 : i32
    return %arg0, %c0_i32 : i32, i32
  }
  func.func @transform_4(%arg0: i32) -> (i32, i32, i32) {
    %c0_i32 = arith.constant 0 : i32
    %c0_i32_0 = arith.constant 0 : i32
    %c0_i32_1 = arith.constant 0 : i32
    return %arg0, %c0_i32, %c0_i32_0 : i32, i32, i32
  }
  func.func @transform_5(%arg0: i32) -> (i32, i32, i32) {
    %c0_i32 = arith.constant 0 : i32
    %c0_i32_0 = arith.constant 0 : i32
    %c0_i32_1 = arith.constant 0 : i32
    return %arg0, %c0_i32, %c0_i32_0 : i32, i32, i32
  }
}

module attributes {stable_mosaic.version = 11 : i64} {
  func.func @_bn_relu_kernel(%arg0: i32, %arg1: memref<16x256xf32, #tpu.memory_space<vmem>>, %arg2: memref<1x256xf32, #tpu.memory_space<vmem>>, %arg3: memref<1x256xf32, #tpu.memory_space<vmem>>, %arg4: memref<16x256xbf16, #tpu.memory_space<vmem>>) attributes {dimension_semantics = [#tpu.dimension_semantics<parallel>], iteration_bounds = array<i64: 1>, scalar_prefetch = 0 : i64, scratch_operands = 0 : i64, tpu.core_type = #tpu.core_type<tc>, window_params = [{transform_indices = @transform_0, window_bounds = array<i64: 16, 256>}, {pipeline_mode = #tpu.pipeline_mode<synchronous>, transform_indices = @transform_1, window_bounds = array<i64: 1, 256>}, {pipeline_mode = #tpu.pipeline_mode<synchronous>, transform_indices = @transform_2, window_bounds = array<i64: 1, 256>}, {transform_indices = @transform_3, window_bounds = array<i64: 16, 256>}]} {
    %c0 = arith.constant 0 : index
    %c0_0 = arith.constant 0 : index
    %0 = vector.load %arg1[%c0, %c0_0] : memref<16x256xf32, #tpu.memory_space<vmem>>, vector<16x256xf32>
    %c0_1 = arith.constant 0 : index
    %c0_2 = arith.constant 0 : index
    %1 = vector.load %arg2[%c0_1, %c0_2] : memref<1x256xf32, #tpu.memory_space<vmem>>, vector<1x256xf32>
    %2 = vector.broadcast %1 : vector<1x256xf32> to vector<16x256xf32>
    %3 = arith.mulf %0, %2 : vector<16x256xf32>
    %c0_3 = arith.constant 0 : index
    %c0_4 = arith.constant 0 : index
    %4 = vector.load %arg3[%c0_3, %c0_4] : memref<1x256xf32, #tpu.memory_space<vmem>>, vector<1x256xf32>
    %5 = vector.broadcast %4 : vector<1x256xf32> to vector<16x256xf32>
    %6 = arith.addf %3, %5 : vector<16x256xf32>
    %cst = arith.constant 0.000000e+00 : f32
    %7 = vector.broadcast %cst : f32 to vector<16x256xf32>
    %8 = arith.maximumf %6, %7 : vector<16x256xf32>
    %9 = arith.truncf %8 : vector<16x256xf32> to vector<16x256xbf16>
    %c0_5 = arith.constant 0 : index
    %c0_6 = arith.constant 0 : index
    %10 = vector.load %arg4[%c0_5, %c0_6] : memref<16x256xbf16, #tpu.memory_space<vmem>>, vector<16x256xbf16>
    tpu.vector_store %arg4[%c0_5, %c0_6], %9 {strides = array<i32>} : memref<16x256xbf16, #tpu.memory_space<vmem>>, vector<16x256xbf16>,
    return
  }
  func.func @transform_0(%arg0: i32) -> (i32, i32) {
    %c0_i32 = arith.constant 0 : i32
    %c0_i32_0 = arith.constant 0 : i32
    return %arg0, %c0_i32 : i32, i32
  }
  func.func @transform_1(%arg0: i32) -> (i32, i32) {
    %c0_i32 = arith.constant 0 : i32
    %c0_i32_0 = arith.constant 0 : i32
    %c0_i32_1 = arith.constant 0 : i32
    return %c0_i32, %c0_i32_0 : i32, i32
  }
  func.func @transform_2(%arg0: i32) -> (i32, i32) {
    %c0_i32 = arith.constant 0 : i32
    %c0_i32_0 = arith.constant 0 : i32
    %c0_i32_1 = arith.constant 0 : i32
    return %c0_i32, %c0_i32_0 : i32, i32
  }
  func.func @transform_3(%arg0: i32) -> (i32, i32) {
    %c0_i32 = arith.constant 0 : i32
    %c0_i32_0 = arith.constant 0 : i32
    return %arg0, %c0_i32 : i32, i32
  }
}

module attributes {stable_mosaic.version = 11 : i64} {
  func.func @_mm_bias_stats_kernel(%arg0: i32, %arg1: memref<128x288xbf16, #tpu.memory_space<vmem>>, %arg2: memref<288x32xbf16, #tpu.memory_space<vmem>>, %arg3: memref<1x32xf32, #tpu.memory_space<vmem>>, %arg4: memref<128x32xf32, #tpu.memory_space<vmem>>, %arg5: memref<1x1x32xf32, #tpu.memory_space<vmem>>, %arg6: memref<1x1x32xf32, #tpu.memory_space<vmem>>) attributes {dimension_semantics = [#tpu.dimension_semantics<parallel>], iteration_bounds = array<i64: 1>, scalar_prefetch = 0 : i64, scratch_operands = 0 : i64, tpu.core_type = #tpu.core_type<tc>, window_params = [{transform_indices = @transform_0, window_bounds = array<i64: 128, 288>}, {pipeline_mode = #tpu.pipeline_mode<synchronous>, transform_indices = @transform_1, window_bounds = array<i64: 288, 32>}, {pipeline_mode = #tpu.pipeline_mode<synchronous>, transform_indices = @transform_2, window_bounds = array<i64: 1, 32>}, {transform_indices = @transform_3, window_bounds = array<i64: 128, 32>}, {transform_indices = @transform_4, window_bounds = array<i64: 1, 1, 32>}, {transform_indices = @transform_5, window_bounds = array<i64: 1, 1, 32>}]} {
    %c0 = arith.constant 0 : index
    %c0_0 = arith.constant 0 : index
    %0 = vector.load %arg1[%c0, %c0_0] : memref<128x288xbf16, #tpu.memory_space<vmem>>, vector<128x288xbf16>
    %c0_1 = arith.constant 0 : index
    %c0_2 = arith.constant 0 : index
    %1 = vector.load %arg2[%c0_1, %c0_2] : memref<288x32xbf16, #tpu.memory_space<vmem>>, vector<288x32xbf16>
    %cst = arith.constant dense<0.000000e+00> : vector<128x32xf32>
    %2 = tpu.matmul %0, %1, %cst {dimension_numbers = #tpu.dot_dimension_numbers<[1], [0], [0], [1], [0, 0, 1, 1], [], []>} : vector<128x288xbf16>, vector<288x32xbf16>, vector<128x32xf32> -> vector<128x32xf32>
    %c0_3 = arith.constant 0 : index
    %c0_4 = arith.constant 0 : index
    %3 = vector.load %arg3[%c0_3, %c0_4] : memref<1x32xf32, #tpu.memory_space<vmem>>, vector<1x32xf32>
    %4 = vector.broadcast %3 : vector<1x32xf32> to vector<128x32xf32>
    %5 = arith.addf %2, %4 : vector<128x32xf32>
    %c0_5 = arith.constant 0 : index
    %c0_6 = arith.constant 0 : index
    %6 = vector.load %arg4[%c0_5, %c0_6] : memref<128x32xf32, #tpu.memory_space<vmem>>, vector<128x32xf32>
    tpu.vector_store %arg4[%c0_5, %c0_6], %5 {strides = array<i32>} : memref<128x32xf32, #tpu.memory_space<vmem>>, vector<128x32xf32>,
    %cst_7 = arith.constant dense<0.000000e+00> : vector<32xf32>
    %7 = vector.multi_reduction <add>, %5, %cst_7 [0] : vector<128x32xf32> to vector<32xf32>
    %8 = vector.shape_cast %7 : vector<32xf32> to vector<1x32xf32>
    %9 = vector.shape_cast %8 : vector<1x32xf32> to vector<1x1x32xf32>
    %c0_8 = arith.constant 0 : index
    %c0_9 = arith.constant 0 : index
    %c0_10 = arith.constant 0 : index
    %10 = vector.load %arg5[%c0_8, %c0_9, %c0_10] : memref<1x1x32xf32, #tpu.memory_space<vmem>>, vector<1x1x32xf32>
    tpu.vector_store %arg5[%c0_8, %c0_9, %c0_10], %9 {strides = array<i32>} : memref<1x1x32xf32, #tpu.memory_space<vmem>>, vector<1x1x32xf32>,
    %11 = arith.mulf %5, %5 : vector<128x32xf32>
    %cst_11 = arith.constant dense<0.000000e+00> : vector<32xf32>
    %12 = vector.multi_reduction <add>, %11, %cst_11 [0] : vector<128x32xf32> to vector<32xf32>
    %13 = vector.shape_cast %12 : vector<32xf32> to vector<1x32xf32>
    %14 = vector.shape_cast %13 : vector<1x32xf32> to vector<1x1x32xf32>
    %c0_12 = arith.constant 0 : index
    %c0_13 = arith.constant 0 : index
    %c0_14 = arith.constant 0 : index
    %15 = vector.load %arg6[%c0_12, %c0_13, %c0_14] : memref<1x1x32xf32, #tpu.memory_space<vmem>>, vector<1x1x32xf32>
    tpu.vector_store %arg6[%c0_12, %c0_13, %c0_14], %14 {strides = array<i32>} : memref<1x1x32xf32, #tpu.memory_space<vmem>>, vector<1x1x32xf32>,
    return
  }
  func.func @transform_0(%arg0: i32) -> (i32, i32) {
    %c0_i32 = arith.constant 0 : i32
    %c0_i32_0 = arith.constant 0 : i32
    return %arg0, %c0_i32 : i32, i32
  }
  func.func @transform_1(%arg0: i32) -> (i32, i32) {
    %c0_i32 = arith.constant 0 : i32
    %c0_i32_0 = arith.constant 0 : i32
    %c0_i32_1 = arith.constant 0 : i32
    return %c0_i32, %c0_i32_0 : i32, i32
  }
  func.func @transform_2(%arg0: i32) -> (i32, i32) {
    %c0_i32 = arith.constant 0 : i32
    %c0_i32_0 = arith.constant 0 : i32
    %c0_i32_1 = arith.constant 0 : i32
    return %c0_i32, %c0_i32_0 : i32, i32
  }
  func.func @transform_3(%arg0: i32) -> (i32, i32) {
    %c0_i32 = arith.constant 0 : i32
    %c0_i32_0 = arith.constant 0 : i32
    return %arg0, %c0_i32 : i32, i32
  }
  func.func @transform_4(%arg0: i32) -> (i32, i32, i32) {
    %c0_i32 = arith.constant 0 : i32
    %c0_i32_0 = arith.constant 0 : i32
    %c0_i32_1 = arith.constant 0 : i32
    return %arg0, %c0_i32, %c0_i32_0 : i32, i32, i32
  }
  func.func @transform_5(%arg0: i32) -> (i32, i32, i32) {
    %c0_i32 = arith.constant 0 : i32
    %c0_i32_0 = arith.constant 0 : i32
    %c0_i32_1 = arith.constant 0 : i32
    return %arg0, %c0_i32, %c0_i32_0 : i32, i32, i32
  }
}

module attributes {stable_mosaic.version = 11 : i64} {
  func.func @_mm_bias_stats_kernel(%arg0: i32, %arg1: memref<32x288xbf16, #tpu.memory_space<vmem>>, %arg2: memref<288x64xbf16, #tpu.memory_space<vmem>>, %arg3: memref<1x64xf32, #tpu.memory_space<vmem>>, %arg4: memref<32x64xf32, #tpu.memory_space<vmem>>, %arg5: memref<1x1x64xf32, #tpu.memory_space<vmem>>, %arg6: memref<1x1x64xf32, #tpu.memory_space<vmem>>) attributes {dimension_semantics = [#tpu.dimension_semantics<parallel>], iteration_bounds = array<i64: 1>, scalar_prefetch = 0 : i64, scratch_operands = 0 : i64, tpu.core_type = #tpu.core_type<tc>, window_params = [{transform_indices = @transform_0, window_bounds = array<i64: 32, 288>}, {pipeline_mode = #tpu.pipeline_mode<synchronous>, transform_indices = @transform_1, window_bounds = array<i64: 288, 64>}, {pipeline_mode = #tpu.pipeline_mode<synchronous>, transform_indices = @transform_2, window_bounds = array<i64: 1, 64>}, {transform_indices = @transform_3, window_bounds = array<i64: 32, 64>}, {transform_indices = @transform_4, window_bounds = array<i64: 1, 1, 64>}, {transform_indices = @transform_5, window_bounds = array<i64: 1, 1, 64>}]} {
    %c0 = arith.constant 0 : index
    %c0_0 = arith.constant 0 : index
    %0 = vector.load %arg1[%c0, %c0_0] : memref<32x288xbf16, #tpu.memory_space<vmem>>, vector<32x288xbf16>
    %c0_1 = arith.constant 0 : index
    %c0_2 = arith.constant 0 : index
    %1 = vector.load %arg2[%c0_1, %c0_2] : memref<288x64xbf16, #tpu.memory_space<vmem>>, vector<288x64xbf16>
    %cst = arith.constant dense<0.000000e+00> : vector<32x64xf32>
    %2 = tpu.matmul %0, %1, %cst {dimension_numbers = #tpu.dot_dimension_numbers<[1], [0], [0], [1], [0, 0, 1, 1], [], []>} : vector<32x288xbf16>, vector<288x64xbf16>, vector<32x64xf32> -> vector<32x64xf32>
    %c0_3 = arith.constant 0 : index
    %c0_4 = arith.constant 0 : index
    %3 = vector.load %arg3[%c0_3, %c0_4] : memref<1x64xf32, #tpu.memory_space<vmem>>, vector<1x64xf32>
    %4 = vector.broadcast %3 : vector<1x64xf32> to vector<32x64xf32>
    %5 = arith.addf %2, %4 : vector<32x64xf32>
    %c0_5 = arith.constant 0 : index
    %c0_6 = arith.constant 0 : index
    %6 = vector.load %arg4[%c0_5, %c0_6] : memref<32x64xf32, #tpu.memory_space<vmem>>, vector<32x64xf32>
    tpu.vector_store %arg4[%c0_5, %c0_6], %5 {strides = array<i32>} : memref<32x64xf32, #tpu.memory_space<vmem>>, vector<32x64xf32>,
    %cst_7 = arith.constant dense<0.000000e+00> : vector<64xf32>
    %7 = vector.multi_reduction <add>, %5, %cst_7 [0] : vector<32x64xf32> to vector<64xf32>
    %8 = vector.shape_cast %7 : vector<64xf32> to vector<1x64xf32>
    %9 = vector.shape_cast %8 : vector<1x64xf32> to vector<1x1x64xf32>
    %c0_8 = arith.constant 0 : index
    %c0_9 = arith.constant 0 : index
    %c0_10 = arith.constant 0 : index
    %10 = vector.load %arg5[%c0_8, %c0_9, %c0_10] : memref<1x1x64xf32, #tpu.memory_space<vmem>>, vector<1x1x64xf32>
    tpu.vector_store %arg5[%c0_8, %c0_9, %c0_10], %9 {strides = array<i32>} : memref<1x1x64xf32, #tpu.memory_space<vmem>>, vector<1x1x64xf32>,
    %11 = arith.mulf %5, %5 : vector<32x64xf32>
    %cst_11 = arith.constant dense<0.000000e+00> : vector<64xf32>
    %12 = vector.multi_reduction <add>, %11, %cst_11 [0] : vector<32x64xf32> to vector<64xf32>
    %13 = vector.shape_cast %12 : vector<64xf32> to vector<1x64xf32>
    %14 = vector.shape_cast %13 : vector<1x64xf32> to vector<1x1x64xf32>
    %c0_12 = arith.constant 0 : index
    %c0_13 = arith.constant 0 : index
    %c0_14 = arith.constant 0 : index
    %15 = vector.load %arg6[%c0_12, %c0_13, %c0_14] : memref<1x1x64xf32, #tpu.memory_space<vmem>>, vector<1x1x64xf32>
    tpu.vector_store %arg6[%c0_12, %c0_13, %c0_14], %14 {strides = array<i32>} : memref<1x1x64xf32, #tpu.memory_space<vmem>>, vector<1x1x64xf32>,
    return
  }
  func.func @transform_0(%arg0: i32) -> (i32, i32) {
    %c0_i32 = arith.constant 0 : i32
    %c0_i32_0 = arith.constant 0 : i32
    return %arg0, %c0_i32 : i32, i32
  }
  func.func @transform_1(%arg0: i32) -> (i32, i32) {
    %c0_i32 = arith.constant 0 : i32
    %c0_i32_0 = arith.constant 0 : i32
    %c0_i32_1 = arith.constant 0 : i32
    return %c0_i32, %c0_i32_0 : i32, i32
  }
  func.func @transform_2(%arg0: i32) -> (i32, i32) {
    %c0_i32 = arith.constant 0 : i32
    %c0_i32_0 = arith.constant 0 : i32
    %c0_i32_1 = arith.constant 0 : i32
    return %c0_i32, %c0_i32_0 : i32, i32
  }
  func.func @transform_3(%arg0: i32) -> (i32, i32) {
    %c0_i32 = arith.constant 0 : i32
    %c0_i32_0 = arith.constant 0 : i32
    return %arg0, %c0_i32 : i32, i32
  }
  func.func @transform_4(%arg0: i32) -> (i32, i32, i32) {
    %c0_i32 = arith.constant 0 : i32
    %c0_i32_0 = arith.constant 0 : i32
    %c0_i32_1 = arith.constant 0 : i32
    return %arg0, %c0_i32, %c0_i32_0 : i32, i32, i32
  }
  func.func @transform_5(%arg0: i32) -> (i32, i32, i32) {
    %c0_i32 = arith.constant 0 : i32
    %c0_i32_0 = arith.constant 0 : i32
    %c0_i32_1 = arith.constant 0 : i32
    return %arg0, %c0_i32, %c0_i32_0 : i32, i32, i32
  }
}

module attributes {stable_mosaic.version = 11 : i64} {
  func.func @_bn_relu_kernel(%arg0: i32, %arg1: memref<8x256xf32, #tpu.memory_space<vmem>>, %arg2: memref<1x256xf32, #tpu.memory_space<vmem>>, %arg3: memref<1x256xf32, #tpu.memory_space<vmem>>, %arg4: memref<8x256xbf16, #tpu.memory_space<vmem>>) attributes {dimension_semantics = [#tpu.dimension_semantics<parallel>], iteration_bounds = array<i64: 1>, scalar_prefetch = 0 : i64, scratch_operands = 0 : i64, tpu.core_type = #tpu.core_type<tc>, window_params = [{transform_indices = @transform_0, window_bounds = array<i64: 8, 256>}, {pipeline_mode = #tpu.pipeline_mode<synchronous>, transform_indices = @transform_1, window_bounds = array<i64: 1, 256>}, {pipeline_mode = #tpu.pipeline_mode<synchronous>, transform_indices = @transform_2, window_bounds = array<i64: 1, 256>}, {transform_indices = @transform_3, window_bounds = array<i64: 8, 256>}]} {
    %c0 = arith.constant 0 : index
    %c0_0 = arith.constant 0 : index
    %0 = vector.load %arg1[%c0, %c0_0] : memref<8x256xf32, #tpu.memory_space<vmem>>, vector<8x256xf32>
    %c0_1 = arith.constant 0 : index
    %c0_2 = arith.constant 0 : index
    %1 = vector.load %arg2[%c0_1, %c0_2] : memref<1x256xf32, #tpu.memory_space<vmem>>, vector<1x256xf32>
    %2 = vector.broadcast %1 : vector<1x256xf32> to vector<8x256xf32>
    %3 = arith.mulf %0, %2 : vector<8x256xf32>
    %c0_3 = arith.constant 0 : index
    %c0_4 = arith.constant 0 : index
    %4 = vector.load %arg3[%c0_3, %c0_4] : memref<1x256xf32, #tpu.memory_space<vmem>>, vector<1x256xf32>
    %5 = vector.broadcast %4 : vector<1x256xf32> to vector<8x256xf32>
    %6 = arith.addf %3, %5 : vector<8x256xf32>
    %cst = arith.constant 0.000000e+00 : f32
    %7 = vector.broadcast %cst : f32 to vector<8x256xf32>
    %8 = arith.maximumf %6, %7 : vector<8x256xf32>
    %9 = arith.truncf %8 : vector<8x256xf32> to vector<8x256xbf16>
    %c0_5 = arith.constant 0 : index
    %c0_6 = arith.constant 0 : index
    %10 = vector.load %arg4[%c0_5, %c0_6] : memref<8x256xbf16, #tpu.memory_space<vmem>>, vector<8x256xbf16>
    tpu.vector_store %arg4[%c0_5, %c0_6], %9 {strides = array<i32>} : memref<8x256xbf16, #tpu.memory_space<vmem>>, vector<8x256xbf16>,
    return
  }
  func.func @transform_0(%arg0: i32) -> (i32, i32) {
    %c0_i32 = arith.constant 0 : i32
    %c0_i32_0 = arith.constant 0 : i32
    return %arg0, %c0_i32 : i32, i32
  }
  func.func @transform_1(%arg0: i32) -> (i32, i32) {
    %c0_i32 = arith.constant 0 : i32
    %c0_i32_0 = arith.constant 0 : i32
    %c0_i32_1 = arith.constant 0 : i32
    return %c0_i32, %c0_i32_0 : i32, i32
  }
  func.func @transform_2(%arg0: i32) -> (i32, i32) {
    %c0_i32 = arith.constant 0 : i32
    %c0_i32_0 = arith.constant 0 : i32
    %c0_i32_1 = arith.constant 0 : i32
    return %c0_i32, %c0_i32_0 : i32, i32
  }
  func.func @transform_3(%arg0: i32) -> (i32, i32) {
    %c0_i32 = arith.constant 0 : i32
    %c0_i32_0 = arith.constant 0 : i32
    return %arg0, %c0_i32 : i32, i32
  }
}

module attributes {stable_mosaic.version = 11 : i64} {
  func.func @_mm_bias_stats_kernel(%arg0: i32, %arg1: memref<32x576xbf16, #tpu.memory_space<vmem>>, %arg2: memref<576x64xbf16, #tpu.memory_space<vmem>>, %arg3: memref<1x64xf32, #tpu.memory_space<vmem>>, %arg4: memref<32x64xf32, #tpu.memory_space<vmem>>, %arg5: memref<1x1x64xf32, #tpu.memory_space<vmem>>, %arg6: memref<1x1x64xf32, #tpu.memory_space<vmem>>) attributes {dimension_semantics = [#tpu.dimension_semantics<parallel>], iteration_bounds = array<i64: 1>, scalar_prefetch = 0 : i64, scratch_operands = 0 : i64, tpu.core_type = #tpu.core_type<tc>, window_params = [{transform_indices = @transform_0, window_bounds = array<i64: 32, 576>}, {pipeline_mode = #tpu.pipeline_mode<synchronous>, transform_indices = @transform_1, window_bounds = array<i64: 576, 64>}, {pipeline_mode = #tpu.pipeline_mode<synchronous>, transform_indices = @transform_2, window_bounds = array<i64: 1, 64>}, {transform_indices = @transform_3, window_bounds = array<i64: 32, 64>}, {transform_indices = @transform_4, window_bounds = array<i64: 1, 1, 64>}, {transform_indices = @transform_5, window_bounds = array<i64: 1, 1, 64>}]} {
    %c0 = arith.constant 0 : index
    %c0_0 = arith.constant 0 : index
    %0 = vector.load %arg1[%c0, %c0_0] : memref<32x576xbf16, #tpu.memory_space<vmem>>, vector<32x576xbf16>
    %c0_1 = arith.constant 0 : index
    %c0_2 = arith.constant 0 : index
    %1 = vector.load %arg2[%c0_1, %c0_2] : memref<576x64xbf16, #tpu.memory_space<vmem>>, vector<576x64xbf16>
    %cst = arith.constant dense<0.000000e+00> : vector<32x64xf32>
    %2 = tpu.matmul %0, %1, %cst {dimension_numbers = #tpu.dot_dimension_numbers<[1], [0], [0], [1], [0, 0, 1, 1], [], []>} : vector<32x576xbf16>, vector<576x64xbf16>, vector<32x64xf32> -> vector<32x64xf32>
    %c0_3 = arith.constant 0 : index
    %c0_4 = arith.constant 0 : index
    %3 = vector.load %arg3[%c0_3, %c0_4] : memref<1x64xf32, #tpu.memory_space<vmem>>, vector<1x64xf32>
    %4 = vector.broadcast %3 : vector<1x64xf32> to vector<32x64xf32>
    %5 = arith.addf %2, %4 : vector<32x64xf32>
    %c0_5 = arith.constant 0 : index
    %c0_6 = arith.constant 0 : index
    %6 = vector.load %arg4[%c0_5, %c0_6] : memref<32x64xf32, #tpu.memory_space<vmem>>, vector<32x64xf32>
    tpu.vector_store %arg4[%c0_5, %c0_6], %5 {strides = array<i32>} : memref<32x64xf32, #tpu.memory_space<vmem>>, vector<32x64xf32>,
    %cst_7 = arith.constant dense<0.000000e+00> : vector<64xf32>
    %7 = vector.multi_reduction <add>, %5, %cst_7 [0] : vector<32x64xf32> to vector<64xf32>
    %8 = vector.shape_cast %7 : vector<64xf32> to vector<1x64xf32>
    %9 = vector.shape_cast %8 : vector<1x64xf32> to vector<1x1x64xf32>
    %c0_8 = arith.constant 0 : index
    %c0_9 = arith.constant 0 : index
    %c0_10 = arith.constant 0 : index
    %10 = vector.load %arg5[%c0_8, %c0_9, %c0_10] : memref<1x1x64xf32, #tpu.memory_space<vmem>>, vector<1x1x64xf32>
    tpu.vector_store %arg5[%c0_8, %c0_9, %c0_10], %9 {strides = array<i32>} : memref<1x1x64xf32, #tpu.memory_space<vmem>>, vector<1x1x64xf32>,
    %11 = arith.mulf %5, %5 : vector<32x64xf32>
    %cst_11 = arith.constant dense<0.000000e+00> : vector<64xf32>
    %12 = vector.multi_reduction <add>, %11, %cst_11 [0] : vector<32x64xf32> to vector<64xf32>
    %13 = vector.shape_cast %12 : vector<64xf32> to vector<1x64xf32>
    %14 = vector.shape_cast %13 : vector<1x64xf32> to vector<1x1x64xf32>
    %c0_12 = arith.constant 0 : index
    %c0_13 = arith.constant 0 : index
    %c0_14 = arith.constant 0 : index
    %15 = vector.load %arg6[%c0_12, %c0_13, %c0_14] : memref<1x1x64xf32, #tpu.memory_space<vmem>>, vector<1x1x64xf32>
    tpu.vector_store %arg6[%c0_12, %c0_13, %c0_14], %14 {strides = array<i32>} : memref<1x1x64xf32, #tpu.memory_space<vmem>>, vector<1x1x64xf32>,
    return
  }
  func.func @transform_0(%arg0: i32) -> (i32, i32) {
    %c0_i32 = arith.constant 0 : i32
    %c0_i32_0 = arith.constant 0 : i32
    return %arg0, %c0_i32 : i32, i32
  }
  func.func @transform_1(%arg0: i32) -> (i32, i32) {
    %c0_i32 = arith.constant 0 : i32
    %c0_i32_0 = arith.constant 0 : i32
    %c0_i32_1 = arith.constant 0 : i32
    return %c0_i32, %c0_i32_0 : i32, i32
  }
  func.func @transform_2(%arg0: i32) -> (i32, i32) {
    %c0_i32 = arith.constant 0 : i32
    %c0_i32_0 = arith.constant 0 : i32
    %c0_i32_1 = arith.constant 0 : i32
    return %c0_i32, %c0_i32_0 : i32, i32
  }
  func.func @transform_3(%arg0: i32) -> (i32, i32) {
    %c0_i32 = arith.constant 0 : i32
    %c0_i32_0 = arith.constant 0 : i32
    return %arg0, %c0_i32 : i32, i32
  }
  func.func @transform_4(%arg0: i32) -> (i32, i32, i32) {
    %c0_i32 = arith.constant 0 : i32
    %c0_i32_0 = arith.constant 0 : i32
    %c0_i32_1 = arith.constant 0 : i32
    return %arg0, %c0_i32, %c0_i32_0 : i32, i32, i32
  }
  func.func @transform_5(%arg0: i32) -> (i32, i32, i32) {
    %c0_i32 = arith.constant 0 : i32
    %c0_i32_0 = arith.constant 0 : i32
    %c0_i32_1 = arith.constant 0 : i32
    return %arg0, %c0_i32, %c0_i32_0 : i32, i32, i32
  }
}

module attributes {stable_mosaic.version = 11 : i64} {
  func.func @_mm_bias_stats_kernel(%arg0: i32, %arg1: memref<8x576xbf16, #tpu.memory_space<vmem>>, %arg2: memref<576x128xbf16, #tpu.memory_space<vmem>>, %arg3: memref<1x128xf32, #tpu.memory_space<vmem>>, %arg4: memref<8x128xf32, #tpu.memory_space<vmem>>, %arg5: memref<1x1x128xf32, #tpu.memory_space<vmem>>, %arg6: memref<1x1x128xf32, #tpu.memory_space<vmem>>) attributes {dimension_semantics = [#tpu.dimension_semantics<parallel>], iteration_bounds = array<i64: 1>, scalar_prefetch = 0 : i64, scratch_operands = 0 : i64, tpu.core_type = #tpu.core_type<tc>, window_params = [{transform_indices = @transform_0, window_bounds = array<i64: 8, 576>}, {pipeline_mode = #tpu.pipeline_mode<synchronous>, transform_indices = @transform_1, window_bounds = array<i64: 576, 128>}, {pipeline_mode = #tpu.pipeline_mode<synchronous>, transform_indices = @transform_2, window_bounds = array<i64: 1, 128>}, {transform_indices = @transform_3, window_bounds = array<i64: 8, 128>}, {transform_indices = @transform_4, window_bounds = array<i64: 1, 1, 128>}, {transform_indices = @transform_5, window_bounds = array<i64: 1, 1, 128>}]} {
    %c0 = arith.constant 0 : index
    %c0_0 = arith.constant 0 : index
    %0 = vector.load %arg1[%c0, %c0_0] : memref<8x576xbf16, #tpu.memory_space<vmem>>, vector<8x576xbf16>
    %c0_1 = arith.constant 0 : index
    %c0_2 = arith.constant 0 : index
    %1 = vector.load %arg2[%c0_1, %c0_2] : memref<576x128xbf16, #tpu.memory_space<vmem>>, vector<576x128xbf16>
    %cst = arith.constant dense<0.000000e+00> : vector<8x128xf32>
    %2 = tpu.matmul %0, %1, %cst {dimension_numbers = #tpu.dot_dimension_numbers<[1], [0], [0], [1], [0, 0, 1, 1], [], []>} : vector<8x576xbf16>, vector<576x128xbf16>, vector<8x128xf32> -> vector<8x128xf32>
    %c0_3 = arith.constant 0 : index
    %c0_4 = arith.constant 0 : index
    %3 = vector.load %arg3[%c0_3, %c0_4] : memref<1x128xf32, #tpu.memory_space<vmem>>, vector<1x128xf32>
    %4 = vector.broadcast %3 : vector<1x128xf32> to vector<8x128xf32>
    %5 = arith.addf %2, %4 : vector<8x128xf32>
    %c0_5 = arith.constant 0 : index
    %c0_6 = arith.constant 0 : index
    %6 = vector.load %arg4[%c0_5, %c0_6] : memref<8x128xf32, #tpu.memory_space<vmem>>, vector<8x128xf32>
    tpu.vector_store %arg4[%c0_5, %c0_6], %5 {strides = array<i32>} : memref<8x128xf32, #tpu.memory_space<vmem>>, vector<8x128xf32>,
    %cst_7 = arith.constant dense<0.000000e+00> : vector<128xf32>
    %7 = vector.multi_reduction <add>, %5, %cst_7 [0] : vector<8x128xf32> to vector<128xf32>
    %8 = vector.shape_cast %7 : vector<128xf32> to vector<1x128xf32>
    %9 = vector.shape_cast %8 : vector<1x128xf32> to vector<1x1x128xf32>
    %c0_8 = arith.constant 0 : index
    %c0_9 = arith.constant 0 : index
    %c0_10 = arith.constant 0 : index
    %10 = vector.load %arg5[%c0_8, %c0_9, %c0_10] : memref<1x1x128xf32, #tpu.memory_space<vmem>>, vector<1x1x128xf32>
    tpu.vector_store %arg5[%c0_8, %c0_9, %c0_10], %9 {strides = array<i32>} : memref<1x1x128xf32, #tpu.memory_space<vmem>>, vector<1x1x128xf32>,
    %11 = arith.mulf %5, %5 : vector<8x128xf32>
    %cst_11 = arith.constant dense<0.000000e+00> : vector<128xf32>
    %12 = vector.multi_reduction <add>, %11, %cst_11 [0] : vector<8x128xf32> to vector<128xf32>
    %13 = vector.shape_cast %12 : vector<128xf32> to vector<1x128xf32>
    %14 = vector.shape_cast %13 : vector<1x128xf32> to vector<1x1x128xf32>
    %c0_12 = arith.constant 0 : index
    %c0_13 = arith.constant 0 : index
    %c0_14 = arith.constant 0 : index
    %15 = vector.load %arg6[%c0_12, %c0_13, %c0_14] : memref<1x1x128xf32, #tpu.memory_space<vmem>>, vector<1x1x128xf32>
    tpu.vector_store %arg6[%c0_12, %c0_13, %c0_14], %14 {strides = array<i32>} : memref<1x1x128xf32, #tpu.memory_space<vmem>>, vector<1x1x128xf32>,
    return
  }
  func.func @transform_0(%arg0: i32) -> (i32, i32) {
    %c0_i32 = arith.constant 0 : i32
    %c0_i32_0 = arith.constant 0 : i32
    return %arg0, %c0_i32 : i32, i32
  }
  func.func @transform_1(%arg0: i32) -> (i32, i32) {
    %c0_i32 = arith.constant 0 : i32
    %c0_i32_0 = arith.constant 0 : i32
    %c0_i32_1 = arith.constant 0 : i32
    return %c0_i32, %c0_i32_0 : i32, i32
  }
  func.func @transform_2(%arg0: i32) -> (i32, i32) {
    %c0_i32 = arith.constant 0 : i32
    %c0_i32_0 = arith.constant 0 : i32
    %c0_i32_1 = arith.constant 0 : i32
    return %c0_i32, %c0_i32_0 : i32, i32
  }
  func.func @transform_3(%arg0: i32) -> (i32, i32) {
    %c0_i32 = arith.constant 0 : i32
    %c0_i32_0 = arith.constant 0 : i32
    return %arg0, %c0_i32 : i32, i32
  }
  func.func @transform_4(%arg0: i32) -> (i32, i32, i32) {
    %c0_i32 = arith.constant 0 : i32
    %c0_i32_0 = arith.constant 0 : i32
    %c0_i32_1 = arith.constant 0 : i32
    return %arg0, %c0_i32, %c0_i32_0 : i32, i32, i32
  }
  func.func @transform_5(%arg0: i32) -> (i32, i32, i32) {
    %c0_i32 = arith.constant 0 : i32
    %c0_i32_0 = arith.constant 0 : i32
    %c0_i32_1 = arith.constant 0 : i32
    return %arg0, %c0_i32, %c0_i32_0 : i32, i32, i32
  }
}

module attributes {stable_mosaic.version = 11 : i64} {
  func.func @_bn_relu_kernel(%arg0: i32, %arg1: memref<4x256xf32, #tpu.memory_space<vmem>>, %arg2: memref<1x256xf32, #tpu.memory_space<vmem>>, %arg3: memref<1x256xf32, #tpu.memory_space<vmem>>, %arg4: memref<4x256xbf16, #tpu.memory_space<vmem>>) attributes {dimension_semantics = [#tpu.dimension_semantics<parallel>], iteration_bounds = array<i64: 1>, scalar_prefetch = 0 : i64, scratch_operands = 0 : i64, tpu.core_type = #tpu.core_type<tc>, window_params = [{transform_indices = @transform_0, window_bounds = array<i64: 4, 256>}, {pipeline_mode = #tpu.pipeline_mode<synchronous>, transform_indices = @transform_1, window_bounds = array<i64: 1, 256>}, {pipeline_mode = #tpu.pipeline_mode<synchronous>, transform_indices = @transform_2, window_bounds = array<i64: 1, 256>}, {transform_indices = @transform_3, window_bounds = array<i64: 4, 256>}]} {
    %c0 = arith.constant 0 : index
    %c0_0 = arith.constant 0 : index
    %0 = vector.load %arg1[%c0, %c0_0] : memref<4x256xf32, #tpu.memory_space<vmem>>, vector<4x256xf32>
    %c0_1 = arith.constant 0 : index
    %c0_2 = arith.constant 0 : index
    %1 = vector.load %arg2[%c0_1, %c0_2] : memref<1x256xf32, #tpu.memory_space<vmem>>, vector<1x256xf32>
    %2 = vector.broadcast %1 : vector<1x256xf32> to vector<4x256xf32>
    %3 = arith.mulf %0, %2 : vector<4x256xf32>
    %c0_3 = arith.constant 0 : index
    %c0_4 = arith.constant 0 : index
    %4 = vector.load %arg3[%c0_3, %c0_4] : memref<1x256xf32, #tpu.memory_space<vmem>>, vector<1x256xf32>
    %5 = vector.broadcast %4 : vector<1x256xf32> to vector<4x256xf32>
    %6 = arith.addf %3, %5 : vector<4x256xf32>
    %cst = arith.constant 0.000000e+00 : f32
    %7 = vector.broadcast %cst : f32 to vector<4x256xf32>
    %8 = arith.maximumf %6, %7 : vector<4x256xf32>
    %9 = arith.truncf %8 : vector<4x256xf32> to vector<4x256xbf16>
    %c0_5 = arith.constant 0 : index
    %c0_6 = arith.constant 0 : index
    %10 = vector.load %arg4[%c0_5, %c0_6] : memref<4x256xbf16, #tpu.memory_space<vmem>>, vector<4x256xbf16>
    tpu.vector_store %arg4[%c0_5, %c0_6], %9 {strides = array<i32>} : memref<4x256xbf16, #tpu.memory_space<vmem>>, vector<4x256xbf16>,
    return
  }
  func.func @transform_0(%arg0: i32) -> (i32, i32) {
    %c0_i32 = arith.constant 0 : i32
    %c0_i32_0 = arith.constant 0 : i32
    return %arg0, %c0_i32 : i32, i32
  }
  func.func @transform_1(%arg0: i32) -> (i32, i32) {
    %c0_i32 = arith.constant 0 : i32
    %c0_i32_0 = arith.constant 0 : i32
    %c0_i32_1 = arith.constant 0 : i32
    return %c0_i32, %c0_i32_0 : i32, i32
  }
  func.func @transform_2(%arg0: i32) -> (i32, i32) {
    %c0_i32 = arith.constant 0 : i32
    %c0_i32_0 = arith.constant 0 : i32
    %c0_i32_1 = arith.constant 0 : i32
    return %c0_i32, %c0_i32_0 : i32, i32
  }
  func.func @transform_3(%arg0: i32) -> (i32, i32) {
    %c0_i32 = arith.constant 0 : i32
    %c0_i32_0 = arith.constant 0 : i32
    return %arg0, %c0_i32 : i32, i32
  }
}

module attributes {stable_mosaic.version = 11 : i64} {
  func.func @_mm_bias_stats_kernel(%arg0: i32, %arg1: memref<8x1152xbf16, #tpu.memory_space<vmem>>, %arg2: memref<1152x128xbf16, #tpu.memory_space<vmem>>, %arg3: memref<1x128xf32, #tpu.memory_space<vmem>>, %arg4: memref<8x128xf32, #tpu.memory_space<vmem>>, %arg5: memref<1x1x128xf32, #tpu.memory_space<vmem>>, %arg6: memref<1x1x128xf32, #tpu.memory_space<vmem>>) attributes {dimension_semantics = [#tpu.dimension_semantics<parallel>], iteration_bounds = array<i64: 1>, scalar_prefetch = 0 : i64, scratch_operands = 0 : i64, tpu.core_type = #tpu.core_type<tc>, window_params = [{transform_indices = @transform_0, window_bounds = array<i64: 8, 1152>}, {pipeline_mode = #tpu.pipeline_mode<synchronous>, transform_indices = @transform_1, window_bounds = array<i64: 1152, 128>}, {pipeline_mode = #tpu.pipeline_mode<synchronous>, transform_indices = @transform_2, window_bounds = array<i64: 1, 128>}, {transform_indices = @transform_3, window_bounds = array<i64: 8, 128>}, {transform_indices = @transform_4, window_bounds = array<i64: 1, 1, 128>}, {transform_indices = @transform_5, window_bounds = array<i64: 1, 1, 128>}]} {
    %c0 = arith.constant 0 : index
    %c0_0 = arith.constant 0 : index
    %0 = vector.load %arg1[%c0, %c0_0] : memref<8x1152xbf16, #tpu.memory_space<vmem>>, vector<8x1152xbf16>
    %c0_1 = arith.constant 0 : index
    %c0_2 = arith.constant 0 : index
    %1 = vector.load %arg2[%c0_1, %c0_2] : memref<1152x128xbf16, #tpu.memory_space<vmem>>, vector<1152x128xbf16>
    %cst = arith.constant dense<0.000000e+00> : vector<8x128xf32>
    %2 = tpu.matmul %0, %1, %cst {dimension_numbers = #tpu.dot_dimension_numbers<[1], [0], [0], [1], [0, 0, 1, 1], [], []>} : vector<8x1152xbf16>, vector<1152x128xbf16>, vector<8x128xf32> -> vector<8x128xf32>
    %c0_3 = arith.constant 0 : index
    %c0_4 = arith.constant 0 : index
    %3 = vector.load %arg3[%c0_3, %c0_4] : memref<1x128xf32, #tpu.memory_space<vmem>>, vector<1x128xf32>
    %4 = vector.broadcast %3 : vector<1x128xf32> to vector<8x128xf32>
    %5 = arith.addf %2, %4 : vector<8x128xf32>
    %c0_5 = arith.constant 0 : index
    %c0_6 = arith.constant 0 : index
    %6 = vector.load %arg4[%c0_5, %c0_6] : memref<8x128xf32, #tpu.memory_space<vmem>>, vector<8x128xf32>
    tpu.vector_store %arg4[%c0_5, %c0_6], %5 {strides = array<i32>} : memref<8x128xf32, #tpu.memory_space<vmem>>, vector<8x128xf32>,
    %cst_7 = arith.constant dense<0.000000e+00> : vector<128xf32>
    %7 = vector.multi_reduction <add>, %5, %cst_7 [0] : vector<8x128xf32> to vector<128xf32>
    %8 = vector.shape_cast %7 : vector<128xf32> to vector<1x128xf32>
    %9 = vector.shape_cast %8 : vector<1x128xf32> to vector<1x1x128xf32>
    %c0_8 = arith.constant 0 : index
    %c0_9 = arith.constant 0 : index
    %c0_10 = arith.constant 0 : index
    %10 = vector.load %arg5[%c0_8, %c0_9, %c0_10] : memref<1x1x128xf32, #tpu.memory_space<vmem>>, vector<1x1x128xf32>
    tpu.vector_store %arg5[%c0_8, %c0_9, %c0_10], %9 {strides = array<i32>} : memref<1x1x128xf32, #tpu.memory_space<vmem>>, vector<1x1x128xf32>,
    %11 = arith.mulf %5, %5 : vector<8x128xf32>
    %cst_11 = arith.constant dense<0.000000e+00> : vector<128xf32>
    %12 = vector.multi_reduction <add>, %11, %cst_11 [0] : vector<8x128xf32> to vector<128xf32>
    %13 = vector.shape_cast %12 : vector<128xf32> to vector<1x128xf32>
    %14 = vector.shape_cast %13 : vector<1x128xf32> to vector<1x1x128xf32>
    %c0_12 = arith.constant 0 : index
    %c0_13 = arith.constant 0 : index
    %c0_14 = arith.constant 0 : index
    %15 = vector.load %arg6[%c0_12, %c0_13, %c0_14] : memref<1x1x128xf32, #tpu.memory_space<vmem>>, vector<1x1x128xf32>
    tpu.vector_store %arg6[%c0_12, %c0_13, %c0_14], %14 {strides = array<i32>} : memref<1x1x128xf32, #tpu.memory_space<vmem>>, vector<1x1x128xf32>,
    return
  }
  func.func @transform_0(%arg0: i32) -> (i32, i32) {
    %c0_i32 = arith.constant 0 : i32
    %c0_i32_0 = arith.constant 0 : i32
    return %arg0, %c0_i32 : i32, i32
  }
  func.func @transform_1(%arg0: i32) -> (i32, i32) {
    %c0_i32 = arith.constant 0 : i32
    %c0_i32_0 = arith.constant 0 : i32
    %c0_i32_1 = arith.constant 0 : i32
    return %c0_i32, %c0_i32_0 : i32, i32
  }
  func.func @transform_2(%arg0: i32) -> (i32, i32) {
    %c0_i32 = arith.constant 0 : i32
    %c0_i32_0 = arith.constant 0 : i32
    %c0_i32_1 = arith.constant 0 : i32
    return %c0_i32, %c0_i32_0 : i32, i32
  }
  func.func @transform_3(%arg0: i32) -> (i32, i32) {
    %c0_i32 = arith.constant 0 : i32
    %c0_i32_0 = arith.constant 0 : i32
    return %arg0, %c0_i32 : i32, i32
  }
  func.func @transform_4(%arg0: i32) -> (i32, i32, i32) {
    %c0_i32 = arith.constant 0 : i32
    %c0_i32_0 = arith.constant 0 : i32
    %c0_i32_1 = arith.constant 0 : i32
    return %arg0, %c0_i32, %c0_i32_0 : i32, i32, i32
  }
  func.func @transform_5(%arg0: i32) -> (i32, i32, i32) {
    %c0_i32 = arith.constant 0 : i32
    %c0_i32_0 = arith.constant 0 : i32
    %c0_i32_1 = arith.constant 0 : i32
    return %arg0, %c0_i32, %c0_i32_0 : i32, i32, i32
  }
}

module attributes {stable_mosaic.version = 11 : i64} {
  func.func @_mm_bias_stats_kernel(%arg0: i32, %arg1: memref<8x512xbf16, #tpu.memory_space<vmem>>, %arg2: memref<512x256xbf16, #tpu.memory_space<vmem>>, %arg3: memref<1x256xf32, #tpu.memory_space<vmem>>, %arg4: memref<8x256xf32, #tpu.memory_space<vmem>>, %arg5: memref<1x1x256xf32, #tpu.memory_space<vmem>>, %arg6: memref<1x1x256xf32, #tpu.memory_space<vmem>>) attributes {dimension_semantics = [#tpu.dimension_semantics<parallel>], iteration_bounds = array<i64: 1>, scalar_prefetch = 0 : i64, scratch_operands = 0 : i64, tpu.core_type = #tpu.core_type<tc>, window_params = [{transform_indices = @transform_0, window_bounds = array<i64: 8, 512>}, {pipeline_mode = #tpu.pipeline_mode<synchronous>, transform_indices = @transform_1, window_bounds = array<i64: 512, 256>}, {pipeline_mode = #tpu.pipeline_mode<synchronous>, transform_indices = @transform_2, window_bounds = array<i64: 1, 256>}, {transform_indices = @transform_3, window_bounds = array<i64: 8, 256>}, {transform_indices = @transform_4, window_bounds = array<i64: 1, 1, 256>}, {transform_indices = @transform_5, window_bounds = array<i64: 1, 1, 256>}]} {
    %c0 = arith.constant 0 : index
    %c0_0 = arith.constant 0 : index
    %0 = vector.load %arg1[%c0, %c0_0] : memref<8x512xbf16, #tpu.memory_space<vmem>>, vector<8x512xbf16>
    %c0_1 = arith.constant 0 : index
    %c0_2 = arith.constant 0 : index
    %1 = vector.load %arg2[%c0_1, %c0_2] : memref<512x256xbf16, #tpu.memory_space<vmem>>, vector<512x256xbf16>
    %cst = arith.constant dense<0.000000e+00> : vector<8x256xf32>
    %2 = tpu.matmul %0, %1, %cst {dimension_numbers = #tpu.dot_dimension_numbers<[1], [0], [0], [1], [0, 0, 1, 1], [], []>} : vector<8x512xbf16>, vector<512x256xbf16>, vector<8x256xf32> -> vector<8x256xf32>
    %c0_3 = arith.constant 0 : index
    %c0_4 = arith.constant 0 : index
    %3 = vector.load %arg3[%c0_3, %c0_4] : memref<1x256xf32, #tpu.memory_space<vmem>>, vector<1x256xf32>
    %4 = vector.broadcast %3 : vector<1x256xf32> to vector<8x256xf32>
    %5 = arith.addf %2, %4 : vector<8x256xf32>
    %c0_5 = arith.constant 0 : index
    %c0_6 = arith.constant 0 : index
    %6 = vector.load %arg4[%c0_5, %c0_6] : memref<8x256xf32, #tpu.memory_space<vmem>>, vector<8x256xf32>
    tpu.vector_store %arg4[%c0_5, %c0_6], %5 {strides = array<i32>} : memref<8x256xf32, #tpu.memory_space<vmem>>, vector<8x256xf32>,
    %cst_7 = arith.constant dense<0.000000e+00> : vector<256xf32>
    %7 = vector.multi_reduction <add>, %5, %cst_7 [0] : vector<8x256xf32> to vector<256xf32>
    %8 = vector.shape_cast %7 : vector<256xf32> to vector<1x256xf32>
    %9 = vector.shape_cast %8 : vector<1x256xf32> to vector<1x1x256xf32>
    %c0_8 = arith.constant 0 : index
    %c0_9 = arith.constant 0 : index
    %c0_10 = arith.constant 0 : index
    %10 = vector.load %arg5[%c0_8, %c0_9, %c0_10] : memref<1x1x256xf32, #tpu.memory_space<vmem>>, vector<1x1x256xf32>
    tpu.vector_store %arg5[%c0_8, %c0_9, %c0_10], %9 {strides = array<i32>} : memref<1x1x256xf32, #tpu.memory_space<vmem>>, vector<1x1x256xf32>,
    %11 = arith.mulf %5, %5 : vector<8x256xf32>
    %cst_11 = arith.constant dense<0.000000e+00> : vector<256xf32>
    %12 = vector.multi_reduction <add>, %11, %cst_11 [0] : vector<8x256xf32> to vector<256xf32>
    %13 = vector.shape_cast %12 : vector<256xf32> to vector<1x256xf32>
    %14 = vector.shape_cast %13 : vector<1x256xf32> to vector<1x1x256xf32>
    %c0_12 = arith.constant 0 : index
    %c0_13 = arith.constant 0 : index
    %c0_14 = arith.constant 0 : index
    %15 = vector.load %arg6[%c0_12, %c0_13, %c0_14] : memref<1x1x256xf32, #tpu.memory_space<vmem>>, vector<1x1x256xf32>
    tpu.vector_store %arg6[%c0_12, %c0_13, %c0_14], %14 {strides = array<i32>} : memref<1x1x256xf32, #tpu.memory_space<vmem>>, vector<1x1x256xf32>,
    return
  }
  func.func @transform_0(%arg0: i32) -> (i32, i32) {
    %c0_i32 = arith.constant 0 : i32
    %c0_i32_0 = arith.constant 0 : i32
    return %arg0, %c0_i32 : i32, i32
  }
  func.func @transform_1(%arg0: i32) -> (i32, i32) {
    %c0_i32 = arith.constant 0 : i32
    %c0_i32_0 = arith.constant 0 : i32
    %c0_i32_1 = arith.constant 0 : i32
    return %c0_i32, %c0_i32_0 : i32, i32
  }
  func.func @transform_2(%arg0: i32) -> (i32, i32) {
    %c0_i32 = arith.constant 0 : i32
    %c0_i32_0 = arith.constant 0 : i32
    %c0_i32_1 = arith.constant 0 : i32
    return %c0_i32, %c0_i32_0 : i32, i32
  }
  func.func @transform_3(%arg0: i32) -> (i32, i32) {
    %c0_i32 = arith.constant 0 : i32
    %c0_i32_0 = arith.constant 0 : i32
    return %arg0, %c0_i32 : i32, i32
  }
  func.func @transform_4(%arg0: i32) -> (i32, i32, i32) {
    %c0_i32 = arith.constant 0 : i32
    %c0_i32_0 = arith.constant 0 : i32
    %c0_i32_1 = arith.constant 0 : i32
    return %arg0, %c0_i32, %c0_i32_0 : i32, i32, i32
  }
  func.func @transform_5(%arg0: i32) -> (i32, i32, i32) {
    %c0_i32 = arith.constant 0 : i32
    %c0_i32_0 = arith.constant 0 : i32
    %c0_i32_1 = arith.constant 0 : i32
    return %arg0, %c0_i32, %c0_i32_0 : i32, i32, i32
  }
}

module attributes {stable_mosaic.version = 11 : i64} {
  func.func @_bn_relu_kernel(%arg0: i32, %arg1: memref<4x512xf32, #tpu.memory_space<vmem>>, %arg2: memref<1x512xf32, #tpu.memory_space<vmem>>, %arg3: memref<1x512xf32, #tpu.memory_space<vmem>>, %arg4: memref<4x512xbf16, #tpu.memory_space<vmem>>) attributes {dimension_semantics = [#tpu.dimension_semantics<parallel>], iteration_bounds = array<i64: 1>, scalar_prefetch = 0 : i64, scratch_operands = 0 : i64, tpu.core_type = #tpu.core_type<tc>, window_params = [{transform_indices = @transform_0, window_bounds = array<i64: 4, 512>}, {pipeline_mode = #tpu.pipeline_mode<synchronous>, transform_indices = @transform_1, window_bounds = array<i64: 1, 512>}, {pipeline_mode = #tpu.pipeline_mode<synchronous>, transform_indices = @transform_2, window_bounds = array<i64: 1, 512>}, {transform_indices = @transform_3, window_bounds = array<i64: 4, 512>}]} {
    %c0 = arith.constant 0 : index
    %c0_0 = arith.constant 0 : index
    %0 = vector.load %arg1[%c0, %c0_0] : memref<4x512xf32, #tpu.memory_space<vmem>>, vector<4x512xf32>
    %c0_1 = arith.constant 0 : index
    %c0_2 = arith.constant 0 : index
    %1 = vector.load %arg2[%c0_1, %c0_2] : memref<1x512xf32, #tpu.memory_space<vmem>>, vector<1x512xf32>
    %2 = vector.broadcast %1 : vector<1x512xf32> to vector<4x512xf32>
    %3 = arith.mulf %0, %2 : vector<4x512xf32>
    %c0_3 = arith.constant 0 : index
    %c0_4 = arith.constant 0 : index
    %4 = vector.load %arg3[%c0_3, %c0_4] : memref<1x512xf32, #tpu.memory_space<vmem>>, vector<1x512xf32>
    %5 = vector.broadcast %4 : vector<1x512xf32> to vector<4x512xf32>
    %6 = arith.addf %3, %5 : vector<4x512xf32>
    %cst = arith.constant 0.000000e+00 : f32
    %7 = vector.broadcast %cst : f32 to vector<4x512xf32>
    %8 = arith.maximumf %6, %7 : vector<4x512xf32>
    %9 = arith.truncf %8 : vector<4x512xf32> to vector<4x512xbf16>
    %c0_5 = arith.constant 0 : index
    %c0_6 = arith.constant 0 : index
    %10 = vector.load %arg4[%c0_5, %c0_6] : memref<4x512xbf16, #tpu.memory_space<vmem>>, vector<4x512xbf16>
    tpu.vector_store %arg4[%c0_5, %c0_6], %9 {strides = array<i32>} : memref<4x512xbf16, #tpu.memory_space<vmem>>, vector<4x512xbf16>,
    return
  }
  func.func @transform_0(%arg0: i32) -> (i32, i32) {
    %c0_i32 = arith.constant 0 : i32
    %c0_i32_0 = arith.constant 0 : i32
    return %arg0, %c0_i32 : i32, i32
  }
  func.func @transform_1(%arg0: i32) -> (i32, i32) {
    %c0_i32 = arith.constant 0 : i32
    %c0_i32_0 = arith.constant 0 : i32
    %c0_i32_1 = arith.constant 0 : i32
    return %c0_i32, %c0_i32_0 : i32, i32
  }
  func.func @transform_2(%arg0: i32) -> (i32, i32) {
    %c0_i32 = arith.constant 0 : i32
    %c0_i32_0 = arith.constant 0 : i32
    %c0_i32_1 = arith.constant 0 : i32
    return %c0_i32, %c0_i32_0 : i32, i32
  }
  func.func @transform_3(%arg0: i32) -> (i32, i32) {
    %c0_i32 = arith.constant 0 : i32
    %c0_i32_0 = arith.constant 0 : i32
    return %arg0, %c0_i32 : i32, i32
  }
}

module attributes {stable_mosaic.version = 11 : i64} {
  func.func @_mm_bias_stats_kernel(%arg0: i32, %arg1: memref<32x256xbf16, #tpu.memory_space<vmem>>, %arg2: memref<256x128xbf16, #tpu.memory_space<vmem>>, %arg3: memref<1x128xf32, #tpu.memory_space<vmem>>, %arg4: memref<32x128xf32, #tpu.memory_space<vmem>>, %arg5: memref<1x1x128xf32, #tpu.memory_space<vmem>>, %arg6: memref<1x1x128xf32, #tpu.memory_space<vmem>>) attributes {dimension_semantics = [#tpu.dimension_semantics<parallel>], iteration_bounds = array<i64: 1>, scalar_prefetch = 0 : i64, scratch_operands = 0 : i64, tpu.core_type = #tpu.core_type<tc>, window_params = [{transform_indices = @transform_0, window_bounds = array<i64: 32, 256>}, {pipeline_mode = #tpu.pipeline_mode<synchronous>, transform_indices = @transform_1, window_bounds = array<i64: 256, 128>}, {pipeline_mode = #tpu.pipeline_mode<synchronous>, transform_indices = @transform_2, window_bounds = array<i64: 1, 128>}, {transform_indices = @transform_3, window_bounds = array<i64: 32, 128>}, {transform_indices = @transform_4, window_bounds = array<i64: 1, 1, 128>}, {transform_indices = @transform_5, window_bounds = array<i64: 1, 1, 128>}]} {
    %c0 = arith.constant 0 : index
    %c0_0 = arith.constant 0 : index
    %0 = vector.load %arg1[%c0, %c0_0] : memref<32x256xbf16, #tpu.memory_space<vmem>>, vector<32x256xbf16>
    %c0_1 = arith.constant 0 : index
    %c0_2 = arith.constant 0 : index
    %1 = vector.load %arg2[%c0_1, %c0_2] : memref<256x128xbf16, #tpu.memory_space<vmem>>, vector<256x128xbf16>
    %cst = arith.constant dense<0.000000e+00> : vector<32x128xf32>
    %2 = tpu.matmul %0, %1, %cst {dimension_numbers = #tpu.dot_dimension_numbers<[1], [0], [0], [1], [0, 0, 1, 1], [], []>} : vector<32x256xbf16>, vector<256x128xbf16>, vector<32x128xf32> -> vector<32x128xf32>
    %c0_3 = arith.constant 0 : index
    %c0_4 = arith.constant 0 : index
    %3 = vector.load %arg3[%c0_3, %c0_4] : memref<1x128xf32, #tpu.memory_space<vmem>>, vector<1x128xf32>
    %4 = vector.broadcast %3 : vector<1x128xf32> to vector<32x128xf32>
    %5 = arith.addf %2, %4 : vector<32x128xf32>
    %c0_5 = arith.constant 0 : index
    %c0_6 = arith.constant 0 : index
    %6 = vector.load %arg4[%c0_5, %c0_6] : memref<32x128xf32, #tpu.memory_space<vmem>>, vector<32x128xf32>
    tpu.vector_store %arg4[%c0_5, %c0_6], %5 {strides = array<i32>} : memref<32x128xf32, #tpu.memory_space<vmem>>, vector<32x128xf32>,
    %cst_7 = arith.constant dense<0.000000e+00> : vector<128xf32>
    %7 = vector.multi_reduction <add>, %5, %cst_7 [0] : vector<32x128xf32> to vector<128xf32>
    %8 = vector.shape_cast %7 : vector<128xf32> to vector<1x128xf32>
    %9 = vector.shape_cast %8 : vector<1x128xf32> to vector<1x1x128xf32>
    %c0_8 = arith.constant 0 : index
    %c0_9 = arith.constant 0 : index
    %c0_10 = arith.constant 0 : index
    %10 = vector.load %arg5[%c0_8, %c0_9, %c0_10] : memref<1x1x128xf32, #tpu.memory_space<vmem>>, vector<1x1x128xf32>
    tpu.vector_store %arg5[%c0_8, %c0_9, %c0_10], %9 {strides = array<i32>} : memref<1x1x128xf32, #tpu.memory_space<vmem>>, vector<1x1x128xf32>,
    %11 = arith.mulf %5, %5 : vector<32x128xf32>
    %cst_11 = arith.constant dense<0.000000e+00> : vector<128xf32>
    %12 = vector.multi_reduction <add>, %11, %cst_11 [0] : vector<32x128xf32> to vector<128xf32>
    %13 = vector.shape_cast %12 : vector<128xf32> to vector<1x128xf32>
    %14 = vector.shape_cast %13 : vector<1x128xf32> to vector<1x1x128xf32>
    %c0_12 = arith.constant 0 : index
    %c0_13 = arith.constant 0 : index
    %c0_14 = arith.constant 0 : index
    %15 = vector.load %arg6[%c0_12, %c0_13, %c0_14] : memref<1x1x128xf32, #tpu.memory_space<vmem>>, vector<1x1x128xf32>
    tpu.vector_store %arg6[%c0_12, %c0_13, %c0_14], %14 {strides = array<i32>} : memref<1x1x128xf32, #tpu.memory_space<vmem>>, vector<1x1x128xf32>,
    return
  }
  func.func @transform_0(%arg0: i32) -> (i32, i32) {
    %c0_i32 = arith.constant 0 : i32
    %c0_i32_0 = arith.constant 0 : i32
    return %arg0, %c0_i32 : i32, i32
  }
  func.func @transform_1(%arg0: i32) -> (i32, i32) {
    %c0_i32 = arith.constant 0 : i32
    %c0_i32_0 = arith.constant 0 : i32
    %c0_i32_1 = arith.constant 0 : i32
    return %c0_i32, %c0_i32_0 : i32, i32
  }
  func.func @transform_2(%arg0: i32) -> (i32, i32) {
    %c0_i32 = arith.constant 0 : i32
    %c0_i32_0 = arith.constant 0 : i32
    %c0_i32_1 = arith.constant 0 : i32
    return %c0_i32, %c0_i32_0 : i32, i32
  }
  func.func @transform_3(%arg0: i32) -> (i32, i32) {
    %c0_i32 = arith.constant 0 : i32
    %c0_i32_0 = arith.constant 0 : i32
    return %arg0, %c0_i32 : i32, i32
  }
  func.func @transform_4(%arg0: i32) -> (i32, i32, i32) {
    %c0_i32 = arith.constant 0 : i32
    %c0_i32_0 = arith.constant 0 : i32
    %c0_i32_1 = arith.constant 0 : i32
    return %arg0, %c0_i32, %c0_i32_0 : i32, i32, i32
  }
  func.func @transform_5(%arg0: i32) -> (i32, i32, i32) {
    %c0_i32 = arith.constant 0 : i32
    %c0_i32_0 = arith.constant 0 : i32
    %c0_i32_1 = arith.constant 0 : i32
    return %arg0, %c0_i32, %c0_i32_0 : i32, i32, i32
  }
}

module attributes {stable_mosaic.version = 11 : i64} {
  func.func @_bn_relu_kernel(%arg0: i32, %arg1: memref<8x512xf32, #tpu.memory_space<vmem>>, %arg2: memref<1x512xf32, #tpu.memory_space<vmem>>, %arg3: memref<1x512xf32, #tpu.memory_space<vmem>>, %arg4: memref<8x512xbf16, #tpu.memory_space<vmem>>) attributes {dimension_semantics = [#tpu.dimension_semantics<parallel>], iteration_bounds = array<i64: 1>, scalar_prefetch = 0 : i64, scratch_operands = 0 : i64, tpu.core_type = #tpu.core_type<tc>, window_params = [{transform_indices = @transform_0, window_bounds = array<i64: 8, 512>}, {pipeline_mode = #tpu.pipeline_mode<synchronous>, transform_indices = @transform_1, window_bounds = array<i64: 1, 512>}, {pipeline_mode = #tpu.pipeline_mode<synchronous>, transform_indices = @transform_2, window_bounds = array<i64: 1, 512>}, {transform_indices = @transform_3, window_bounds = array<i64: 8, 512>}]} {
    %c0 = arith.constant 0 : index
    %c0_0 = arith.constant 0 : index
    %0 = vector.load %arg1[%c0, %c0_0] : memref<8x512xf32, #tpu.memory_space<vmem>>, vector<8x512xf32>
    %c0_1 = arith.constant 0 : index
    %c0_2 = arith.constant 0 : index
    %1 = vector.load %arg2[%c0_1, %c0_2] : memref<1x512xf32, #tpu.memory_space<vmem>>, vector<1x512xf32>
    %2 = vector.broadcast %1 : vector<1x512xf32> to vector<8x512xf32>
    %3 = arith.mulf %0, %2 : vector<8x512xf32>
    %c0_3 = arith.constant 0 : index
    %c0_4 = arith.constant 0 : index
    %4 = vector.load %arg3[%c0_3, %c0_4] : memref<1x512xf32, #tpu.memory_space<vmem>>, vector<1x512xf32>
    %5 = vector.broadcast %4 : vector<1x512xf32> to vector<8x512xf32>
    %6 = arith.addf %3, %5 : vector<8x512xf32>
    %cst = arith.constant 0.000000e+00 : f32
    %7 = vector.broadcast %cst : f32 to vector<8x512xf32>
    %8 = arith.maximumf %6, %7 : vector<8x512xf32>
    %9 = arith.truncf %8 : vector<8x512xf32> to vector<8x512xbf16>
    %c0_5 = arith.constant 0 : index
    %c0_6 = arith.constant 0 : index
    %10 = vector.load %arg4[%c0_5, %c0_6] : memref<8x512xbf16, #tpu.memory_space<vmem>>, vector<8x512xbf16>
    tpu.vector_store %arg4[%c0_5, %c0_6], %9 {strides = array<i32>} : memref<8x512xbf16, #tpu.memory_space<vmem>>, vector<8x512xbf16>,
    return
  }
  func.func @transform_0(%arg0: i32) -> (i32, i32) {
    %c0_i32 = arith.constant 0 : i32
    %c0_i32_0 = arith.constant 0 : i32
    return %arg0, %c0_i32 : i32, i32
  }
  func.func @transform_1(%arg0: i32) -> (i32, i32) {
    %c0_i32 = arith.constant 0 : i32
    %c0_i32_0 = arith.constant 0 : i32
    %c0_i32_1 = arith.constant 0 : i32
    return %c0_i32, %c0_i32_0 : i32, i32
  }
  func.func @transform_2(%arg0: i32) -> (i32, i32) {
    %c0_i32 = arith.constant 0 : i32
    %c0_i32_0 = arith.constant 0 : i32
    %c0_i32_1 = arith.constant 0 : i32
    return %c0_i32, %c0_i32_0 : i32, i32
  }
  func.func @transform_3(%arg0: i32) -> (i32, i32) {
    %c0_i32 = arith.constant 0 : i32
    %c0_i32_0 = arith.constant 0 : i32
    return %arg0, %c0_i32 : i32, i32
  }
}

module attributes {stable_mosaic.version = 11 : i64} {
  func.func @_mm_bias_stats_kernel(%arg0: i32, %arg1: memref<128x128xbf16, #tpu.memory_space<vmem>>, %arg2: memref<128x64xbf16, #tpu.memory_space<vmem>>, %arg3: memref<1x64xf32, #tpu.memory_space<vmem>>, %arg4: memref<128x64xf32, #tpu.memory_space<vmem>>, %arg5: memref<1x1x64xf32, #tpu.memory_space<vmem>>, %arg6: memref<1x1x64xf32, #tpu.memory_space<vmem>>) attributes {dimension_semantics = [#tpu.dimension_semantics<parallel>], iteration_bounds = array<i64: 1>, scalar_prefetch = 0 : i64, scratch_operands = 0 : i64, tpu.core_type = #tpu.core_type<tc>, window_params = [{transform_indices = @transform_0, window_bounds = array<i64: 128, 128>}, {pipeline_mode = #tpu.pipeline_mode<synchronous>, transform_indices = @transform_1, window_bounds = array<i64: 128, 64>}, {pipeline_mode = #tpu.pipeline_mode<synchronous>, transform_indices = @transform_2, window_bounds = array<i64: 1, 64>}, {transform_indices = @transform_3, window_bounds = array<i64: 128, 64>}, {transform_indices = @transform_4, window_bounds = array<i64: 1, 1, 64>}, {transform_indices = @transform_5, window_bounds = array<i64: 1, 1, 64>}]} {
    %c0 = arith.constant 0 : index
    %c0_0 = arith.constant 0 : index
    %0 = vector.load %arg1[%c0, %c0_0] : memref<128x128xbf16, #tpu.memory_space<vmem>>, vector<128x128xbf16>
    %c0_1 = arith.constant 0 : index
    %c0_2 = arith.constant 0 : index
    %1 = vector.load %arg2[%c0_1, %c0_2] : memref<128x64xbf16, #tpu.memory_space<vmem>>, vector<128x64xbf16>
    %cst = arith.constant dense<0.000000e+00> : vector<128x64xf32>
    %2 = tpu.matmul %0, %1, %cst {dimension_numbers = #tpu.dot_dimension_numbers<[1], [0], [0], [1], [0, 0, 1, 1], [], []>} : vector<128x128xbf16>, vector<128x64xbf16>, vector<128x64xf32> -> vector<128x64xf32>
    %c0_3 = arith.constant 0 : index
    %c0_4 = arith.constant 0 : index
    %3 = vector.load %arg3[%c0_3, %c0_4] : memref<1x64xf32, #tpu.memory_space<vmem>>, vector<1x64xf32>
    %4 = vector.broadcast %3 : vector<1x64xf32> to vector<128x64xf32>
    %5 = arith.addf %2, %4 : vector<128x64xf32>
    %c0_5 = arith.constant 0 : index
    %c0_6 = arith.constant 0 : index
    %6 = vector.load %arg4[%c0_5, %c0_6] : memref<128x64xf32, #tpu.memory_space<vmem>>, vector<128x64xf32>
    tpu.vector_store %arg4[%c0_5, %c0_6], %5 {strides = array<i32>} : memref<128x64xf32, #tpu.memory_space<vmem>>, vector<128x64xf32>,
    %cst_7 = arith.constant dense<0.000000e+00> : vector<64xf32>
    %7 = vector.multi_reduction <add>, %5, %cst_7 [0] : vector<128x64xf32> to vector<64xf32>
    %8 = vector.shape_cast %7 : vector<64xf32> to vector<1x64xf32>
    %9 = vector.shape_cast %8 : vector<1x64xf32> to vector<1x1x64xf32>
    %c0_8 = arith.constant 0 : index
    %c0_9 = arith.constant 0 : index
    %c0_10 = arith.constant 0 : index
    %10 = vector.load %arg5[%c0_8, %c0_9, %c0_10] : memref<1x1x64xf32, #tpu.memory_space<vmem>>, vector<1x1x64xf32>
    tpu.vector_store %arg5[%c0_8, %c0_9, %c0_10], %9 {strides = array<i32>} : memref<1x1x64xf32, #tpu.memory_space<vmem>>, vector<1x1x64xf32>,
    %11 = arith.mulf %5, %5 : vector<128x64xf32>
    %cst_11 = arith.constant dense<0.000000e+00> : vector<64xf32>
    %12 = vector.multi_reduction <add>, %11, %cst_11 [0] : vector<128x64xf32> to vector<64xf32>
    %13 = vector.shape_cast %12 : vector<64xf32> to vector<1x64xf32>
    %14 = vector.shape_cast %13 : vector<1x64xf32> to vector<1x1x64xf32>
    %c0_12 = arith.constant 0 : index
    %c0_13 = arith.constant 0 : index
    %c0_14 = arith.constant 0 : index
    %15 = vector.load %arg6[%c0_12, %c0_13, %c0_14] : memref<1x1x64xf32, #tpu.memory_space<vmem>>, vector<1x1x64xf32>
    tpu.vector_store %arg6[%c0_12, %c0_13, %c0_14], %14 {strides = array<i32>} : memref<1x1x64xf32, #tpu.memory_space<vmem>>, vector<1x1x64xf32>,
    return
  }
  func.func @transform_0(%arg0: i32) -> (i32, i32) {
    %c0_i32 = arith.constant 0 : i32
    %c0_i32_0 = arith.constant 0 : i32
    return %arg0, %c0_i32 : i32, i32
  }
  func.func @transform_1(%arg0: i32) -> (i32, i32) {
    %c0_i32 = arith.constant 0 : i32
    %c0_i32_0 = arith.constant 0 : i32
    %c0_i32_1 = arith.constant 0 : i32
    return %c0_i32, %c0_i32_0 : i32, i32
  }
  func.func @transform_2(%arg0: i32) -> (i32, i32) {
    %c0_i32 = arith.constant 0 : i32
    %c0_i32_0 = arith.constant 0 : i32
    %c0_i32_1 = arith.constant 0 : i32
    return %c0_i32, %c0_i32_0 : i32, i32
  }
  func.func @transform_3(%arg0: i32) -> (i32, i32) {
    %c0_i32 = arith.constant 0 : i32
    %c0_i32_0 = arith.constant 0 : i32
    return %arg0, %c0_i32 : i32, i32
  }
  func.func @transform_4(%arg0: i32) -> (i32, i32, i32) {
    %c0_i32 = arith.constant 0 : i32
    %c0_i32_0 = arith.constant 0 : i32
    %c0_i32_1 = arith.constant 0 : i32
    return %arg0, %c0_i32, %c0_i32_0 : i32, i32, i32
  }
  func.func @transform_5(%arg0: i32) -> (i32, i32, i32) {
    %c0_i32 = arith.constant 0 : i32
    %c0_i32_0 = arith.constant 0 : i32
    %c0_i32_1 = arith.constant 0 : i32
    return %arg0, %c0_i32, %c0_i32_0 : i32, i32, i32
  }
}

module attributes {stable_mosaic.version = 11 : i64} {
  func.func @_bn_relu_kernel(%arg0: i32, %arg1: memref<16x512xf32, #tpu.memory_space<vmem>>, %arg2: memref<1x512xf32, #tpu.memory_space<vmem>>, %arg3: memref<1x512xf32, #tpu.memory_space<vmem>>, %arg4: memref<16x512xbf16, #tpu.memory_space<vmem>>) attributes {dimension_semantics = [#tpu.dimension_semantics<parallel>], iteration_bounds = array<i64: 1>, scalar_prefetch = 0 : i64, scratch_operands = 0 : i64, tpu.core_type = #tpu.core_type<tc>, window_params = [{transform_indices = @transform_0, window_bounds = array<i64: 16, 512>}, {pipeline_mode = #tpu.pipeline_mode<synchronous>, transform_indices = @transform_1, window_bounds = array<i64: 1, 512>}, {pipeline_mode = #tpu.pipeline_mode<synchronous>, transform_indices = @transform_2, window_bounds = array<i64: 1, 512>}, {transform_indices = @transform_3, window_bounds = array<i64: 16, 512>}]} {
    %c0 = arith.constant 0 : index
    %c0_0 = arith.constant 0 : index
    %0 = vector.load %arg1[%c0, %c0_0] : memref<16x512xf32, #tpu.memory_space<vmem>>, vector<16x512xf32>
    %c0_1 = arith.constant 0 : index
    %c0_2 = arith.constant 0 : index
    %1 = vector.load %arg2[%c0_1, %c0_2] : memref<1x512xf32, #tpu.memory_space<vmem>>, vector<1x512xf32>
    %2 = vector.broadcast %1 : vector<1x512xf32> to vector<16x512xf32>
    %3 = arith.mulf %0, %2 : vector<16x512xf32>
    %c0_3 = arith.constant 0 : index
    %c0_4 = arith.constant 0 : index
    %4 = vector.load %arg3[%c0_3, %c0_4] : memref<1x512xf32, #tpu.memory_space<vmem>>, vector<1x512xf32>
    %5 = vector.broadcast %4 : vector<1x512xf32> to vector<16x512xf32>
    %6 = arith.addf %3, %5 : vector<16x512xf32>
    %cst = arith.constant 0.000000e+00 : f32
    %7 = vector.broadcast %cst : f32 to vector<16x512xf32>
    %8 = arith.maximumf %6, %7 : vector<16x512xf32>
    %9 = arith.truncf %8 : vector<16x512xf32> to vector<16x512xbf16>
    %c0_5 = arith.constant 0 : index
    %c0_6 = arith.constant 0 : index
    %10 = vector.load %arg4[%c0_5, %c0_6] : memref<16x512xbf16, #tpu.memory_space<vmem>>, vector<16x512xbf16>
    tpu.vector_store %arg4[%c0_5, %c0_6], %9 {strides = array<i32>} : memref<16x512xbf16, #tpu.memory_space<vmem>>, vector<16x512xbf16>,
    return
  }
  func.func @transform_0(%arg0: i32) -> (i32, i32) {
    %c0_i32 = arith.constant 0 : i32
    %c0_i32_0 = arith.constant 0 : i32
    return %arg0, %c0_i32 : i32, i32
  }
  func.func @transform_1(%arg0: i32) -> (i32, i32) {
    %c0_i32 = arith.constant 0 : i32
    %c0_i32_0 = arith.constant 0 : i32
    %c0_i32_1 = arith.constant 0 : i32
    return %c0_i32, %c0_i32_0 : i32, i32
  }
  func.func @transform_2(%arg0: i32) -> (i32, i32) {
    %c0_i32 = arith.constant 0 : i32
    %c0_i32_0 = arith.constant 0 : i32
    %c0_i32_1 = arith.constant 0 : i32
    return %c0_i32, %c0_i32_0 : i32, i32
  }
  func.func @transform_3(%arg0: i32) -> (i32, i32) {
    %c0_i32 = arith.constant 0 : i32
    %c0_i32_0 = arith.constant 0 : i32
    return %arg0, %c0_i32 : i32, i32
  }
}

module attributes {stable_mosaic.version = 11 : i64} {
  func.func @_mm_bias_stats_kernel(%arg0: i32, %arg1: memref<512x144xbf16, #tpu.memory_space<vmem>>, %arg2: memref<144x16xbf16, #tpu.memory_space<vmem>>, %arg3: memref<1x16xf32, #tpu.memory_space<vmem>>, %arg4: memref<512x16xf32, #tpu.memory_space<vmem>>, %arg5: memref<1x1x16xf32, #tpu.memory_space<vmem>>, %arg6: memref<1x1x16xf32, #tpu.memory_space<vmem>>) attributes {dimension_semantics = [#tpu.dimension_semantics<parallel>], iteration_bounds = array<i64: 1>, scalar_prefetch = 0 : i64, scratch_operands = 0 : i64, tpu.core_type = #tpu.core_type<tc>, window_params = [{transform_indices = @transform_0, window_bounds = array<i64: 512, 144>}, {pipeline_mode = #tpu.pipeline_mode<synchronous>, transform_indices = @transform_1, window_bounds = array<i64: 144, 16>}, {pipeline_mode = #tpu.pipeline_mode<synchronous>, transform_indices = @transform_2, window_bounds = array<i64: 1, 16>}, {transform_indices = @transform_3, window_bounds = array<i64: 512, 16>}, {transform_indices = @transform_4, window_bounds = array<i64: 1, 1, 16>}, {transform_indices = @transform_5, window_bounds = array<i64: 1, 1, 16>}]} {
    %c0 = arith.constant 0 : index
    %c0_0 = arith.constant 0 : index
    %0 = vector.load %arg1[%c0, %c0_0] : memref<512x144xbf16, #tpu.memory_space<vmem>>, vector<512x144xbf16>
    %c0_1 = arith.constant 0 : index
    %c0_2 = arith.constant 0 : index
    %1 = vector.load %arg2[%c0_1, %c0_2] : memref<144x16xbf16, #tpu.memory_space<vmem>>, vector<144x16xbf16>
    %cst = arith.constant dense<0.000000e+00> : vector<512x16xf32>
    %2 = tpu.matmul %0, %1, %cst {dimension_numbers = #tpu.dot_dimension_numbers<[1], [0], [0], [1], [0, 0, 1, 1], [], []>} : vector<512x144xbf16>, vector<144x16xbf16>, vector<512x16xf32> -> vector<512x16xf32>
    %c0_3 = arith.constant 0 : index
    %c0_4 = arith.constant 0 : index
    %3 = vector.load %arg3[%c0_3, %c0_4] : memref<1x16xf32, #tpu.memory_space<vmem>>, vector<1x16xf32>
    %4 = vector.broadcast %3 : vector<1x16xf32> to vector<512x16xf32>
    %5 = arith.addf %2, %4 : vector<512x16xf32>
    %c0_5 = arith.constant 0 : index
    %c0_6 = arith.constant 0 : index
    %6 = vector.load %arg4[%c0_5, %c0_6] : memref<512x16xf32, #tpu.memory_space<vmem>>, vector<512x16xf32>
    tpu.vector_store %arg4[%c0_5, %c0_6], %5 {strides = array<i32>} : memref<512x16xf32, #tpu.memory_space<vmem>>, vector<512x16xf32>,
    %cst_7 = arith.constant dense<0.000000e+00> : vector<16xf32>
    %7 = vector.multi_reduction <add>, %5, %cst_7 [0] : vector<512x16xf32> to vector<16xf32>
    %8 = vector.shape_cast %7 : vector<16xf32> to vector<1x16xf32>
    %9 = vector.shape_cast %8 : vector<1x16xf32> to vector<1x1x16xf32>
    %c0_8 = arith.constant 0 : index
    %c0_9 = arith.constant 0 : index
    %c0_10 = arith.constant 0 : index
    %10 = vector.load %arg5[%c0_8, %c0_9, %c0_10] : memref<1x1x16xf32, #tpu.memory_space<vmem>>, vector<1x1x16xf32>
    tpu.vector_store %arg5[%c0_8, %c0_9, %c0_10], %9 {strides = array<i32>} : memref<1x1x16xf32, #tpu.memory_space<vmem>>, vector<1x1x16xf32>,
    %11 = arith.mulf %5, %5 : vector<512x16xf32>
    %cst_11 = arith.constant dense<0.000000e+00> : vector<16xf32>
    %12 = vector.multi_reduction <add>, %11, %cst_11 [0] : vector<512x16xf32> to vector<16xf32>
    %13 = vector.shape_cast %12 : vector<16xf32> to vector<1x16xf32>
    %14 = vector.shape_cast %13 : vector<1x16xf32> to vector<1x1x16xf32>
    %c0_12 = arith.constant 0 : index
    %c0_13 = arith.constant 0 : index
    %c0_14 = arith.constant 0 : index
    %15 = vector.load %arg6[%c0_12, %c0_13, %c0_14] : memref<1x1x16xf32, #tpu.memory_space<vmem>>, vector<1x1x16xf32>
    tpu.vector_store %arg6[%c0_12, %c0_13, %c0_14], %14 {strides = array<i32>} : memref<1x1x16xf32, #tpu.memory_space<vmem>>, vector<1x1x16xf32>,
    return
  }
  func.func @transform_0(%arg0: i32) -> (i32, i32) {
    %c0_i32 = arith.constant 0 : i32
    %c0_i32_0 = arith.constant 0 : i32
    return %arg0, %c0_i32 : i32, i32
  }
  func.func @transform_1(%arg0: i32) -> (i32, i32) {
    %c0_i32 = arith.constant 0 : i32
    %c0_i32_0 = arith.constant 0 : i32
    %c0_i32_1 = arith.constant 0 : i32
    return %c0_i32, %c0_i32_0 : i32, i32
  }
  func.func @transform_2(%arg0: i32) -> (i32, i32) {
    %c0_i32 = arith.constant 0 : i32
    %c0_i32_0 = arith.constant 0 : i32
    %c0_i32_1 = arith.constant 0 : i32
    return %c0_i32, %c0_i32_0 : i32, i32
  }
  func.func @transform_3(%arg0: i32) -> (i32, i32) {
    %c0_i32 = arith.constant 0 : i32
    %c0_i32_0 = arith.constant 0 : i32
    return %arg0, %c0_i32 : i32, i32
  }
  func.func @transform_4(%arg0: i32) -> (i32, i32, i32) {
    %c0_i32 = arith.constant 0 : i32
    %c0_i32_0 = arith.constant 0 : i32
    %c0_i32_1 = arith.constant 0 : i32
    return %arg0, %c0_i32, %c0_i32_0 : i32, i32, i32
  }
  func.func @transform_5(%arg0: i32) -> (i32, i32, i32) {
    %c0_i32 = arith.constant 0 : i32
    %c0_i32_0 = arith.constant 0 : i32
    %c0_i32_1 = arith.constant 0 : i32
    return %arg0, %c0_i32, %c0_i32_0 : i32, i32, i32
  }
}

module attributes {stable_mosaic.version = 11 : i64} {
  func.func @_mm_bias_kernel(%arg0: i32, %arg1: memref<512x64xbf16, #tpu.memory_space<vmem>>, %arg2: memref<64x8xbf16, #tpu.memory_space<vmem>>, %arg3: memref<1x8xf32, #tpu.memory_space<vmem>>, %arg4: memref<512x8xf32, #tpu.memory_space<vmem>>) attributes {dimension_semantics = [#tpu.dimension_semantics<parallel>], iteration_bounds = array<i64: 1>, scalar_prefetch = 0 : i64, scratch_operands = 0 : i64, tpu.core_type = #tpu.core_type<tc>, window_params = [{transform_indices = @transform_0, window_bounds = array<i64: 512, 64>}, {pipeline_mode = #tpu.pipeline_mode<synchronous>, transform_indices = @transform_1, window_bounds = array<i64: 64, 8>}, {pipeline_mode = #tpu.pipeline_mode<synchronous>, transform_indices = @transform_2, window_bounds = array<i64: 1, 8>}, {transform_indices = @transform_3, window_bounds = array<i64: 512, 8>}]} {
    %c0 = arith.constant 0 : index
    %c0_0 = arith.constant 0 : index
    %0 = vector.load %arg1[%c0, %c0_0] : memref<512x64xbf16, #tpu.memory_space<vmem>>, vector<512x64xbf16>
    %c0_1 = arith.constant 0 : index
    %c0_2 = arith.constant 0 : index
    %1 = vector.load %arg2[%c0_1, %c0_2] : memref<64x8xbf16, #tpu.memory_space<vmem>>, vector<64x8xbf16>
    %cst = arith.constant dense<0.000000e+00> : vector<512x8xf32>
    %2 = tpu.matmul %0, %1, %cst {dimension_numbers = #tpu.dot_dimension_numbers<[1], [0], [0], [1], [0, 0, 1, 1], [], []>} : vector<512x64xbf16>, vector<64x8xbf16>, vector<512x8xf32> -> vector<512x8xf32>
    %c0_3 = arith.constant 0 : index
    %c0_4 = arith.constant 0 : index
    %3 = vector.load %arg3[%c0_3, %c0_4] : memref<1x8xf32, #tpu.memory_space<vmem>>, vector<1x8xf32>
    %4 = vector.broadcast %3 : vector<1x8xf32> to vector<512x8xf32>
    %5 = arith.addf %2, %4 : vector<512x8xf32>
    %c0_5 = arith.constant 0 : index
    %c0_6 = arith.constant 0 : index
    %6 = vector.load %arg4[%c0_5, %c0_6] : memref<512x8xf32, #tpu.memory_space<vmem>>, vector<512x8xf32>
    tpu.vector_store %arg4[%c0_5, %c0_6], %5 {strides = array<i32>} : memref<512x8xf32, #tpu.memory_space<vmem>>, vector<512x8xf32>,
    return
  }
  func.func @transform_0(%arg0: i32) -> (i32, i32) {
    %c0_i32 = arith.constant 0 : i32
    %c0_i32_0 = arith.constant 0 : i32
    return %arg0, %c0_i32 : i32, i32
  }
  func.func @transform_1(%arg0: i32) -> (i32, i32) {
    %c0_i32 = arith.constant 0 : i32
    %c0_i32_0 = arith.constant 0 : i32
    %c0_i32_1 = arith.constant 0 : i32
    return %c0_i32, %c0_i32_0 : i32, i32
  }
  func.func @transform_2(%arg0: i32) -> (i32, i32) {
    %c0_i32 = arith.constant 0 : i32
    %c0_i32_0 = arith.constant 0 : i32
    %c0_i32_1 = arith.constant 0 : i32
    return %c0_i32, %c0_i32_0 : i32, i32
  }
  func.func @transform_3(%arg0: i32) -> (i32, i32) {
    %c0_i32 = arith.constant 0 : i32
    %c0_i32_0 = arith.constant 0 : i32
    return %arg0, %c0_i32 : i32, i32
  }
}

</mosaic_0001>

<bundles_post_ra>
// kernel: tile.193
= control target key start
LH: loop header
LB: loop body
LE: loop exit
PB: predicated region body
PF: predicated region fallthrough
CT: control target
= control target key end

     0   :  { %s28_s0 = inlined_call_operand.vmem [shape: f32[16], index: 0, kind: input, shape index: {}]   ;;  %s29_s1 = inlined_call_operand.vmem [shape: f32[16,16], index: 1, kind: output, shape index: {}]  }
   0x1   :  { %v4_v0 = vld [vmem:[%s28_s0] ss:$0 sm:$0xff] }
   0x2   :  { %5 = vst [vmem:[%s29_s1] sm:$0xff] %v4_v0  ;;  %8 = vst [vmem:[%s29_s1 + $0x8] sm:$0xff] %v4_v0 }

// kernel: tile.198
= control target key start
LH: loop header
LB: loop body
LE: loop exit
PB: predicated region body
PF: predicated region fallthrough
CT: control target
= control target key end

     0   :  { %s7_s6 = smov 3  ;;  %s21_s9 = smov 3  ;;  %vm4_vm0 = vcmask 130048   ;;  %vm11_vm1 = vcmask 1048448   ;;  %vm18_vm2 = vcmask 917248   ;;  %vm25_vm3 = vcmask 786048   ;;  %s131_s0 = inlined_call_operand.vmem [shape: f32[16,16], index: 0, kind: input, shape index: {}]   ;;  %s132_s1 = inlined_call_operand.vmem [shape: f32[1,256], index: 1, kind: output, shape index: {}]  }
   0x1   :  { %v69_v0 = vld [vmem:[%s131_s0 + $0x7] ss:$8 sm:%s7_s6]   ;;  %s84_s10 = smov 112   ;;  %v71_v1 = vld [vmem:[%s131_s0 + $0x5] ss:$8 sm:%s21_s9]   ;;  %s14_s13 = smov 3 }
   0x2   :  { %9 = vrot.lane.b32.xlu0 %v69_v0, %s84_s10  ;;  %s85_s14 = smov 80   ;;  %v70_v2 = vld [vmem:[%s131_s0 + $0x6] ss:$8 sm:%s14_s13]   ;;  %s28_s17 = smov 3  ;;  %vm32_vm4 = vcmask 654848   ;;  %vm39_vm5 = vcmask 523648  }
   0x3   :  { %23 = vrot.lane.b32.xlu1 %v71_v1, %s85_s14  ;;  %v72_v3 = vld [vmem:[%s131_s0 + $0x4] ss:$8 sm:%s28_s17]   ;;  %s35_s20 = smov 3  ;;  %s42_s21 = smov 3  ;;  %vm46_vm6 = vcmask 392448   ;;  %vm53_vm7 = vcmask 261248  }
   0x4   :  { %s86_s22 = smov 96   ;;  %s87_s23 = smov 64   ;;  %v73_v4 = vld [vmem:[%s131_s0 + $0x3] ss:$8 sm:%s35_s20]   ;;  %v74_v5 = vld [vmem:[%s131_s0 + $0x2] ss:$8 sm:%s42_s21]  }
   0x5   :  { %s2_s26 = smov 3  ;;  %s49_s29 = smov 3 }
   0x6   :  { %16 = vrot.lane.b32.xlu0 %v70_v2, %s86_s22  ;;  %v3_v6 = vld [vmem:[%s131_s0] ss:$8 sm:%s2_s26]   ;;  %s88_s3 = smov 48   ;;  %s89_s4 = smov 32  }
   0x7   :  { %30 = vrot.lane.b32.xlu1 %v72_v3, %s87_s23  ;;  %5 = vst.msk [vmem:[#allocation0] ss:$8 sm:$0x3] %vm4_vm0, %v3_v6   ;;  %v75_v7 = vld [vmem:[%s131_s0 + $0x1] ss:$8 sm:%s49_s29]   ;;  %s90_s0 = smov 16  }
   0xa   :  { %37 = vrot.lane.b32.xlu0 %v73_v4, %s88_s3 }
   0xb   :  { %44 = vrot.lane.b32.xlu1 %v74_v5, %s89_s4 }
   0xe   :  { %51 = vrot.lane.b32.xlu0 %v75_v7, %s90_s0 }
  0x74   :  { %v10_v8 = vpop.permute.xlu0 %9  }
  0x75   :  { %12 = vst.msk [vmem:[#allocation0] ss:$8 sm:$0x3] %vm11_vm1, %v10_v8   ;;  %v24_v9 = vpop.permute.xlu1 %23  }
  0x78   :  { %v17_v10 = vpop.permute.xlu0 %16  }
  0x79   :  { %19 = vst.msk [vmem:[#allocation0] ss:$8 sm:$0x3] %vm18_vm2, %v17_v10   ;;  %v31_v11 = vpop.permute.xlu1 %30  }
  0x7a   :  { %26 = vst.msk [vmem:[#allocation0] ss:$8 sm:$0x3] %vm25_vm3, %v24_v9  }
  0x7b   :  { %33 = vst.msk [vmem:[#allocation0] ss:$8 sm:$0x3] %vm32_vm4, %v31_v11  }
  0x7c   :  { %v38_v12 = vpop.permute.xlu0 %37  }
  0x7d   :  { %40 = vst.msk [vmem:[#allocation0] ss:$8 sm:$0x3] %vm39_vm5, %v38_v12   ;;  %v45_v13 = vpop.permute.xlu1 %44  }
  0x7e   :  { %47 = vst.msk [vmem:[#allocation0] ss:$8 sm:$0x3] %vm46_vm6, %v45_v13  }
  0x80   :  { %v52_v14 = vpop.permute.xlu0 %51  }
  0x81   :  { %54 = vst.msk [vmem:[#allocation0] ss:$8 sm:$0x3] %vm53_vm7, %v52_v14  }
  0x88   :  { %v59_v15 = vld [vmem:[#allocation0] sm:$0x1]  ;;  %v64_v16 = vld [vmem:[#allocation0 + $0x8] sm:$0x1] }
  0x89   :  { %62 = vst [vmem:[%s132_s1] sm:$0x1] %v59_v15  ;;  %76 = vst [vmem:[%s132_s1 + $0x1] sm:$0x1] %v64_v16 }

// kernel: _lambda_.32
= control target key start
LH: loop header
LB: loop body
LE: loop exit
PB: predicated region body
PF: predicated region fallthrough
CT: control target
= control target key end

     0   :  { %v24_v0 = vlaneseq  ;;  %s172_s1 = inlined_call_operand.vmem [shape: f32[1,256], index: 1, kind: input, shape index: {}]   ;;  %s173_s2 = inlined_call_operand.vmem [shape: f32[1,256], index: 2, kind: input, shape index: {}]   ;;  %s174_s0 = inlined_call_operand.vmem [shape: f32[32,256], index: 0, kind: input, shape index: {}]   ;;  %s175_s3 = inlined_call_operand.vmem [shape: bf16[32,256], index: 3, kind: output, shape index: {}]  }
   0x1   :  { %v22_v2 = vld [vmem:[%s172_s1] sm:$0x3]  ;;  %v15_v5 = vld [vmem:[%s174_s0 + $0x8] sm:$0xff]  ;;  %v16_v8 = vld [vmem:[%s174_s0 + $0x10] sm:$0xff] }
   0x2   :  { %v25_v1 = vshrl.u32 %v24_v0, 7  ;;  %v42_v3 = vld [vmem:[%s173_s2] sm:$0x3]  ;;  %v17_v9 = vld [vmem:[%s174_s0 + $0x18] sm:$0xff]  ;;  %v19_v15 = vld [vmem:[%s174_s0 + $0x28] sm:$0xff] }
   0x3   :  { %v14_v4 = vld [vmem:[%s174_s0] sm:$0xff]  ;;  %v20_v16 = vld [vmem:[%s174_s0 + $0x30] sm:$0xff]  ;;  %v21_v17 = vld [vmem:[%s174_s0 + $0x38] sm:$0xff] }
   0x4   :  { %v26_v6 = vsub.s32 0, %v25_v1  ;;  %v30_v7 = vsub.s32 1, %v25_v1  ;;  %v18_v10 = vld [vmem:[%s174_s0 + $0x20] sm:$0xff] }
   0x6   :  { %v27_v11 = vrot.slane %v22_v2, %v26_v6  ;;  %v31_v12 = vrot.slane %v22_v2, %v30_v7  ;;  %v47_v13 = vrot.slane %v42_v3, %v26_v6  ;;  %v51_v14 = vrot.slane %v42_v3, %v30_v7 }
   0x8   :  { %v34_v18 = vmul.f32 %v27_v11, %v14_v4  ;;  %v35_v19 = vmul.f32 %v31_v12, %v15_v5  ;;  %v36_v20 = vmul.f32 %v27_v11, %v16_v8  ;;  %v37_v21 = vmul.f32 %v31_v12, %v17_v9 }
   0x9   :  { %v38_v22 = vmul.f32 %v27_v11, %v18_v10  ;;  %v39_v23 = vmul.f32 %v31_v12, %v19_v15  ;;  %v40_v24 = vmul.f32 %v27_v11, %v20_v16  ;;  %v41_v25 = vmul.f32 %v31_v12, %v21_v17 }
   0xa   :  { %v54_v26 = vadd.f32 %v47_v13, %v34_v18  ;;  %v55_v27 = vadd.f32 %v51_v14, %v35_v19  ;;  %v56_v28 = vadd.f32 %v47_v13, %v36_v20  ;;  %v57_v29 = vadd.f32 %v51_v14, %v37_v21 }
   0xb   :  { %v58_v30 = vadd.f32 %v47_v13, %v38_v22  ;;  %v59_v31 = vadd.f32 %v51_v14, %v39_v23  ;;  %v60_v32 = vadd.f32 %v47_v13, %v40_v24  ;;  %v61_v33 = vadd.f32 %v51_v14, %v41_v25 }
   0xc   :  { %v62_v34 = vmax.f32 %v54_v26, 0.0  ;;  %v63_v35 = vmax.f32 %v55_v27, 0.0  ;;  %v64_v36 = vmax.f32 %v56_v28, 0.0  ;;  %v65_v37 = vmax.f32 %v57_v29, 0.0 }
   0xd   :  { %v66_v38 = vmax.f32 %v58_v30, 0.0  ;;  %v67_v39 = vmax.f32 %v59_v31, 0.0  ;;  %v68_v40 = vmax.f32 %v60_v32, 0.0  ;;  %v69_v41 = vmax.f32 %v61_v33, 0.0 }
   0xe   :  { %v106_v42 = vpack.c.bf16 %v63_v35, %v62_v34  ;;  %v107_v43 = vpack.c.bf16 %v65_v37, %v64_v36 }
   0xf   :  { %v108_v44 = vpack.c.bf16 %v67_v39, %v66_v38  ;;  %v109_v45 = vpack.c.bf16 %v69_v41, %v68_v40 }
  0x10   :  { %94 = vst [vmem:[%s175_s3] sm:$0xff] %v106_v42  ;;  %95 = vst [vmem:[%s175_s3 + $0x8] sm:$0xff] %v107_v43 }
  0x11   :  { %96 = vst [vmem:[%s175_s3 + $0x10] sm:$0xff] %v108_v44  ;;  %97 = vst [vmem:[%s175_s3 + $0x18] sm:$0xff] %v109_v45 }

// kernel: _lambda_.31
= control target key start
LH: loop header
LB: loop body
LE: loop exit
PB: predicated region body
PF: predicated region fallthrough
CT: control target
= control target key end

     0   :  { %vm361_vm0 = vcmask 1044480   ;;  %vm362_vm1 = vcmask 1045504   ;;  %v1275_v1 = vmov 65535   ;;  %vm264_vm2 = vcmask 220160   ;;  %s2154_s1 = inlined_call_operand.vmem [shape: bf16[27,16], index: 1, kind: input, shape index: {}]   ;;  %s2155_s0 = inlined_call_operand.vmem [shape: bf16[512,27], index: 0, kind: input, shape index: {}]   ;;  %s2156_s2 = inlined_call_operand.vmem [shape: f32[1,16], index: 2, kind: input, shape index: {}]   ;;  %s2157_s3 = inlined_call_operand.vmem [shape: f32[512,16], index: 3, kind: output, shape index: {0}]   ;;  %s2158_s4 = inlined_call_operand.vmem [shape: f32[1,1,16], index: 4, kind: output, shape index: {1}]   ;;  %s2159_s5 = inlined_call_operand.vmem [shape: f32[1,1,16], index: 5, kind: output, shape index: {2}]  }
   0x1   :  { %v1241_v0 = vld [vmem:[%s2154_s1 + $0x8] sm:$0x3f]   ;;  %v363_v2 = vsel %vm361_vm0, 4294967295, %v1275_v1  ;;  %v1243_v4 = vld [vmem:[%s2155_s0] sm:$0xff]   ;;  %v1245_v8 = vld [vmem:[%s2155_s0 + $0x10] sm:$0xff]   ;;  %vm657_vm3 = vcmask 130048  }
   0x2   :  { %v364_v3 = vsel %vm362_vm1, %v363_v2, 0  ;;  %v1242_v6 = vld [vmem:[%s2154_s1] sm:$0xff]   ;;  %1172 = vmatprep.mubr.msk.bf16.mxu0 %vm264_vm2, %v1243_v4  ;;  %v1244_v7 = vld [vmem:[%s2155_s0 + $0x8] sm:$0xff]   ;;  %v1246_v9 = vld [vmem:[%s2155_s0 + $0x18] sm:$0xff]   ;;  %vm855_vm4 = vcmask 122880  }
   0x3   :  { %v366_v5 = vand.u32 %v1241_v0, %v364_v3  ;;  %v1247_v10 = vld [vmem:[%s2155_s0 + $0x20] sm:$0xff]   ;;  %v1260_v12 = vld [vmem:[%s2155_s0 + $0x88] sm:$0xff]   ;;  %v1261_v13 = vld [vmem:[%s2155_s0 + $0x90] sm:$0xff]  }
   0x4   :  { %v1259_v11 = vld [vmem:[%s2155_s0 + $0x80] sm:$0xff]   ;;  %v1248_v14 = vld [vmem:[%s2155_s0 + $0x28] sm:$0xff]   ;;  %v1249_v15 = vld [vmem:[%s2155_s0 + $0x30] sm:$0xff]  }
   0x5   :  { %1168 = vmatprep.subr.bf16.mxu0 %v366_v5  ;;  %1236 = vmatprep.subr.bf16.mxu1 %v366_v5  ;;  %v1262_v16 = vld [vmem:[%s2155_s0 + $0x98] sm:$0xff]   ;;  %v1263_v17 = vld [vmem:[%s2155_s0 + $0xa0] sm:$0xff]   ;;  %v1264_v19 = vld [vmem:[%s2155_s0 + $0xa8] sm:$0xff]  }
   0x6   :  { %1169 = vmatpush3.bf16.msra.mxu0 %v366_v5  ;;  %1238 = vmatpush3.bf16.msra.mxu1 %v366_v5  ;;  %v1250_v18 = vld [vmem:[%s2155_s0 + $0x38] sm:$0xff]   ;;  %v1251_v20 = vld [vmem:[%s2155_s0 + $0x40] sm:$0xff]   ;;  %v1265_v21 = vld [vmem:[%s2155_s0 + $0xb0] sm:$0xff]  }
   0x7   :  { %1170 = vmatprep.subr.bf16.mxu0 %v1242_v6  ;;  %1237 = vmatprep.subr.bf16.mxu1 %v1242_v6  ;;  %v1252_v22 = vld [vmem:[%s2155_s0 + $0x48] sm:$0xff]   ;;  %v1266_v23 = vld [vmem:[%s2155_s0 + $0xb8] sm:$0xff]   ;;  %v1253_v24 = vld [vmem:[%s2155_s0 + $0x50] sm:$0xff]  }
   0x8   :  { %1204 = vmatprep.mubr.msk.bf16.mxu1 %vm264_vm2, %v1259_v11  ;;  %v1267_v25 = vld [vmem:[%s2155_s0 + $0xc0] sm:$0xff]   ;;  %v1254_v26 = vld [vmem:[%s2155_s0 + $0x58] sm:$0xff]   ;;  %v1268_v27 = vld [vmem:[%s2155_s0 + $0xc8] sm:$0xff]  }
   0x9   :  { %v1255_v28 = vld [vmem:[%s2155_s0 + $0x60] sm:$0xff]   ;;  %v1269_v29 = vld [vmem:[%s2155_s0 + $0xd0] sm:$0xff]   ;;  %v1256_v30 = vld [vmem:[%s2155_s0 + $0x68] sm:$0xff]  }
   0xa   :  { %1171 = vmatpush3.bf16.msra.mxu0 %v1242_v6  ;;  %1239 = vmatpush3.bf16.msra.mxu1 %v1242_v6  ;;  %v1270_v31 = vld [vmem:[%s2155_s0 + $0xd8] sm:$0xff]   ;;  %v1257_v32 = vld [vmem:[%s2155_s0 + $0x70] sm:$0xff]   ;;  %v1271_v33 = vld [vmem:[%s2155_s0 + $0xe0] sm:$0xff]  }
   0xb   :  { %v1258_v34 = vld [vmem:[%s2155_s0 + $0x78] sm:$0xff]   ;;  %v1272_v35 = vld [vmem:[%s2155_s0 + $0xe8] sm:$0xff]   ;;  %v1273_v36 = vld [vmem:[%s2155_s0 + $0xf0] sm:$0xff]  }
   0xc   :  { %v1274_v37 = vld [vmem:[%s2155_s0 + $0xf8] sm:$0xff]   ;;  %v1443_v38 = vld [vmem:[%s2156_s2] ss:$0 sm:$0xff] }
   0xd   :  { %1173 = vmatmul.mubr.msk.bf16.vlgmr.msra.gmra.mxu0 %vm264_vm2, %v1244_v7  ;;  %1205 = vmatmul.mubr.msk.bf16.vlgmr.msra.gmra.mxu1 %vm264_vm2, %v1260_v12 }
   0xe   :  { %1176 = vmatprep.mubr.msk.bf16.mxu0 %vm264_vm2, %v1245_v8  ;;  %1208 = vmatprep.mubr.msk.bf16.mxu1 %vm264_vm2, %v1261_v13 }
  0x15   :  { %1177 = vmatmul.mubr.msk.bf16.gmra.mxu0 %vm264_vm2, %v1246_v9  ;;  %1209 = vmatmul.mubr.msk.bf16.gmra.mxu1 %vm264_vm2, %v1262_v16 }
  0x16   :  { %1180 = vmatprep.mubr.msk.bf16.mxu0 %vm264_vm2, %v1247_v10  ;;  %1212 = vmatprep.mubr.msk.bf16.mxu1 %vm264_vm2, %v1263_v17 }
  0x1d   :  { %1181 = vmatmul.mubr.msk.bf16.gmra.mxu0 %vm264_vm2, %v1248_v14  ;;  %1213 = vmatmul.mubr.msk.bf16.gmra.mxu1 %vm264_vm2, %v1264_v19 }
  0x1e   :  { %1184 = vmatprep.mubr.msk.bf16.mxu0 %vm264_vm2, %v1249_v15  ;;  %1216 = vmatprep.mubr.msk.bf16.mxu1 %vm264_vm2, %v1265_v21 }
  0x25   :  { %1185 = vmatmul.mubr.msk.bf16.gmra.mxu0 %vm264_vm2, %v1250_v18  ;;  %1217 = vmatmul.mubr.msk.bf16.gmra.mxu1 %vm264_vm2, %v1266_v23 }
  0x26   :  { %1188 = vmatprep.mubr.msk.bf16.mxu0 %vm264_vm2, %v1251_v20  ;;  %1220 = vmatprep.mubr.msk.bf16.mxu1 %vm264_vm2, %v1267_v25 }
  0x2d   :  { %1189 = vmatmul.mubr.msk.bf16.gmra.mxu0 %vm264_vm2, %v1252_v22  ;;  %1221 = vmatmul.mubr.msk.bf16.gmra.mxu1 %vm264_vm2, %v1268_v27 }
  0x2e   :  { %1192 = vmatprep.mubr.msk.bf16.mxu0 %vm264_vm2, %v1253_v24  ;;  %1224 = vmatprep.mubr.msk.bf16.mxu1 %vm264_vm2, %v1269_v29 }
  0x35   :  { %1193 = vmatmul.mubr.msk.bf16.gmra.mxu0 %vm264_vm2, %v1254_v26  ;;  %1225 = vmatmul.mubr.msk.bf16.gmra.mxu1 %vm264_vm2, %v1270_v31 }
  0x36   :  { %1196 = vmatprep.mubr.msk.bf16.mxu0 %vm264_vm2, %v1255_v28  ;;  %1228 = vmatprep.mubr.msk.bf16.mxu1 %vm264_vm2, %v1271_v33 }
  0x3d   :  { %1197 = vmatmul.mubr.msk.bf16.gmra.mxu0 %vm264_vm2, %v1256_v30  ;;  %1229 = vmatmul.mubr.msk.bf16.gmra.mxu1 %vm264_vm2, %v1272_v35 }
  0x3e   :  { %1200 = vmatprep.mubr.msk.bf16.mxu0 %vm264_vm2, %v1257_v32  ;;  %1232 = vmatprep.mubr.msk.bf16.mxu1 %vm264_vm2, %v1273_v36 }
  0x45   :  { %1201 = vmatmul.mubr.msk.bf16.gmra.mxu0 %vm264_vm2, %v1258_v34  ;;  %1233 = vmatmul.mubr.msk.bf16.gmra.mxu1 %vm264_vm2, %v1274_v37 }
  0xcd   :  { %v1174_v39 = vpop.f32.mrf.mxu0  ;;  %v1206_v50 = vpop.f32.mrf.mxu1 }
  0xce   :  { %v411_v40 = vadd.f32 %v1174_v39, %v1443_v38  ;;  %v1470_v58 = vadd.f32 %v1206_v50, %v1443_v38 }
  0xcf   :  { %v402_v41 = vpop.f32.mrf.mxu0  ;;  %v530_v59 = vpop.f32.mrf.mxu1 }
  0xd0   :  { %660 = vst.msk [vmem:[%s2157_s3 + $0x10] sm:$0xff] %vm657_vm3, %v411_v40  ;;  %v403_v42 = vadd.f32 %v1443_v38, %v402_v41  ;;  %v859_v48 = vmul.f32 %v411_v40, %v411_v40  ;;  %v725_v55 = vsel %vm657_vm3, %v411_v40, 0.0  ;;  %692 = vst.msk [vmem:[%s2157_s3 + $0x110] sm:$0xff] %vm657_vm3, %v1470_v58  ;;  %v1492_v11 = vadd.f32 %v1443_v38, %v530_v59 }
  0xd1   :  { %v1175_v43 = vpop.f32.mrf.mxu0  ;;  %v1207_v3 = vpop.f32.mrf.mxu1 }
  0xd2   :  { %658 = vst.msk [vmem:[%s2157_s3] sm:$0xff] %vm657_vm3, %v403_v42  ;;  %v414_v44 = vadd.f32 %v1175_v43, %v1443_v38  ;;  %v857_v46 = vmul.f32 %v403_v42, %v403_v42  ;;  %v722_v51 = vsel %vm657_vm3, %v403_v42, 0.0  ;;  %v924_v4 = vsel %vm657_vm3, %v859_v48, 0.0  ;;  %690 = vst.msk [vmem:[%s2157_s3 + $0x100] sm:$0xff] %vm657_vm3, %v1492_v11 }
  0xd3   :  { %v405_v45 = vpop.f32.mrf.mxu0  ;;  %v533_v12 = vpop.f32.mrf.mxu1  ;;  %v1514_v28 = vadd.f32 %v1207_v3, %v1443_v38 }
  0xd4   :  { %661 = vst.msk [vmem:[%s2157_s3 + $0x18] sm:$0xff] %vm657_vm3, %v414_v44  ;;  %v406_v47 = vadd.f32 %v1443_v38, %v405_v45  ;;  %v921_v60 = vsel %vm657_vm3, %v857_v46, 0.0  ;;  %v860_v61 = vmul.f32 %v414_v44, %v414_v44  ;;  %v727_v5 = vsel %vm657_vm3, %v414_v44, 0.0 }
  0xd5   :  { %v1178_v49 = vpop.f32.mrf.mxu0  ;;  %v1210_v20 = vpop.f32.mrf.mxu1  ;;  %693 = vst.msk [vmem:[%s2157_s3 + $0x118] sm:$0xff] %vm657_vm3, %v1514_v28  ;;  %v1538_v46 = vadd.f32 %v1443_v38, %v533_v12 }
  0xd6   :  { %659 = vst.msk [vmem:[%s2157_s3 + $0x8] sm:$0xff] %vm657_vm3, %v406_v47  ;;  %v723_v52 = vsel %vm657_vm3, %v406_v47, 0.0  ;;  %v858_v53 = vmul.f32 %v406_v47, %v406_v47  ;;  %v427_v54 = vadd.f32 %v1178_v49, %v1443_v38  ;;  %v926_v13 = vsel %vm657_vm3, %v860_v61, 0.0 }
  0xd7   :  { %v724_v56 = vadd.f32 %v723_v52, %v722_v51  ;;  %v418_v57 = vpop.f32.mrf.mxu0  ;;  %v546_v29 = vpop.f32.mrf.mxu1  ;;  %691 = vst.msk [vmem:[%s2157_s3 + $0x108] sm:$0xff] %vm657_vm3, %v1538_v46 }
  0xd8   :  { %v922_v62 = vsel %vm657_vm3, %v858_v53, 0.0  ;;  %664 = vst.msk [vmem:[%s2157_s3 + $0x30] sm:$0xff] %vm657_vm3, %v427_v54  ;;  %v419_v63 = vadd.f32 %v1443_v38, %v418_v57  ;;  %v863_v16 = vmul.f32 %v427_v54, %v427_v54  ;;  %v733_v30 = vsel %vm657_vm3, %v427_v54, 0.0 }
  0xd9   :  { %v726_v0 = vadd.f32 %v725_v55, %v724_v56  ;;  %v923_v1 = vadd.f32 %v922_v62, %v921_v60  ;;  %v1179_v2 = vpop.f32.mrf.mxu0  ;;  %v1528_v37 = vpop.f32.mrf.mxu1 }
  0xda   :  { %662 = vst.msk [vmem:[%s2157_s3 + $0x20] sm:$0xff] %vm657_vm3, %v419_v63  ;;  %v861_v6 = vmul.f32 %v419_v63, %v419_v63  ;;  %v430_v7 = vadd.f32 %v1179_v2, %v1443_v38  ;;  %v729_v14 = vsel %vm657_vm3, %v419_v63, 0.0  ;;  %v932_v39 = vsel %vm657_vm3, %v863_v16, 0.0 }
  0xdb   :  { %v925_v8 = vadd.f32 %v924_v4, %v923_v1  ;;  %v728_v9 = vadd.f32 %v727_v5, %v726_v0  ;;  %v421_v10 = vpop.f32.mrf.mxu0  ;;  %v1540_v47 = vpop.f32.mrf.mxu1  ;;  %v1564_v0 = vadd.f32 %v1210_v20, %v1443_v38 }
  0xdc   :  { %665 = vst.msk [vmem:[%s2157_s3 + $0x38] sm:$0xff] %vm657_vm3, %v430_v7  ;;  %v422_v15 = vadd.f32 %v1443_v38, %v421_v10  ;;  %v928_v21 = vsel %vm657_vm3, %v861_v6, 0.0  ;;  %v864_v31 = vmul.f32 %v430_v7, %v430_v7  ;;  %v735_v40 = vsel %vm657_vm3, %v430_v7, 0.0 }
  0xdd   :  { %v730_v17 = vadd.f32 %v729_v14, %v728_v9  ;;  %v927_v18 = vadd.f32 %v926_v13, %v925_v8  ;;  %v1182_v19 = vpop.f32.mrf.mxu0  ;;  %v1554_v55 = vpop.f32.mrf.mxu1  ;;  %696 = vst.msk [vmem:[%s2157_s3 + $0x130] sm:$0xff] %vm657_vm3, %v1564_v0 }
  0xde   :  { %663 = vst.msk [vmem:[%s2157_s3 + $0x28] sm:$0xff] %vm657_vm3, %v422_v15  ;;  %v731_v22 = vsel %vm657_vm3, %v422_v15, 0.0  ;;  %v862_v23 = vmul.f32 %v422_v15, %v422_v15  ;;  %v443_v24 = vadd.f32 %v1182_v19, %v1443_v38  ;;  %v934_v48 = vsel %vm657_vm3, %v864_v31, 0.0 }
  0xdf   :  { %v929_v25 = vadd.f32 %v928_v21, %v927_v18  ;;  %v732_v26 = vadd.f32 %v731_v22, %v730_v17  ;;  %v434_v27 = vpop.f32.mrf.mxu0  ;;  %v1566_v1 = vpop.f32.mrf.mxu1  ;;  %v1590_v18 = vadd.f32 %v1443_v38, %v546_v29 }
  0xe0   :  { %v930_v32 = vsel %vm657_vm3, %v862_v23, 0.0  ;;  %668 = vst.msk [vmem:[%s2157_s3 + $0x50] sm:$0xff] %vm657_vm3, %v443_v24  ;;  %v435_v33 = vadd.f32 %v1443_v38, %v434_v27  ;;  %v867_v51 = vmul.f32 %v443_v24, %v443_v24  ;;  %v741_v2 = vsel %vm657_vm3, %v443_v24, 0.0 }
  0xe1   :  { %v734_v34 = vadd.f32 %v733_v30, %v732_v26  ;;  %v931_v35 = vadd.f32 %v930_v32, %v929_v25  ;;  %v1183_v36 = vpop.f32.mrf.mxu0  ;;  %v1580_v9 = vpop.f32.mrf.mxu1  ;;  %694 = vst.msk [vmem:[%s2157_s3 + $0x120] sm:$0xff] %vm657_vm3, %v1590_v18 }
  0xe2   :  { %666 = vst.msk [vmem:[%s2157_s3 + $0x40] sm:$0xff] %vm657_vm3, %v435_v33  ;;  %v865_v41 = vmul.f32 %v435_v33, %v435_v33  ;;  %v446_v42 = vadd.f32 %v1183_v36, %v1443_v38  ;;  %v737_v49 = vsel %vm657_vm3, %v435_v33, 0.0  ;;  %v940_v10 = vsel %vm657_vm3, %v867_v51, 0.0 }
  0xe3   :  { %v933_v43 = vadd.f32 %v932_v39, %v931_v35  ;;  %v736_v44 = vadd.f32 %v735_v40, %v734_v34  ;;  %v437_v45 = vpop.f32.mrf.mxu0  ;;  %v1592_v19 = vpop.f32.mrf.mxu1  ;;  %v1617_v36 = vadd.f32 %v1528_v37, %v1443_v38 }
  0xe4   :  { %669 = vst.msk [vmem:[%s2157_s3 + $0x58] sm:$0xff] %vm657_vm3, %v446_v42  ;;  %v438_v50 = vadd.f32 %v1443_v38, %v437_v45  ;;  %v936_v56 = vsel %vm657_vm3, %v865_v41, 0.0  ;;  %v868_v3 = vmul.f32 %v446_v42, %v446_v42  ;;  %v743_v12 = vsel %vm657_vm3, %v446_v42, 0.0 }
  0xe5   :  { %v738_v52 = vadd.f32 %v737_v49, %v736_v44  ;;  %v935_v53 = vadd.f32 %v934_v48, %v933_v43  ;;  %v1186_v54 = vpop.f32.mrf.mxu0  ;;  %v1606_v27 = vpop.f32.mrf.mxu1  ;;  %697 = vst.msk [vmem:[%s2157_s3 + $0x138] sm:$0xff] %vm657_vm3, %v1617_v36 }
  0xe6   :  { %667 = vst.msk [vmem:[%s2157_s3 + $0x48] sm:$0xff] %vm657_vm3, %v438_v50  ;;  %v739_v57 = vsel %vm657_vm3, %v438_v50, 0.0  ;;  %v866_v59 = vmul.f32 %v438_v50, %v438_v50  ;;  %v459_v60 = vadd.f32 %v1186_v54, %v1443_v38  ;;  %v942_v20 = vsel %vm657_vm3, %v868_v3, 0.0 }
  0xe7   :  { %v937_v61 = vadd.f32 %v936_v56, %v935_v53  ;;  %v740_v62 = vadd.f32 %v739_v57, %v738_v52  ;;  %v450_v63 = vpop.f32.mrf.mxu0  ;;  %v1619_v39 = vpop.f32.mrf.mxu1  ;;  %v1644_v57 = vadd.f32 %v1443_v38, %v1540_v47 }
  0xe8   :  { %v938_v4 = vsel %vm657_vm3, %v866_v59, 0.0  ;;  %672 = vst.msk [vmem:[%s2157_s3 + $0x70] sm:$0xff] %vm657_vm3, %v459_v60  ;;  %v451_v5 = vadd.f32 %v1443_v38, %v450_v63  ;;  %v871_v23 = vmul.f32 %v459_v60, %v459_v60  ;;  %v749_v40 = vsel %vm657_vm3, %v459_v60, 0.0 }
  0xe9   :  { %v742_v6 = vadd.f32 %v741_v2, %v740_v62  ;;  %v939_v7 = vadd.f32 %v938_v4, %v937_v61  ;;  %v1187_v8 = vpop.f32.mrf.mxu0  ;;  %v1633_v37 = vpop.f32.mrf.mxu1  ;;  %695 = vst.msk [vmem:[%s2157_s3 + $0x128] sm:$0xff] %vm657_vm3, %v1644_v57 }
  0xea   :  { %670 = vst.msk [vmem:[%s2157_s3 + $0x60] sm:$0xff] %vm657_vm3, %v451_v5  ;;  %v869_v13 = vmul.f32 %v451_v5, %v451_v5  ;;  %v462_v14 = vadd.f32 %v1187_v8, %v1443_v38  ;;  %v745_v21 = vsel %vm657_vm3, %v451_v5, 0.0  ;;  %v948_v49 = vsel %vm657_vm3, %v871_v23, 0.0 }
  0xeb   :  { %v941_v15 = vadd.f32 %v940_v10, %v939_v7  ;;  %v744_v16 = vadd.f32 %v743_v12, %v742_v6  ;;  %v453_v17 = vpop.f32.mrf.mxu0  ;;  %v1646_v59 = vpop.f32.mrf.mxu1 }
  0xec   :  { %673 = vst.msk [vmem:[%s2157_s3 + $0x78] sm:$0xff] %vm657_vm3, %v462_v14  ;;  %v454_v22 = vadd.f32 %v1443_v38, %v453_v17  ;;  %v944_v29 = vsel %vm657_vm3, %v869_v13, 0.0  ;;  %v872_v41 = vmul.f32 %v462_v14, %v462_v14  ;;  %v751_v50 = vsel %vm657_vm3, %v462_v14, 0.0 }
  0xed   :  { %v746_v24 = vadd.f32 %v745_v21, %v744_v16  ;;  %v943_v25 = vadd.f32 %v942_v20, %v941_v15  ;;  %v1190_v26 = vpop.f32.mrf.mxu0  ;;  %v1660_v47 = vpop.f32.mrf.mxu1  ;;  %v1671_v14 = vadd.f32 %v1554_v55, %v1443_v38 }
  0xee   :  { %671 = vst.msk [vmem:[%s2157_s3 + $0x68] sm:$0xff] %vm657_vm3, %v454_v22  ;;  %v747_v30 = vsel %vm657_vm3, %v454_v22, 0.0  ;;  %v870_v31 = vmul.f32 %v454_v22, %v454_v22  ;;  %v475_v32 = vadd.f32 %v1190_v26, %v1443_v38  ;;  %v950_v60 = vsel %vm657_vm3, %v872_v41, 0.0 }
  0xef   :  { %v945_v33 = vadd.f32 %v944_v29, %v943_v25  ;;  %v748_v34 = vadd.f32 %v747_v30, %v746_v24  ;;  %v466_v35 = vpop.f32.mrf.mxu0  ;;  %v1673_v15 = vpop.f32.mrf.mxu1  ;;  %700 = vst.msk [vmem:[%s2157_s3 + $0x150] sm:$0xff] %vm657_vm3, %v1671_v14 }
  0xf0   :  { %v946_v42 = vsel %vm657_vm3, %v870_v31, 0.0  ;;  %676 = vst.msk [vmem:[%s2157_s3 + $0x90] sm:$0xff] %vm657_vm3, %v475_v32  ;;  %v467_v43 = vadd.f32 %v1443_v38, %v466_v35  ;;  %v875_v63 = vmul.f32 %v475_v32, %v475_v32  ;;  %v757_v16 = vsel %vm657_vm3, %v475_v32, 0.0 }
  0xf1   :  { %v750_v44 = vadd.f32 %v749_v40, %v748_v34  ;;  %v947_v45 = vadd.f32 %v946_v42, %v945_v33  ;;  %v1191_v48 = vpop.f32.mrf.mxu0  ;;  %v1687_v55 = vpop.f32.mrf.mxu1  ;;  %v1698_v34 = vadd.f32 %v1443_v38, %v1566_v1 }
  0xf2   :  { %674 = vst.msk [vmem:[%s2157_s3 + $0x80] sm:$0xff] %vm657_vm3, %v467_v43  ;;  %v873_v51 = vmul.f32 %v467_v43, %v467_v43  ;;  %v478_v52 = vadd.f32 %v1191_v48, %v1443_v38  ;;  %v753_v61 = vsel %vm657_vm3, %v467_v43, 0.0  ;;  %v956_v25 = vsel %vm657_vm3, %v875_v63, 0.0 }
  0xf3   :  { %v949_v53 = vadd.f32 %v948_v49, %v947_v45  ;;  %v752_v54 = vadd.f32 %v751_v50, %v750_v44  ;;  %v469_v56 = vpop.f32.mrf.mxu0  ;;  %v1700_v35 = vpop.f32.mrf.mxu1  ;;  %698 = vst.msk [vmem:[%s2157_s3 + $0x140] sm:$0xff] %vm657_vm3, %v1698_v34 }
  0xf4   :  { %677 = vst.msk [vmem:[%s2157_s3 + $0x98] sm:$0xff] %vm657_vm3, %v478_v52  ;;  %v470_v62 = vadd.f32 %v1443_v38, %v469_v56  ;;  %v952_v5 = vsel %vm657_vm3, %v873_v51, 0.0  ;;  %v876_v17 = vmul.f32 %v478_v52, %v478_v52  ;;  %v759_v26 = vsel %vm657_vm3, %v478_v52, 0.0 }
  0xf5   :  { %v754_v2 = vadd.f32 %v753_v61, %v752_v54  ;;  %v951_v3 = vadd.f32 %v950_v60, %v949_v53  ;;  %v1194_v4 = vpop.f32.mrf.mxu0  ;;  %v1714_v1 = vpop.f32.mrf.mxu1  ;;  %v1725_v60 = vadd.f32 %v1580_v9, %v1443_v38 }
  0xf6   :  { %675 = vst.msk [vmem:[%s2157_s3 + $0x88] sm:$0xff] %vm657_vm3, %v470_v62  ;;  %v755_v6 = vsel %vm657_vm3, %v470_v62, 0.0  ;;  %v874_v7 = vmul.f32 %v470_v62, %v470_v62  ;;  %v491_v8 = vadd.f32 %v1194_v4, %v1443_v38  ;;  %v958_v40 = vsel %vm657_vm3, %v876_v17, 0.0 }
  0xf7   :  { %v953_v10 = vadd.f32 %v952_v5, %v951_v3  ;;  %v756_v12 = vadd.f32 %v755_v6, %v754_v2  ;;  %v482_v13 = vpop.f32.mrf.mxu0  ;;  %v1727_v61 = vpop.f32.mrf.mxu1  ;;  %701 = vst.msk [vmem:[%s2157_s3 + $0x158] sm:$0xff] %vm657_vm3, %v1725_v60 }
  0xf8   :  { %v954_v20 = vsel %vm657_vm3, %v874_v7, 0.0  ;;  %680 = vst.msk [vmem:[%s2157_s3 + $0xb0] sm:$0xff] %vm657_vm3, %v491_v8  ;;  %v483_v21 = vadd.f32 %v1443_v38, %v482_v13  ;;  %v879_v43 = vmul.f32 %v491_v8, %v491_v8  ;;  %v765_v62 = vsel %vm657_vm3, %v491_v8, 0.0 }
  0xf9   :  { %v758_v22 = vadd.f32 %v757_v16, %v756_v12  ;;  %v955_v23 = vadd.f32 %v954_v20, %v953_v10  ;;  %v1195_v24 = vpop.f32.mrf.mxu0  ;;  %v1741_v9 = vpop.f32.mrf.mxu1  ;;  %v1752_v20 = vadd.f32 %v1443_v38, %v1592_v19 }
  0xfa   :  { %678 = vst.msk [vmem:[%s2157_s3 + $0xa0] sm:$0xff] %vm657_vm3, %v483_v21  ;;  %v877_v29 = vmul.f32 %v483_v21, %v483_v21  ;;  %v494_v30 = vadd.f32 %v1195_v24, %v1443_v38  ;;  %v761_v41 = vsel %vm657_vm3, %v483_v21, 0.0  ;;  %v964_v7 = vsel %vm657_vm3, %v879_v43, 0.0 }
  0xfb   :  { %v957_v31 = vadd.f32 %v956_v25, %v955_v23  ;;  %v760_v32 = vadd.f32 %v759_v26, %v758_v22  ;;  %v485_v33 = vpop.f32.mrf.mxu0  ;;  %v1754_v21 = vpop.f32.mrf.mxu1  ;;  %699 = vst.msk [vmem:[%s2157_s3 + $0x148] sm:$0xff] %vm657_vm3, %v1752_v20 }
  0xfc   :  { %681 = vst.msk [vmem:[%s2157_s3 + $0xb8] sm:$0xff] %vm657_vm3, %v494_v30  ;;  %v486_v42 = vadd.f32 %v1443_v38, %v485_v33  ;;  %v960_v49 = vsel %vm657_vm3, %v877_v29, 0.0  ;;  %v880_v63 = vmul.f32 %v494_v30, %v494_v30  ;;  %v767_v8 = vsel %vm657_vm3, %v494_v30, 0.0 }
  0xfd   :  { %v762_v44 = vadd.f32 %v761_v41, %v760_v32  ;;  %v959_v45 = vadd.f32 %v958_v40, %v957_v31  ;;  %v1198_v48 = vpop.f32.mrf.mxu0  ;;  %v1768_v19 = vpop.f32.mrf.mxu1 }
  0xfe   :  { %679 = vst.msk [vmem:[%s2157_s3 + $0xa8] sm:$0xff] %vm657_vm3, %v486_v42  ;;  %v763_v50 = vsel %vm657_vm3, %v486_v42, 0.0  ;;  %v878_v51 = vmul.f32 %v486_v42, %v486_v42  ;;  %v507_v52 = vadd.f32 %v1198_v48, %v1443_v38  ;;  %v966_v22 = vsel %vm657_vm3, %v880_v63, 0.0 }
  0xff   :  { %v961_v53 = vadd.f32 %v960_v49, %v959_v45  ;;  %v764_v54 = vadd.f32 %v763_v50, %v762_v44  ;;  %v498_v56 = vpop.f32.mrf.mxu0  ;;  %v1779_v44 = vadd.f32 %v1606_v27, %v1443_v38  ;;  %v1793_v27 = vpop.f32.mrf.mxu1 }
 0x100   :  { %v962_v2 = vsel %vm657_vm3, %v878_v51, 0.0  ;;  %684 = vst.msk [vmem:[%s2157_s3 + $0xd0] sm:$0xff] %vm657_vm3, %v507_v52  ;;  %v499_v3 = vadd.f32 %v1443_v38, %v498_v56  ;;  %v883_v25 = vmul.f32 %v507_v52, %v507_v52  ;;  %v773_v45 = vsel %vm657_vm3, %v507_v52, 0.0 }
 0x101   :  { %v766_v4 = vadd.f32 %v765_v62, %v764_v54  ;;  %v963_v5 = vadd.f32 %v962_v2, %v961_v53  ;;  %v1199_v6 = vpop.f32.mrf.mxu0  ;;  %704 = vst.msk [vmem:[%s2157_s3 + $0x170] sm:$0xff] %vm657_vm3, %v1779_v44 }
 0x102   :  { %682 = vst.msk [vmem:[%s2157_s3 + $0xc0] sm:$0xff] %vm657_vm3, %v499_v3  ;;  %v881_v10 = vmul.f32 %v499_v3, %v499_v3  ;;  %v510_v12 = vadd.f32 %v1199_v6, %v1443_v38  ;;  %v769_v23 = vsel %vm657_vm3, %v499_v3, 0.0  ;;  %v972_v52 = vsel %vm657_vm3, %v883_v25, 0.0 }
 0x103   :  { %v965_v13 = vadd.f32 %v964_v7, %v963_v5  ;;  %v768_v16 = vadd.f32 %v767_v8, %v766_v4  ;;  %v501_v17 = vpop.f32.mrf.mxu0  ;;  %v1804_v5 = vadd.f32 %v1443_v38, %v1619_v39  ;;  %v1818_v39 = vpop.f32.mrf.mxu1 }
 0x104   :  { %685 = vst.msk [vmem:[%s2157_s3 + $0xd8] sm:$0xff] %vm657_vm3, %v510_v12  ;;  %v502_v24 = vadd.f32 %v1443_v38, %v501_v17  ;;  %v968_v31 = vsel %vm657_vm3, %v881_v10, 0.0  ;;  %v884_v48 = vmul.f32 %v510_v12, %v510_v12  ;;  %v775_v56 = vsel %vm657_vm3, %v510_v12, 0.0 }
 0x105   :  { %v770_v26 = vadd.f32 %v769_v23, %v768_v16  ;;  %v967_v29 = vadd.f32 %v966_v22, %v965_v13  ;;  %v1202_v30 = vpop.f32.mrf.mxu0  ;;  %702 = vst.msk [vmem:[%s2157_s3 + $0x160] sm:$0xff] %vm657_vm3, %v1804_v5  ;;  %v1828_v23 = vadd.f32 %v1633_v37, %v1443_v38  ;;  %v1843_v37 = vadd.f32 %v1660_v47, %v1443_v38 }
 0x106   :  { %683 = vst.msk [vmem:[%s2157_s3 + $0xc8] sm:$0xff] %vm657_vm3, %v502_v24  ;;  %v771_v32 = vsel %vm657_vm3, %v502_v24, 0.0  ;;  %v882_v33 = vmul.f32 %v502_v24, %v502_v24  ;;  %v523_v40 = vadd.f32 %v1202_v30, %v1443_v38  ;;  %v974_v6 = vsel %vm657_vm3, %v884_v48, 0.0 }
 0x107   :  { %v969_v41 = vadd.f32 %v968_v31, %v967_v29  ;;  %v772_v42 = vadd.f32 %v771_v32, %v770_v26  ;;  %v514_v43 = vpop.f32.mrf.mxu0  ;;  %v1832_v26 = vadd.f32 %v1443_v38, %v1646_v59  ;;  %705 = vst.msk [vmem:[%s2157_s3 + $0x178] sm:$0xff] %vm657_vm3, %v1828_v23  ;;  %v629_v59 = vpop.f32.mrf.mxu1  ;;  %708 = vst.msk [vmem:[%s2157_s3 + $0x190] sm:$0xff] %vm657_vm3, %v1843_v37 }
 0x108   :  { %v970_v49 = vsel %vm657_vm3, %v882_v33, 0.0  ;;  %688 = vst.msk [vmem:[%s2157_s3 + $0xf0] sm:$0xff] %vm657_vm3, %v523_v40  ;;  %v515_v50 = vadd.f32 %v1443_v38, %v514_v43  ;;  %v887_v10 = vmul.f32 %v523_v40, %v523_v40  ;;  %v781_v29 = vsel %vm657_vm3, %v523_v40, 0.0 }
 0x109   :  { %v774_v51 = vadd.f32 %v773_v45, %v772_v42  ;;  %v971_v53 = vadd.f32 %v970_v49, %v969_v41  ;;  %v1203_v54 = vpop.f32.mrf.mxu0  ;;  %703 = vst.msk [vmem:[%s2157_s3 + $0x168] sm:$0xff] %vm657_vm3, %v1832_v26  ;;  %v889_v42 = vmul.f32 %v1492_v11, %v1492_v11  ;;  %v1861_v47 = vadd.f32 %v1443_v38, %v1673_v15 }
 0x10a   :  { %686 = vst.msk [vmem:[%s2157_s3 + $0xe0] sm:$0xff] %vm657_vm3, %v515_v50  ;;  %v885_v62 = vmul.f32 %v515_v50, %v515_v50  ;;  %v526_v63 = vadd.f32 %v1203_v54, %v1443_v38  ;;  %v777_v7 = vsel %vm657_vm3, %v515_v50, 0.0  ;;  %v980_v40 = vsel %vm657_vm3, %v887_v10, 0.0 }
 0x10b   :  { %v973_v2 = vadd.f32 %v972_v52, %v971_v53  ;;  %v776_v3 = vadd.f32 %v775_v56, %v774_v51  ;;  %v517_v4 = vpop.f32.mrf.mxu0  ;;  %v1865_v48 = vadd.f32 %v1687_v55, %v1443_v38  ;;  %v785_v50 = vsel %vm657_vm3, %v1492_v11, 0.0  ;;  %706 = vst.msk [vmem:[%s2157_s3 + $0x180] sm:$0xff] %vm657_vm3, %v1861_v47  ;;  %v1234_v11 = vpop.f32.mrf.mxu1 }
 0x10c   :  { %689 = vst.msk [vmem:[%s2157_s3 + $0xf8] sm:$0xff] %vm657_vm3, %v526_v63  ;;  %v518_v8 = vadd.f32 %v1443_v38, %v517_v4  ;;  %v976_v16 = vsel %vm657_vm3, %v885_v62, 0.0  ;;  %v888_v30 = vmul.f32 %v526_v63, %v526_v63  ;;  %v783_v41 = vsel %vm657_vm3, %v526_v63, 0.0 }
 0x10d   :  { %v778_v12 = vadd.f32 %v777_v7, %v776_v3  ;;  %v975_v13 = vadd.f32 %v974_v6, %v973_v2  ;;  %v890_v51 = vmul.f32 %v1538_v46, %v1538_v46  ;;  %v1879_v15 = vadd.f32 %v1443_v38, %v1700_v35  ;;  %709 = vst.msk [vmem:[%s2157_s3 + $0x198] sm:$0xff] %vm657_vm3, %v1865_v48 }
 0x10e   :  { %687 = vst.msk [vmem:[%s2157_s3 + $0xe8] sm:$0xff] %vm657_vm3, %v518_v8  ;;  %v779_v17 = vsel %vm657_vm3, %v518_v8, 0.0  ;;  %v886_v22 = vmul.f32 %v518_v8, %v518_v8  ;;  %v982_v49 = vsel %vm657_vm3, %v888_v30, 0.0  ;;  %v891_v54 = vmul.f32 %v1470_v58, %v1470_v58 }
 0x10f   :  { %v977_v24 = vadd.f32 %v976_v16, %v975_v13  ;;  %v780_v25 = vadd.f32 %v779_v17, %v778_v12  ;;  %v984_v52 = vsel %vm657_vm3, %v889_v42, 0.0  ;;  %v787_v56 = vsel %vm657_vm3, %v1538_v46, 0.0  ;;  %707 = vst.msk [vmem:[%s2157_s3 + $0x188] sm:$0xff] %vm657_vm3, %v1879_v15 }
 0x110   :  { %v978_v31 = vsel %vm657_vm3, %v886_v22, 0.0  ;;  %v1898_v35 = vadd.f32 %v1714_v1, %v1443_v38  ;;  %v1902_v2 = vadd.f32 %v1443_v38, %v1727_v61  ;;  %v789_v3 = vsel %vm657_vm3, %v1470_v58, 0.0  ;;  %v642_v58 = vpop.f32.mrf.mxu1 }
 0x111   :  { %v782_v32 = vadd.f32 %v781_v29, %v780_v25  ;;  %v979_v33 = vadd.f32 %v978_v31, %v977_v24  ;;  %v892_v46 = vmul.f32 %v1514_v28, %v1514_v28  ;;  %v986_v4 = vsel %vm657_vm3, %v890_v51, 0.0 }
 0x112   :  { %712 = vst.msk [vmem:[%s2157_s3 + $0x1b0] sm:$0xff] %vm657_vm3, %v1898_v35  ;;  %v1916_v1 = vadd.f32 %v1741_v9, %v1443_v38  ;;  %710 = vst.msk [vmem:[%s2157_s3 + $0x1a0] sm:$0xff] %vm657_vm3, %v1902_v2  ;;  %v988_v7 = vsel %vm657_vm3, %v891_v54, 0.0  ;;  %v791_v8 = vsel %vm657_vm3, %v1514_v28, 0.0  ;;  %v893_v10 = vmul.f32 %v1590_v18, %v1590_v18 }
 0x113   :  { %v981_v43 = vadd.f32 %v980_v40, %v979_v33  ;;  %v784_v45 = vadd.f32 %v783_v41, %v782_v32  ;;  %v1935_v9 = vadd.f32 %v1443_v38, %v1754_v21  ;;  %v1939_v16 = vadd.f32 %v1768_v19, %v1443_v38 }
 0x114   :  { %713 = vst.msk [vmem:[%s2157_s3 + $0x1b8] sm:$0xff] %vm657_vm3, %v1916_v1  ;;  %v990_v28 = vsel %vm657_vm3, %v892_v46, 0.0  ;;  %v793_v17 = vsel %vm657_vm3, %v1590_v18, 0.0  ;;  %v894_v22 = vmul.f32 %v1644_v57, %v1644_v57  ;;  %v1953_v21 = vadd.f32 %v1443_v38, %v1793_v27  ;;  %v1235_v18 = vpop.f32.mrf.mxu1 }
 0x115   :  { %v786_v55 = vadd.f32 %v785_v50, %v784_v45  ;;  %v983_v53 = vadd.f32 %v982_v49, %v981_v43  ;;  %711 = vst.msk [vmem:[%s2157_s3 + $0x1a8] sm:$0xff] %vm657_vm3, %v1935_v9  ;;  %716 = vst.msk [vmem:[%s2157_s3 + $0x1d0] sm:$0xff] %vm657_vm3, %v1939_v16  ;;  %v895_v25 = vmul.f32 %v1564_v0, %v1564_v0  ;;  %v992_v29 = vsel %vm657_vm3, %v893_v10, 0.0 }
 0x116   :  { %v795_v30 = vsel %vm657_vm3, %v1644_v57, 0.0  ;;  %714 = vst.msk [vmem:[%s2157_s3 + $0x1c0] sm:$0xff] %vm657_vm3, %v1953_v21  ;;  %v1972_v27 = vadd.f32 %v1818_v39, %v1443_v38  ;;  %v1975_v33 = vadd.f32 %v1443_v38, %v629_v59  ;;  %v797_v40 = vsel %vm657_vm3, %v1564_v0, 0.0  ;;  %v645_v0 = vpop.f32.mrf.mxu1 }
 0x117   :  { %v788_v62 = vadd.f32 %v787_v56, %v786_v55  ;;  %v985_v63 = vadd.f32 %v984_v52, %v983_v53  ;;  %v896_v57 = vmul.f32 %v1617_v36, %v1617_v36  ;;  %v994_v41 = vsel %vm657_vm3, %v894_v22, 0.0 }
 0x118   :  { %717 = vst.msk [vmem:[%s2157_s3 + $0x1d8] sm:$0xff] %vm657_vm3, %v1972_v27  ;;  %v1988_v39 = vadd.f32 %v1234_v11, %v1443_v38  ;;  %715 = vst.msk [vmem:[%s2157_s3 + $0x1c8] sm:$0xff] %vm657_vm3, %v1975_v33  ;;  %v996_v43 = vsel %vm657_vm3, %v895_v25, 0.0  ;;  %v799_v45 = vsel %vm657_vm3, %v1617_v36, 0.0  ;;  %v897_v49 = vmul.f32 %v1698_v34, %v1698_v34 }
 0x119   :  { %v790_v61 = vadd.f32 %v789_v3, %v788_v62  ;;  %v987_v6 = vadd.f32 %v986_v4, %v985_v63  ;;  %v2006_v50 = vadd.f32 %v1443_v38, %v642_v58  ;;  %v2009_v53 = vadd.f32 %v1235_v18, %v1443_v38 }
 0x11a   :  { %720 = vst.msk [vmem:[%s2157_s3 + $0x1f0] sm:$0xff] %vm657_vm3, %v1988_v39  ;;  %v998_v11 = vsel %vm657_vm3, %v896_v57, 0.0  ;;  %v801_v36 = vsel %vm657_vm3, %v1698_v34, 0.0  ;;  %v898_v54 = vmul.f32 %v1752_v20, %v1752_v20  ;;  %v2022_v52 = vadd.f32 %v1443_v38, %v645_v0 }
 0x11b   :  { %v989_v12 = vadd.f32 %v988_v7, %v987_v6  ;;  %v792_v13 = vadd.f32 %v791_v8, %v790_v61  ;;  %718 = vst.msk [vmem:[%s2157_s3 + $0x1e0] sm:$0xff] %vm657_vm3, %v2006_v50  ;;  %721 = vst.msk [vmem:[%s2157_s3 + $0x1f8] sm:$0xff] %vm657_vm3, %v2009_v53  ;;  %v899_v34 = vmul.f32 %v1671_v14, %v1671_v14  ;;  %v1000_v63 = vsel %vm657_vm3, %v897_v49, 0.0 }
 0x11c   :  { %v803_v3 = vsel %vm657_vm3, %v1752_v20, 0.0  ;;  %719 = vst.msk [vmem:[%s2157_s3 + $0x1e8] sm:$0xff] %vm657_vm3, %v2022_v52  ;;  %v805_v4 = vsel %vm657_vm3, %v1671_v14, 0.0  ;;  %v900_v61 = vmul.f32 %v1725_v60, %v1725_v60  ;;  %v1002_v6 = vsel %vm657_vm3, %v898_v54, 0.0 }
 0x11d   :  { %v794_v19 = vadd.f32 %v793_v17, %v792_v13  ;;  %v991_v24 = vadd.f32 %v990_v28, %v989_v12  ;;  %v1004_v20 = vsel %vm657_vm3, %v899_v34, 0.0  ;;  %v807_v8 = vsel %vm657_vm3, %v1725_v60, 0.0 }
 0x11e   :  { %v901_v10 = vmul.f32 %v1804_v5, %v1804_v5  ;;  %v1006_v28 = vsel %vm657_vm3, %v900_v61, 0.0  ;;  %v809_v14 = vsel %vm657_vm3, %v1804_v5, 0.0  ;;  %v902_v17 = vmul.f32 %v1832_v26, %v1832_v26 }
 0x11f   :  { %v993_v31 = vadd.f32 %v992_v29, %v991_v24  ;;  %v796_v32 = vadd.f32 %v795_v30, %v794_v19  ;;  %v903_v24 = vmul.f32 %v1779_v44, %v1779_v44  ;;  %v811_v18 = vsel %vm657_vm3, %v1832_v26, 0.0 }
 0x120   :  { %v1008_v60 = vsel %vm657_vm3, %v901_v10, 0.0  ;;  %v813_v30 = vsel %vm657_vm3, %v1779_v44, 0.0  ;;  %v904_v5 = vmul.f32 %v1828_v23, %v1828_v23  ;;  %v905_v26 = vmul.f32 %v1861_v47, %v1861_v47 }
 0x121   :  { %v798_v42 = vadd.f32 %v797_v40, %v796_v32  ;;  %v995_v59 = vadd.f32 %v994_v41, %v993_v31  ;;  %v1010_v31 = vsel %vm657_vm3, %v902_v17, 0.0  ;;  %v1012_v57 = vsel %vm657_vm3, %v903_v24, 0.0 }
 0x122   :  { %v815_v41 = vsel %vm657_vm3, %v1828_v23, 0.0  ;;  %v1014_v0 = vsel %vm657_vm3, %v904_v5, 0.0  ;;  %v817_v44 = vsel %vm657_vm3, %v1861_v47, 0.0  ;;  %v1016_v23 = vsel %vm657_vm3, %v905_v26, 0.0 }
 0x123   :  { %v997_v51 = vadd.f32 %v996_v43, %v995_v59  ;;  %v800_v55 = vadd.f32 %v799_v45, %v798_v42  ;;  %v906_v43 = vmul.f32 %v1879_v15, %v1879_v15  ;;  %v821_v54 = vsel %vm657_vm3, %v1843_v37, 0.0 }
 0x124   :  { %v908_v47 = vmul.f32 %v1865_v48, %v1865_v48  ;;  %v910_v61 = vmul.f32 %v1935_v9, %v1935_v9  ;;  %v835_v5 = vsel %vm657_vm3, %v1975_v33, 0.0 }
 0x125   :  { %v802_v56 = vadd.f32 %v801_v36, %v800_v55  ;;  %v999_v62 = vadd.f32 %v998_v11, %v997_v51  ;;  %v907_v51 = vmul.f32 %v1843_v37, %v1843_v37  ;;  %v819_v55 = vsel %vm657_vm3, %v1879_v15, 0.0 }
 0x126   :  { %v909_v15 = vmul.f32 %v1902_v2, %v1902_v2  ;;  %v825_v37 = vsel %vm657_vm3, %v1902_v2, 0.0  ;;  %v912_v2 = vmul.f32 %v1916_v1, %v1916_v1 }
 0x127   :  { %v1001_v38 = vadd.f32 %v1000_v63, %v999_v62  ;;  %v804_v46 = vadd.f32 %v803_v3, %v802_v56  ;;  %v1018_v56 = vsel %vm657_vm3, %v906_v43, 0.0  ;;  %v1020_v63 = vsel %vm657_vm3, %v907_v51, 0.0 }
 0x128   :  { %v823_v3 = vsel %vm657_vm3, %v1865_v48, 0.0  ;;  %v1024_v48 = vsel %vm657_vm3, %v909_v15, 0.0 }
 0x129   :  { %v806_v58 = vadd.f32 %v805_v4, %v804_v46  ;;  %v1003_v7 = vadd.f32 %v1002_v6, %v1001_v38  ;;  %v1022_v4 = vsel %vm657_vm3, %v908_v47, 0.0 }
 0x12b   :  { %v1005_v12 = vadd.f32 %v1004_v20, %v1003_v7  ;;  %v808_v13 = vadd.f32 %v807_v8, %v806_v58  ;;  %v911_v7 = vmul.f32 %v1898_v35, %v1898_v35  ;;  %v827_v20 = vsel %vm657_vm3, %v1935_v9, 0.0 }
 0x12c   :  { %v913_v9 = vmul.f32 %v1953_v21, %v1953_v21 }
 0x12d   :  { %v810_v22 = vadd.f32 %v809_v14, %v808_v13  ;;  %v1007_v19 = vadd.f32 %v1006_v28, %v1005_v12  ;;  %v829_v12 = vsel %vm657_vm3, %v1898_v35, 0.0  ;;  %v1026_v13 = vsel %vm657_vm3, %v910_v61, 0.0 }
 0x12e   :  { %v1028_v17 = vsel %vm657_vm3, %v911_v7, 0.0  ;;  %v833_v35 = vsel %vm657_vm3, %v1953_v21, 0.0  ;;  %v916_v21 = vmul.f32 %v1972_v27, %v1972_v27 }
 0x12f   :  { %v1009_v25 = vadd.f32 %v1008_v60, %v1007_v19  ;;  %v812_v29 = vadd.f32 %v811_v18, %v810_v22  ;;  %v831_v22 = vsel %vm657_vm3, %v1916_v1, 0.0  ;;  %v1030_v60 = vsel %vm657_vm3, %v912_v2, 0.0 }
 0x130   :  { %v914_v18 = vmul.f32 %v1975_v33, %v1975_v33  ;;  %v1032_v1 = vsel %vm657_vm3, %v913_v9, 0.0  ;;  %v917_v33 = vmul.f32 %v2006_v50, %v2006_v50  ;;  %v1038_v43 = vsel %vm657_vm3, %v916_v21, 0.0 }
 0x131   :  { %v814_v32 = vadd.f32 %v813_v30, %v812_v29  ;;  %v1011_v40 = vadd.f32 %v1010_v31, %v1009_v25  ;;  %v915_v30 = vmul.f32 %v1939_v16, %v1939_v16 }
 0x133   :  { %v1013_v42 = vadd.f32 %v1012_v57, %v1011_v40  ;;  %v816_v59 = vadd.f32 %v815_v41, %v814_v32  ;;  %v837_v40 = vsel %vm657_vm3, %v1939_v16, 0.0  ;;  %v1034_v57 = vsel %vm657_vm3, %v914_v18, 0.0 }
 0x134   :  { %v841_v16 = vsel %vm657_vm3, %v2006_v50, 0.0  ;;  %v920_v50 = vmul.f32 %v2009_v53, %v2009_v53 }
 0x135   :  { %v818_v45 = vadd.f32 %v817_v44, %v816_v59  ;;  %v1015_v49 = vadd.f32 %v1014_v0, %v1013_v42  ;;  %v1036_v42 = vsel %vm657_vm3, %v915_v30, 0.0  ;;  %v839_v59 = vsel %vm657_vm3, %v1972_v27, 0.0 }
 0x136   :  { %v1040_v27 = vsel %vm657_vm3, %v917_v33, 0.0 }
 0x137   :  { %v1017_v11 = vadd.f32 %v1016_v23, %v1015_v49  ;;  %v820_v36 = vadd.f32 %v819_v55, %v818_v45  ;;  %v918_v45 = vmul.f32 %v2022_v52, %v2022_v52  ;;  %v919_v23 = vmul.f32 %v1988_v39, %v1988_v39 }
 0x138   :  { %v843_v55 = vsel %vm657_vm3, %v2022_v52, 0.0  ;;  %v1046_v52 = vsel %vm657_vm3, %v920_v50, 0.0 }
 0x139   :  { %v822_v62 = vadd.f32 %v821_v54, %v820_v36  ;;  %v1019_v34 = vadd.f32 %v1018_v56, %v1017_v11  ;;  %v845_v54 = vsel %vm657_vm3, %v1988_v39, 0.0  ;;  %v1042_v47 = vsel %vm657_vm3, %v918_v45, 0.0 }
 0x13b   :  { %v1021_v38 = vadd.f32 %v1020_v63, %v1019_v34  ;;  %v824_v46 = vadd.f32 %v823_v3, %v822_v62  ;;  %v1044_v34 = vsel %vm657_vm3, %v919_v23, 0.0  ;;  %v847_v63 = vsel %vm657_vm3, %v2009_v53, 0.0 }
 0x13d   :  { %v826_v6 = vadd.f32 %v825_v37, %v824_v46  ;;  %v1023_v58 = vadd.f32 %v1022_v4, %v1021_v38 }
 0x13f   :  { %v1025_v8 = vadd.f32 %v1024_v48, %v1023_v58  ;;  %v828_v10 = vadd.f32 %v827_v20, %v826_v6 }
 0x141   :  { %v830_v28 = vadd.f32 %v829_v12, %v828_v10  ;;  %v1027_v14 = vadd.f32 %v1026_v13, %v1025_v8 }
 0x143   :  { %v1029_v19 = vadd.f32 %v1028_v17, %v1027_v14  ;;  %v832_v24 = vadd.f32 %v831_v22, %v830_v28 }
 0x145   :  { %v834_v25 = vadd.f32 %v833_v35, %v832_v24  ;;  %v1031_v29 = vadd.f32 %v1030_v60, %v1029_v19 }
 0x147   :  { %v1033_v31 = vadd.f32 %v1032_v1, %v1031_v29  ;;  %v836_v32 = vadd.f32 %v835_v5, %v834_v25 }
 0x149   :  { %v838_v41 = vadd.f32 %v837_v40, %v836_v32  ;;  %v1035_v26 = vadd.f32 %v1034_v57, %v1033_v31 }
 0x14b   :  { %v1037_v0 = vadd.f32 %v1036_v42, %v1035_v26  ;;  %v840_v44 = vadd.f32 %v839_v59, %v838_v41 }
 0x14d   :  { %v842_v49 = vadd.f32 %v841_v16, %v840_v44  ;;  %v1039_v51 = vadd.f32 %v1038_v43, %v1037_v0 }
 0x14f   :  { %v1041_v11 = vadd.f32 %v1040_v27, %v1039_v51  ;;  %v844_v36 = vadd.f32 %v843_v55, %v842_v49 }
 0x151   :  { %v846_v56 = vadd.f32 %v845_v54, %v844_v36  ;;  %v1043_v62 = vadd.f32 %v1042_v47, %v1041_v11 }
 0x153   :  { %v848_v3 = vadd.f32 %v847_v63, %v846_v56  ;;  %v1045_v15 = vadd.f32 %v1044_v34, %v1043_v62 }
 0x155   :  { %v849_v38 = vrot.slane %v848_v3, 4  ;;  %v1047_v46 = vadd.f32 %v1046_v52, %v1045_v15 }
 0x157   :  { %v850_v4 = vadd.f32 %v849_v38, %v848_v3  ;;  %v1048_v39 = vrot.slane %v1047_v46, 4 }
 0x159   :  { %v851_v37 = vrot.slane %v850_v4, 2  ;;  %v1049_v61 = vadd.f32 %v1048_v39, %v1047_v46 }
 0x15b   :  { %v852_v6 = vadd.f32 %v851_v37, %v850_v4  ;;  %v1050_v58 = vrot.slane %v1049_v61, 2 }
 0x15d   :  { %v853_v7 = vrot.slane %v852_v6, 1  ;;  %v1051_v48 = vadd.f32 %v1050_v58, %v1049_v61 }
 0x15f   :  { %v854_v20 = vadd.f32 %v853_v7, %v852_v6  ;;  %v1052_v8 = vrot.slane %v1051_v48, 1 }
 0x161   :  { %856 = vst.msk [vmem:[%s2158_s4] sm:$0x1] %vm855_vm4, %v854_v20  ;;  %v1053_v53 = vadd.f32 %v1052_v8, %v1051_v48 }
 0x163   :  { %1054 = vst.msk [vmem:[%s2159_s5] sm:$0x1] %vm855_vm4, %v1053_v53 }

// kernel: tile.203
= control target key start
LH: loop header
LB: loop body
LE: loop exit
PB: predicated region body
PF: predicated region fallthrough
CT: control target
= control target key end

     0   :  { %s22_s0 = inlined_call_operand.vmem [shape: f32[32], index: 0, kind: input, shape index: {}]   ;;  %s23_s1 = inlined_call_operand.vmem [shape: f32[8,32], index: 1, kind: output, shape index: {}]  }
   0x1   :  { %v4_v0 = vld [vmem:[%s22_s0] ss:$0 sm:$0xff] }
   0x2   :  { %5 = vst [vmem:[%s23_s1] sm:$0xff] %v4_v0 }

// kernel: tile.208
= control target key start
LH: loop header
LB: loop body
LE: loop exit
PB: predicated region body
PF: predicated region fallthrough
CT: control target
= control target key end

     0   :  { %s7_s6 = smov 3  ;;  %s14_s9 = smov 3  ;;  %vm4_vm0 = vcmask 261120   ;;  %vm11_vm1 = vcmask 1048320   ;;  %vm18_vm2 = vcmask 785920   ;;  %vm25_vm3 = vcmask 523520   ;;  %s79_s0 = inlined_call_operand.vmem [shape: f32[8,32], index: 0, kind: input, shape index: {}]   ;;  %s80_s1 = inlined_call_operand.vmem [shape: f32[1,256], index: 1, kind: output, shape index: {}]  }
   0x1   :  { %v41_v0 = vld [vmem:[%s79_s0 + $0x3] ss:$4 sm:%s7_s6]   ;;  %s48_s10 = smov 96   ;;  %s21_s11 = smov 3  ;;  %v42_v1 = vld [vmem:[%s79_s0 + $0x2] ss:$4 sm:%s14_s9]  }
   0x2   :  { %9 = vrot.lane.b32.xlu0 %v41_v0, %s48_s10  ;;  %v43_v2 = vld [vmem:[%s79_s0 + $0x1] ss:$4 sm:%s21_s11]   ;;  %s2_s16 = smov 3  ;;  %s49_s17 = smov 32  }
   0x3   :  { %23 = vrot.lane.b32.xlu1 %v43_v2, %s49_s17  ;;  %v3_v3 = vld [vmem:[%s79_s0] ss:$4 sm:%s2_s16]   ;;  %s50_s0 = smov 64  }
   0x4   :  { %5 = vst.msk [vmem:[#allocation0] ss:$8 sm:$0x3] %vm4_vm0, %v3_v3  }
   0x6   :  { %16 = vrot.lane.b32.xlu0 %v42_v1, %s50_s0 }
  0x74   :  { %v10_v4 = vpop.permute.xlu0 %9  }
  0x75   :  { %12 = vst.msk [vmem:[#allocation0] ss:$8 sm:$0x3] %vm11_vm1, %v10_v4   ;;  %v24_v5 = vpop.permute.xlu1 %23  }
  0x78   :  { %v17_v6 = vpop.permute.xlu0 %16  }
  0x79   :  { %19 = vst.msk [vmem:[#allocation0] ss:$8 sm:$0x3] %vm18_vm2, %v17_v6  }
  0x7a   :  { %26 = vst.msk [vmem:[#allocation0] ss:$8 sm:$0x3] %vm25_vm3, %v24_v5  }
  0x81   :  { %v31_v7 = vld [vmem:[#allocation0] sm:$0x1]  ;;  %v36_v8 = vld [vmem:[#allocation0 + $0x8] sm:$0x1] }
  0x82   :  { %34 = vst [vmem:[%s80_s1] sm:$0x1] %v31_v7  ;;  %44 = vst [vmem:[%s80_s1 + $0x1] sm:$0x1] %v36_v8 }

// kernel: _lambda_.33
= control target key start
LH: loop header
LB: loop body
LE: loop exit
PB: predicated region body
PF: predicated region fallthrough
CT: control target
= control target key end

     0   :  { %v515_v0 = vmov 0   ;;  %vm185_vm0 = vcmask 130048   ;;  %vm307_vm1 = vcmask 261120   ;;  %vm361_vm2 = vcmask 253952   ;;  %s788_s1 = inlined_call_operand.vmem [shape: bf16[144,32], index: 1, kind: input, shape index: {}]   ;;  %s789_s0 = inlined_call_operand.vmem [shape: bf16[128,144], index: 0, kind: input, shape index: {}]   ;;  %s790_s2 = inlined_call_operand.vmem [shape: f32[1,32], index: 2, kind: input, shape index: {}]   ;;  %s791_s3 = inlined_call_operand.vmem [shape: f32[128,32], index: 3, kind: output, shape index: {0}]   ;;  %s792_s4 = inlined_call_operand.vmem [shape: f32[1,1,32], index: 4, kind: output, shape index: {1}]   ;;  %s793_s5 = inlined_call_operand.vmem [shape: f32[1,1,32], index: 5, kind: output, shape index: {2}]  }
   0x1   :  { %210 = vmatprep.subr.bf16.mxu0 %v515_v0  ;;  %v482_v1 = vld [vmem:[%s788_s1 + $0x38] sm:$0xff]   ;;  %463 = vmatprep.subr.bf16.mxu1 %v515_v0  ;;  %v483_v2 = vld [vmem:[%s788_s1 + $0x30] sm:$0xff]   ;;  %v484_v3 = vld [vmem:[%s788_s1 + $0x28] sm:$0xff]  }
   0x2   :  { %211 = vmatpush1.bf16.msra.mxu0 %v482_v1  ;;  %472 = vmatpush1.bf16.msra.mxu1 %v482_v1  ;;  %v485_v4 = vld [vmem:[%s788_s1 + $0x20] sm:$0xff]   ;;  %v486_v7 = vld [vmem:[%s788_s1 + $0x18] sm:$0xff]   ;;  %v487_v8 = vld [vmem:[%s788_s1 + $0x10] sm:$0xff]  }
   0x3   :  { %212 = vmatprep.subr.bf16.mxu0 %v515_v0  ;;  %464 = vmatprep.subr.bf16.mxu1 %v515_v0  ;;  %v493_v5 = vld [vmem:[%s789_s0 + $0x4] ss:$8 sps:$4 sm:$0xff]   ;;  %v491_v12 = vld [vmem:[%s789_s0] ss:$8 sps:$4 sm:$0xff]   ;;  %v494_v14 = vld [vmem:[%s789_s0 + $0x14] ss:$8 sps:$4 sm:$0xff]  }
   0x4   :  { %455 = vmatprep.mubr.msk.bf16.mxu0 %vm185_vm0, %v493_v5  ;;  %v499_v6 = vld [vmem:[%s789_s0 + $0x44] ss:$8 sps:$4 sm:$0xff]   ;;  %v497_v13 = vld [vmem:[%s789_s0 + $0x40] ss:$8 sps:$4 sm:$0xff]   ;;  %v503_v15 = vld [vmem:[%s789_s0 + $0x54] ss:$8 sps:$4 sm:$0xff]  }
   0x5   :  { %459 = vmatprep.mubr.msk.bf16.mxu1 %vm185_vm0, %v499_v6  ;;  %v488_v9 = vld [vmem:[%s788_s1 + $0x8] sm:$0xff]   ;;  %v489_v10 = vld [vmem:[%s788_s1] sm:$0xff]   ;;  %v496_v16 = vld [vmem:[%s789_s0 + $0x10] ss:$8 sps:$4 sm:$0xff]  }
   0x6   :  { %213 = vmatpush1.bf16.msra.mxu0 %v483_v2  ;;  %473 = vmatpush1.bf16.msra.mxu1 %v483_v2  ;;  %v490_v11 = vld [vmem:[%s788_s1 + $0x40] sm:$0xff]   ;;  %v505_v17 = vld [vmem:[%s789_s0 + $0x50] ss:$8 sps:$4 sm:$0xff]   ;;  %v506_v22 = vld [vmem:[%s789_s0 + $0x34] ss:$8 sps:$4 sm:$0xff]  }
   0x7   :  { %214 = vmatprep.subr.bf16.mxu0 %v515_v0  ;;  %465 = vmatprep.subr.bf16.mxu1 %v515_v0  ;;  %v500_v18 = vld [vmem:[%s789_s0 + $0x24] ss:$8 sps:$4 sm:$0xff]   ;;  %v502_v20 = vld [vmem:[%s789_s0 + $0x20] ss:$8 sps:$4 sm:$0xff]   ;;  %v512_v23 = vld [vmem:[%s789_s0 + $0x74] ss:$8 sps:$4 sm:$0xff]  }
   0x8   :  { %v509_v19 = vld [vmem:[%s789_s0 + $0x64] ss:$8 sps:$4 sm:$0xff]   ;;  %v511_v21 = vld [vmem:[%s789_s0 + $0x60] ss:$8 sps:$4 sm:$0xff]   ;;  %v508_v24 = vld [vmem:[%s789_s0 + $0x30] ss:$8 sps:$4 sm:$0xff]  }
   0x9   :  { %v514_v25 = vld [vmem:[%s789_s0 + $0x70] ss:$8 sps:$4 sm:$0xff]   ;;  %v632_v26 = vld [vmem:[%s790_s2] ss:$0 sm:$0xff] }
   0xa   :  { %215 = vmatpush1.bf16.msra.mxu0 %v484_v3  ;;  %474 = vmatpush1.bf16.msra.mxu1 %v484_v3 }
   0xb   :  { %216 = vmatprep.subr.bf16.mxu0 %v515_v0  ;;  %466 = vmatprep.subr.bf16.mxu1 %v515_v0 }
   0xe   :  { %217 = vmatpush1.bf16.msra.mxu0 %v485_v4  ;;  %475 = vmatpush1.bf16.msra.mxu1 %v485_v4 }
   0xf   :  { %218 = vmatprep.subr.bf16.mxu0 %v515_v0  ;;  %467 = vmatprep.subr.bf16.mxu1 %v515_v0 }
  0x12   :  { %219 = vmatpush1.bf16.msra.mxu0 %v486_v7  ;;  %476 = vmatpush1.bf16.msra.mxu1 %v486_v7 }
  0x13   :  { %220 = vmatprep.subr.bf16.mxu0 %v515_v0  ;;  %468 = vmatprep.subr.bf16.mxu1 %v515_v0 }
  0x16   :  { %221 = vmatpush1.bf16.msra.mxu0 %v487_v8  ;;  %477 = vmatpush1.bf16.msra.mxu1 %v487_v8 }
  0x17   :  { %222 = vmatprep.subr.bf16.mxu0 %v515_v0  ;;  %469 = vmatprep.subr.bf16.mxu1 %v515_v0 }
  0x1a   :  { %223 = vmatpush1.bf16.msra.mxu0 %v488_v9  ;;  %478 = vmatpush1.bf16.msra.mxu1 %v488_v9 }
  0x1b   :  { %224 = vmatprep.subr.bf16.mxu0 %v515_v0  ;;  %470 = vmatprep.subr.bf16.mxu1 %v515_v0 }
  0x1e   :  { %225 = vmatpush1.bf16.msra.mxu0 %v489_v10  ;;  %479 = vmatpush1.bf16.msra.mxu1 %v489_v10 }
  0x1f   :  { %240 = vmatprep.subr.bf16.mxu0 %v515_v0  ;;  %471 = vmatprep.subr.bf16.mxu1 %v515_v0 }
  0x22   :  { %241 = vmatpush2.bf16.msra.mxu0 %v490_v11  ;;  %480 = vmatpush2.bf16.msra.mxu1 %v490_v11 }
  0x25   :  { %243 = vmatmul.mubr.bf16.vlgmr.msra.gmra.mxu0 %v491_v12  ;;  %275 = vmatmul.mubr.bf16.vlgmr.msra.gmra.mxu1 %v497_v13 }
  0x26   :  { %456 = vmatprep.mubr.msk.bf16.mxu0 %vm185_vm0, %v494_v14  ;;  %460 = vmatprep.mubr.msk.bf16.mxu1 %vm185_vm0, %v503_v15 }
  0x2d   :  { %251 = vmatmul.mubr.bf16.gmra.mxu0 %v496_v16  ;;  %283 = vmatmul.mubr.bf16.gmra.mxu1 %v505_v17 }
  0x2e   :  { %457 = vmatprep.mubr.msk.bf16.mxu0 %vm185_vm0, %v500_v18  ;;  %461 = vmatprep.mubr.msk.bf16.mxu1 %vm185_vm0, %v509_v19 }
  0x35   :  { %259 = vmatmul.mubr.bf16.gmra.mxu0 %v502_v20  ;;  %291 = vmatmul.mubr.bf16.gmra.mxu1 %v511_v21 }
  0x36   :  { %458 = vmatprep.mubr.msk.bf16.mxu0 %vm185_vm0, %v506_v22  ;;  %462 = vmatprep.mubr.msk.bf16.mxu1 %vm185_vm0, %v512_v23 }
  0x3d   :  { %267 = vmatmul.mubr.bf16.gmra.mxu0 %v508_v24  ;;  %299 = vmatmul.mubr.bf16.gmra.mxu1 %v514_v25 }
  0xe5   :  { %v244_v27 = vpop.f32.mrf.mxu0  ;;  %v276_v28 = vpop.f32.mrf.mxu1 }
  0xe6   :  { %v245_v29 = vadd.f32 %v632_v26, %v244_v27  ;;  %v636_v30 = vadd.f32 %v632_v26, %v276_v28 }
  0xe7   :  { %v246_v31 = vpop.f32.mrf.mxu0  ;;  %v278_v32 = vpop.f32.mrf.mxu1 }
  0xe8   :  { %308 = vst.msk [vmem:[%s791_s3] sm:$0xff] %vm307_vm1, %v245_v29  ;;  %316 = vst.msk [vmem:[%s791_s3 + $0x40] sm:$0xff] %vm307_vm1, %v636_v30  ;;  %v363_v52 = vmul.f32 %v245_v29, %v245_v29  ;;  %v324_v61 = vsel %vm307_vm1, %v245_v29, 0.0 }
  0xe9   :  { %v247_v33 = vpop.f32.mrf.mxu0  ;;  %v279_v34 = vpop.f32.mrf.mxu1 }
  0xea   :  { %v248_v35 = vadd.f32 %v632_v26, %v247_v33  ;;  %v649_v36 = vadd.f32 %v632_v26, %v279_v34  ;;  %v379_v1 = vsel %vm307_vm1, %v363_v52, 0.0  ;;  %v339_v52 = vsel %vm307_vm1, %v636_v30, 0.0 }
  0xeb   :  { %v249_v37 = vpop.f32.mrf.mxu0  ;;  %v281_v38 = vpop.f32.mrf.mxu1 }
  0xec   :  { %309 = vst.msk [vmem:[%s791_s3 + $0x8] sm:$0xff] %vm307_vm1, %v248_v35  ;;  %317 = vst.msk [vmem:[%s791_s3 + $0x48] sm:$0xff] %vm307_vm1, %v649_v36  ;;  %v364_v51 = vmul.f32 %v248_v35, %v248_v35  ;;  %v325_v56 = vsel %vm307_vm1, %v248_v35, 0.0 }
  0xed   :  { %v252_v39 = vpop.f32.mrf.mxu0  ;;  %v284_v40 = vpop.f32.mrf.mxu1  ;;  %v326_v2 = vadd.f32 %v325_v56, %v324_v61 }
  0xee   :  { %v253_v41 = vadd.f32 %v632_v26, %v252_v39  ;;  %v662_v42 = vadd.f32 %v632_v26, %v284_v40  ;;  %v380_v62 = vsel %vm307_vm1, %v364_v51, 0.0 }
  0xef   :  { %v254_v43 = vpop.f32.mrf.mxu0  ;;  %v286_v44 = vpop.f32.mrf.mxu1  ;;  %v381_v10 = vadd.f32 %v380_v62, %v379_v1 }
  0xf0   :  { %310 = vst.msk [vmem:[%s791_s3 + $0x10] sm:$0xff] %vm307_vm1, %v253_v41  ;;  %318 = vst.msk [vmem:[%s791_s3 + $0x50] sm:$0xff] %vm307_vm1, %v662_v42  ;;  %v365_v53 = vmul.f32 %v253_v41, %v253_v41  ;;  %v327_v63 = vsel %vm307_vm1, %v253_v41, 0.0 }
  0xf1   :  { %v255_v45 = vpop.f32.mrf.mxu0  ;;  %v287_v46 = vpop.f32.mrf.mxu1  ;;  %v328_v11 = vadd.f32 %v327_v63, %v326_v2 }
  0xf2   :  { %v256_v47 = vadd.f32 %v632_v26, %v255_v45  ;;  %v675_v48 = vadd.f32 %v632_v26, %v287_v46  ;;  %v382_v3 = vsel %vm307_vm1, %v365_v53, 0.0  ;;  %v372_v53 = vmul.f32 %v649_v36, %v649_v36 }
  0xf3   :  { %v257_v49 = vpop.f32.mrf.mxu0  ;;  %v289_v50 = vpop.f32.mrf.mxu1  ;;  %v383_v17 = vadd.f32 %v382_v3, %v381_v10 }
  0xf4   :  { %311 = vst.msk [vmem:[%s791_s3 + $0x18] sm:$0xff] %vm307_vm1, %v256_v47  ;;  %319 = vst.msk [vmem:[%s791_s3 + $0x58] sm:$0xff] %vm307_vm1, %v675_v48  ;;  %v366_v0 = vmul.f32 %v256_v47, %v256_v47  ;;  %v329_v6 = vsel %vm307_vm1, %v256_v47, 0.0  ;;  %v371_v47 = vmul.f32 %v636_v30, %v636_v30  ;;  %v396_v63 = vsel %vm307_vm1, %v372_v53, 0.0 }
  0xf5   :  { %v260_v54 = vpop.f32.mrf.mxu0  ;;  %v292_v55 = vpop.f32.mrf.mxu1  ;;  %v330_v18 = vadd.f32 %v329_v6, %v328_v11  ;;  %v343_v30 = vsel %vm307_vm1, %v662_v42, 0.0 }
  0xf6   :  { %v261_v57 = vadd.f32 %v632_v26, %v260_v54  ;;  %v689_v58 = vadd.f32 %v632_v26, %v292_v55  ;;  %v384_v14 = vsel %vm307_vm1, %v366_v0, 0.0  ;;  %v374_v0 = vmul.f32 %v675_v48, %v675_v48 }
  0xf7   :  { %v262_v59 = vpop.f32.mrf.mxu0  ;;  %v294_v60 = vpop.f32.mrf.mxu1  ;;  %v385_v25 = vadd.f32 %v384_v14, %v383_v17 }
  0xf8   :  { %312 = vst.msk [vmem:[%s791_s3 + $0x20] sm:$0xff] %vm307_vm1, %v261_v57  ;;  %320 = vst.msk [vmem:[%s791_s3 + $0x60] sm:$0xff] %vm307_vm1, %v689_v58  ;;  %v367_v7 = vmul.f32 %v261_v57, %v261_v57  ;;  %v331_v15 = vsel %vm307_vm1, %v261_v57, 0.0  ;;  %v394_v57 = vsel %vm307_vm1, %v371_v47, 0.0  ;;  %v341_v59 = vsel %vm307_vm1, %v649_v36, 0.0 }
  0xf9   :  { %v263_v4 = vpop.f32.mrf.mxu0  ;;  %v295_v5 = vpop.f32.mrf.mxu1  ;;  %v332_v27 = vadd.f32 %v331_v15, %v330_v18  ;;  %v373_v60 = vmul.f32 %v662_v42, %v662_v42  ;;  %v345_v36 = vsel %vm307_vm1, %v675_v48, 0.0  ;;  %v347_v42 = vsel %vm307_vm1, %v689_v58, 0.0 }
  0xfa   :  { %v264_v8 = vadd.f32 %v632_v26, %v263_v4  ;;  %v708_v9 = vadd.f32 %v632_v26, %v295_v5  ;;  %v386_v21 = vsel %vm307_vm1, %v367_v7, 0.0  ;;  %v375_v4 = vmul.f32 %v689_v58, %v689_v58 }
  0xfb   :  { %v265_v12 = vpop.f32.mrf.mxu0  ;;  %v297_v13 = vpop.f32.mrf.mxu1  ;;  %v387_v34 = vadd.f32 %v386_v21, %v385_v25  ;;  %v398_v3 = vsel %vm307_vm1, %v373_v60, 0.0  ;;  %v400_v7 = vsel %vm307_vm1, %v374_v0, 0.0 }
  0xfc   :  { %313 = vst.msk [vmem:[%s791_s3 + $0x28] sm:$0xff] %vm307_vm1, %v264_v8  ;;  %v368_v16 = vmul.f32 %v264_v8, %v264_v8  ;;  %321 = vst.msk [vmem:[%s791_s3 + $0x68] sm:$0xff] %vm307_vm1, %v708_v9  ;;  %v333_v22 = vsel %vm307_vm1, %v264_v8, 0.0  ;;  %v376_v8 = vmul.f32 %v708_v9, %v708_v9  ;;  %v402_v12 = vsel %vm307_vm1, %v375_v4, 0.0 }
  0xfd   :  { %v268_v19 = vpop.f32.mrf.mxu0  ;;  %v300_v20 = vpop.f32.mrf.mxu1  ;;  %v334_v35 = vadd.f32 %v333_v22, %v332_v27  ;;  %v349_v48 = vsel %vm307_vm1, %v708_v9, 0.0 }
  0xfe   :  { %v269_v23 = vadd.f32 %v632_v26, %v268_v19  ;;  %v301_v24 = vadd.f32 %v632_v26, %v300_v20  ;;  %v388_v31 = vsel %vm307_vm1, %v368_v16, 0.0  ;;  %v404_v16 = vsel %vm307_vm1, %v376_v8, 0.0 }
  0xff   :  { %v270_v28 = vpop.f32.mrf.mxu0  ;;  %v302_v29 = vpop.f32.mrf.mxu1  ;;  %v389_v43 = vadd.f32 %v388_v31, %v387_v34 }
 0x100   :  { %314 = vst.msk [vmem:[%s791_s3 + $0x30] sm:$0xff] %vm307_vm1, %v269_v23  ;;  %v335_v32 = vsel %vm307_vm1, %v269_v23, 0.0  ;;  %v369_v33 = vmul.f32 %v269_v23, %v269_v23  ;;  %322 = vst.msk [vmem:[%s791_s3 + $0x70] sm:$0xff] %vm307_vm1, %v301_v24  ;;  %v377_v13 = vmul.f32 %v301_v24, %v301_v24  ;;  %v351_v17 = vsel %vm307_vm1, %v301_v24, 0.0 }
 0x101   :  { %v271_v37 = vpop.f32.mrf.mxu0  ;;  %v303_v38 = vpop.f32.mrf.mxu1  ;;  %v336_v44 = vadd.f32 %v335_v32, %v334_v35 }
 0x102   :  { %v390_v39 = vsel %vm307_vm1, %v369_v33, 0.0  ;;  %v272_v40 = vadd.f32 %v632_v26, %v271_v37  ;;  %v304_v41 = vadd.f32 %v632_v26, %v303_v38  ;;  %v406_v20 = vsel %vm307_vm1, %v377_v13, 0.0 }
 0x103   :  { %v273_v45 = vpop.f32.mrf.mxu0  ;;  %v305_v46 = vpop.f32.mrf.mxu1  ;;  %v391_v26 = vadd.f32 %v390_v39, %v389_v43 }
 0x104   :  { %315 = vst.msk [vmem:[%s791_s3 + $0x38] sm:$0xff] %vm307_vm1, %v272_v40  ;;  %v337_v49 = vsel %vm307_vm1, %v272_v40, 0.0  ;;  %v370_v50 = vmul.f32 %v272_v40, %v272_v40  ;;  %323 = vst.msk [vmem:[%s791_s3 + $0x78] sm:$0xff] %vm307_vm1, %v304_v41  ;;  %v378_v18 = vmul.f32 %v304_v41, %v304_v41  ;;  %v353_v21 = vsel %vm307_vm1, %v304_v41, 0.0 }
 0x105   :  { %v338_v51 = vadd.f32 %v337_v49, %v336_v44 }
 0x106   :  { %v392_v54 = vsel %vm307_vm1, %v370_v50, 0.0  ;;  %v408_v25 = vsel %vm307_vm1, %v378_v18, 0.0 }
 0x107   :  { %v340_v55 = vadd.f32 %v339_v52, %v338_v51  ;;  %v393_v56 = vadd.f32 %v392_v54, %v391_v26 }
 0x109   :  { %v342_v61 = vadd.f32 %v341_v59, %v340_v55  ;;  %v395_v62 = vadd.f32 %v394_v57, %v393_v56 }
 0x10b   :  { %v397_v1 = vadd.f32 %v396_v63, %v395_v62  ;;  %v344_v2 = vadd.f32 %v343_v30, %v342_v61 }
 0x10d   :  { %v346_v5 = vadd.f32 %v345_v36, %v344_v2  ;;  %v399_v6 = vadd.f32 %v398_v3, %v397_v1 }
 0x10f   :  { %v348_v10 = vadd.f32 %v347_v42, %v346_v5  ;;  %v401_v11 = vadd.f32 %v400_v7, %v399_v6 }
 0x111   :  { %v350_v14 = vadd.f32 %v349_v48, %v348_v10  ;;  %v403_v15 = vadd.f32 %v402_v12, %v401_v11 }
 0x113   :  { %v405_v19 = vadd.f32 %v404_v16, %v403_v15  ;;  %v352_v58 = vadd.f32 %v351_v17, %v350_v14 }
 0x115   :  { %v407_v22 = vadd.f32 %v406_v20, %v405_v19  ;;  %v354_v23 = vadd.f32 %v353_v21, %v352_v58 }
 0x117   :  { %v355_v27 = vrot.slane %v354_v23, 4  ;;  %v409_v9 = vadd.f32 %v408_v25, %v407_v22 }
 0x119   :  { %v356_v28 = vadd.f32 %v355_v27, %v354_v23  ;;  %v410_v29 = vrot.slane %v409_v9, 4 }
 0x11b   :  { %v357_v31 = vrot.slane %v356_v28, 2  ;;  %v411_v32 = vadd.f32 %v410_v29, %v409_v9 }
 0x11d   :  { %v358_v33 = vadd.f32 %v357_v31, %v356_v28  ;;  %v412_v34 = vrot.slane %v411_v32, 2 }
 0x11f   :  { %v359_v24 = vrot.slane %v358_v33, 1  ;;  %v413_v35 = vadd.f32 %v412_v34, %v411_v32 }
 0x121   :  { %v360_v37 = vadd.f32 %v359_v24, %v358_v33  ;;  %v414_v38 = vrot.slane %v413_v35, 1 }
 0x123   :  { %362 = vst.msk [vmem:[%s792_s4] sm:$0x1] %vm361_vm2, %v360_v37  ;;  %v415_v39 = vadd.f32 %v414_v38, %v413_v35 }
 0x125   :  { %416 = vst.msk [vmem:[%s793_s5] sm:$0x1] %vm361_vm2, %v415_v39 }

// kernel: _lambda_.34
= control target key start
LH: loop header
LB: loop body
LE: loop exit
PB: predicated region body
PF: predicated region fallthrough
CT: control target
= control target key end

     0   :  { %v20_v0 = vlaneseq  ;;  %s120_s1 = inlined_call_operand.vmem [shape: f32[1,256], index: 1, kind: input, shape index: {}]   ;;  %s121_s2 = inlined_call_operand.vmem [shape: f32[1,256], index: 2, kind: input, shape index: {}]   ;;  %s122_s0 = inlined_call_operand.vmem [shape: f32[16,256], index: 0, kind: input, shape index: {}]   ;;  %s123_s3 = inlined_call_operand.vmem [shape: bf16[16,256], index: 3, kind: output, shape index: {}]  }
   0x1   :  { %v18_v2 = vld [vmem:[%s120_s1] sm:$0x3]  ;;  %v15_v7 = vld [vmem:[%s122_s0 + $0x8] sm:$0xff]  ;;  %v16_v8 = vld [vmem:[%s122_s0 + $0x10] sm:$0xff] }
   0x2   :  { %v21_v1 = vshrl.u32 %v20_v0, 7  ;;  %v34_v3 = vld [vmem:[%s121_s2] sm:$0x3]  ;;  %v17_v9 = vld [vmem:[%s122_s0 + $0x18] sm:$0xff] }
   0x3   :  { %v14_v4 = vld [vmem:[%s122_s0] sm:$0xff] }
   0x4   :  { %v22_v5 = vsub.s32 0, %v21_v1  ;;  %v26_v6 = vsub.s32 1, %v21_v1 }
   0x6   :  { %v23_v10 = vrot.slane %v18_v2, %v22_v5  ;;  %v27_v11 = vrot.slane %v18_v2, %v26_v6  ;;  %v39_v12 = vrot.slane %v34_v3, %v22_v5  ;;  %v43_v13 = vrot.slane %v34_v3, %v26_v6 }
   0x8   :  { %v30_v14 = vmul.f32 %v23_v10, %v14_v4  ;;  %v31_v15 = vmul.f32 %v27_v11, %v15_v7  ;;  %v32_v16 = vmul.f32 %v23_v10, %v16_v8  ;;  %v33_v17 = vmul.f32 %v27_v11, %v17_v9 }
   0xa   :  { %v46_v18 = vadd.f32 %v39_v12, %v30_v14  ;;  %v47_v19 = vadd.f32 %v43_v13, %v31_v15  ;;  %v48_v20 = vadd.f32 %v39_v12, %v32_v16  ;;  %v49_v21 = vadd.f32 %v43_v13, %v33_v17 }
   0xc   :  { %v50_v22 = vmax.f32 %v46_v18, 0.0  ;;  %v51_v23 = vmax.f32 %v47_v19, 0.0  ;;  %v52_v24 = vmax.f32 %v48_v20, 0.0  ;;  %v53_v25 = vmax.f32 %v49_v21, 0.0 }
   0xe   :  { %v74_v26 = vpack.c.bf16 %v51_v23, %v50_v22  ;;  %v75_v27 = vpack.c.bf16 %v53_v25, %v52_v24 }
  0x10   :  { %66 = vst [vmem:[%s123_s3] sm:$0xff] %v74_v26  ;;  %67 = vst [vmem:[%s123_s3 + $0x8] sm:$0xff] %v75_v27 }

// kernel: _lambda_.35
= control target key start
LH: loop header
LB: loop body
LE: loop exit
PB: predicated region body
PF: predicated region fallthrough
CT: control target
= control target key end

     0   :  { %vm321_vm0 = vcmask 261120   ;;  %vm593_vm1 = vcmask 253952   ;;  %s1195_s1 = inlined_call_operand.vmem [shape: bf16[288,32], index: 1, kind: input, shape index: {}]   ;;  %s1196_s0 = inlined_call_operand.vmem [shape: bf16[128,288], index: 0, kind: input, shape index: {}]   ;;  %s1197_s2 = inlined_call_operand.vmem [shape: f32[1,32], index: 2, kind: input, shape index: {}]   ;;  %s1198_s3 = inlined_call_operand.vmem [shape: f32[128,32], index: 3, kind: output, shape index: {0}]   ;;  %s1199_s4 = inlined_call_operand.vmem [shape: f32[1,1,32], index: 4, kind: output, shape index: {1}]   ;;  %s1200_s5 = inlined_call_operand.vmem [shape: f32[1,1,32], index: 5, kind: output, shape index: {2}]  }
   0x1   :  { %v822_v0 = vld [vmem:[%s1195_s1 + $0x78] sm:$0xff]   ;;  %v824_v2 = vld [vmem:[%s1195_s1 + $0x70] sm:$0xff]   ;;  %v826_v4 = vld [vmem:[%s1195_s1 + $0x68] sm:$0xff]  }
   0x2   :  { %v823_v1 = vld [vmem:[%s1195_s1 + $0x38] sm:$0xff]   ;;  %712 = vmatprep.subr.bf16.mxu0 %v822_v0  ;;  %806 = vmatprep.subr.bf16.mxu1 %v822_v0  ;;  %v825_v3 = vld [vmem:[%s1195_s1 + $0x30] sm:$0xff]   ;;  %v827_v5 = vld [vmem:[%s1195_s1 + $0x28] sm:$0xff]  }
   0x3   :  { %713 = vmatpush3.bf16.msra.mxu0 %v823_v1  ;;  %814 = vmatpush3.bf16.msra.mxu1 %v823_v1  ;;  %v828_v6 = vld [vmem:[%s1195_s1 + $0x60] sm:$0xff]   ;;  %v830_v8 = vld [vmem:[%s1195_s1 + $0x58] sm:$0xff]   ;;  %v832_v10 = vld [vmem:[%s1195_s1 + $0x50] sm:$0xff]  }
   0x4   :  { %714 = vmatprep.subr.bf16.mxu0 %v824_v2  ;;  %807 = vmatprep.subr.bf16.mxu1 %v824_v2  ;;  %v829_v7 = vld [vmem:[%s1195_s1 + $0x20] sm:$0xff]   ;;  %v831_v9 = vld [vmem:[%s1195_s1 + $0x18] sm:$0xff]   ;;  %v833_v13 = vld [vmem:[%s1195_s1 + $0x10] sm:$0xff]  }
   0x5   :  { %v840_v11 = vld [vmem:[%s1196_s0 + $0x4] ss:$12 sps:$4 sm:$0xff]   ;;  %v843_v12 = vld [vmem:[%s1196_s0 + $0x94] ss:$12 sps:$4 sm:$0xff]   ;;  %v834_v14 = vld [vmem:[%s1195_s1 + $0x48] sm:$0xff]  }
   0x6   :  { %378 = vmatprep.mubr.bf16.mxu0 %v840_v11  ;;  %426 = vmatprep.mubr.bf16.mxu1 %v843_v12  ;;  %v835_v15 = vld [vmem:[%s1195_s1 + $0x8] sm:$0xff]   ;;  %v836_v16 = vld [vmem:[%s1195_s1 + $0x40] sm:$0xff]   ;;  %v841_v20 = vld [vmem:[%s1196_s0 + $0x90] ss:$12 sps:$4 sm:$0xff]  }
   0x7   :  { %715 = vmatpush3.bf16.msra.mxu0 %v825_v3  ;;  %815 = vmatpush3.bf16.msra.mxu1 %v825_v3  ;;  %v837_v17 = vld [vmem:[%s1195_s1] sm:$0xff]   ;;  %v848_v19 = vld [vmem:[%s1195_s1 + $0x88] sm:$0xff]   ;;  %v855_v28 = vld [vmem:[%s1196_s0 + $0x30] ss:$12 sps:$4 sm:$0xff]  }
   0x8   :  { %716 = vmatprep.subr.bf16.mxu0 %v826_v4  ;;  %808 = vmatprep.subr.bf16.mxu1 %v826_v4  ;;  %v838_v18 = vld [vmem:[%s1196_s0] ss:$12 sps:$4 sm:$0xff]   ;;  %v844_v21 = vld [vmem:[%s1196_s0 + $0x1c] ss:$12 sps:$4 sm:$0xff]   ;;  %v849_v24 = vld [vmem:[%s1196_s0 + $0x18] ss:$12 sps:$4 sm:$0xff]  }
   0x9   :  { %v846_v22 = vld [vmem:[%s1196_s0 + $0xac] ss:$12 sps:$4 sm:$0xff]   ;;  %v851_v23 = vld [vmem:[%s1195_s1 + $0x80] sm:$0xff]   ;;  %v850_v25 = vld [vmem:[%s1196_s0 + $0xa8] ss:$12 sps:$4 sm:$0xff]  }
   0xa   :  { %v852_v26 = vld [vmem:[%s1196_s0 + $0x34] ss:$12 sps:$4 sm:$0xff]   ;;  %v857_v30 = vld [vmem:[%s1196_s0 + $0x4c] ss:$12 sps:$4 sm:$0xff]   ;;  %v861_v33 = vld [vmem:[%s1196_s0 + $0x50] ss:$12 sps:$4 sm:$0xff]  }
   0xb   :  { %717 = vmatpush3.bf16.msra.mxu0 %v827_v5  ;;  %816 = vmatpush3.bf16.msra.mxu1 %v827_v5  ;;  %v854_v27 = vld [vmem:[%s1196_s0 + $0x8] ss:$12 sps:$4 sm:$0xff]   ;;  %v856_v29 = vld [vmem:[%s1196_s0 + $0x20] ss:$12 sps:$4 sm:$0xff]   ;;  %v859_v31 = vld [vmem:[%s1196_s0 + $0x38] ss:$12 sps:$4 sm:$0xff]  }
   0xc   :  { %718 = vmatprep.subr.bf16.mxu0 %v828_v6  ;;  %809 = vmatprep.subr.bf16.mxu1 %v828_v6  ;;  %v860_v32 = vld [vmem:[%s1196_s0 + $0x48] ss:$12 sps:$4 sm:$0xff]   ;;  %v862_v34 = vld [vmem:[%s1196_s0 + $0x64] ss:$12 sps:$4 sm:$0xff]   ;;  %v865_v36 = vld [vmem:[%s1196_s0 + $0x60] ss:$12 sps:$4 sm:$0xff]  }
   0xd   :  { %v864_v35 = vld [vmem:[%s1196_s0 + $0x68] ss:$12 sps:$4 sm:$0xff]   ;;  %v866_v37 = vld [vmem:[%s1196_s0 + $0x80] ss:$12 sps:$4 sm:$0xff]   ;;  %v869_v39 = vld [vmem:[%s1196_s0 + $0x98] ss:$12 sps:$4 sm:$0xff]  }
   0xe   :  { %v867_v38 = vld [vmem:[%s1196_s0 + $0x7c] ss:$12 sps:$4 sm:$0xff]   ;;  %v870_v40 = vld [vmem:[%s1196_s0 + $0x78] ss:$12 sps:$4 sm:$0xff]   ;;  %v1055_v60 = vld [vmem:[%s1197_s2] ss:$0 sm:$0xff] }
   0xf   :  { %719 = vmatpush3.bf16.msra.mxu0 %v829_v7  ;;  %817 = vmatpush3.bf16.msra.mxu1 %v829_v7  ;;  %v871_v41 = vld [vmem:[%s1196_s0 + $0xb0] ss:$12 sps:$4 sm:$0xff]  }
  0x10   :  { %720 = vmatprep.subr.bf16.mxu0 %v830_v8  ;;  %810 = vmatprep.subr.bf16.mxu1 %v830_v8 }
  0x13   :  { %721 = vmatpush3.bf16.msra.mxu0 %v831_v9  ;;  %818 = vmatpush3.bf16.msra.mxu1 %v831_v9 }
  0x14   :  { %722 = vmatprep.subr.bf16.mxu0 %v832_v10  ;;  %811 = vmatprep.subr.bf16.mxu1 %v832_v10 }
  0x17   :  { %723 = vmatpush3.bf16.msra.mxu0 %v833_v13  ;;  %819 = vmatpush3.bf16.msra.mxu1 %v833_v13 }
  0x18   :  { %724 = vmatprep.subr.bf16.mxu0 %v834_v14  ;;  %812 = vmatprep.subr.bf16.mxu1 %v834_v14 }
  0x1b   :  { %725 = vmatpush3.bf16.msra.mxu0 %v835_v15  ;;  %820 = vmatpush3.bf16.msra.mxu1 %v835_v15 }
  0x1c   :  { %726 = vmatprep.subr.bf16.mxu0 %v836_v16  ;;  %813 = vmatprep.subr.bf16.mxu1 %v836_v16 }
  0x1f   :  { %727 = vmatpush3.bf16.msra.mxu0 %v837_v17  ;;  %821 = vmatpush3.bf16.msra.mxu1 %v837_v17 }
  0x20   :  { %786 = vmatprep.subr.bf16.mxu1 %v848_v19 }
  0x22   :  { %379 = vmatmul.mubr.bf16.vlgmr.msra.gmra.mxu0 %v838_v18  ;;  %427 = vmatmul.mubr.bf16.vlgmr.msra.gmra.mxu1 %v841_v20 }
  0x23   :  { %386 = vmatprep.mubr.bf16.mxu0 %v844_v21  ;;  %434 = vmatprep.mubr.bf16.mxu1 %v846_v22 }
  0x24   :  { %787 = vmatpush3.bf16.msra.mxu1 %v848_v19 }
  0x25   :  { %788 = vmatprep.subr.bf16.mxu1 %v851_v23 }
  0x28   :  { %789 = vmatpush3.bf16.msra.mxu1 %v851_v23 }
  0x2a   :  { %387 = vmatmul.mubr.bf16.gmra.mxu0 %v849_v24  ;;  %435 = vmatmul.mubr.bf16.gmra.mxu1 %v850_v25 }
  0x2b   :  { %394 = vmatprep.mubr.bf16.mxu0 %v852_v26  ;;  %790 = vmatprep.mubr.msk.bf16.mxu1 %vm321_vm0, %v854_v27 }
  0x32   :  { %395 = vmatmul.mubr.bf16.gmra.mxu0 %v855_v28  ;;  %791 = vmatmul.mubr.msk.bf16.vlgmr.msra.gmra.mxu1 %vm321_vm0, %v856_v29 }
  0x33   :  { %402 = vmatprep.mubr.bf16.mxu0 %v857_v30  ;;  %794 = vmatprep.mubr.msk.bf16.mxu1 %vm321_vm0, %v859_v31 }
  0x3a   :  { %403 = vmatmul.mubr.bf16.gmra.mxu0 %v860_v32  ;;  %795 = vmatmul.mubr.msk.bf16.gmra.mxu1 %vm321_vm0, %v861_v33 }
  0x3b   :  { %410 = vmatprep.mubr.bf16.mxu0 %v862_v34  ;;  %798 = vmatprep.mubr.msk.bf16.mxu1 %vm321_vm0, %v864_v35 }
  0x42   :  { %411 = vmatmul.mubr.bf16.gmra.mxu0 %v865_v36  ;;  %799 = vmatmul.mubr.msk.bf16.gmra.mxu1 %vm321_vm0, %v866_v37 }
  0x43   :  { %418 = vmatprep.mubr.bf16.mxu0 %v867_v38  ;;  %802 = vmatprep.mubr.msk.bf16.mxu1 %vm321_vm0, %v869_v39 }
  0x4a   :  { %419 = vmatmul.mubr.bf16.gmra.mxu0 %v870_v40  ;;  %803 = vmatmul.mubr.msk.bf16.gmra.mxu1 %vm321_vm0, %v871_v41 }
  0xe2   :  { %v728_v42 = vpop.f32.mrf.mxu0  ;;  %v1036_v43 = vpop.f32.mrf.mxu1 }
  0xe4   :  { %v729_v44 = vpop.f32.mrf.mxu0  ;;  %v1038_v45 = vpop.f32.mrf.mxu1 }
  0xe5   :  { %v730_v57 = vadd.f32 %v729_v44, %v728_v42 }
  0xe6   :  { %v731_v46 = vpop.f32.mrf.mxu0  ;;  %v1040_v47 = vpop.f32.mrf.mxu1 }
  0xe7   :  { %v381_v2 = vadd.f32 %v730_v57, %v1055_v60 }
  0xe8   :  { %v732_v48 = vpop.f32.mrf.mxu0  ;;  %v1042_v49 = vpop.f32.mrf.mxu1 }
  0xe9   :  { %v733_v3 = vadd.f32 %v732_v48, %v731_v46 }
  0xea   :  { %v734_v50 = vpop.f32.mrf.mxu0  ;;  %v1044_v51 = vpop.f32.mrf.mxu1 }
  0xeb   :  { %v384_v13 = vadd.f32 %v733_v3, %v1055_v60 }
  0xec   :  { %v735_v52 = vpop.f32.mrf.mxu0  ;;  %v1046_v53 = vpop.f32.mrf.mxu1 }
  0xed   :  { %v736_v54 = vadd.f32 %v735_v52, %v734_v50 }
  0xee   :  { %v737_v55 = vpop.f32.mrf.mxu0  ;;  %v1048_v56 = vpop.f32.mrf.mxu1 }
  0xef   :  { %v389_v62 = vadd.f32 %v736_v54, %v1055_v60 }
  0xf0   :  { %v738_v58 = vpop.f32.mrf.mxu0  ;;  %v1050_v59 = vpop.f32.mrf.mxu1 }
  0xf1   :  { %v739_v61 = vadd.f32 %v738_v58, %v737_v55 }
  0xf2   :  { %v740_v63 = vpop.f32.mrf.mxu0  ;;  %v792_v0 = vpop.f32.mrf.mxu1 }
  0xf3   :  { %v486_v1 = vadd.f32 %v792_v0, %v389_v62  ;;  %v392_v7 = vadd.f32 %v739_v61, %v1055_v60 }
  0xf4   :  { %v741_v4 = vpop.f32.mrf.mxu0  ;;  %v477_v5 = vpop.f32.mrf.mxu1 }
  0xf5   :  { %542 = vst.msk [vmem:[%s1198_s3 + $0x10] sm:$0xff] %vm321_vm0, %v486_v1  ;;  %v478_v6 = vadd.f32 %v477_v5, %v381_v2  ;;  %v742_v10 = vadd.f32 %v741_v4, %v740_v63  ;;  %v597_v19 = vmul.f32 %v486_v1, %v486_v1  ;;  %v559_v30 = vsel %vm321_vm0, %v486_v1, 0.0 }
  0xf6   :  { %v743_v8 = vpop.f32.mrf.mxu0  ;;  %v793_v9 = vpop.f32.mrf.mxu1  ;;  %v772_v5 = vadd.f32 %v1046_v53, %v1044_v51  ;;  %v766_v51 = vadd.f32 %v1038_v45, %v1036_v43 }
  0xf7   :  { %540 = vst.msk [vmem:[%s1198_s3] sm:$0xff] %vm321_vm0, %v478_v6  ;;  %v489_v11 = vadd.f32 %v793_v9, %v392_v7  ;;  %v595_v15 = vmul.f32 %v478_v6, %v478_v6  ;;  %v397_v20 = vadd.f32 %v742_v10, %v1055_v60  ;;  %v556_v21 = vsel %vm321_vm0, %v478_v6, 0.0 }
  0xf8   :  { %v744_v12 = vpop.f32.mrf.mxu0  ;;  %v480_v14 = vpop.f32.mrf.mxu1  ;;  %v614_v39 = vsel %vm321_vm0, %v597_v19, 0.0  ;;  %v437_v19 = vadd.f32 %v772_v5, %v1055_v60 }
  0xf9   :  { %543 = vst.msk [vmem:[%s1198_s3 + $0x18] sm:$0xff] %vm321_vm0, %v489_v11  ;;  %v481_v16 = vadd.f32 %v480_v14, %v384_v13  ;;  %v745_v22 = vadd.f32 %v744_v12, %v743_v8  ;;  %v611_v31 = vsel %vm321_vm0, %v595_v15, 0.0  ;;  %v598_v32 = vmul.f32 %v489_v11, %v489_v11 }
  0xfa   :  { %v746_v17 = vpop.f32.mrf.mxu0  ;;  %v796_v18 = vpop.f32.mrf.mxu1  ;;  %v561_v40 = vsel %vm321_vm0, %v489_v11, 0.0 }
  0xfb   :  { %541 = vst.msk [vmem:[%s1198_s3 + $0x8] sm:$0xff] %vm321_vm0, %v481_v16  ;;  %v557_v23 = vsel %vm321_vm0, %v481_v16, 0.0  ;;  %v596_v24 = vmul.f32 %v481_v16, %v481_v16  ;;  %v400_v44 = vadd.f32 %v745_v22, %v1055_v60  ;;  %v616_v55 = vsel %vm321_vm0, %v598_v32, 0.0 }
  0xfc   :  { %v747_v25 = vpop.f32.mrf.mxu0  ;;  %v493_v26 = vpop.f32.mrf.mxu1  ;;  %v558_v27 = vadd.f32 %v557_v23, %v556_v21  ;;  %v775_v21 = vadd.f32 %v1050_v59, %v1048_v56  ;;  %v429_v56 = vadd.f32 %v766_v51, %v1055_v60 }
  0xfd   :  { %v748_v28 = vadd.f32 %v747_v25, %v746_v17  ;;  %v494_v29 = vadd.f32 %v493_v26, %v397_v20  ;;  %v612_v33 = vsel %vm321_vm0, %v596_v24, 0.0  ;;  %v769_v20 = vadd.f32 %v1042_v49, %v1040_v47 }
  0xfe   :  { %v749_v34 = vpop.f32.mrf.mxu0  ;;  %v797_v35 = vpop.f32.mrf.mxu1  ;;  %v560_v36 = vadd.f32 %v559_v30, %v558_v27  ;;  %v613_v37 = vadd.f32 %v612_v33, %v611_v31 }
  0xff   :  { %v405_v38 = vadd.f32 %v748_v28, %v1055_v60  ;;  %544 = vst.msk [vmem:[%s1198_s3 + $0x20] sm:$0xff] %vm321_vm0, %v494_v29  ;;  %v599_v41 = vmul.f32 %v494_v29, %v494_v29  ;;  %v563_v62 = vsel %vm321_vm0, %v494_v29, 0.0 }
 0x100   :  { %v750_v42 = vpop.f32.mrf.mxu0  ;;  %v496_v46 = vpop.f32.mrf.mxu1  ;;  %v615_v48 = vadd.f32 %v614_v39, %v613_v37  ;;  %v562_v52 = vadd.f32 %v561_v40, %v560_v36  ;;  %v432_v37 = vadd.f32 %v769_v20, %v1055_v60 }
 0x101   :  { %v502_v50 = vadd.f32 %v796_v18, %v405_v38  ;;  %v751_v54 = vadd.f32 %v750_v42, %v749_v34  ;;  %v497_v57 = vadd.f32 %v496_v46, %v400_v44  ;;  %v618_v6 = vsel %vm321_vm0, %v599_v41, 0.0 }
 0x102   :  { %v752_v58 = vpop.f32.mrf.mxu0  ;;  %v1092_v61 = vpop.f32.mrf.mxu1  ;;  %v617_v63 = vadd.f32 %v616_v55, %v615_v48  ;;  %v564_v1 = vadd.f32 %v563_v62, %v562_v52  ;;  %v440_v41 = vadd.f32 %v775_v21, %v1055_v60 }
 0x103   :  { %546 = vst.msk [vmem:[%s1198_s3 + $0x30] sm:$0xff] %vm321_vm0, %v502_v50  ;;  %v408_v0 = vadd.f32 %v751_v54, %v1055_v60  ;;  %545 = vst.msk [vmem:[%s1198_s3 + $0x28] sm:$0xff] %vm321_vm0, %v497_v57  ;;  %v600_v2 = vmul.f32 %v497_v57, %v497_v57  ;;  %v565_v8 = vsel %vm321_vm0, %v497_v57, 0.0  ;;  %v601_v17 = vmul.f32 %v502_v50, %v502_v50 }
 0x104   :  { %v753_v3 = vpop.f32.mrf.mxu0  ;;  %v509_v4 = vpop.f32.mrf.mxu1  ;;  %v619_v9 = vadd.f32 %v618_v6, %v617_v63  ;;  %v566_v53 = vadd.f32 %v565_v8, %v564_v1  ;;  %v567_v45 = vsel %vm321_vm0, %v502_v50, 0.0 }
 0x105   :  { %v505_v7 = vadd.f32 %v797_v35, %v408_v0  ;;  %v754_v10 = vadd.f32 %v753_v3, %v752_v58  ;;  %v620_v13 = vsel %vm321_vm0, %v600_v2, 0.0  ;;  %v622_v29 = vsel %vm321_vm0, %v601_v17, 0.0 }
 0x106   :  { %v755_v11 = vpop.f32.mrf.mxu0  ;;  %v1108_v12 = vpop.f32.mrf.mxu1  ;;  %v621_v22 = vadd.f32 %v620_v13, %v619_v9  ;;  %v568_v28 = vadd.f32 %v567_v45, %v566_v53 }
 0x107   :  { %547 = vst.msk [vmem:[%s1198_s3 + $0x38] sm:$0xff] %vm321_vm0, %v505_v7  ;;  %v413_v14 = vadd.f32 %v754_v10, %v1055_v60  ;;  %v602_v43 = vmul.f32 %v505_v7, %v505_v7  ;;  %v569_v30 = vsel %vm321_vm0, %v505_v7, 0.0 }
 0x108   :  { %v756_v15 = vpop.f32.mrf.mxu0  ;;  %v512_v16 = vpop.f32.mrf.mxu1  ;;  %v623_v32 = vadd.f32 %v622_v29, %v621_v22  ;;  %v570_v42 = vadd.f32 %v569_v30, %v568_v28 }
 0x109   :  { %v757_v18 = vadd.f32 %v756_v15, %v755_v11  ;;  %v510_v23 = vadd.f32 %v509_v4, %v413_v14  ;;  %v624_v39 = vsel %vm321_vm0, %v602_v43, 0.0 }
 0x10a   :  { %v758_v24 = vpop.f32.mrf.mxu0  ;;  %v804_v25 = vpop.f32.mrf.mxu1  ;;  %v625_v62 = vadd.f32 %v624_v39, %v623_v32 }
 0x10b   :  { %v416_v26 = vadd.f32 %v757_v18, %v1055_v60  ;;  %v1125_v27 = vadd.f32 %v804_v25, %v437_v19  ;;  %548 = vst.msk [vmem:[%s1198_s3 + $0x40] sm:$0xff] %vm321_vm0, %v510_v23  ;;  %v603_v47 = vmul.f32 %v510_v23, %v510_v23  ;;  %v571_v38 = vsel %vm321_vm0, %v510_v23, 0.0 }
 0x10c   :  { %v759_v49 = vpop.f32.mrf.mxu0  ;;  %v525_v59 = vpop.f32.mrf.mxu1  ;;  %v572_v58 = vadd.f32 %v571_v38, %v570_v42 }
 0x10d   :  { %v513_v31 = vadd.f32 %v512_v16, %v416_v26  ;;  %554 = vst.msk [vmem:[%s1198_s3 + $0x70] sm:$0xff] %vm321_vm0, %v1125_v27  ;;  %v760_v33 = vadd.f32 %v759_v49, %v758_v24  ;;  %v526_v34 = vadd.f32 %v525_v59, %v429_v56  ;;  %v626_v44 = vsel %vm321_vm0, %v603_v47, 0.0 }
 0x10e   :  { %v761_v35 = vpop.f32.mrf.mxu0  ;;  %v805_v36 = vpop.f32.mrf.mxu1  ;;  %v627_v2 = vadd.f32 %v626_v44, %v625_v62  ;;  %v609_v16 = vmul.f32 %v1125_v27, %v1125_v27  ;;  %v583_v21 = vsel %vm321_vm0, %v1125_v27, 0.0 }
 0x10f   :  { %549 = vst.msk [vmem:[%s1198_s3 + $0x48] sm:$0xff] %vm321_vm0, %v513_v31  ;;  %v604_v40 = vmul.f32 %v513_v31, %v513_v31  ;;  %v421_v46 = vadd.f32 %v760_v33, %v1055_v60  ;;  %552 = vst.msk [vmem:[%s1198_s3 + $0x60] sm:$0xff] %vm321_vm0, %v526_v34  ;;  %v573_v52 = vsel %vm321_vm0, %v513_v31, 0.0  ;;  %v537_v54 = vadd.f32 %v805_v36, %v440_v41 }
 0x110   :  { %v762_v48 = vpop.f32.mrf.mxu0  ;;  %v528_v50 = vpop.f32.mrf.mxu1  ;;  %v574_v3 = vadd.f32 %v573_v52, %v572_v58  ;;  %v607_v8 = vmul.f32 %v526_v34, %v526_v34  ;;  %v579_v51 = vsel %vm321_vm0, %v526_v34, 0.0  ;;  %v638_v43 = vsel %vm321_vm0, %v609_v16, 0.0 }
 0x111   :  { %v763_v55 = vadd.f32 %v762_v48, %v761_v35  ;;  %v529_v57 = vadd.f32 %v528_v50, %v432_v37  ;;  %v518_v63 = vadd.f32 %v1092_v61, %v421_v46  ;;  %v628_v0 = vsel %vm321_vm0, %v604_v40, 0.0  ;;  %555 = vst.msk [vmem:[%s1198_s3 + $0x78] sm:$0xff] %vm321_vm0, %v537_v54 }
 0x112   :  { %v629_v6 = vadd.f32 %v628_v0, %v627_v2  ;;  %v634_v17 = vsel %vm321_vm0, %v607_v8, 0.0  ;;  %v610_v22 = vmul.f32 %v537_v54, %v537_v54  ;;  %v585_v45 = vsel %vm321_vm0, %v537_v54, 0.0 }
 0x113   :  { %v424_v1 = vadd.f32 %v763_v55, %v1055_v60  ;;  %553 = vst.msk [vmem:[%s1198_s3 + $0x68] sm:$0xff] %vm321_vm0, %v529_v57  ;;  %550 = vst.msk [vmem:[%s1198_s3 + $0x50] sm:$0xff] %vm321_vm0, %v518_v63  ;;  %v575_v61 = vsel %vm321_vm0, %v518_v63, 0.0  ;;  %v605_v4 = vmul.f32 %v518_v63, %v518_v63  ;;  %v581_v18 = vsel %vm321_vm0, %v529_v57, 0.0 }
 0x114   :  { %v576_v7 = vadd.f32 %v575_v61, %v574_v3  ;;  %v640_v47 = vsel %vm321_vm0, %v610_v22, 0.0 }
 0x115   :  { %v521_v5 = vadd.f32 %v1108_v12, %v424_v1  ;;  %v630_v60 = vsel %vm321_vm0, %v605_v4, 0.0  ;;  %v608_v12 = vmul.f32 %v529_v57, %v529_v57 }
 0x116   :  { %v631_v11 = vadd.f32 %v630_v60, %v629_v6 }
 0x117   :  { %551 = vst.msk [vmem:[%s1198_s3 + $0x58] sm:$0xff] %vm321_vm0, %v521_v5  ;;  %v577_v9 = vsel %vm321_vm0, %v521_v5, 0.0  ;;  %v606_v10 = vmul.f32 %v521_v5, %v521_v5  ;;  %v636_v23 = vsel %vm321_vm0, %v608_v12, 0.0 }
 0x118   :  { %v578_v13 = vadd.f32 %v577_v9, %v576_v7 }
 0x119   :  { %v632_v53 = vsel %vm321_vm0, %v606_v10, 0.0 }
 0x11a   :  { %v580_v14 = vadd.f32 %v579_v51, %v578_v13  ;;  %v633_v15 = vadd.f32 %v632_v53, %v631_v11 }
 0x11c   :  { %v582_v19 = vadd.f32 %v581_v18, %v580_v14  ;;  %v635_v20 = vadd.f32 %v634_v17, %v633_v15 }
 0x11e   :  { %v584_v24 = vadd.f32 %v583_v21, %v582_v19  ;;  %v637_v25 = vadd.f32 %v636_v23, %v635_v20 }
 0x120   :  { %v586_v26 = vadd.f32 %v585_v45, %v584_v24  ;;  %v639_v28 = vadd.f32 %v638_v43, %v637_v25 }
 0x122   :  { %v587_v49 = vrot.slane %v586_v26, 4  ;;  %v641_v56 = vadd.f32 %v640_v47, %v639_v28 }
 0x124   :  { %v588_v59 = vadd.f32 %v587_v49, %v586_v26  ;;  %v642_v29 = vrot.slane %v641_v56, 4 }
 0x126   :  { %v589_v30 = vrot.slane %v588_v59, 2  ;;  %v643_v31 = vadd.f32 %v642_v29, %v641_v56 }
 0x128   :  { %v590_v27 = vadd.f32 %v589_v30, %v588_v59  ;;  %v644_v32 = vrot.slane %v643_v31, 2 }
 0x12a   :  { %v591_v33 = vrot.slane %v590_v27, 1  ;;  %v645_v34 = vadd.f32 %v644_v32, %v643_v31 }
 0x12c   :  { %v592_v35 = vadd.f32 %v591_v33, %v590_v27  ;;  %v646_v36 = vrot.slane %v645_v34, 1 }
 0x12e   :  { %594 = vst.msk [vmem:[%s1199_s4] sm:$0x1] %vm593_vm1, %v592_v35  ;;  %v647_v37 = vadd.f32 %v646_v36, %v645_v34 }
 0x130   :  { %648 = vst.msk [vmem:[%s1200_s5] sm:$0x1] %vm593_vm1, %v647_v37 }

// kernel: tile.223
= control target key start
LH: loop header
LB: loop body
LE: loop exit
PB: predicated region body
PF: predicated region fallthrough
CT: control target
= control target key end

     0   :  { %s22_s0 = inlined_call_operand.vmem [shape: f32[64], index: 0, kind: input, shape index: {}]   ;;  %s23_s1 = inlined_call_operand.vmem [shape: f32[4,64], index: 1, kind: output, shape index: {}]  }
   0x1   :  { %v4_v0 = vld [vmem:[%s22_s0] ss:$0 sm:$0xff] }
   0x2   :  { %5 = vst [vmem:[%s23_s1] sm:$0xf] %v4_v0 }

// kernel: tile.228
= control target key start
LH: loop header
LB: loop body
LE: loop exit
PB: predicated region body
PF: predicated region fallthrough
CT: control target
= control target key end

     0   :  { %s7_s8 = smov 3  ;;  %vm9_vm0 = vcmask 523264   ;;  %s34_s9 = smov 64   ;;  %vm16_vm1 = vcmask 1048064   ;;  %s54_s0 = inlined_call_operand.vmem [shape: f32[4,64], index: 0, kind: input, shape index: {}]   ;;  %s55_s1 = inlined_call_operand.vmem [shape: f32[1,256], index: 1, kind: output, shape index: {}]  }
   0x1   :  { %v5_v0 = vld [vmem:[%s54_s0] sm:$0xf]  ;;  %s12_s0 = smov 3 }
   0x2   :  { %6 = vst [vmem:[#allocation1] sm:$0xf] %v5_v0 }
   0x9   :  { %v13_v1 = vld [vmem:[#allocation1 + $0x1] ss:$2 sm:%s12_s0]   ;;  %v8_v2 = vld [vmem:[#allocation1] ss:$2 sm:%s7_s8]  }
   0xa   :  { %14 = vrot.lane.b32.xlu0 %v13_v1, %s34_s9  ;;  %10 = vst.msk [vmem:[#allocation0] ss:$8 sm:$0x3] %vm9_vm0, %v8_v2  }
  0x7c   :  { %v15_v3 = vpop.permute.xlu0 %14  }
  0x7d   :  { %17 = vst.msk [vmem:[#allocation0] ss:$8 sm:$0x3] %vm16_vm1, %v15_v3  }
  0x84   :  { %v22_v4 = vld [vmem:[#allocation0] sm:$0x1]  ;;  %v27_v5 = vld [vmem:[#allocation0 + $0x8] sm:$0x1] }
  0x85   :  { %25 = vst [vmem:[%s55_s1] sm:$0x1] %v22_v4  ;;  %32 = vst [vmem:[%s55_s1 + $0x1] sm:$0x1] %v27_v5 }

// kernel: _lambda_.38
= control target key start
LH: loop header
LB: loop body
LE: loop exit
PB: predicated region body
PF: predicated region fallthrough
CT: control target
= control target key end

     0   :  { %v18_v0 = vlaneseq  ;;  %s96_s1 = inlined_call_operand.vmem [shape: f32[1,256], index: 1, kind: input, shape index: {}]   ;;  %s97_s2 = inlined_call_operand.vmem [shape: f32[1,256], index: 2, kind: input, shape index: {}]   ;;  %s98_s0 = inlined_call_operand.vmem [shape: f32[8,256], index: 0, kind: input, shape index: {}]   ;;  %s99_s3 = inlined_call_operand.vmem [shape: bf16[8,256], index: 3, kind: output, shape index: {}]  }
   0x1   :  { %v16_v2 = vld [vmem:[%s96_s1] sm:$0x3]  ;;  %v15_v7 = vld [vmem:[%s98_s0 + $0x8] sm:$0xff] }
   0x2   :  { %v19_v1 = vshrl.u32 %v18_v0, 7  ;;  %v30_v3 = vld [vmem:[%s97_s2] sm:$0x3] }
   0x3   :  { %v14_v6 = vld [vmem:[%s98_s0] sm:$0xff] }
   0x4   :  { %v20_v4 = vsub.s32 0, %v19_v1  ;;  %v24_v5 = vsub.s32 1, %v19_v1 }
   0x6   :  { %v21_v8 = vrot.slane %v16_v2, %v20_v4  ;;  %v25_v9 = vrot.slane %v16_v2, %v24_v5  ;;  %v35_v10 = vrot.slane %v30_v3, %v20_v4  ;;  %v39_v11 = vrot.slane %v30_v3, %v24_v5 }
   0x8   :  { %v28_v12 = vmul.f32 %v21_v8, %v14_v6  ;;  %v29_v13 = vmul.f32 %v25_v9, %v15_v7 }
   0xa   :  { %v42_v14 = vadd.f32 %v35_v10, %v28_v12  ;;  %v43_v15 = vadd.f32 %v39_v11, %v29_v13 }
   0xc   :  { %v44_v16 = vmax.f32 %v42_v14, 0.0  ;;  %v45_v17 = vmax.f32 %v43_v15, 0.0 }
   0xe   :  { %v60_v18 = vpack.c.bf16 %v45_v17, %v44_v16 }
  0x10   :  { %54 = vst [vmem:[%s99_s3] sm:$0xff] %v60_v18 }

// kernel: _lambda_.37
= control target key start
LH: loop header
LB: loop body
LE: loop exit
PB: predicated region body
PF: predicated region fallthrough
CT: control target
= control target key end

     0   :  { %vm207_vm0 = vcmask 261120   ;;  %vm312_vm1 = vcmask 523264   ;;  %vm330_vm2 = vcmask 516096   ;;  %s590_s1 = inlined_call_operand.vmem [shape: bf16[288,64], index: 1, kind: input, shape index: {}]   ;;  %s591_s0 = inlined_call_operand.vmem [shape: bf16[32,288], index: 0, kind: input, shape index: {}]   ;;  %s592_s2 = inlined_call_operand.vmem [shape: f32[1,64], index: 2, kind: input, shape index: {}]   ;;  %s593_s3 = inlined_call_operand.vmem [shape: f32[32,64], index: 3, kind: output, shape index: {0}]   ;;  %s594_s4 = inlined_call_operand.vmem [shape: f32[1,1,64], index: 4, kind: output, shape index: {1}]   ;;  %s595_s5 = inlined_call_operand.vmem [shape: f32[1,1,64], index: 5, kind: output, shape index: {2}]  }
   0x1   :  { %v429_v0 = vld [vmem:[%s590_s1 + $0x78] sm:$0xff]   ;;  %v431_v2 = vld [vmem:[%s590_s1 + $0x70] sm:$0xff]   ;;  %v433_v4 = vld [vmem:[%s590_s1 + $0x68] sm:$0xff]  }
   0x2   :  { %v430_v1 = vld [vmem:[%s590_s1 + $0x38] sm:$0xff]   ;;  %389 = vmatprep.subr.bf16.mxu0 %v429_v0  ;;  %v432_v3 = vld [vmem:[%s590_s1 + $0x30] sm:$0xff]   ;;  %v434_v5 = vld [vmem:[%s590_s1 + $0x28] sm:$0xff]  }
   0x3   :  { %390 = vmatpush3.bf16.msra.mxu0 %v430_v1  ;;  %v435_v6 = vld [vmem:[%s590_s1 + $0x60] sm:$0xff]   ;;  %v437_v8 = vld [vmem:[%s590_s1 + $0x58] sm:$0xff]   ;;  %v443_v9 = vld [vmem:[%s590_s1 + $0x88] sm:$0xff]  }
   0x4   :  { %391 = vmatprep.subr.bf16.mxu0 %v431_v2  ;;  %v436_v7 = vld [vmem:[%s590_s1 + $0x20] sm:$0xff]   ;;  %v438_v10 = vld [vmem:[%s590_s1 + $0x18] sm:$0xff]   ;;  %v439_v11 = vld [vmem:[%s590_s1 + $0x50] sm:$0xff]   ;;  %421 = vmatprep.subr.bf16.mxu1 %v443_v9 }
   0x5   :  { %v440_v12 = vld [vmem:[%s590_s1 + $0x10] sm:$0xff]   ;;  %422 = vmatpush3.bf16.msra.mxu1 %v443_v9  ;;  %v446_v13 = vld [vmem:[%s590_s1 + $0x80] sm:$0xff]   ;;  %v441_v14 = vld [vmem:[%s590_s1 + $0x48] sm:$0xff]  }
   0x6   :  { %423 = vmatprep.subr.bf16.mxu1 %v446_v13  ;;  %v449_v15 = vld [vmem:[%s591_s0 + $0x4] ss:$12 sps:$4 sm:$0xff]   ;;  %v450_v16 = vld [vmem:[%s591_s0 + $0x8] ss:$12 sps:$4 sm:$0xff]   ;;  %v451_v17 = vld [vmem:[%s591_s0 + $0x20] ss:$12 sps:$4 sm:$0xff]  }
   0x7   :  { %392 = vmatpush3.bf16.msra.mxu0 %v432_v3  ;;  %246 = vmatprep.mubr.bf16.mxu0 %v449_v15  ;;  %v442_v18 = vld [vmem:[%s590_s1 + $0x8] sm:$0xff]   ;;  %v444_v19 = vld [vmem:[%s590_s1 + $0x40] sm:$0xff]  }
   0x8   :  { %393 = vmatprep.subr.bf16.mxu0 %v433_v4  ;;  %425 = vmatprep.mubr.msk.bf16.mxu1 %vm207_vm0, %v450_v16  ;;  %v445_v20 = vld [vmem:[%s590_s1] sm:$0xff]   ;;  %v452_v22 = vld [vmem:[%s591_s0 + $0x1c] ss:$12 sps:$4 sm:$0xff]  }
   0x9   :  { %424 = vmatpush3.bf16.msra.mxu1 %v446_v13  ;;  %v447_v21 = vld [vmem:[%s591_s0] ss:$12 sps:$4 sm:$0xff]   ;;  %v454_v23 = vld [vmem:[%s591_s0 + $0x18] ss:$12 sps:$4 sm:$0xff]  }
   0xa   :  { %v362_v27 = vld [vmem:[%s592_s2] ss:$0 sm:$0xff] }
   0xb   :  { %394 = vmatpush3.bf16.msra.mxu0 %v434_v5 }
   0xc   :  { %395 = vmatprep.subr.bf16.mxu0 %v435_v6  ;;  %426 = vmatmul.mubr.msk.bf16.vlgmr.msra.gmra.mxu1 %vm207_vm0, %v451_v17 }
   0xf   :  { %396 = vmatpush3.bf16.msra.mxu0 %v436_v7 }
  0x10   :  { %397 = vmatprep.subr.bf16.mxu0 %v437_v8 }
  0x13   :  { %398 = vmatpush3.bf16.msra.mxu0 %v438_v10 }
  0x14   :  { %399 = vmatprep.subr.bf16.mxu0 %v439_v11 }
  0x17   :  { %400 = vmatpush3.bf16.msra.mxu0 %v440_v12 }
  0x18   :  { %401 = vmatprep.subr.bf16.mxu0 %v441_v14 }
  0x1b   :  { %402 = vmatpush3.bf16.msra.mxu0 %v442_v18 }
  0x1c   :  { %403 = vmatprep.subr.bf16.mxu0 %v444_v19 }
  0x1f   :  { %404 = vmatpush3.bf16.msra.mxu0 %v445_v20 }
  0x22   :  { %247 = vmatmul.mubr.bf16.vlgmr.msra.gmra.mxu0 %v447_v21 }
  0x23   :  { %254 = vmatprep.mubr.bf16.mxu0 %v452_v22 }
  0x2a   :  { %255 = vmatmul.mubr.bf16.gmra.mxu0 %v454_v23 }
  0xcc   :  { %v427_v24 = vpop.f32.mrf.mxu1 }
  0xce   :  { %v297_v28 = vpop.f32.mrf.mxu1 }
  0xd0   :  { %v428_v33 = vpop.f32.mrf.mxu1 }
  0xd2   :  { %v300_v38 = vpop.f32.mrf.mxu1 }
  0xe2   :  { %v405_v25 = vpop.f32.mrf.mxu0 }
  0xe4   :  { %v406_v26 = vpop.f32.mrf.mxu0 }
  0xe5   :  { %v407_v29 = vadd.f32 %v406_v26, %v405_v25 }
  0xe6   :  { %v408_v30 = vpop.f32.mrf.mxu0 }
  0xe7   :  { %v249_v31 = vadd.f32 %v407_v29, %v362_v27 }
  0xe8   :  { %v409_v32 = vpop.f32.mrf.mxu0 }
  0xe9   :  { %v298_v34 = vadd.f32 %v297_v28, %v249_v31  ;;  %v410_v35 = vadd.f32 %v409_v32, %v408_v30 }
  0xea   :  { %v411_v36 = vpop.f32.mrf.mxu0 }
  0xeb   :  { %313 = vst.msk [vmem:[%s593_s3] sm:$0xff] %vm312_vm1, %v298_v34  ;;  %v252_v37 = vadd.f32 %v410_v35, %v362_v27  ;;  %v332_v46 = vmul.f32 %v298_v34, %v298_v34  ;;  %v317_v50 = vsel %vm312_vm1, %v298_v34, 0.0 }
  0xec   :  { %v412_v39 = vpop.f32.mrf.mxu0 }
  0xed   :  { %v301_v40 = vadd.f32 %v300_v38, %v252_v37  ;;  %v413_v41 = vadd.f32 %v412_v39, %v411_v36  ;;  %v336_v56 = vsel %vm312_vm1, %v332_v46, 0.0 }
  0xee   :  { %v414_v42 = vpop.f32.mrf.mxu0 }
  0xef   :  { %314 = vst.msk [vmem:[%s593_s3 + $0x8] sm:$0xff] %vm312_vm1, %v301_v40  ;;  %v333_v43 = vmul.f32 %v301_v40, %v301_v40  ;;  %v257_v44 = vadd.f32 %v413_v41, %v362_v27  ;;  %v318_v47 = vsel %vm312_vm1, %v301_v40, 0.0 }
  0xf0   :  { %v415_v45 = vpop.f32.mrf.mxu0  ;;  %v319_v55 = vadd.f32 %v318_v47, %v317_v50 }
  0xf1   :  { %v306_v48 = vadd.f32 %v427_v24, %v257_v44  ;;  %v416_v49 = vadd.f32 %v415_v45, %v414_v42  ;;  %v337_v51 = vsel %vm312_vm1, %v333_v43, 0.0 }
  0xf2   :  { %v338_v59 = vadd.f32 %v337_v51, %v336_v56 }
  0xf3   :  { %315 = vst.msk [vmem:[%s593_s3 + $0x10] sm:$0xff] %vm312_vm1, %v306_v48  ;;  %v320_v52 = vsel %vm312_vm1, %v306_v48, 0.0  ;;  %v334_v53 = vmul.f32 %v306_v48, %v306_v48  ;;  %v260_v54 = vadd.f32 %v416_v49, %v362_v27 }
  0xf4   :  { %v321_v60 = vadd.f32 %v320_v52, %v319_v55 }
  0xf5   :  { %v339_v57 = vsel %vm312_vm1, %v334_v53, 0.0  ;;  %v309_v58 = vadd.f32 %v428_v33, %v260_v54 }
  0xf6   :  { %v340_v63 = vadd.f32 %v339_v57, %v338_v59 }
  0xf7   :  { %316 = vst.msk [vmem:[%s593_s3 + $0x18] sm:$0xff] %vm312_vm1, %v309_v58  ;;  %v322_v61 = vsel %vm312_vm1, %v309_v58, 0.0  ;;  %v335_v62 = vmul.f32 %v309_v58, %v309_v58 }
  0xf8   :  { %v323_v0 = vadd.f32 %v322_v61, %v321_v60 }
  0xf9   :  { %v341_v1 = vsel %vm312_vm1, %v335_v62, 0.0 }
  0xfa   :  { %v324_v2 = vrot.slane %v323_v0, 4  ;;  %v342_v3 = vadd.f32 %v341_v1, %v340_v63 }
  0xfc   :  { %v325_v4 = vadd.f32 %v324_v2, %v323_v0  ;;  %v343_v5 = vrot.slane %v342_v3, 4 }
  0xfe   :  { %v326_v6 = vrot.slane %v325_v4, 2  ;;  %v344_v7 = vadd.f32 %v343_v5, %v342_v3 }
 0x100   :  { %v327_v8 = vadd.f32 %v326_v6, %v325_v4  ;;  %v345_v9 = vrot.slane %v344_v7, 2 }
 0x102   :  { %v328_v10 = vrot.slane %v327_v8, 1  ;;  %v346_v11 = vadd.f32 %v345_v9, %v344_v7 }
 0x104   :  { %v329_v12 = vadd.f32 %v328_v10, %v327_v8  ;;  %v347_v13 = vrot.slane %v346_v11, 1 }
 0x106   :  { %331 = vst.msk [vmem:[%s594_s4] sm:$0x1] %vm330_vm2, %v329_v12  ;;  %v348_v14 = vadd.f32 %v347_v13, %v346_v11 }
 0x108   :  { %349 = vst.msk [vmem:[%s595_s5] sm:$0x1] %vm330_vm2, %v348_v14 }

// kernel: _lambda_.39
= control target key start
LH: loop header
LB: loop body
LE: loop exit
PB: predicated region body
PF: predicated region fallthrough
CT: control target
= control target key end

     0   :  { %vm375_vm0 = vcmask 523264   ;;  %vm546_vm1 = vcmask 516096   ;;  %s954_s1 = inlined_call_operand.vmem [shape: bf16[576,64], index: 1, kind: input, shape index: {}]   ;;  %s955_s0 = inlined_call_operand.vmem [shape: bf16[32,576], index: 0, kind: input, shape index: {}]   ;;  %s956_s2 = inlined_call_operand.vmem [shape: f32[1,64], index: 2, kind: input, shape index: {}]   ;;  %s957_s3 = inlined_call_operand.vmem [shape: f32[32,64], index: 3, kind: output, shape index: {0}]   ;;  %s958_s4 = inlined_call_operand.vmem [shape: f32[1,1,64], index: 4, kind: output, shape index: {1}]   ;;  %s959_s5 = inlined_call_operand.vmem [shape: f32[1,1,64], index: 5, kind: output, shape index: {2}]  }
   0x1   :  { %v701_v0 = vld [vmem:[%s954_s1 + $0x78] sm:$0xff]   ;;  %v705_v4 = vld [vmem:[%s954_s1 + $0x70] sm:$0xff]   ;;  %v709_v8 = vld [vmem:[%s954_s1 + $0x68] sm:$0xff]  }
   0x2   :  { %v702_v1 = vld [vmem:[%s954_s1 + $0x38] sm:$0xff]   ;;  %627 = vmatprep.subr.bf16.mxu0 %v701_v0  ;;  %v706_v5 = vld [vmem:[%s954_s1 + $0x30] sm:$0xff]   ;;  %v710_v9 = vld [vmem:[%s954_s1 + $0x28] sm:$0xff]  }
   0x3   :  { %v703_v2 = vld [vmem:[%s954_s1 + $0xf8] sm:$0xff]   ;;  %628 = vmatpush3.bf16.msra.mxu0 %v702_v1  ;;  %v707_v6 = vld [vmem:[%s954_s1 + $0xf0] sm:$0xff]   ;;  %v711_v10 = vld [vmem:[%s954_s1 + $0xe8] sm:$0xff]  }
   0x4   :  { %v704_v3 = vld [vmem:[%s954_s1 + $0xb8] sm:$0xff]   ;;  %655 = vmatprep.subr.bf16.mxu1 %v703_v2  ;;  %629 = vmatprep.subr.bf16.mxu0 %v705_v4  ;;  %v708_v7 = vld [vmem:[%s954_s1 + $0xb0] sm:$0xff]   ;;  %v712_v11 = vld [vmem:[%s954_s1 + $0xa8] sm:$0xff]  }
   0x5   :  { %656 = vmatpush3.bf16.msra.mxu1 %v704_v3  ;;  %v713_v12 = vld [vmem:[%s954_s1 + $0x60] sm:$0xff]   ;;  %v717_v16 = vld [vmem:[%s954_s1 + $0x58] sm:$0xff]   ;;  %v721_v20 = vld [vmem:[%s954_s1 + $0x50] sm:$0xff]  }
   0x6   :  { %657 = vmatprep.subr.bf16.mxu1 %v707_v6  ;;  %v714_v13 = vld [vmem:[%s954_s1 + $0x20] sm:$0xff]   ;;  %v718_v17 = vld [vmem:[%s954_s1 + $0x18] sm:$0xff]   ;;  %v722_v21 = vld [vmem:[%s954_s1 + $0x10] sm:$0xff]  }
   0x7   :  { %630 = vmatpush3.bf16.msra.mxu0 %v706_v5  ;;  %v715_v14 = vld [vmem:[%s954_s1 + $0xe0] sm:$0xff]   ;;  %v719_v18 = vld [vmem:[%s954_s1 + $0xd8] sm:$0xff]   ;;  %v723_v22 = vld [vmem:[%s954_s1 + $0xd0] sm:$0xff]  }
   0x8   :  { %631 = vmatprep.subr.bf16.mxu0 %v709_v8  ;;  %v716_v15 = vld [vmem:[%s954_s1 + $0xa0] sm:$0xff]   ;;  %v720_v19 = vld [vmem:[%s954_s1 + $0x98] sm:$0xff]   ;;  %v724_v23 = vld [vmem:[%s954_s1 + $0x90] sm:$0xff]  }
   0x9   :  { %658 = vmatpush3.bf16.msra.mxu1 %v708_v7  ;;  %v725_v24 = vld [vmem:[%s954_s1 + $0x48] sm:$0xff]   ;;  %v729_v28 = vld [vmem:[%s954_s1 + $0x40] sm:$0xff]   ;;  %v736_v34 = vld [vmem:[%s954_s1 + $0x118] sm:$0xff]  }
   0xa   :  { %659 = vmatprep.subr.bf16.mxu1 %v711_v10  ;;  %v726_v25 = vld [vmem:[%s954_s1 + $0x8] sm:$0xff]   ;;  %v730_v29 = vld [vmem:[%s954_s1] sm:$0xff]   ;;  %v740_v37 = vld [vmem:[%s954_s1 + $0x110] sm:$0xff]  }
   0xb   :  { %632 = vmatpush3.bf16.msra.mxu0 %v710_v9  ;;  %v727_v26 = vld [vmem:[%s954_s1 + $0xc8] sm:$0xff]   ;;  %v731_v30 = vld [vmem:[%s954_s1 + $0xc0] sm:$0xff]  }
   0xc   :  { %633 = vmatprep.subr.bf16.mxu0 %v713_v12  ;;  %v728_v27 = vld [vmem:[%s954_s1 + $0x88] sm:$0xff]   ;;  %v732_v31 = vld [vmem:[%s955_s0] ss:$20 sps:$4 sm:$0xff]   ;;  %v734_v32 = vld [vmem:[%s955_s0 + $0x4] ss:$20 sps:$4 sm:$0xff]  }
   0xd   :  { %660 = vmatpush3.bf16.msra.mxu1 %v712_v11  ;;  %v735_v33 = vld [vmem:[%s954_s1 + $0x80] sm:$0xff]   ;;  %414 = vmatprep.mubr.bf16.mxu0 %v734_v32  ;;  %v737_v35 = vld [vmem:[%s955_s0 + $0x8] ss:$20 sps:$4 sm:$0xff]   ;;  %v750_v45 = vld [vmem:[%s955_s0 + $0x38] ss:$20 sps:$4 sm:$0xff]  }
   0xe   :  { %661 = vmatprep.subr.bf16.mxu1 %v715_v14  ;;  %v739_v36 = vld [vmem:[%s955_s0 + $0xc] ss:$20 sps:$4 sm:$0xff]   ;;  %v743_v39 = vld [vmem:[%s955_s0 + $0x28] ss:$20 sps:$4 sm:$0xff]   ;;  %v747_v42 = vld [vmem:[%s955_s0 + $0x30] ss:$20 sps:$4 sm:$0xff]  }
   0xf   :  { %634 = vmatpush3.bf16.msra.mxu0 %v714_v13  ;;  %463 = vmatprep.mubr.bf16.mxu1 %v739_v36  ;;  %v741_v38 = vld [vmem:[%s955_s0 + $0x2c] ss:$20 sps:$4 sm:$0xff]   ;;  %v745_v41 = vld [vmem:[%s955_s0 + $0x34] ss:$20 sps:$4 sm:$0xff]   ;;  %v749_v44 = vld [vmem:[%s955_s0 + $0x10] ss:$20 sps:$4 sm:$0xff]  }
  0x10   :  { %635 = vmatprep.subr.bf16.mxu0 %v717_v16  ;;  %v744_v40 = vld [vmem:[%s954_s1 + $0x108] sm:$0xff]   ;;  %v748_v43 = vld [vmem:[%s954_s1 + $0x100] sm:$0xff]  }
  0x11   :  { %662 = vmatpush3.bf16.msra.mxu1 %v716_v15  ;;  %v578_v56 = vld [vmem:[%s956_s2] ss:$0 sm:$0xff] }
  0x12   :  { %663 = vmatprep.subr.bf16.mxu1 %v719_v18 }
  0x13   :  { %636 = vmatpush3.bf16.msra.mxu0 %v718_v17 }
  0x14   :  { %637 = vmatprep.subr.bf16.mxu0 %v721_v20 }
  0x15   :  { %664 = vmatpush3.bf16.msra.mxu1 %v720_v19 }
  0x16   :  { %665 = vmatprep.subr.bf16.mxu1 %v723_v22 }
  0x17   :  { %638 = vmatpush3.bf16.msra.mxu0 %v722_v21 }
  0x18   :  { %639 = vmatprep.subr.bf16.mxu0 %v725_v24 }
  0x19   :  { %666 = vmatpush3.bf16.msra.mxu1 %v724_v23 }
  0x1a   :  { %667 = vmatprep.subr.bf16.mxu1 %v727_v26 }
  0x1b   :  { %640 = vmatpush3.bf16.msra.mxu0 %v726_v25 }
  0x1c   :  { %641 = vmatprep.subr.bf16.mxu0 %v729_v28 }
  0x1d   :  { %668 = vmatpush3.bf16.msra.mxu1 %v728_v27 }
  0x1e   :  { %669 = vmatprep.subr.bf16.mxu1 %v731_v30 }
  0x1f   :  { %642 = vmatpush3.bf16.msra.mxu0 %v730_v29 }
  0x20   :  { %689 = vmatprep.subr.bf16.mxu0 %v736_v34 }
  0x21   :  { %670 = vmatpush3.bf16.msra.mxu1 %v735_v33 }
  0x22   :  { %415 = vmatmul.mubr.bf16.vlgmr.msra.gmra.mxu0 %v732_v31 }
  0x23   :  { %690 = vmatpush3.bf16.msra.mxu0 %v736_v34  ;;  %422 = vmatprep.mubr.bf16.mxu0 %v741_v38 }
  0x24   :  { %464 = vmatmul.mubr.bf16.vlgmr.msra.gmra.mxu1 %v737_v35  ;;  %691 = vmatprep.subr.bf16.mxu0 %v740_v37 }
  0x25   :  { %471 = vmatprep.mubr.bf16.mxu1 %v745_v41 }
  0x27   :  { %692 = vmatpush3.bf16.msra.mxu0 %v740_v37 }
  0x28   :  { %693 = vmatprep.subr.bf16.mxu0 %v744_v40 }
  0x2a   :  { %423 = vmatmul.mubr.bf16.gmra.mxu0 %v743_v39 }
  0x2b   :  { %697 = vmatprep.mubr.msk.bf16.mxu0 %vm375_vm0, %v749_v44  ;;  %694 = vmatpush3.bf16.msra.mxu0 %v744_v40 }
  0x2c   :  { %472 = vmatmul.mubr.bf16.gmra.mxu1 %v747_v42  ;;  %695 = vmatprep.subr.bf16.mxu0 %v748_v43 }
  0x2f   :  { %696 = vmatpush3.bf16.msra.mxu0 %v748_v43 }
  0x32   :  { %698 = vmatmul.mubr.msk.bf16.vlgmr.msra.gmra.mxu0 %vm375_vm0, %v750_v45 }
  0xe2   :  { %v643_v46 = vpop.f32.mrf.mxu0 }
  0xe4   :  { %v644_v47 = vpop.f32.mrf.mxu0  ;;  %v671_v48 = vpop.f32.mrf.mxu1 }
  0xe5   :  { %v645_v54 = vadd.f32 %v644_v47, %v643_v46 }
  0xe6   :  { %v646_v49 = vpop.f32.mrf.mxu0  ;;  %v672_v50 = vpop.f32.mrf.mxu1 }
  0xe7   :  { %v417_v61 = vadd.f32 %v645_v54, %v578_v56  ;;  %v673_v62 = vadd.f32 %v672_v50, %v671_v48 }
  0xe8   :  { %v647_v51 = vpop.f32.mrf.mxu0  ;;  %v674_v52 = vpop.f32.mrf.mxu1 }
  0xe9   :  { %v648_v1 = vadd.f32 %v647_v51, %v646_v49  ;;  %v466_v10 = vadd.f32 %v673_v62, %v417_v61 }
  0xea   :  { %v649_v53 = vpop.f32.mrf.mxu0  ;;  %v675_v55 = vpop.f32.mrf.mxu1 }
  0xeb   :  { %v420_v11 = vadd.f32 %v648_v1, %v578_v56  ;;  %v676_v12 = vadd.f32 %v675_v55, %v674_v52 }
  0xec   :  { %v650_v57 = vpop.f32.mrf.mxu0  ;;  %v677_v59 = vpop.f32.mrf.mxu1 }
  0xed   :  { %v651_v58 = vadd.f32 %v650_v57, %v649_v53  ;;  %v469_v20 = vadd.f32 %v676_v12, %v420_v11 }
  0xee   :  { %v652_v60 = vpop.f32.mrf.mxu0  ;;  %v678_v0 = vpop.f32.mrf.mxu1 }
  0xef   :  { %v425_v63 = vadd.f32 %v651_v58, %v578_v56  ;;  %v679_v2 = vadd.f32 %v678_v0, %v677_v59 }
  0xf0   :  { %v653_v3 = vpop.f32.mrf.mxu0  ;;  %v680_v5 = vpop.f32.mrf.mxu1 }
  0xf1   :  { %v654_v4 = vadd.f32 %v653_v3, %v652_v60  ;;  %v474_v6 = vadd.f32 %v679_v2, %v425_v63 }
  0xf2   :  { %v681_v8 = vpop.f32.mrf.mxu1  ;;  %v699_v9 = vpop.f32.mrf.mxu0 }
  0xf3   :  { %v428_v7 = vadd.f32 %v654_v4, %v578_v56  ;;  %v682_v13 = vadd.f32 %v681_v8, %v680_v5  ;;  %v523_v14 = vadd.f32 %v699_v9, %v474_v6 }
  0xf4   :  { %v514_v15 = vpop.f32.mrf.mxu0 }
  0xf5   :  { %531 = vst.msk [vmem:[%s957_s3 + $0x10] sm:$0xff] %vm375_vm0, %v523_v14  ;;  %v515_v16 = vadd.f32 %v514_v15, %v466_v10  ;;  %v477_v17 = vadd.f32 %v682_v13, %v428_v7  ;;  %v550_v24 = vmul.f32 %v523_v14, %v523_v14  ;;  %v536_v29 = vsel %vm375_vm0, %v523_v14, 0.0 }
  0xf6   :  { %v700_v18 = vpop.f32.mrf.mxu0 }
  0xf7   :  { %529 = vst.msk [vmem:[%s957_s3] sm:$0xff] %vm375_vm0, %v515_v16  ;;  %v526_v19 = vadd.f32 %v700_v18, %v477_v17  ;;  %v548_v22 = vmul.f32 %v515_v16, %v515_v16  ;;  %v533_v25 = vsel %vm375_vm0, %v515_v16, 0.0  ;;  %v555_v35 = vsel %vm375_vm0, %v550_v24, 0.0 }
  0xf8   :  { %v517_v21 = vpop.f32.mrf.mxu0 }
  0xf9   :  { %532 = vst.msk [vmem:[%s957_s3 + $0x18] sm:$0xff] %vm375_vm0, %v526_v19  ;;  %v518_v23 = vadd.f32 %v517_v21, %v469_v20  ;;  %v552_v30 = vsel %vm375_vm0, %v548_v22, 0.0  ;;  %v551_v31 = vmul.f32 %v526_v19, %v526_v19  ;;  %v538_v36 = vsel %vm375_vm0, %v526_v19, 0.0 }
  0xfb   :  { %530 = vst.msk [vmem:[%s957_s3 + $0x8] sm:$0xff] %vm375_vm0, %v518_v23  ;;  %v534_v26 = vsel %vm375_vm0, %v518_v23, 0.0  ;;  %v549_v27 = vmul.f32 %v518_v23, %v518_v23  ;;  %v557_v39 = vsel %vm375_vm0, %v551_v31, 0.0 }
  0xfc   :  { %v535_v28 = vadd.f32 %v534_v26, %v533_v25 }
  0xfd   :  { %v553_v32 = vsel %vm375_vm0, %v549_v27, 0.0 }
  0xfe   :  { %v537_v33 = vadd.f32 %v536_v29, %v535_v28  ;;  %v554_v34 = vadd.f32 %v553_v32, %v552_v30 }
 0x100   :  { %v539_v37 = vadd.f32 %v538_v36, %v537_v33  ;;  %v556_v38 = vadd.f32 %v555_v35, %v554_v34 }
 0x102   :  { %v540_v40 = vrot.slane %v539_v37, 4  ;;  %v558_v41 = vadd.f32 %v557_v39, %v556_v38 }
 0x104   :  { %v541_v42 = vadd.f32 %v540_v40, %v539_v37  ;;  %v559_v43 = vrot.slane %v558_v41, 4 }
 0x106   :  { %v542_v44 = vrot.slane %v541_v42, 2  ;;  %v560_v45 = vadd.f32 %v559_v43, %v558_v41 }
 0x108   :  { %v543_v46 = vadd.f32 %v542_v44, %v541_v42  ;;  %v561_v47 = vrot.slane %v560_v45, 2 }
 0x10a   :  { %v544_v48 = vrot.slane %v543_v46, 1  ;;  %v562_v49 = vadd.f32 %v561_v47, %v560_v45 }
 0x10c   :  { %v545_v50 = vadd.f32 %v544_v48, %v543_v46  ;;  %v563_v51 = vrot.slane %v562_v49, 1 }
 0x10e   :  { %547 = vst.msk [vmem:[%s958_s4] sm:$0x1] %vm546_vm1, %v545_v50  ;;  %v564_v52 = vadd.f32 %v563_v51, %v562_v49 }
 0x110   :  { %565 = vst.msk [vmem:[%s959_s5] sm:$0x1] %vm546_vm1, %v564_v52 }

// kernel: tile.253
= control target key start
LH: loop header
LB: loop body
LE: loop exit
PB: predicated region body
PF: predicated region fallthrough
CT: control target
= control target key end

     0   :  { %s22_s0 = inlined_call_operand.vmem [shape: f32[128], index: 0, kind: input, shape index: {}]   ;;  %s23_s1 = inlined_call_operand.vmem [shape: f32[2,128], index: 1, kind: output, shape index: {}]  }
   0x1   :  { %v4_v0 = vld [vmem:[%s22_s0] ss:$0 sm:$0xff] }
   0x2   :  { %5 = vst [vmem:[%s23_s1] sm:$0x3] %v4_v0 }

// kernel: _lambda_.44
= control target key start
LH: loop header
LB: loop body
LE: loop exit
PB: predicated region body
PF: predicated region fallthrough
CT: control target
= control target key end

     0   :  { %v17_v0 = vlaneseq  ;;  %s97_s1 = inlined_call_operand.vmem [shape: f32[1,256], index: 1, kind: input, shape index: {}]   ;;  %s98_s2 = inlined_call_operand.vmem [shape: f32[1,256], index: 2, kind: input, shape index: {}]   ;;  %s99_s0 = inlined_call_operand.vmem [shape: f32[4,256], index: 0, kind: input, shape index: {}]   ;;  %s100_s3 = inlined_call_operand.vmem [shape: bf16[4,256], index: 3, kind: output, shape index: {}]  }
   0x1   :  { %v15_v2 = vld [vmem:[%s97_s1] sm:$0x3] }
   0x2   :  { %v18_v1 = vshrl.u32 %v17_v0, 7  ;;  %v28_v3 = vld [vmem:[%s98_s2] sm:$0x3] }
   0x3   :  { %v14_v10 = vld [vmem:[%s99_s0] sm:$0xff] }
   0x4   :  { %v19_v4 = vsub.s32 0, %v18_v1  ;;  %v23_v5 = vsub.s32 1, %v18_v1 }
   0x6   :  { %v20_v6 = vrot.slane %v15_v2, %v19_v4  ;;  %v24_v7 = vrot.slane %v15_v2, %v23_v5  ;;  %v33_v8 = vrot.slane %v28_v3, %v19_v4  ;;  %v37_v9 = vrot.slane %v28_v3, %v23_v5 }
   0x8   :  { %v25_v11 = vcombine.low %v20_v6, %v24_v7  ;;  %v38_v12 = vcombine.low %v33_v8, %v37_v9 }
   0xa   :  { %v27_v13 = vmul.f32 %v25_v11, %v14_v10 }
   0xc   :  { %v40_v14 = vadd.f32 %v38_v12, %v27_v13 }
   0xe   :  { %v41_v15 = vmax.f32 %v40_v14, 0.0 }
  0x10   :  { %v43_v16 = vcombine.high %v41_v15, %v41_v15 }
  0x12   :  { %v63_v17 = vpack.c.bf16 %v43_v16, %v41_v15 }
  0x14   :  { %64 = vst.sshfl [vmem:[%s100_s3] sm:$0x33 pattern:$0x76325410] %v63_v17 }

// kernel: _lambda_.43
= control target key start
LH: loop header
LB: loop body
LE: loop exit
PB: predicated region body
PF: predicated region fallthrough
CT: control target
= control target key end

     0   :  { %v632_v35 = vmov 0.0   ;;  %vm633_vm0 = vmmov 0   ;;  %vm333_vm1 = vcmask 523264   ;;  %s793_s1 = inlined_call_operand.vmem [shape: bf16[576,128], index: 1, kind: input, shape index: {}]   ;;  %s794_s0 = inlined_call_operand.vmem [shape: bf16[8,576], index: 0, kind: input, shape index: {}]   ;;  %s795_s2 = inlined_call_operand.vmem [shape: f32[1,128], index: 2, kind: input, shape index: {}]   ;;  %s796_s3 = inlined_call_operand.vmem [shape: f32[8,128], index: 3, kind: output, shape index: {0}]   ;;  %s797_s4 = inlined_call_operand.vmem [shape: f32[1,1,128], index: 4, kind: output, shape index: {1}]   ;;  %s798_s5 = inlined_call_operand.vmem [shape: f32[1,1,128], index: 5, kind: output, shape index: {2}]  }
   0x1   :  { %v591_v0 = vld [vmem:[%s793_s1 + $0x78] sm:$0xff]   ;;  %v595_v4 = vld [vmem:[%s793_s1 + $0x70] sm:$0xff]   ;;  %v599_v8 = vld [vmem:[%s793_s1 + $0x68] sm:$0xff]  }
   0x2   :  { %v592_v1 = vld [vmem:[%s793_s1 + $0x38] sm:$0xff]   ;;  %528 = vmatprep.subr.bf16.mxu0 %v591_v0  ;;  %v596_v5 = vld [vmem:[%s793_s1 + $0x30] sm:$0xff]   ;;  %v600_v9 = vld [vmem:[%s793_s1 + $0x28] sm:$0xff]  }
   0x3   :  { %v593_v2 = vld [vmem:[%s793_s1 + $0xf8] sm:$0xff]   ;;  %529 = vmatpush3.bf16.msra.mxu0 %v592_v1  ;;  %v597_v6 = vld [vmem:[%s793_s1 + $0xf0] sm:$0xff]   ;;  %v601_v10 = vld [vmem:[%s793_s1 + $0xe8] sm:$0xff]  }
   0x4   :  { %v594_v3 = vld [vmem:[%s793_s1 + $0xb8] sm:$0xff]   ;;  %550 = vmatprep.subr.bf16.mxu1 %v593_v2  ;;  %530 = vmatprep.subr.bf16.mxu0 %v595_v4  ;;  %v598_v7 = vld [vmem:[%s793_s1 + $0xb0] sm:$0xff]   ;;  %v602_v11 = vld [vmem:[%s793_s1 + $0xa8] sm:$0xff]  }
   0x5   :  { %551 = vmatpush3.bf16.msra.mxu1 %v594_v3  ;;  %v603_v12 = vld [vmem:[%s793_s1 + $0x60] sm:$0xff]   ;;  %v607_v16 = vld [vmem:[%s793_s1 + $0x58] sm:$0xff]   ;;  %v611_v20 = vld [vmem:[%s793_s1 + $0x50] sm:$0xff]  }
   0x6   :  { %552 = vmatprep.subr.bf16.mxu1 %v597_v6  ;;  %v604_v13 = vld [vmem:[%s793_s1 + $0x20] sm:$0xff]   ;;  %v608_v17 = vld [vmem:[%s793_s1 + $0x18] sm:$0xff]   ;;  %v612_v21 = vld [vmem:[%s793_s1 + $0x10] sm:$0xff]  }
   0x7   :  { %531 = vmatpush3.bf16.msra.mxu0 %v596_v5  ;;  %v605_v14 = vld [vmem:[%s793_s1 + $0xe0] sm:$0xff]   ;;  %v609_v18 = vld [vmem:[%s793_s1 + $0xd8] sm:$0xff]   ;;  %v613_v22 = vld [vmem:[%s793_s1 + $0xd0] sm:$0xff]  }
   0x8   :  { %532 = vmatprep.subr.bf16.mxu0 %v599_v8  ;;  %v606_v15 = vld [vmem:[%s793_s1 + $0xa0] sm:$0xff]   ;;  %v610_v19 = vld [vmem:[%s793_s1 + $0x98] sm:$0xff]   ;;  %v614_v23 = vld [vmem:[%s793_s1 + $0x90] sm:$0xff]  }
   0x9   :  { %553 = vmatpush3.bf16.msra.mxu1 %v598_v7  ;;  %v615_v24 = vld [vmem:[%s793_s1 + $0x48] sm:$0xff]   ;;  %v619_v28 = vld [vmem:[%s793_s1 + $0x40] sm:$0xff]   ;;  %v628_v39 = vld [vmem:[%s793_s1 + $0x118] sm:$0xff]  }
   0xa   :  { %554 = vmatprep.subr.bf16.mxu1 %v601_v10  ;;  %v616_v25 = vld [vmem:[%s793_s1 + $0x8] sm:$0xff]   ;;  %v620_v29 = vld [vmem:[%s793_s1] sm:$0xff]   ;;  %v629_v40 = vld [vmem:[%s793_s1 + $0x110] sm:$0xff]  }
   0xb   :  { %533 = vmatpush3.bf16.msra.mxu0 %v600_v9  ;;  %v617_v26 = vld [vmem:[%s793_s1 + $0xc8] sm:$0xff]   ;;  %v621_v30 = vld [vmem:[%s793_s1 + $0xc0] sm:$0xff]   ;;  %v624_v43 = vld [vmem:[%s794_s0 + $0x10] ss:$0 sps:$4 sm:$0xff]  }
   0xc   :  { %534 = vmatprep.subr.bf16.mxu0 %v603_v12  ;;  %v618_v27 = vld [vmem:[%s793_s1 + $0x88] sm:$0xff]   ;;  %v18_v31 = vld [vmem:[%s794_s0] sm:$0xff] }
   0xd   :  { %555 = vmatpush3.bf16.msra.mxu1 %v602_v11  ;;  %v486_v32 = vcombine.low %v18_v31, %v18_v31  ;;  %v487_v33 = vcombine.high %v18_v31, %v18_v31  ;;  %v625_v34 = vld [vmem:[%s793_s1 + $0x80] sm:$0xff]   ;;  %v19_v36 = vld [vmem:[%s794_s0 + $0x8] sm:$0xff] }
   0xe   :  { %556 = vmatprep.subr.bf16.mxu1 %v605_v14  ;;  %v488_v37 = vcombine.low %v19_v36, %v19_v36  ;;  %v489_v38 = vcombine.high %v19_v36, %v19_v36  ;;  %v630_v41 = vld [vmem:[%s793_s1 + $0x108] sm:$0xff]   ;;  %v631_v42 = vld [vmem:[%s793_s1 + $0x100] sm:$0xff]  }
   0xf   :  { %535 = vmatpush3.bf16.msra.mxu0 %v604_v13  ;;  %369 = vmatprep.mubr.bf16.mxu0 %v487_v33  ;;  %v485_v52 = vld [vmem:[%s795_s2] ss:$0 sm:$0xff] }
  0x10   :  { %536 = vmatprep.subr.bf16.mxu0 %v607_v16  ;;  %409 = vmatprep.mubr.bf16.mxu1 %v489_v38 }
  0x11   :  { %557 = vmatpush3.bf16.msra.mxu1 %v606_v15 }
  0x12   :  { %558 = vmatprep.subr.bf16.mxu1 %v609_v18 }
  0x13   :  { %537 = vmatpush3.bf16.msra.mxu0 %v608_v17 }
  0x14   :  { %538 = vmatprep.subr.bf16.mxu0 %v611_v20 }
  0x15   :  { %559 = vmatpush3.bf16.msra.mxu1 %v610_v19 }
  0x16   :  { %560 = vmatprep.subr.bf16.mxu1 %v613_v22 }
  0x17   :  { %539 = vmatpush3.bf16.msra.mxu0 %v612_v21 }
  0x18   :  { %540 = vmatprep.subr.bf16.mxu0 %v615_v24 }
  0x19   :  { %561 = vmatpush3.bf16.msra.mxu1 %v614_v23 }
  0x1a   :  { %562 = vmatprep.subr.bf16.mxu1 %v617_v26 }
  0x1b   :  { %541 = vmatpush3.bf16.msra.mxu0 %v616_v25 }
  0x1c   :  { %542 = vmatprep.subr.bf16.mxu0 %v619_v28 }
  0x1d   :  { %563 = vmatpush3.bf16.msra.mxu1 %v618_v27 }
  0x1e   :  { %564 = vmatprep.subr.bf16.mxu1 %v621_v30 }
  0x1f   :  { %543 = vmatpush3.bf16.msra.mxu0 %v620_v29 }
  0x20   :  { %577 = vmatprep.subr.bf16.mxu0 %v632_v35 }
  0x21   :  { %565 = vmatpush3.bf16.msra.mxu1 %v625_v34 }
  0x22   :  { %370 = vmatmul.mubr.bf16.vlgmr.msra.gmra.mxu0 %v486_v32 }
  0x23   :  { %578 = vmatpush3.bf16.msra.mxu0 %v628_v39  ;;  %585 = vmatprep.mubr.msk.bf16.mxu0 %vm633_vm0, %v632_v35 }
  0x24   :  { %410 = vmatmul.mubr.bf16.vlgmr.msra.gmra.mxu1 %v488_v37  ;;  %579 = vmatprep.subr.bf16.mxu0 %v632_v35 }
  0x27   :  { %580 = vmatpush3.bf16.msra.mxu0 %v629_v40 }
  0x28   :  { %581 = vmatprep.subr.bf16.mxu0 %v632_v35 }
  0x2b   :  { %582 = vmatpush3.bf16.msra.mxu0 %v630_v41 }
  0x2c   :  { %583 = vmatprep.subr.bf16.mxu0 %v632_v35 }
  0x2f   :  { %584 = vmatpush3.bf16.msra.mxu0 %v631_v42 }
  0x32   :  { %586 = vmatmul.mubr.msk.bf16.vlgmr.msra.gmra.mxu0 %vm333_vm1, %v624_v43 }
  0xe2   :  { %v544_v44 = vpop.f32.mrf.mxu0 }
  0xe4   :  { %v545_v45 = vpop.f32.mrf.mxu0  ;;  %v566_v46 = vpop.f32.mrf.mxu1 }
  0xe5   :  { %v546_v51 = vadd.f32 %v545_v45, %v544_v44 }
  0xe6   :  { %v547_v47 = vpop.f32.mrf.mxu0  ;;  %v567_v48 = vpop.f32.mrf.mxu1 }
  0xe7   :  { %v372_v54 = vadd.f32 %v546_v51, %v485_v52  ;;  %v568_v55 = vadd.f32 %v567_v48, %v566_v46 }
  0xe8   :  { %v548_v49 = vpop.f32.mrf.mxu0  ;;  %v569_v50 = vpop.f32.mrf.mxu1 }
  0xe9   :  { %v412_v56 = vadd.f32 %v568_v55, %v372_v54 }
  0xea   :  { %v570_v53 = vpop.f32.mrf.mxu1 }
  0xf2   :  { %v451_v57 = vpop.f32.mrf.mxu0 }
  0xf3   :  { %v452_v58 = vadd.f32 %v451_v57, %v412_v56 }
  0xf4   :  { %v587_v59 = vpop.f32.mrf.mxu0 }
  0xf5   :  { %457 = vst [vmem:[%s796_s3] sm:$0xff] %v452_v58  ;;  %v458_v60 = vrot.slane %v452_v58, 4  ;;  %v465_v61 = vmul.f32 %v452_v58, %v452_v58 }
  0xf6   :  { %v454_v62 = vpop.f32.mrf.mxu0 }
  0xf7   :  { %v459_v63 = vadd.f32 %v458_v60, %v452_v58  ;;  %v466_v0 = vrot.slane %v465_v61, 4 }
  0xf8   :  { %v588_v1 = vpop.f32.mrf.mxu0 }
  0xf9   :  { %v460_v2 = vrot.slane %v459_v63, 2  ;;  %v467_v3 = vadd.f32 %v466_v0, %v465_v61 }
  0xfb   :  { %v461_v4 = vadd.f32 %v460_v2, %v459_v63  ;;  %v468_v5 = vrot.slane %v467_v3, 2 }
  0xfd   :  { %v462_v6 = vrot.slane %v461_v4, 1  ;;  %v469_v7 = vadd.f32 %v468_v5, %v467_v3 }
  0xff   :  { %v463_v8 = vadd.f32 %v462_v6, %v461_v4  ;;  %v470_v9 = vrot.slane %v469_v7, 1 }
 0x101   :  { %464 = vst [vmem:[%s797_s4] sm:$0x1] %v463_v8  ;;  %v471_v10 = vadd.f32 %v470_v9, %v469_v7 }
 0x103   :  { %472 = vst [vmem:[%s798_s5] sm:$0x1] %v471_v10 }

// kernel: _lambda_.45
= control target key start
LH: loop header
LB: loop body
LE: loop exit
PB: predicated region body
PF: predicated region fallthrough
CT: control target
= control target key end

     0   :  { %vm1149_vm0 = vmmov 0   ;;  %s1423_s1 = inlined_call_operand.vmem [shape: bf16[1152,128], index: 1, kind: input, shape index: {}]   ;;  %s1424_s0 = inlined_call_operand.vmem [shape: bf16[8,1152], index: 0, kind: input, shape index: {}]   ;;  %s1425_s2 = inlined_call_operand.vmem [shape: f32[1,128], index: 2, kind: input, shape index: {}]   ;;  %s1426_s3 = inlined_call_operand.vmem [shape: f32[8,128], index: 3, kind: output, shape index: {0}]   ;;  %s1427_s4 = inlined_call_operand.vmem [shape: f32[1,1,128], index: 4, kind: output, shape index: {1}]   ;;  %s1428_s5 = inlined_call_operand.vmem [shape: f32[1,1,128], index: 5, kind: output, shape index: {2}]  }
   0x1   :  { %v1067_v0 = vld [vmem:[%s1423_s1 + $0x78] sm:$0xff]   ;;  %v1071_v4 = vld [vmem:[%s1423_s1 + $0x70] sm:$0xff]   ;;  %v1075_v8 = vld [vmem:[%s1423_s1 + $0x68] sm:$0xff]  }
   0x2   :  { %v1068_v1 = vld [vmem:[%s1423_s1 + $0x38] sm:$0xff]   ;;  %948 = vmatprep.subr.bf16.mxu0 %v1067_v0  ;;  %v1072_v5 = vld [vmem:[%s1423_s1 + $0x30] sm:$0xff]   ;;  %v1076_v9 = vld [vmem:[%s1423_s1 + $0x28] sm:$0xff]  }
   0x3   :  { %v1069_v2 = vld [vmem:[%s1423_s1 + $0xf8] sm:$0xff]   ;;  %949 = vmatpush3.bf16.msra.mxu0 %v1068_v1  ;;  %v1073_v6 = vld [vmem:[%s1423_s1 + $0xf0] sm:$0xff]   ;;  %v1077_v10 = vld [vmem:[%s1423_s1 + $0xe8] sm:$0xff]  }
   0x4   :  { %v1070_v3 = vld [vmem:[%s1423_s1 + $0xb8] sm:$0xff]   ;;  %970 = vmatprep.subr.bf16.mxu1 %v1069_v2  ;;  %950 = vmatprep.subr.bf16.mxu0 %v1071_v4  ;;  %v1074_v7 = vld [vmem:[%s1423_s1 + $0xb0] sm:$0xff]   ;;  %v1078_v11 = vld [vmem:[%s1423_s1 + $0xa8] sm:$0xff]  }
   0x5   :  { %971 = vmatpush3.bf16.msra.mxu1 %v1070_v3  ;;  %v1079_v12 = vld [vmem:[%s1423_s1 + $0x60] sm:$0xff]   ;;  %v1083_v16 = vld [vmem:[%s1423_s1 + $0x58] sm:$0xff]   ;;  %v1087_v20 = vld [vmem:[%s1423_s1 + $0x50] sm:$0xff]  }
   0x6   :  { %972 = vmatprep.subr.bf16.mxu1 %v1073_v6  ;;  %v1080_v13 = vld [vmem:[%s1423_s1 + $0x20] sm:$0xff]   ;;  %v1084_v17 = vld [vmem:[%s1423_s1 + $0x18] sm:$0xff]   ;;  %v1088_v21 = vld [vmem:[%s1423_s1 + $0x10] sm:$0xff]  }
   0x7   :  { %951 = vmatpush3.bf16.msra.mxu0 %v1072_v5  ;;  %v1081_v14 = vld [vmem:[%s1423_s1 + $0xe0] sm:$0xff]   ;;  %v1085_v18 = vld [vmem:[%s1423_s1 + $0xd8] sm:$0xff]   ;;  %v1089_v22 = vld [vmem:[%s1423_s1 + $0xd0] sm:$0xff]  }
   0x8   :  { %952 = vmatprep.subr.bf16.mxu0 %v1075_v8  ;;  %v1082_v15 = vld [vmem:[%s1423_s1 + $0xa0] sm:$0xff]   ;;  %v1086_v19 = vld [vmem:[%s1423_s1 + $0x98] sm:$0xff]   ;;  %v1090_v23 = vld [vmem:[%s1423_s1 + $0x90] sm:$0xff]  }
   0x9   :  { %973 = vmatpush3.bf16.msra.mxu1 %v1074_v7  ;;  %v1091_v24 = vld [vmem:[%s1423_s1 + $0x48] sm:$0xff]   ;;  %v1095_v28 = vld [vmem:[%s1423_s1 + $0x40] sm:$0xff]   ;;  %v1101_v35 = vld [vmem:[%s1423_s1 + $0x178] sm:$0xff]  }
   0xa   :  { %974 = vmatprep.subr.bf16.mxu1 %v1077_v10  ;;  %v1092_v25 = vld [vmem:[%s1423_s1 + $0x8] sm:$0xff]   ;;  %v1096_v29 = vld [vmem:[%s1423_s1] sm:$0xff]   ;;  %v1104_v39 = vld [vmem:[%s1423_s1 + $0x138] sm:$0xff]  }
   0xb   :  { %953 = vmatpush3.bf16.msra.mxu0 %v1076_v9  ;;  %v1093_v26 = vld [vmem:[%s1423_s1 + $0xc8] sm:$0xff]   ;;  %v1097_v30 = vld [vmem:[%s1423_s1 + $0xc0] sm:$0xff]   ;;  %v1105_v40 = vld [vmem:[%s1423_s1 + $0x1f8] sm:$0xff]   ;;  %v1148_v9 = vmov 0.0  }
   0xc   :  { %954 = vmatprep.subr.bf16.mxu0 %v1079_v12  ;;  %v1094_v27 = vld [vmem:[%s1423_s1 + $0x88] sm:$0xff]   ;;  %v18_v31 = vld [vmem:[%s1424_s0] sm:$0xff]  ;;  %v1106_v41 = vld [vmem:[%s1423_s1 + $0x1b8] sm:$0xff]  }
   0xd   :  { %975 = vmatpush3.bf16.msra.mxu1 %v1078_v11  ;;  %v867_v32 = vcombine.low %v18_v31, %v18_v31  ;;  %v868_v33 = vcombine.high %v18_v31, %v18_v31  ;;  %v1100_v34 = vld [vmem:[%s1423_s1 + $0x80] sm:$0xff]   ;;  %v19_v36 = vld [vmem:[%s1424_s0 + $0x8] sm:$0xff]  ;;  %v1107_v42 = vld [vmem:[%s1423_s1 + $0x170] sm:$0xff]  }
   0xe   :  { %976 = vmatprep.subr.bf16.mxu1 %v1081_v14  ;;  %v869_v37 = vcombine.low %v19_v36, %v19_v36  ;;  %v870_v38 = vcombine.high %v19_v36, %v19_v36  ;;  %v1108_v43 = vld [vmem:[%s1423_s1 + $0x130] sm:$0xff]   ;;  %v1111_v46 = vld [vmem:[%s1423_s1 + $0x168] sm:$0xff]   ;;  %v1115_v50 = vld [vmem:[%s1423_s1 + $0x160] sm:$0xff]  }
   0xf   :  { %955 = vmatpush3.bf16.msra.mxu0 %v1080_v13  ;;  %670 = vmatprep.mubr.bf16.mxu0 %v868_v33  ;;  %v1109_v44 = vld [vmem:[%s1423_s1 + $0x1f0] sm:$0xff]   ;;  %v1112_v47 = vld [vmem:[%s1423_s1 + $0x128] sm:$0xff]   ;;  %v1116_v51 = vld [vmem:[%s1423_s1 + $0x120] sm:$0xff]  }
  0x10   :  { %956 = vmatprep.subr.bf16.mxu0 %v1083_v16  ;;  %710 = vmatprep.mubr.bf16.mxu1 %v870_v38  ;;  %v1110_v45 = vld [vmem:[%s1423_s1 + $0x1b0] sm:$0xff]   ;;  %v1113_v48 = vld [vmem:[%s1423_s1 + $0x1e8] sm:$0xff]   ;;  %v1117_v52 = vld [vmem:[%s1423_s1 + $0x1e0] sm:$0xff]  }
  0x11   :  { %977 = vmatpush3.bf16.msra.mxu1 %v1082_v15  ;;  %v1114_v49 = vld [vmem:[%s1423_s1 + $0x1a8] sm:$0xff]   ;;  %v1118_v53 = vld [vmem:[%s1423_s1 + $0x1a0] sm:$0xff]   ;;  %v1119_v54 = vld [vmem:[%s1423_s1 + $0x158] sm:$0xff]  }
  0x12   :  { %978 = vmatprep.subr.bf16.mxu1 %v1085_v18  ;;  %v1120_v55 = vld [vmem:[%s1423_s1 + $0x118] sm:$0xff]   ;;  %v1123_v58 = vld [vmem:[%s1423_s1 + $0x150] sm:$0xff]   ;;  %v1127_v62 = vld [vmem:[%s1423_s1 + $0x148] sm:$0xff]  }
  0x13   :  { %957 = vmatpush3.bf16.msra.mxu0 %v1084_v17  ;;  %v1121_v56 = vld [vmem:[%s1423_s1 + $0x1d8] sm:$0xff]   ;;  %v1124_v59 = vld [vmem:[%s1423_s1 + $0x110] sm:$0xff]   ;;  %v1128_v63 = vld [vmem:[%s1423_s1 + $0x108] sm:$0xff]  }
  0x14   :  { %958 = vmatprep.subr.bf16.mxu0 %v1087_v20  ;;  %v1122_v57 = vld [vmem:[%s1423_s1 + $0x198] sm:$0xff]   ;;  %v1125_v60 = vld [vmem:[%s1423_s1 + $0x1d0] sm:$0xff]   ;;  %v1129_v0 = vld [vmem:[%s1423_s1 + $0x1c8] sm:$0xff]  }
  0x15   :  { %979 = vmatpush3.bf16.msra.mxu1 %v1086_v19  ;;  %v1126_v61 = vld [vmem:[%s1423_s1 + $0x190] sm:$0xff]   ;;  %v1130_v1 = vld [vmem:[%s1423_s1 + $0x188] sm:$0xff]   ;;  %v1131_v2 = vld [vmem:[%s1423_s1 + $0x140] sm:$0xff]  }
  0x16   :  { %980 = vmatprep.subr.bf16.mxu1 %v1089_v22  ;;  %v1132_v3 = vld [vmem:[%s1423_s1 + $0x100] sm:$0xff]   ;;  %v20_v5 = vld [vmem:[%s1424_s0 + $0x10] sm:$0xff]  ;;  %v21_v10 = vld [vmem:[%s1424_s0 + $0x18] sm:$0xff] }
  0x17   :  { %959 = vmatpush3.bf16.msra.mxu0 %v1088_v21  ;;  %v1133_v4 = vld [vmem:[%s1423_s1 + $0x1c0] sm:$0xff]   ;;  %v871_v6 = vcombine.low %v20_v5, %v20_v5  ;;  %v872_v7 = vcombine.high %v20_v5, %v20_v5  ;;  %v873_v11 = vcombine.low %v21_v10, %v21_v10  ;;  %v874_v12 = vcombine.high %v21_v10, %v21_v10  ;;  %v1139_v13 = vld [vmem:[%s1423_s1 + $0x238] sm:$0xff]   ;;  %v1140_v14 = vld [vmem:[%s1423_s1 + $0x230] sm:$0xff]  }
  0x18   :  { %960 = vmatprep.subr.bf16.mxu0 %v1091_v24  ;;  %v1136_v8 = vld [vmem:[%s1423_s1 + $0x180] sm:$0xff]   ;;  %v1141_v15 = vld [vmem:[%s1423_s1 + $0x228] sm:$0xff]   ;;  %v1143_v17 = vld [vmem:[%s1423_s1 + $0x218] sm:$0xff]  }
  0x19   :  { %981 = vmatpush3.bf16.msra.mxu1 %v1090_v23  ;;  %v1142_v16 = vld [vmem:[%s1423_s1 + $0x220] sm:$0xff]   ;;  %v1144_v18 = vld [vmem:[%s1423_s1 + $0x210] sm:$0xff]   ;;  %v1145_v19 = vld [vmem:[%s1423_s1 + $0x208] sm:$0xff]  }
  0x1a   :  { %982 = vmatprep.subr.bf16.mxu1 %v1093_v26  ;;  %v1146_v20 = vld [vmem:[%s1423_s1 + $0x200] sm:$0xff]  }
  0x1b   :  { %961 = vmatpush3.bf16.msra.mxu0 %v1092_v25  ;;  %v1147_v21 = vld [vmem:[%s1424_s0 + $0x20] ss:$0 sps:$4 sm:$0xff]  }
  0x1c   :  { %962 = vmatprep.subr.bf16.mxu0 %v1095_v28 }
  0x1d   :  { %983 = vmatpush3.bf16.msra.mxu1 %v1094_v27 }
  0x1e   :  { %984 = vmatprep.subr.bf16.mxu1 %v1097_v30 }
  0x1f   :  { %963 = vmatpush3.bf16.msra.mxu0 %v1096_v29 }
  0x20   :  { %992 = vmatprep.subr.bf16.mxu0 %v1101_v35 }
  0x21   :  { %985 = vmatpush3.bf16.msra.mxu1 %v1100_v34 }
  0x22   :  { %671 = vmatmul.mubr.bf16.vlgmr.msra.gmra.mxu0 %v867_v32  ;;  %1014 = vmatprep.subr.bf16.mxu1 %v1105_v40 }
  0x23   :  { %993 = vmatpush3.bf16.msra.mxu0 %v1104_v39  ;;  %750 = vmatprep.mubr.bf16.mxu0 %v872_v7  ;;  %v866_v39 = vld [vmem:[%s1425_s2] ss:$0 sm:$0xff] }
  0x24   :  { %711 = vmatmul.mubr.bf16.vlgmr.msra.gmra.mxu1 %v869_v37  ;;  %994 = vmatprep.subr.bf16.mxu0 %v1107_v42 }
  0x25   :  { %1015 = vmatpush3.bf16.msra.mxu1 %v1106_v41  ;;  %790 = vmatprep.mubr.bf16.mxu1 %v874_v12 }
  0x26   :  { %1016 = vmatprep.subr.bf16.mxu1 %v1109_v44 }
  0x27   :  { %995 = vmatpush3.bf16.msra.mxu0 %v1108_v43 }
  0x28   :  { %996 = vmatprep.subr.bf16.mxu0 %v1111_v46 }
  0x29   :  { %1017 = vmatpush3.bf16.msra.mxu1 %v1110_v45 }
  0x2a   :  { %1018 = vmatprep.subr.bf16.mxu1 %v1113_v48 }
  0x2b   :  { %997 = vmatpush3.bf16.msra.mxu0 %v1112_v47 }
  0x2c   :  { %998 = vmatprep.subr.bf16.mxu0 %v1115_v50 }
  0x2d   :  { %1019 = vmatpush3.bf16.msra.mxu1 %v1114_v49 }
  0x2e   :  { %1020 = vmatprep.subr.bf16.mxu1 %v1117_v52 }
  0x2f   :  { %999 = vmatpush3.bf16.msra.mxu0 %v1116_v51 }
  0x30   :  { %1000 = vmatprep.subr.bf16.mxu0 %v1119_v54 }
  0x31   :  { %1021 = vmatpush3.bf16.msra.mxu1 %v1118_v53 }
  0x32   :  { %1022 = vmatprep.subr.bf16.mxu1 %v1121_v56 }
  0x33   :  { %1001 = vmatpush3.bf16.msra.mxu0 %v1120_v55 }
  0x34   :  { %1002 = vmatprep.subr.bf16.mxu0 %v1123_v58 }
  0x35   :  { %1023 = vmatpush3.bf16.msra.mxu1 %v1122_v57 }
  0x36   :  { %1024 = vmatprep.subr.bf16.mxu1 %v1125_v60 }
  0x37   :  { %1003 = vmatpush3.bf16.msra.mxu0 %v1124_v59 }
  0x38   :  { %1004 = vmatprep.subr.bf16.mxu0 %v1127_v62 }
  0x39   :  { %1025 = vmatpush3.bf16.msra.mxu1 %v1126_v61 }
  0x3a   :  { %1026 = vmatprep.subr.bf16.mxu1 %v1129_v0 }
  0x3b   :  { %1005 = vmatpush3.bf16.msra.mxu0 %v1128_v63 }
  0x3c   :  { %1006 = vmatprep.subr.bf16.mxu0 %v1131_v2 }
  0x3d   :  { %1027 = vmatpush3.bf16.msra.mxu1 %v1130_v1 }
  0x3e   :  { %1028 = vmatprep.subr.bf16.mxu1 %v1133_v4 }
  0x3f   :  { %1007 = vmatpush3.bf16.msra.mxu0 %v1132_v3 }
  0x40   :  { %1045 = vmatprep.subr.bf16.mxu0 %v1148_v9 }
  0x41   :  { %1029 = vmatpush3.bf16.msra.mxu1 %v1136_v8 }
  0x42   :  { %751 = vmatmul.mubr.bf16.vlgmr.msra.gmra.mxu0 %v871_v6 }
  0x43   :  { %1046 = vmatpush3.bf16.msra.mxu0 %v1139_v13  ;;  %1061 = vmatprep.mubr.msk.bf16.mxu0 %vm1149_vm0, %v1148_v9 }
  0x44   :  { %791 = vmatmul.mubr.bf16.vlgmr.msra.gmra.mxu1 %v873_v11  ;;  %1047 = vmatprep.subr.bf16.mxu0 %v1148_v9 }
  0x47   :  { %1048 = vmatpush3.bf16.msra.mxu0 %v1140_v14 }
  0x48   :  { %1049 = vmatprep.subr.bf16.mxu0 %v1148_v9 }
  0x4b   :  { %1050 = vmatpush3.bf16.msra.mxu0 %v1141_v15 }
  0x4c   :  { %1051 = vmatprep.subr.bf16.mxu0 %v1148_v9 }
  0x4f   :  { %1052 = vmatpush3.bf16.msra.mxu0 %v1142_v16 }
  0x50   :  { %1053 = vmatprep.subr.bf16.mxu0 %v1148_v9 }
  0x53   :  { %1054 = vmatpush3.bf16.msra.mxu0 %v1143_v17 }
  0x54   :  { %1055 = vmatprep.subr.bf16.mxu0 %v1148_v9 }
  0x57   :  { %1056 = vmatpush3.bf16.msra.mxu0 %v1144_v18 }
  0x58   :  { %1057 = vmatprep.subr.bf16.mxu0 %v1148_v9 }
  0x5b   :  { %1058 = vmatpush3.bf16.msra.mxu0 %v1145_v19 }
  0x5c   :  { %1059 = vmatprep.subr.bf16.mxu0 %v1148_v9 }
  0x5f   :  { %1060 = vmatpush3.bf16.msra.mxu0 %v1146_v20 }
  0x62   :  { %1062 = vmatmul.mubr.bf16.vlgmr.msra.gmra.mxu0 %v1147_v21 }
  0xe2   :  { %v964_v22 = vpop.f32.mrf.mxu0 }
  0xe4   :  { %v965_v23 = vpop.f32.mrf.mxu0  ;;  %v986_v24 = vpop.f32.mrf.mxu1 }
  0xe5   :  { %v966_v38 = vadd.f32 %v965_v23, %v964_v22 }
  0xe6   :  { %v967_v25 = vpop.f32.mrf.mxu0  ;;  %v987_v26 = vpop.f32.mrf.mxu1 }
  0xe7   :  { %v673_v40 = vadd.f32 %v966_v38, %v866_v39  ;;  %v988_v41 = vadd.f32 %v987_v26, %v986_v24 }
  0xe8   :  { %v968_v27 = vpop.f32.mrf.mxu0  ;;  %v989_v28 = vpop.f32.mrf.mxu1 }
  0xe9   :  { %v713_v43 = vadd.f32 %v988_v41, %v673_v40 }
  0xea   :  { %v990_v29 = vpop.f32.mrf.mxu1 }
 0x102   :  { %v1008_v30 = vpop.f32.mrf.mxu0 }
 0x104   :  { %v1009_v31 = vpop.f32.mrf.mxu0  ;;  %v1030_v32 = vpop.f32.mrf.mxu1 }
 0x105   :  { %v1010_v42 = vadd.f32 %v1009_v31, %v1008_v30 }
 0x106   :  { %v1011_v33 = vpop.f32.mrf.mxu0  ;;  %v1031_v34 = vpop.f32.mrf.mxu1 }
 0x107   :  { %v753_v44 = vadd.f32 %v1010_v42, %v713_v43  ;;  %v1032_v45 = vadd.f32 %v1031_v34, %v1030_v32 }
 0x108   :  { %v1012_v35 = vpop.f32.mrf.mxu0  ;;  %v1033_v36 = vpop.f32.mrf.mxu1 }
 0x109   :  { %v793_v46 = vadd.f32 %v1032_v45, %v753_v44 }
 0x10a   :  { %v1034_v37 = vpop.f32.mrf.mxu1 }
 0x122   :  { %v832_v47 = vpop.f32.mrf.mxu0 }
 0x123   :  { %v833_v48 = vadd.f32 %v832_v47, %v793_v46 }
 0x124   :  { %v1063_v49 = vpop.f32.mrf.mxu0 }
 0x125   :  { %838 = vst [vmem:[%s1426_s3] sm:$0xff] %v833_v48  ;;  %v839_v50 = vrot.slane %v833_v48, 4  ;;  %v846_v51 = vmul.f32 %v833_v48, %v833_v48 }
 0x126   :  { %v835_v52 = vpop.f32.mrf.mxu0 }
 0x127   :  { %v840_v53 = vadd.f32 %v839_v50, %v833_v48  ;;  %v847_v54 = vrot.slane %v846_v51, 4 }
 0x128   :  { %v1064_v55 = vpop.f32.mrf.mxu0 }
 0x129   :  { %v841_v56 = vrot.slane %v840_v53, 2  ;;  %v848_v57 = vadd.f32 %v847_v54, %v846_v51 }
 0x12b   :  { %v842_v58 = vadd.f32 %v841_v56, %v840_v53  ;;  %v849_v59 = vrot.slane %v848_v57, 2 }
 0x12d   :  { %v843_v60 = vrot.slane %v842_v58, 1  ;;  %v850_v61 = vadd.f32 %v849_v59, %v848_v57 }
 0x12f   :  { %v844_v62 = vadd.f32 %v843_v60, %v842_v58  ;;  %v851_v63 = vrot.slane %v850_v61, 1 }
 0x131   :  { %845 = vst [vmem:[%s1427_s4] sm:$0x1] %v844_v62  ;;  %v852_v0 = vadd.f32 %v851_v63, %v850_v61 }
 0x133   :  { %853 = vst [vmem:[%s1428_s5] sm:$0x1] %v852_v0 }

// kernel: tile.294
= control target key start
LH: loop header
LB: loop body
LE: loop exit
PB: predicated region body
PF: predicated region fallthrough
CT: control target
= control target key end

     0   :  { %s7_s8 = smov 3  ;;  %vm9_vm0 = vcmask 523264   ;;  %s27_s9 = smov 64   ;;  %vm16_vm1 = vcmask 1048064   ;;  %s44_s0 = inlined_call_operand.vmem [shape: f32[4,64], index: 0, kind: input, shape index: {}]   ;;  %s45_s1 = inlined_call_operand.vmem [shape: f32[256], index: 1, kind: output, shape index: {}]  }
   0x1   :  { %v5_v0 = vld [vmem:[%s44_s0] sm:$0xf]  ;;  %s12_s0 = smov 3 }
   0x2   :  { %6 = vst [vmem:[#allocation1] sm:$0xf] %v5_v0 }
   0x9   :  { %v13_v1 = vld [vmem:[#allocation1 + $0x1] ss:$2 sm:%s12_s0]   ;;  %v8_v2 = vld [vmem:[#allocation1] ss:$2 sm:%s7_s8]  }
   0xa   :  { %14 = vrot.lane.b32.xlu0 %v13_v1, %s27_s9  ;;  %10 = vst.msk [vmem:[#allocation0] sm:$0x3] %vm9_vm0, %v8_v2  }
  0x7c   :  { %v15_v3 = vpop.permute.xlu0 %14  }
  0x7d   :  { %17 = vst.msk [vmem:[#allocation0] sm:$0x3] %vm16_vm1, %v15_v3  }
  0x84   :  { %v22_v4 = vld [vmem:[#allocation0] sm:$0x3] }
  0x85   :  { %25 = vst [vmem:[%s45_s1] sm:$0x3] %v22_v4 }

// kernel: _lambda_.49
= control target key start
LH: loop header
LB: loop body
LE: loop exit
PB: predicated region body
PF: predicated region fallthrough
CT: control target
= control target key end

     0   :  { %s1006_s1 = inlined_call_operand.vmem [shape: bf16[512,256], index: 1, kind: input, shape index: {}]   ;;  %s1007_s0 = inlined_call_operand.vmem [shape: bf16[8,512], index: 0, kind: input, shape index: {}]   ;;  %s1008_s2 = inlined_call_operand.vmem [shape: f32[1,256], index: 2, kind: input, shape index: {}]   ;;  %s1009_s3 = inlined_call_operand.vmem [shape: f32[8,256], index: 3, kind: output, shape index: {0}]   ;;  %s1010_s4 = inlined_call_operand.vmem [shape: f32[1,1,256], index: 4, kind: output, shape index: {1}]   ;;  %s1011_s5 = inlined_call_operand.vmem [shape: f32[1,1,256], index: 5, kind: output, shape index: {2}]  }
   0x1   :  { %v662_v0 = vld [vmem:[%s1006_s1 + $0x74] ss:$8 sps:$4 sm:$0xff]   ;;  %v666_v2 = vld [vmem:[%s1006_s1 + $0x70] ss:$8 sps:$4 sm:$0xff]   ;;  %v668_v4 = vld [vmem:[%s1006_s1 + $0x64] ss:$8 sps:$4 sm:$0xff]  }
   0x2   :  { %v664_v1 = vld [vmem:[%s1006_s1 + $0x174] ss:$8 sps:$4 sm:$0xff]   ;;  %429 = vmatprep.subr.bf16.mxu0 %v662_v0  ;;  %v667_v3 = vld [vmem:[%s1006_s1 + $0x170] ss:$8 sps:$4 sm:$0xff]   ;;  %v670_v5 = vld [vmem:[%s1006_s1 + $0x164] ss:$8 sps:$4 sm:$0xff]  }
   0x3   :  { %470 = vmatprep.subr.bf16.mxu1 %v664_v1  ;;  %430 = vmatpush1.bf16.msra.mxu0 %v666_v2  ;;  %v672_v6 = vld [vmem:[%s1006_s1 + $0x60] ss:$8 sps:$4 sm:$0xff]   ;;  %v674_v8 = vld [vmem:[%s1006_s1 + $0x54] ss:$8 sps:$4 sm:$0xff]   ;;  %v678_v10 = vld [vmem:[%s1006_s1 + $0x50] ss:$8 sps:$4 sm:$0xff]  }
   0x4   :  { %471 = vmatpush1.bf16.msra.mxu1 %v667_v3  ;;  %431 = vmatprep.subr.bf16.mxu0 %v668_v4  ;;  %v673_v7 = vld [vmem:[%s1006_s1 + $0x160] ss:$8 sps:$4 sm:$0xff]   ;;  %v676_v9 = vld [vmem:[%s1006_s1 + $0x154] ss:$8 sps:$4 sm:$0xff]   ;;  %v679_v11 = vld [vmem:[%s1006_s1 + $0x150] ss:$8 sps:$4 sm:$0xff]  }
   0x5   :  { %472 = vmatprep.subr.bf16.mxu1 %v670_v5  ;;  %v680_v12 = vld [vmem:[%s1006_s1 + $0x44] ss:$8 sps:$4 sm:$0xff]   ;;  %v684_v14 = vld [vmem:[%s1006_s1 + $0x40] ss:$8 sps:$4 sm:$0xff]   ;;  %v686_v16 = vld [vmem:[%s1006_s1 + $0x34] ss:$8 sps:$4 sm:$0xff]  }
   0x6   :  { %v682_v13 = vld [vmem:[%s1006_s1 + $0x144] ss:$8 sps:$4 sm:$0xff]   ;;  %v685_v15 = vld [vmem:[%s1006_s1 + $0x140] ss:$8 sps:$4 sm:$0xff]   ;;  %v688_v17 = vld [vmem:[%s1006_s1 + $0x134] ss:$8 sps:$4 sm:$0xff]  }
   0x7   :  { %432 = vmatpush1.bf16.msra.mxu0 %v672_v6  ;;  %v690_v18 = vld [vmem:[%s1006_s1 + $0x30] ss:$8 sps:$4 sm:$0xff]   ;;  %v692_v20 = vld [vmem:[%s1006_s1 + $0x24] ss:$8 sps:$4 sm:$0xff]   ;;  %v696_v22 = vld [vmem:[%s1006_s1 + $0x20] ss:$8 sps:$4 sm:$0xff]   ;;  %v85_v6 = vlaneseq }
   0x8   :  { %473 = vmatpush1.bf16.msra.mxu1 %v673_v7  ;;  %433 = vmatprep.subr.bf16.mxu0 %v674_v8  ;;  %v691_v19 = vld [vmem:[%s1006_s1 + $0x130] ss:$8 sps:$4 sm:$0xff]   ;;  %v694_v21 = vld [vmem:[%s1006_s1 + $0x124] ss:$8 sps:$4 sm:$0xff]   ;;  %v697_v23 = vld [vmem:[%s1006_s1 + $0x120] ss:$8 sps:$4 sm:$0xff]  }
   0x9   :  { %474 = vmatprep.subr.bf16.mxu1 %v676_v9  ;;  %v698_v24 = vld [vmem:[%s1006_s1 + $0x14] ss:$8 sps:$4 sm:$0xff]   ;;  %v702_v26 = vld [vmem:[%s1006_s1 + $0x10] ss:$8 sps:$4 sm:$0xff]   ;;  %v704_v28 = vld [vmem:[%s1006_s1 + $0x4] ss:$8 sps:$4 sm:$0xff]  }
   0xa   :  { %v700_v25 = vld [vmem:[%s1006_s1 + $0x114] ss:$8 sps:$4 sm:$0xff]   ;;  %v703_v27 = vld [vmem:[%s1006_s1 + $0x110] ss:$8 sps:$4 sm:$0xff]   ;;  %v706_v29 = vld [vmem:[%s1006_s1 + $0x104] ss:$8 sps:$4 sm:$0xff]  }
   0xb   :  { %434 = vmatpush1.bf16.msra.mxu0 %v678_v10  ;;  %v708_v30 = vld [vmem:[%s1006_s1] ss:$8 sps:$4 sm:$0xff]   ;;  %v710_v32 = vld [vmem:[%s1006_s1 + $0xf4] ss:$8 sps:$4 sm:$0xff]   ;;  %v714_v34 = vld [vmem:[%s1006_s1 + $0xf0] ss:$8 sps:$4 sm:$0xff]  }
   0xc   :  { %475 = vmatpush1.bf16.msra.mxu1 %v679_v11  ;;  %435 = vmatprep.subr.bf16.mxu0 %v680_v12  ;;  %v709_v31 = vld [vmem:[%s1006_s1 + $0x100] ss:$8 sps:$4 sm:$0xff]   ;;  %v712_v33 = vld [vmem:[%s1006_s1 + $0x1f4] ss:$8 sps:$4 sm:$0xff]   ;;  %v715_v35 = vld [vmem:[%s1006_s1 + $0x1f0] ss:$8 sps:$4 sm:$0xff]  }
   0xd   :  { %476 = vmatprep.subr.bf16.mxu1 %v682_v13  ;;  %v716_v36 = vld [vmem:[%s1006_s1 + $0xe4] ss:$8 sps:$4 sm:$0xff]   ;;  %v720_v38 = vld [vmem:[%s1006_s1 + $0xe0] ss:$8 sps:$4 sm:$0xff]   ;;  %v722_v40 = vld [vmem:[%s1006_s1 + $0xd4] ss:$8 sps:$4 sm:$0xff]  }
   0xe   :  { %v718_v37 = vld [vmem:[%s1006_s1 + $0x1e4] ss:$8 sps:$4 sm:$0xff]   ;;  %v721_v39 = vld [vmem:[%s1006_s1 + $0x1e0] ss:$8 sps:$4 sm:$0xff]   ;;  %v724_v41 = vld [vmem:[%s1006_s1 + $0x1d4] ss:$8 sps:$4 sm:$0xff]  }
   0xf   :  { %436 = vmatpush1.bf16.msra.mxu0 %v684_v14  ;;  %v726_v42 = vld [vmem:[%s1006_s1 + $0xd0] ss:$8 sps:$4 sm:$0xff]   ;;  %v728_v44 = vld [vmem:[%s1006_s1 + $0xc4] ss:$8 sps:$4 sm:$0xff]   ;;  %v732_v49 = vld [vmem:[%s1006_s1 + $0xc0] ss:$8 sps:$4 sm:$0xff]  }
  0x10   :  { %477 = vmatpush1.bf16.msra.mxu1 %v685_v15  ;;  %437 = vmatprep.subr.bf16.mxu0 %v686_v16  ;;  %v727_v43 = vld [vmem:[%s1006_s1 + $0x1d0] ss:$8 sps:$4 sm:$0xff]   ;;  %v730_v45 = vld [vmem:[%s1006_s1 + $0x1c4] ss:$8 sps:$4 sm:$0xff]   ;;  %v733_v50 = vld [vmem:[%s1006_s1 + $0x1c0] ss:$8 sps:$4 sm:$0xff]  }
  0x11   :  { %478 = vmatprep.subr.bf16.mxu1 %v688_v17  ;;  %v17_v46 = vld [vmem:[%s1007_s0] sm:$0xff]  ;;  %v18_v48 = vld [vmem:[%s1007_s0 + $0x8] sm:$0xff]  ;;  %v734_v52 = vld [vmem:[%s1006_s1 + $0xb4] ss:$8 sps:$4 sm:$0xff]   ;;  %v86_v7 = vshrl.u32 %v85_v6, 7  ;;  %vm545_vm0 = vcmp.lt.s32.totalorder %v85_v6, 256 }
  0x12   :  { %v594_v47 = vcombine.high %v17_v46, %v17_v46  ;;  %v596_v51 = vcombine.high %v18_v48, %v18_v48  ;;  %v736_v53 = vld [vmem:[%s1006_s1 + $0x1b4] ss:$8 sps:$4 sm:$0xff]   ;;  %v738_v54 = vld [vmem:[%s1006_s1 + $0xb0] ss:$8 sps:$4 sm:$0xff]   ;;  %v740_v56 = vld [vmem:[%s1006_s1 + $0xa4] ss:$8 sps:$4 sm:$0xff]   ;;  %v593_v4 = vcombine.low %v17_v46, %v17_v46  ;;  %v595_v5 = vcombine.low %v18_v48, %v18_v48 }
  0x13   :  { %438 = vmatpush1.bf16.msra.mxu0 %v690_v18  ;;  %v739_v55 = vld [vmem:[%s1006_s1 + $0x1b0] ss:$8 sps:$4 sm:$0xff]   ;;  %v742_v57 = vld [vmem:[%s1006_s1 + $0x1a4] ss:$8 sps:$4 sm:$0xff]   ;;  %v744_v58 = vld [vmem:[%s1006_s1 + $0xa0] ss:$8 sps:$4 sm:$0xff]  }
  0x14   :  { %479 = vmatpush1.bf16.msra.mxu1 %v691_v19  ;;  %439 = vmatprep.subr.bf16.mxu0 %v692_v20  ;;  %v745_v59 = vld [vmem:[%s1006_s1 + $0x1a0] ss:$8 sps:$4 sm:$0xff]   ;;  %v746_v60 = vld [vmem:[%s1006_s1 + $0x94] ss:$8 sps:$4 sm:$0xff]   ;;  %v750_v62 = vld [vmem:[%s1006_s1 + $0x90] ss:$8 sps:$4 sm:$0xff]  }
  0x15   :  { %480 = vmatprep.subr.bf16.mxu1 %v694_v21  ;;  %461 = vmatprep.mubr.bf16.mxu0 %v594_v47  ;;  %v748_v61 = vld [vmem:[%s1006_s1 + $0x194] ss:$8 sps:$4 sm:$0xff]   ;;  %v751_v63 = vld [vmem:[%s1006_s1 + $0x190] ss:$8 sps:$4 sm:$0xff]   ;;  %v752_v0 = vld [vmem:[%s1006_s1 + $0x84] ss:$8 sps:$4 sm:$0xff]  }
  0x16   :  { %502 = vmatprep.mubr.bf16.mxu1 %v596_v51  ;;  %v754_v1 = vld [vmem:[%s1006_s1 + $0x184] ss:$8 sps:$4 sm:$0xff]   ;;  %v756_v2 = vld [vmem:[%s1006_s1 + $0x80] ss:$8 sps:$4 sm:$0xff]   ;;  %v87_v8 = vsub.s32 0, %v86_v7  ;;  %v91_v10 = vsub.s32 1, %v86_v7 }
  0x17   :  { %440 = vmatpush1.bf16.msra.mxu0 %v696_v22  ;;  %v757_v3 = vld [vmem:[%s1006_s1 + $0x180] ss:$8 sps:$4 sm:$0xff]  }
  0x18   :  { %481 = vmatpush1.bf16.msra.mxu1 %v697_v23  ;;  %441 = vmatprep.subr.bf16.mxu0 %v698_v24  ;;  %v83_v9 = vld [vmem:[%s1008_s2] sm:$0x3] }
  0x19   :  { %482 = vmatprep.subr.bf16.mxu1 %v700_v25  ;;  %v88_v11 = vrot.slane %v83_v9, %v87_v8  ;;  %v92_v12 = vrot.slane %v83_v9, %v91_v10 }
  0x1b   :  { %442 = vmatpush1.bf16.msra.mxu0 %v702_v26 }
  0x1c   :  { %483 = vmatpush1.bf16.msra.mxu1 %v703_v27  ;;  %443 = vmatprep.subr.bf16.mxu0 %v704_v28 }
  0x1d   :  { %484 = vmatprep.subr.bf16.mxu1 %v706_v29 }
  0x1f   :  { %444 = vmatpush1.bf16.msra.mxu0 %v708_v30 }
  0x20   :  { %485 = vmatpush1.bf16.msra.mxu1 %v709_v31  ;;  %445 = vmatprep.subr.bf16.mxu0 %v710_v32  ;;  %v762_v31 = vmov 1966171168  }
  0x21   :  { %486 = vmatprep.subr.bf16.mxu1 %v712_v33  ;;  %v529_v32 = vunpack.c.l.s4 %v762_v31 }
  0x23   :  { %446 = vmatpush2.bf16.msra.mxu0 %v714_v34 }
  0x24   :  { %487 = vmatpush2.bf16.msra.mxu1 %v715_v35  ;;  %447 = vmatprep.subr.bf16.mxu0 %v716_v36 }
  0x25   :  { %488 = vmatprep.subr.bf16.mxu1 %v718_v37 }
  0x27   :  { %448 = vmatpush2.bf16.msra.mxu0 %v720_v38 }
  0x28   :  { %489 = vmatpush2.bf16.msra.mxu1 %v721_v39  ;;  %449 = vmatprep.subr.bf16.mxu0 %v722_v40 }
  0x29   :  { %490 = vmatprep.subr.bf16.mxu1 %v724_v41  ;;  %v530_v41 = vunpack.c.0.s8 %v529_v32 }
  0x2b   :  { %450 = vmatpush2.bf16.msra.mxu0 %v726_v42 }
  0x2c   :  { %491 = vmatpush2.bf16.msra.mxu1 %v727_v43  ;;  %451 = vmatprep.subr.bf16.mxu0 %v728_v44 }
  0x2d   :  { %492 = vmatprep.subr.bf16.mxu1 %v730_v45 }
  0x2f   :  { %452 = vmatpush2.bf16.msra.mxu0 %v732_v49  ;;  %v533_v49 = vsub.s32 %v530_v41, %v86_v7 }
  0x30   :  { %493 = vmatpush2.bf16.msra.mxu1 %v733_v50  ;;  %453 = vmatprep.subr.bf16.mxu0 %v734_v52 }
  0x31   :  { %494 = vmatprep.subr.bf16.mxu1 %v736_v53 }
  0x33   :  { %454 = vmatpush2.bf16.msra.mxu0 %v738_v54 }
  0x34   :  { %495 = vmatpush2.bf16.msra.mxu1 %v739_v55  ;;  %455 = vmatprep.subr.bf16.mxu0 %v740_v56 }
  0x35   :  { %496 = vmatprep.subr.bf16.mxu1 %v742_v57 }
  0x37   :  { %456 = vmatpush2.bf16.msra.mxu0 %v744_v58 }
  0x38   :  { %497 = vmatpush2.bf16.msra.mxu1 %v745_v59  ;;  %457 = vmatprep.subr.bf16.mxu0 %v746_v60 }
  0x39   :  { %498 = vmatprep.subr.bf16.mxu1 %v748_v61 }
  0x3b   :  { %458 = vmatpush2.bf16.msra.mxu0 %v750_v62 }
  0x3c   :  { %499 = vmatpush2.bf16.msra.mxu1 %v751_v63  ;;  %459 = vmatprep.subr.bf16.mxu0 %v752_v0 }
  0x3d   :  { %500 = vmatprep.subr.bf16.mxu1 %v754_v1 }
  0x3f   :  { %460 = vmatpush2.bf16.msra.mxu0 %v756_v2 }
  0x40   :  { %501 = vmatpush2.bf16.msra.mxu1 %v757_v3 }
  0x42   :  { %462 = vmatmul.mubr.bf16.vlgmr.msra.gmra.mxu0 %v593_v4 }
  0x43   :  { %503 = vmatmul.mubr.bf16.vlgmr.msra.gmra.mxu1 %v595_v5 }
 0x102   :  { %v463_v13 = vpop.f32.mrf.mxu0 }
 0x103   :  { %v504_v14 = vpop.f32.mrf.mxu1  ;;  %v464_v15 = vadd.f32 %v463_v13, %v88_v11 }
 0x104   :  { %v465_v16 = vpop.f32.mrf.mxu0 }
 0x105   :  { %v506_v17 = vpop.f32.mrf.mxu1  ;;  %v505_v18 = vadd.f32 %v504_v14, %v464_v15  ;;  %v466_v19 = vadd.f32 %v465_v16, %v92_v12 }
 0x106   :  { %v467_v20 = vpop.f32.mrf.mxu0 }
 0x107   :  { %v508_v21 = vpop.f32.mrf.mxu1  ;;  %511 = vst [vmem:[%s1009_s3] sm:$0xff] %v505_v18  ;;  %v513_v22 = vrot.slane %v505_v18, 4  ;;  %v548_v23 = vmul.f32 %v505_v18, %v505_v18  ;;  %v507_v24 = vadd.f32 %v506_v17, %v466_v19 }
 0x108   :  { %v468_v25 = vpop.f32.mrf.mxu0 }
 0x109   :  { %v509_v26 = vpop.f32.mrf.mxu1  ;;  %v514_v27 = vadd.f32 %v513_v22, %v505_v18  ;;  %v550_v28 = vrot.slane %v548_v23, 4  ;;  %512 = vst [vmem:[%s1009_s3 + $0x8] sm:$0xff] %v507_v24  ;;  %v519_v29 = vrot.slane %v507_v24, 4  ;;  %v549_v30 = vmul.f32 %v507_v24, %v507_v24 }
 0x10b   :  { %v515_v33 = vrot.slane %v514_v27, 2  ;;  %v551_v34 = vadd.f32 %v550_v28, %v548_v23  ;;  %v520_v35 = vadd.f32 %v519_v29, %v507_v24  ;;  %v556_v36 = vrot.slane %v549_v30, 4 }
 0x10d   :  { %v516_v37 = vadd.f32 %v515_v33, %v514_v27  ;;  %v552_v38 = vrot.slane %v551_v34, 2  ;;  %v521_v39 = vrot.slane %v520_v35, 2  ;;  %v557_v40 = vadd.f32 %v556_v36, %v549_v30 }
 0x10f   :  { %v517_v42 = vrot.slane %v516_v37, 1  ;;  %v553_v43 = vadd.f32 %v552_v38, %v551_v34  ;;  %v522_v44 = vadd.f32 %v521_v39, %v520_v35  ;;  %v558_v45 = vrot.slane %v557_v40, 2 }
 0x111   :  { %v554_v46 = vrot.slane %v553_v43, 1  ;;  %v523_v47 = vrot.slane %v522_v44, 1  ;;  %v559_v48 = vadd.f32 %v558_v45, %v557_v40  ;;  %v518_v50 = vadd.f32 %v517_v42, %v516_v37 }
 0x113   :  { %v524_v51 = vadd.f32 %v523_v47, %v522_v44  ;;  %v560_v52 = vrot.slane %v559_v48, 1  ;;  %v555_v53 = vadd.f32 %v554_v46, %v553_v43 }
 0x115   :  { %v527_v54 = vcombine.low %v518_v50, %v524_v51  ;;  %v561_v55 = vadd.f32 %v560_v52, %v559_v48 }
 0x117   :  { %v534_v56 = vrot.slane %v527_v54, %v533_v49  ;;  %v564_v57 = vcombine.low %v555_v53, %v561_v55 }
 0x119   :  { %v541_v58 = vrot.slane %v534_v56, %v533_v49  ;;  %v571_v59 = vrot.slane %v564_v57, %v533_v49 }
 0x11b   :  { %547 = vst.msk [vmem:[%s1010_s4] sm:$0x3] %vm545_vm0, %v541_v58  ;;  %v578_v60 = vrot.slane %v571_v59, %v533_v49 }
 0x11d   :  { %580 = vst.msk [vmem:[%s1011_s5] sm:$0x3] %vm545_vm0, %v578_v60 }

// kernel: _lambda_.50
= control target key start
LH: loop header
LB: loop body
LE: loop exit
PB: predicated region body
PF: predicated region fallthrough
CT: control target
= control target key end

     0   :  { %v18_v0 = vlaneseq  ;;  %v106_v20 = vmov 1983009808   ;;  %s142_s1 = inlined_call_operand.vmem [shape: f32[1,512], index: 1, kind: input, shape index: {}]   ;;  %s143_s2 = inlined_call_operand.vmem [shape: f32[1,512], index: 2, kind: input, shape index: {}]   ;;  %s144_s0 = inlined_call_operand.vmem [shape: f32[4,512], index: 0, kind: input, shape index: {}]   ;;  %s145_s3 = inlined_call_operand.vmem [shape: bf16[4,512], index: 3, kind: output, shape index: {}]  }
   0x1   :  { %v16_v2 = vld [vmem:[%s142_s1] sm:$0xf]  ;;  %v15_v13 = vld [vmem:[%s144_s0 + $0x8] sm:$0xff]  ;;  %v83_v21 = vunpack.c.l.s4 %v106_v20 }
   0x2   :  { %v19_v1 = vshrl.u32 %v18_v0, 7  ;;  %v40_v7 = vld [vmem:[%s143_s2] sm:$0xf] }
   0x3   :  { %v14_v12 = vld [vmem:[%s144_s0] sm:$0xff]  ;;  %v84_v28 = vunpack.c.0.s8 %v83_v21 }
   0x4   :  { %v20_v3 = vsub.s32 0, %v19_v1  ;;  %v24_v4 = vsub.s32 1, %v19_v1  ;;  %v28_v5 = vsub.s32 2, %v19_v1  ;;  %v32_v6 = vsub.s32 3, %v19_v1 }
   0x5   :  { %v87_v33 = vsub.s32 %v84_v28, %v19_v1 }
   0x6   :  { %v21_v8 = vrot.slane %v16_v2, %v20_v3  ;;  %v25_v9 = vrot.slane %v16_v2, %v24_v4  ;;  %v29_v10 = vrot.slane %v16_v2, %v28_v5  ;;  %v33_v11 = vrot.slane %v16_v2, %v32_v6 }
   0x7   :  { %v45_v14 = vrot.slane %v40_v7, %v20_v3  ;;  %v49_v15 = vrot.slane %v40_v7, %v24_v4  ;;  %v53_v16 = vrot.slane %v40_v7, %v28_v5  ;;  %v57_v17 = vrot.slane %v40_v7, %v32_v6 }
   0x8   :  { %v34_v18 = vcombine.low %v21_v8, %v25_v9  ;;  %v35_v19 = vcombine.low %v29_v10, %v33_v11 }
   0x9   :  { %v58_v22 = vcombine.low %v45_v14, %v49_v15  ;;  %v59_v23 = vcombine.low %v53_v16, %v57_v17 }
   0xa   :  { %v38_v24 = vmul.f32 %v34_v18, %v14_v12  ;;  %v39_v25 = vmul.f32 %v35_v19, %v15_v13 }
   0xc   :  { %v62_v26 = vadd.f32 %v58_v22, %v38_v24  ;;  %v63_v27 = vadd.f32 %v59_v23, %v39_v25 }
   0xe   :  { %v64_v29 = vmax.f32 %v62_v26, 0.0  ;;  %v65_v30 = vmax.f32 %v63_v27, 0.0 }
  0x10   :  { %v68_v31 = vcombine.high %v64_v29, %v64_v29  ;;  %v69_v32 = vcombine.high %v65_v30, %v65_v30 }
  0x12   :  { %v103_v34 = vpack.c.bf16 %v68_v31, %v64_v29  ;;  %v104_v35 = vpack.c.bf16 %v69_v32, %v65_v30 }
  0x14   :  { %v88_v36 = vrot.slane %v103_v34, %v87_v33  ;;  %v95_v37 = vrot.slane %v104_v35, %v87_v33 }
  0x16   :  { %v96_v38 = vcombine.low %v88_v36, %v95_v37 }
  0x18   :  { %98 = vst [vmem:[%s145_s3] sm:$0xff] %v96_v38 }

// kernel: tile.314
= control target key start
LH: loop header
LB: loop body
LE: loop exit
PB: predicated region body
PF: predicated region fallthrough
CT: control target
= control target key end

     0   :  { %s22_s0 = inlined_call_operand.vmem [shape: f32[32], index: 0, kind: input, shape index: {}]   ;;  %s23_s1 = inlined_call_operand.vmem [shape: f32[4,32], index: 1, kind: output, shape index: {}]  }
   0x1   :  { %v4_v0 = vld [vmem:[%s22_s0] ss:$0 sm:$0xff] }
   0x2   :  { %5 = vst [vmem:[%s23_s1] sm:$0xf] %v4_v0 }

// kernel: tile.315
= control target key start
LH: loop header
LB: loop body
LE: loop exit
PB: predicated region body
PF: predicated region fallthrough
CT: control target
= control target key end

     0   :  { %vm8_vm0 = vcmask 261120   ;;  %s40_s8 = smov 32   ;;  %s41_s9 = smov 64   ;;  %vm14_vm1 = vcmask 1048320   ;;  %vm20_vm2 = vcmask 785920   ;;  %vm26_vm3 = vcmask 523520   ;;  %s58_s0 = inlined_call_operand.vmem [shape: f32[4,32], index: 0, kind: input, shape index: {}]   ;;  %s59_s1 = inlined_call_operand.vmem [shape: f32[1,128], index: 1, kind: output, shape index: {}]  }
   0x1   :  { %v5_v0 = vld [vmem:[%s58_s0] sm:$0xf]  ;;  %s39_s0 = smov 96  }
   0x2   :  { %6 = vst [vmem:[#allocation1] sm:$0xf] %v5_v0 }
   0x9   :  { %v11_v1 = vld [vmem:[#allocation1 + $0x3] sm:$0x1]   ;;  %v23_v2 = vld [vmem:[#allocation1 + $0x1] sm:$0x1]   ;;  %v7_v3 = vld [vmem:[#allocation1] sm:$0x1]  }
   0xa   :  { %12 = vrot.lane.b32.xlu0 %v11_v1, %s39_s0  ;;  %24 = vrot.lane.b32.xlu1 %v23_v2, %s40_s8  ;;  %v17_v4 = vld [vmem:[#allocation1 + $0x2] sm:$0x1]   ;;  %9 = vst.msk [vmem:[#allocation0] sm:$0x1] %vm8_vm0, %v7_v3  }
   0xe   :  { %18 = vrot.lane.b32.xlu0 %v17_v4, %s41_s9 }
  0x7c   :  { %v13_v5 = vpop.permute.xlu0 %12   ;;  %v25_v6 = vpop.permute.xlu1 %24  }
  0x7d   :  { %15 = vst.msk [vmem:[#allocation0] sm:$0x1] %vm14_vm1, %v13_v5  }
  0x80   :  { %v19_v7 = vpop.permute.xlu0 %18  }
  0x81   :  { %21 = vst.msk [vmem:[#allocation0] sm:$0x1] %vm20_vm2, %v19_v7  }
  0x82   :  { %27 = vst.msk [vmem:[#allocation0] sm:$0x1] %vm26_vm3, %v25_v6  }
  0x89   :  { %v32_v8 = vld [vmem:[#allocation0] sm:$0x1] }
  0x8a   :  { %35 = vst [vmem:[%s59_s1] sm:$0x1] %v32_v8 }

// kernel: tile.326
= control target key start
LH: loop header
LB: loop body
LE: loop exit
PB: predicated region body
PF: predicated region fallthrough
CT: control target
= control target key end

     0   :  { %vm8_vm0 = vcmask 261120   ;;  %s40_s8 = smov 32   ;;  %s41_s9 = smov 64   ;;  %vm14_vm1 = vcmask 1048320   ;;  %vm20_vm2 = vcmask 785920   ;;  %vm26_vm3 = vcmask 523520   ;;  %s58_s0 = inlined_call_operand.vmem [shape: f32[4,32], index: 0, kind: input, shape index: {}]   ;;  %s59_s1 = inlined_call_operand.vmem [shape: f32[128], index: 1, kind: output, shape index: {}]  }
   0x1   :  { %v5_v0 = vld [vmem:[%s58_s0] sm:$0xf]  ;;  %s39_s0 = smov 96  }
   0x2   :  { %6 = vst [vmem:[#allocation1] sm:$0xf] %v5_v0 }
   0x9   :  { %v11_v1 = vld [vmem:[#allocation1 + $0x3] sm:$0x1]   ;;  %v23_v2 = vld [vmem:[#allocation1 + $0x1] sm:$0x1]   ;;  %v7_v3 = vld [vmem:[#allocation1] sm:$0x1]  }
   0xa   :  { %12 = vrot.lane.b32.xlu0 %v11_v1, %s39_s0  ;;  %24 = vrot.lane.b32.xlu1 %v23_v2, %s40_s8  ;;  %v17_v4 = vld [vmem:[#allocation1 + $0x2] sm:$0x1]   ;;  %9 = vst.msk [vmem:[#allocation0] sm:$0x1] %vm8_vm0, %v7_v3  }
   0xe   :  { %18 = vrot.lane.b32.xlu0 %v17_v4, %s41_s9 }
  0x7c   :  { %v13_v5 = vpop.permute.xlu0 %12   ;;  %v25_v6 = vpop.permute.xlu1 %24  }
  0x7d   :  { %15 = vst.msk [vmem:[#allocation0] sm:$0x1] %vm14_vm1, %v13_v5  }
  0x80   :  { %v19_v7 = vpop.permute.xlu0 %18  }
  0x81   :  { %21 = vst.msk [vmem:[#allocation0] sm:$0x1] %vm20_vm2, %v19_v7  }
  0x82   :  { %27 = vst.msk [vmem:[#allocation0] sm:$0x1] %vm26_vm3, %v25_v6  }
  0x89   :  { %v32_v8 = vld [vmem:[#allocation0] sm:$0x1] }
  0x8a   :  { %35 = vst [vmem:[%s59_s1] sm:$0x1] %v32_v8 }

// kernel: tile.327
= control target key start
LH: loop header
LB: loop body
LE: loop exit
PB: predicated region body
PF: predicated region fallthrough
CT: control target
= control target key end

     0   :  { %s22_s0 = inlined_call_operand.vmem [shape: f32[128], index: 0, kind: input, shape index: {}]   ;;  %s23_s1 = inlined_call_operand.vmem [shape: f32[4,128], index: 1, kind: output, shape index: {}]  }
   0x1   :  { %v4_v0 = vld [vmem:[%s22_s0] ss:$0 sm:$0xff] }
   0x2   :  { %5 = vst [vmem:[%s23_s1] sm:$0xf] %v4_v0 }

// kernel: _lambda_.53
= control target key start
LH: loop header
LB: loop body
LE: loop exit
PB: predicated region body
PF: predicated region fallthrough
CT: control target
= control target key end

     0   :  { %s464_s1 = inlined_call_operand.vmem [shape: bf16[256,128], index: 1, kind: input, shape index: {}]   ;;  %s465_s0 = inlined_call_operand.vmem [shape: bf16[32,256], index: 0, kind: input, shape index: {}]   ;;  %s466_s2 = inlined_call_operand.vmem [shape: f32[1,128], index: 2, kind: input, shape index: {}]   ;;  %s467_s3 = inlined_call_operand.vmem [shape: f32[32,128], index: 3, kind: output, shape index: {0}]   ;;  %s468_s4 = inlined_call_operand.vmem [shape: f32[1,1,128], index: 4, kind: output, shape index: {1}]   ;;  %s469_s5 = inlined_call_operand.vmem [shape: f32[1,1,128], index: 5, kind: output, shape index: {2}]  }
   0x1   :  { %v331_v0 = vld [vmem:[%s464_s1 + $0x78] sm:$0xff]   ;;  %v333_v2 = vld [vmem:[%s464_s1 + $0x70] sm:$0xff]   ;;  %v335_v4 = vld [vmem:[%s464_s1 + $0x68] sm:$0xff]  }
   0x2   :  { %v332_v1 = vld [vmem:[%s464_s1 + $0x38] sm:$0xff]   ;;  %287 = vmatprep.subr.bf16.mxu0 %v331_v0  ;;  %315 = vmatprep.subr.bf16.mxu1 %v331_v0  ;;  %v334_v3 = vld [vmem:[%s464_s1 + $0x30] sm:$0xff]   ;;  %v336_v5 = vld [vmem:[%s464_s1 + $0x28] sm:$0xff]  }
   0x3   :  { %288 = vmatpush3.bf16.msra.mxu0 %v332_v1  ;;  %323 = vmatpush3.bf16.msra.mxu1 %v332_v1  ;;  %v337_v6 = vld [vmem:[%s464_s1 + $0x60] sm:$0xff]   ;;  %v339_v8 = vld [vmem:[%s464_s1 + $0x58] sm:$0xff]   ;;  %v341_v10 = vld [vmem:[%s464_s1 + $0x50] sm:$0xff]  }
   0x4   :  { %289 = vmatprep.subr.bf16.mxu0 %v333_v2  ;;  %316 = vmatprep.subr.bf16.mxu1 %v333_v2  ;;  %v338_v7 = vld [vmem:[%s464_s1 + $0x20] sm:$0xff]   ;;  %v340_v9 = vld [vmem:[%s464_s1 + $0x18] sm:$0xff]   ;;  %v342_v13 = vld [vmem:[%s464_s1 + $0x10] sm:$0xff]  }
   0x5   :  { %v349_v11 = vld [vmem:[%s465_s0 + $0x4] ss:$8 sps:$4 sm:$0xff]   ;;  %v352_v12 = vld [vmem:[%s465_s0 + $0x14] ss:$8 sps:$4 sm:$0xff]   ;;  %v347_v18 = vld [vmem:[%s465_s0] ss:$8 sps:$4 sm:$0xff]  }
   0x6   :  { %v343_v14 = vld [vmem:[%s464_s1 + $0x48] sm:$0xff]   ;;  %209 = vmatprep.mubr.bf16.mxu0 %v349_v11  ;;  %217 = vmatprep.mubr.bf16.mxu1 %v352_v12  ;;  %v345_v16 = vld [vmem:[%s464_s1 + $0x40] sm:$0xff]   ;;  %v350_v19 = vld [vmem:[%s465_s0 + $0x10] ss:$8 sps:$4 sm:$0xff]  }
   0x7   :  { %290 = vmatpush3.bf16.msra.mxu0 %v334_v3  ;;  %324 = vmatpush3.bf16.msra.mxu1 %v334_v3  ;;  %v344_v15 = vld [vmem:[%s464_s1 + $0x8] sm:$0xff]   ;;  %v346_v17 = vld [vmem:[%s464_s1] sm:$0xff]  }
   0x8   :  { %291 = vmatprep.subr.bf16.mxu0 %v335_v4  ;;  %317 = vmatprep.subr.bf16.mxu1 %v335_v4  ;;  %v266_v22 = vld [vmem:[%s466_s2] ss:$0 sm:$0xff] }
   0xb   :  { %292 = vmatpush3.bf16.msra.mxu0 %v336_v5  ;;  %325 = vmatpush3.bf16.msra.mxu1 %v336_v5 }
   0xc   :  { %293 = vmatprep.subr.bf16.mxu0 %v337_v6  ;;  %318 = vmatprep.subr.bf16.mxu1 %v337_v6 }
   0xf   :  { %294 = vmatpush3.bf16.msra.mxu0 %v338_v7  ;;  %326 = vmatpush3.bf16.msra.mxu1 %v338_v7 }
  0x10   :  { %295 = vmatprep.subr.bf16.mxu0 %v339_v8  ;;  %319 = vmatprep.subr.bf16.mxu1 %v339_v8 }
  0x13   :  { %296 = vmatpush3.bf16.msra.mxu0 %v340_v9  ;;  %327 = vmatpush3.bf16.msra.mxu1 %v340_v9 }
  0x14   :  { %297 = vmatprep.subr.bf16.mxu0 %v341_v10  ;;  %320 = vmatprep.subr.bf16.mxu1 %v341_v10 }
  0x17   :  { %298 = vmatpush3.bf16.msra.mxu0 %v342_v13  ;;  %328 = vmatpush3.bf16.msra.mxu1 %v342_v13 }
  0x18   :  { %299 = vmatprep.subr.bf16.mxu0 %v343_v14  ;;  %321 = vmatprep.subr.bf16.mxu1 %v343_v14 }
  0x1b   :  { %300 = vmatpush3.bf16.msra.mxu0 %v344_v15  ;;  %329 = vmatpush3.bf16.msra.mxu1 %v344_v15 }
  0x1c   :  { %301 = vmatprep.subr.bf16.mxu0 %v345_v16  ;;  %322 = vmatprep.subr.bf16.mxu1 %v345_v16 }
  0x1f   :  { %302 = vmatpush3.bf16.msra.mxu0 %v346_v17  ;;  %330 = vmatpush3.bf16.msra.mxu1 %v346_v17 }
  0x22   :  { %210 = vmatmul.mubr.bf16.vlgmr.msra.gmra.mxu0 %v347_v18  ;;  %218 = vmatmul.mubr.bf16.vlgmr.msra.gmra.mxu1 %v350_v19 }
  0xe2   :  { %v303_v20 = vpop.f32.mrf.mxu0  ;;  %v309_v21 = vpop.f32.mrf.mxu1 }
  0xe4   :  { %v304_v23 = vpop.f32.mrf.mxu0  ;;  %v310_v24 = vpop.f32.mrf.mxu1 }
  0xe5   :  { %v305_v25 = vadd.f32 %v304_v23, %v303_v20  ;;  %v311_v26 = vadd.f32 %v310_v24, %v309_v21 }
  0xe6   :  { %v306_v27 = vpop.f32.mrf.mxu0  ;;  %v312_v28 = vpop.f32.mrf.mxu1 }
  0xe7   :  { %v212_v29 = vadd.f32 %v305_v25, %v266_v22  ;;  %v220_v30 = vadd.f32 %v311_v26, %v266_v22 }
  0xe8   :  { %v307_v31 = vpop.f32.mrf.mxu0  ;;  %v313_v32 = vpop.f32.mrf.mxu1 }
  0xe9   :  { %226 = vst [vmem:[%s467_s3] sm:$0xff] %v212_v29  ;;  %228 = vst [vmem:[%s467_s3 + $0x10] sm:$0xff] %v220_v30  ;;  %v308_v33 = vadd.f32 %v307_v31, %v306_v27  ;;  %v314_v34 = vadd.f32 %v313_v32, %v312_v28  ;;  %v240_v37 = vmul.f32 %v212_v29, %v212_v29 }
  0xea   :  { %v242_v40 = vmul.f32 %v220_v30, %v220_v30 }
  0xeb   :  { %v215_v35 = vadd.f32 %v308_v33, %v266_v22  ;;  %v223_v36 = vadd.f32 %v314_v34, %v266_v22 }
  0xed   :  { %227 = vst [vmem:[%s467_s3 + $0x8] sm:$0xff] %v215_v35  ;;  %v230_v38 = vadd.f32 %v215_v35, %v212_v29  ;;  %v241_v39 = vmul.f32 %v215_v35, %v215_v35  ;;  %229 = vst [vmem:[%s467_s3 + $0x18] sm:$0xff] %v223_v36  ;;  %v243_v44 = vmul.f32 %v223_v36, %v223_v36 }
  0xef   :  { %v244_v41 = vadd.f32 %v241_v39, %v240_v37  ;;  %v231_v42 = vadd.f32 %v230_v38, %v220_v30 }
  0xf1   :  { %v232_v43 = vadd.f32 %v231_v42, %v223_v36  ;;  %v245_v45 = vadd.f32 %v244_v41, %v242_v40 }
  0xf3   :  { %v233_v46 = vrot.slane %v232_v43, 4  ;;  %v246_v47 = vadd.f32 %v245_v45, %v243_v44 }
  0xf5   :  { %v234_v48 = vadd.f32 %v233_v46, %v232_v43  ;;  %v247_v49 = vrot.slane %v246_v47, 4 }
  0xf7   :  { %v235_v50 = vrot.slane %v234_v48, 2  ;;  %v248_v51 = vadd.f32 %v247_v49, %v246_v47 }
  0xf9   :  { %v236_v52 = vadd.f32 %v235_v50, %v234_v48  ;;  %v249_v53 = vrot.slane %v248_v51, 2 }
  0xfb   :  { %v237_v54 = vrot.slane %v236_v52, 1  ;;  %v250_v55 = vadd.f32 %v249_v53, %v248_v51 }
  0xfd   :  { %v238_v56 = vadd.f32 %v237_v54, %v236_v52  ;;  %v251_v57 = vrot.slane %v250_v55, 1 }
  0xff   :  { %239 = vst [vmem:[%s468_s4] sm:$0x1] %v238_v56  ;;  %v252_v58 = vadd.f32 %v251_v57, %v250_v55 }
 0x101   :  { %253 = vst [vmem:[%s469_s5] sm:$0x1] %v252_v58 }

// kernel: _lambda_.54
= control target key start
LH: loop header
LB: loop body
LE: loop exit
PB: predicated region body
PF: predicated region fallthrough
CT: control target
= control target key end

     0   :  { %v20_v0 = vlaneseq  ;;  %s144_s1 = inlined_call_operand.vmem [shape: f32[1,512], index: 1, kind: input, shape index: {}]   ;;  %s145_s2 = inlined_call_operand.vmem [shape: f32[1,512], index: 2, kind: input, shape index: {}]   ;;  %s146_s0 = inlined_call_operand.vmem [shape: f32[8,512], index: 0, kind: input, shape index: {}]   ;;  %s147_s3 = inlined_call_operand.vmem [shape: bf16[8,512], index: 3, kind: output, shape index: {}]  }
   0x1   :  { %v18_v2 = vld [vmem:[%s144_s1] sm:$0xf]  ;;  %v15_v9 = vld [vmem:[%s146_s0 + $0x8] sm:$0xff]  ;;  %v16_v14 = vld [vmem:[%s146_s0 + $0x10] sm:$0xff] }
   0x2   :  { %v21_v1 = vshrl.u32 %v20_v0, 7  ;;  %v44_v3 = vld [vmem:[%s145_s2] sm:$0xf]  ;;  %v17_v15 = vld [vmem:[%s146_s0 + $0x18] sm:$0xff] }
   0x3   :  { %v14_v8 = vld [vmem:[%s146_s0] sm:$0xff] }
   0x4   :  { %v22_v4 = vsub.s32 0, %v21_v1  ;;  %v26_v5 = vsub.s32 1, %v21_v1  ;;  %v30_v6 = vsub.s32 2, %v21_v1  ;;  %v34_v7 = vsub.s32 3, %v21_v1 }
   0x6   :  { %v23_v10 = vrot.slane %v18_v2, %v22_v4  ;;  %v27_v11 = vrot.slane %v18_v2, %v26_v5  ;;  %v49_v12 = vrot.slane %v44_v3, %v22_v4  ;;  %v53_v13 = vrot.slane %v44_v3, %v26_v5 }
   0x7   :  { %v31_v16 = vrot.slane %v18_v2, %v30_v6  ;;  %v35_v17 = vrot.slane %v18_v2, %v34_v7  ;;  %v57_v18 = vrot.slane %v44_v3, %v30_v6  ;;  %v61_v19 = vrot.slane %v44_v3, %v34_v7 }
   0x8   :  { %v40_v20 = vmul.f32 %v23_v10, %v14_v8  ;;  %v41_v21 = vmul.f32 %v27_v11, %v15_v9 }
   0x9   :  { %v42_v22 = vmul.f32 %v31_v16, %v16_v14  ;;  %v43_v23 = vmul.f32 %v35_v17, %v17_v15 }
   0xa   :  { %v66_v24 = vadd.f32 %v49_v12, %v40_v20  ;;  %v67_v25 = vadd.f32 %v53_v13, %v41_v21 }
   0xb   :  { %v68_v26 = vadd.f32 %v57_v18, %v42_v22  ;;  %v69_v27 = vadd.f32 %v61_v19, %v43_v23 }
   0xc   :  { %v70_v28 = vmax.f32 %v66_v24, 0.0  ;;  %v71_v29 = vmax.f32 %v67_v25, 0.0 }
   0xd   :  { %v72_v30 = vmax.f32 %v68_v26, 0.0  ;;  %v73_v31 = vmax.f32 %v69_v27, 0.0 }
   0xe   :  { %v98_v32 = vpack.c.bf16 %v71_v29, %v70_v28 }
   0xf   :  { %v99_v33 = vpack.c.bf16 %v73_v31, %v72_v30 }
  0x10   :  { %90 = vst [vmem:[%s147_s3] sm:$0xff] %v98_v32 }
  0x11   :  { %91 = vst [vmem:[%s147_s3 + $0x8] sm:$0xff] %v99_v33 }

// kernel: tile.346
= control target key start
LH: loop header
LB: loop body
LE: loop exit
PB: predicated region body
PF: predicated region fallthrough
CT: control target
= control target key end

     0   :  { %s22_s0 = inlined_call_operand.vmem [shape: f32[16], index: 0, kind: input, shape index: {}]   ;;  %s23_s1 = inlined_call_operand.vmem [shape: f32[4,16], index: 1, kind: output, shape index: {}]  }
   0x1   :  { %v4_v0 = vld [vmem:[%s22_s0] ss:$0 sm:$0xff] }
   0x2   :  { %5 = vst [vmem:[%s23_s1] sm:$0xf] %v4_v0 }

// kernel: tile.347
= control target key start
LH: loop header
LB: loop body
LE: loop exit
PB: predicated region body
PF: predicated region fallthrough
CT: control target
= control target key end

     0   :  { %vm8_vm0 = vcmask 130048   ;;  %s40_s8 = smov 16   ;;  %s41_s9 = smov 32   ;;  %vm14_vm1 = vcmask 523648   ;;  %vm20_vm2 = vcmask 392448   ;;  %vm26_vm3 = vcmask 261248   ;;  %s58_s0 = inlined_call_operand.vmem [shape: f32[4,16], index: 0, kind: input, shape index: {}]   ;;  %s59_s1 = inlined_call_operand.vmem [shape: f32[1,64], index: 1, kind: output, shape index: {}]  }
   0x1   :  { %v5_v0 = vld [vmem:[%s58_s0] sm:$0xf]  ;;  %s39_s0 = smov 48  }
   0x2   :  { %6 = vst [vmem:[#allocation1] sm:$0xf] %v5_v0 }
   0x9   :  { %v11_v1 = vld [vmem:[#allocation1 + $0x3] sm:$0x1]   ;;  %v23_v2 = vld [vmem:[#allocation1 + $0x1] sm:$0x1]   ;;  %v7_v3 = vld [vmem:[#allocation1] sm:$0x1]  }
   0xa   :  { %12 = vrot.lane.b32.xlu0 %v11_v1, %s39_s0  ;;  %24 = vrot.lane.b32.xlu1 %v23_v2, %s40_s8  ;;  %v17_v4 = vld [vmem:[#allocation1 + $0x2] sm:$0x1]   ;;  %9 = vst.msk [vmem:[#allocation0] sm:$0x1] %vm8_vm0, %v7_v3  }
   0xe   :  { %18 = vrot.lane.b32.xlu0 %v17_v4, %s41_s9 }
  0x7c   :  { %v13_v5 = vpop.permute.xlu0 %12   ;;  %v25_v6 = vpop.permute.xlu1 %24  }
  0x7d   :  { %15 = vst.msk [vmem:[#allocation0] sm:$0x1] %vm14_vm1, %v13_v5  }
  0x80   :  { %v19_v7 = vpop.permute.xlu0 %18  }
  0x81   :  { %21 = vst.msk [vmem:[#allocation0] sm:$0x1] %vm20_vm2, %v19_v7  }
  0x82   :  { %27 = vst.msk [vmem:[#allocation0] sm:$0x1] %vm26_vm3, %v25_v6  }
  0x89   :  { %v32_v8 = vld [vmem:[#allocation0] sm:$0x1] }
  0x8a   :  { %35 = vst [vmem:[%s59_s1] sm:$0x1] %v32_v8 }

// kernel: tile.358
= control target key start
LH: loop header
LB: loop body
LE: loop exit
PB: predicated region body
PF: predicated region fallthrough
CT: control target
= control target key end

     0   :  { %vm8_vm0 = vcmask 130048   ;;  %s40_s8 = smov 16   ;;  %s41_s9 = smov 32   ;;  %vm14_vm1 = vcmask 523648   ;;  %vm20_vm2 = vcmask 392448   ;;  %vm26_vm3 = vcmask 261248   ;;  %s58_s0 = inlined_call_operand.vmem [shape: f32[4,16], index: 0, kind: input, shape index: {}]   ;;  %s59_s1 = inlined_call_operand.vmem [shape: f32[64], index: 1, kind: output, shape index: {}]  }
   0x1   :  { %v5_v0 = vld [vmem:[%s58_s0] sm:$0xf]  ;;  %s39_s0 = smov 48  }
   0x2   :  { %6 = vst [vmem:[#allocation1] sm:$0xf] %v5_v0 }
   0x9   :  { %v11_v1 = vld [vmem:[#allocation1 + $0x3] sm:$0x1]   ;;  %v23_v2 = vld [vmem:[#allocation1 + $0x1] sm:$0x1]   ;;  %v7_v3 = vld [vmem:[#allocation1] sm:$0x1]  }
   0xa   :  { %12 = vrot.lane.b32.xlu0 %v11_v1, %s39_s0  ;;  %24 = vrot.lane.b32.xlu1 %v23_v2, %s40_s8  ;;  %v17_v4 = vld [vmem:[#allocation1 + $0x2] sm:$0x1]   ;;  %9 = vst.msk [vmem:[#allocation0] sm:$0x1] %vm8_vm0, %v7_v3  }
   0xe   :  { %18 = vrot.lane.b32.xlu0 %v17_v4, %s41_s9 }
  0x7c   :  { %v13_v5 = vpop.permute.xlu0 %12   ;;  %v25_v6 = vpop.permute.xlu1 %24  }
  0x7d   :  { %15 = vst.msk [vmem:[#allocation0] sm:$0x1] %vm14_vm1, %v13_v5  }
  0x80   :  { %v19_v7 = vpop.permute.xlu0 %18  }
  0x81   :  { %21 = vst.msk [vmem:[#allocation0] sm:$0x1] %vm20_vm2, %v19_v7  }
  0x82   :  { %27 = vst.msk [vmem:[#allocation0] sm:$0x1] %vm26_vm3, %v25_v6  }
  0x89   :  { %v32_v8 = vld [vmem:[#allocation0] sm:$0x1] }
  0x8a   :  { %35 = vst [vmem:[%s59_s1] sm:$0x1] %v32_v8 }

// kernel: tile.359
= control target key start
LH: loop header
LB: loop body
LE: loop exit
PB: predicated region body
PF: predicated region fallthrough
CT: control target
= control target key end

     0   :  { %s22_s0 = inlined_call_operand.vmem [shape: f32[64], index: 0, kind: input, shape index: {}]   ;;  %s23_s1 = inlined_call_operand.vmem [shape: f32[8,64], index: 1, kind: output, shape index: {}]  }
   0x1   :  { %v4_v0 = vld [vmem:[%s22_s0] ss:$0 sm:$0xff] }
   0x2   :  { %5 = vst [vmem:[%s23_s1] sm:$0xff] %v4_v0 }

// kernel: tile.364
= control target key start
LH: loop header
LB: loop body
LE: loop exit
PB: predicated region body
PF: predicated region fallthrough
CT: control target
= control target key end

     0   :  { %vm3_vm0 = vcmask 523264   ;;  %s46_s8 = smov 64   ;;  %vm9_vm1 = vcmask 1048064   ;;  %s75_s0 = inlined_call_operand.vmem [shape: f32[8,64], index: 0, kind: input, shape index: {}]   ;;  %s76_s1 = inlined_call_operand.vmem [shape: f32[1,512], index: 1, kind: output, shape index: {}]  }
   0x1   :  { %v41_v0 = vld [vmem:[%s75_s0 + $0x1] ss:$2 sm:$0xf]   ;;  %v2_v1 = vld [vmem:[%s75_s0] ss:$2 sm:$0xf]  }
   0x2   :  { %7 = vrot.lane.b32.xlu0 %v41_v0, %s46_s8  ;;  %4 = vst.msk [vmem:[#allocation0] ss:$8 sm:$0xf] %vm3_vm0, %v2_v1  }
  0x74   :  { %v8_v2 = vpop.permute.xlu0 %7  }
  0x75   :  { %10 = vst.msk [vmem:[#allocation0] ss:$8 sm:$0xf] %vm9_vm1, %v8_v2  }
  0x7c   :  { %v15_v3 = vld [vmem:[#allocation0] sm:$0x1]  ;;  %v20_v4 = vld [vmem:[#allocation0 + $0x8] sm:$0x1]  ;;  %v26_v5 = vld [vmem:[#allocation0 + $0x10] sm:$0x1] }
  0x7d   :  { %18 = vst [vmem:[%s76_s1] sm:$0x1] %v15_v3  ;;  %42 = vst [vmem:[%s76_s1 + $0x1] sm:$0x1] %v20_v4  ;;  %v33_v6 = vld [vmem:[#allocation0 + $0x18] sm:$0x1] }
  0x7e   :  { %43 = vst [vmem:[%s76_s1 + $0x2] sm:$0x1] %v26_v5  ;;  %44 = vst [vmem:[%s76_s1 + $0x3] sm:$0x1] %v33_v6 }

// kernel: _lambda_.57
= control target key start
LH: loop header
LB: loop body
LE: loop exit
PB: predicated region body
PF: predicated region fallthrough
CT: control target
= control target key end

     0   :  { %vm250_vm0 = vcmask 523264   ;;  %vm304_vm1 = vcmask 516096   ;;  %s700_s1 = inlined_call_operand.vmem [shape: bf16[128,64], index: 1, kind: input, shape index: {}]   ;;  %s701_s0 = inlined_call_operand.vmem [shape: bf16[128,128], index: 0, kind: input, shape index: {}]   ;;  %s702_s2 = inlined_call_operand.vmem [shape: f32[1,64], index: 2, kind: input, shape index: {}]   ;;  %s703_s3 = inlined_call_operand.vmem [shape: f32[128,64], index: 3, kind: output, shape index: {0}]   ;;  %s704_s4 = inlined_call_operand.vmem [shape: f32[1,1,64], index: 4, kind: output, shape index: {1}]   ;;  %s705_s5 = inlined_call_operand.vmem [shape: f32[1,1,64], index: 5, kind: output, shape index: {2}]  }
   0x1   :  { %v453_v0 = vld [vmem:[%s700_s1 + $0x38] sm:$0xff]   ;;  %v454_v1 = vld [vmem:[%s700_s1 + $0x30] sm:$0xff]   ;;  %v455_v2 = vld [vmem:[%s700_s1 + $0x28] sm:$0xff]  }
   0x2   :  { %405 = vmatprep.subr.bf16.mxu0 %v453_v0  ;;  %437 = vmatprep.subr.bf16.mxu1 %v453_v0  ;;  %v456_v3 = vld [vmem:[%s700_s1 + $0x20] sm:$0xff]   ;;  %v457_v5 = vld [vmem:[%s700_s1 + $0x18] sm:$0xff]   ;;  %v458_v7 = vld [vmem:[%s700_s1 + $0x10] sm:$0xff]  }
   0x3   :  { %406 = vmatpush3.bf16.msra.mxu0 %v453_v0  ;;  %445 = vmatpush3.bf16.msra.mxu1 %v453_v0  ;;  %v461_v4 = vld [vmem:[%s701_s0] sm:$0xff]   ;;  %v459_v8 = vld [vmem:[%s700_s1 + $0x8] sm:$0xff]   ;;  %v463_v12 = vld [vmem:[%s701_s0 + $0x10] sm:$0xff]  }
   0x4   :  { %407 = vmatprep.subr.bf16.mxu0 %v454_v1  ;;  %438 = vmatprep.subr.bf16.mxu1 %v454_v1  ;;  %v465_v6 = vld [vmem:[%s701_s0 + $0x20] sm:$0xff]   ;;  %v462_v10 = vld [vmem:[%s701_s0 + $0x8] sm:$0xff]   ;;  %v467_v13 = vld [vmem:[%s701_s0 + $0x30] sm:$0xff]  }
   0x5   :  { %421 = vmatprep.mubr.bf16.mxu0 %v461_v4  ;;  %429 = vmatprep.mubr.bf16.mxu1 %v465_v6  ;;  %v460_v9 = vld [vmem:[%s700_s1] sm:$0xff]   ;;  %v466_v11 = vld [vmem:[%s701_s0 + $0x28] sm:$0xff]   ;;  %v464_v14 = vld [vmem:[%s701_s0 + $0x18] sm:$0xff]  }
   0x6   :  { %v468_v15 = vld [vmem:[%s701_s0 + $0x38] sm:$0xff]   ;;  %v550_v16 = vld [vmem:[%s702_s2] ss:$0 sm:$0xff] }
   0x7   :  { %408 = vmatpush3.bf16.msra.mxu0 %v454_v1  ;;  %446 = vmatpush3.bf16.msra.mxu1 %v454_v1 }
   0x8   :  { %409 = vmatprep.subr.bf16.mxu0 %v455_v2  ;;  %439 = vmatprep.subr.bf16.mxu1 %v455_v2 }
   0xb   :  { %410 = vmatpush3.bf16.msra.mxu0 %v455_v2  ;;  %447 = vmatpush3.bf16.msra.mxu1 %v455_v2 }
   0xc   :  { %411 = vmatprep.subr.bf16.mxu0 %v456_v3  ;;  %440 = vmatprep.subr.bf16.mxu1 %v456_v3 }
   0xf   :  { %412 = vmatpush3.bf16.msra.mxu0 %v456_v3  ;;  %448 = vmatpush3.bf16.msra.mxu1 %v456_v3 }
  0x10   :  { %413 = vmatprep.subr.bf16.mxu0 %v457_v5  ;;  %441 = vmatprep.subr.bf16.mxu1 %v457_v5 }
  0x13   :  { %414 = vmatpush3.bf16.msra.mxu0 %v457_v5  ;;  %449 = vmatpush3.bf16.msra.mxu1 %v457_v5 }
  0x14   :  { %415 = vmatprep.subr.bf16.mxu0 %v458_v7  ;;  %442 = vmatprep.subr.bf16.mxu1 %v458_v7 }
  0x17   :  { %416 = vmatpush3.bf16.msra.mxu0 %v458_v7  ;;  %450 = vmatpush3.bf16.msra.mxu1 %v458_v7 }
  0x18   :  { %417 = vmatprep.subr.bf16.mxu0 %v459_v8  ;;  %443 = vmatprep.subr.bf16.mxu1 %v459_v8 }
  0x1b   :  { %418 = vmatpush3.bf16.msra.mxu0 %v459_v8  ;;  %451 = vmatpush3.bf16.msra.mxu1 %v459_v8 }
  0x1c   :  { %419 = vmatprep.subr.bf16.mxu0 %v460_v9  ;;  %444 = vmatprep.subr.bf16.mxu1 %v460_v9 }
  0x1f   :  { %420 = vmatpush3.bf16.msra.mxu0 %v460_v9  ;;  %452 = vmatpush3.bf16.msra.mxu1 %v460_v9 }
  0x22   :  { %422 = vmatmul.mubr.bf16.vlgmr.msra.gmra.mxu0 %v462_v10  ;;  %430 = vmatmul.mubr.bf16.vlgmr.msra.gmra.mxu1 %v466_v11 }
  0x23   :  { %425 = vmatprep.mubr.bf16.mxu0 %v463_v12  ;;  %433 = vmatprep.mubr.bf16.mxu1 %v467_v13 }
  0x2a   :  { %426 = vmatmul.mubr.bf16.gmra.mxu0 %v464_v14  ;;  %434 = vmatmul.mubr.bf16.gmra.mxu1 %v468_v15 }
  0xe2   :  { %v423_v17 = vpop.f32.mrf.mxu0  ;;  %v431_v18 = vpop.f32.mrf.mxu1 }
  0xe3   :  { %v196_v19 = vadd.f32 %v423_v17, %v550_v16  ;;  %v554_v20 = vadd.f32 %v431_v18, %v550_v16 }
  0xe4   :  { %v187_v21 = vpop.f32.mrf.mxu0  ;;  %v219_v22 = vpop.f32.mrf.mxu1 }
  0xe5   :  { %253 = vst.msk [vmem:[%s703_s3 + $0x10] sm:$0xff] %vm250_vm0, %v196_v19  ;;  %v188_v23 = vadd.f32 %v550_v16, %v187_v21  ;;  %261 = vst.msk [vmem:[%s703_s3 + $0x50] sm:$0xff] %vm250_vm0, %v554_v20  ;;  %v567_v25 = vadd.f32 %v550_v16, %v219_v22  ;;  %v308_v33 = vmul.f32 %v196_v19, %v196_v19  ;;  %v270_v41 = vsel %vm250_vm0, %v196_v19, 0.0 }
  0xe6   :  { %v424_v24 = vpop.f32.mrf.mxu0  ;;  %v432_v26 = vpop.f32.mrf.mxu1 }
  0xe7   :  { %251 = vst.msk [vmem:[%s703_s3] sm:$0xff] %vm250_vm0, %v188_v23  ;;  %v199_v27 = vadd.f32 %v424_v24, %v550_v16  ;;  %259 = vst.msk [vmem:[%s703_s3 + $0x40] sm:$0xff] %vm250_vm0, %v567_v25  ;;  %v580_v29 = vadd.f32 %v432_v26, %v550_v16  ;;  %v306_v31 = vmul.f32 %v188_v23, %v188_v23  ;;  %v267_v37 = vsel %vm250_vm0, %v188_v23, 0.0 }
  0xe8   :  { %v190_v28 = vpop.f32.mrf.mxu0  ;;  %v222_v30 = vpop.f32.mrf.mxu1  ;;  %v325_v54 = vsel %vm250_vm0, %v308_v33, 0.0  ;;  %v314_v21 = vmul.f32 %v567_v25, %v567_v25 }
  0xe9   :  { %254 = vst.msk [vmem:[%s703_s3 + $0x18] sm:$0xff] %vm250_vm0, %v199_v27  ;;  %v191_v32 = vadd.f32 %v550_v16, %v190_v28  ;;  %262 = vst.msk [vmem:[%s703_s3 + $0x58] sm:$0xff] %vm250_vm0, %v580_v29  ;;  %v593_v35 = vadd.f32 %v550_v16, %v222_v30  ;;  %v322_v45 = vsel %vm250_vm0, %v306_v31, 0.0  ;;  %v309_v46 = vmul.f32 %v199_v27, %v199_v27 }
  0xea   :  { %v427_v34 = vpop.f32.mrf.mxu0  ;;  %v435_v36 = vpop.f32.mrf.mxu1  ;;  %v272_v55 = vsel %vm250_vm0, %v199_v27, 0.0  ;;  %v316_v30 = vmul.f32 %v554_v20, %v554_v20  ;;  %v337_v31 = vsel %vm250_vm0, %v314_v21, 0.0 }
  0xeb   :  { %252 = vst.msk [vmem:[%s703_s3 + $0x8] sm:$0xff] %vm250_vm0, %v191_v32  ;;  %v268_v38 = vsel %vm250_vm0, %v191_v32, 0.0  ;;  %v307_v39 = vmul.f32 %v191_v32, %v191_v32  ;;  %v212_v40 = vadd.f32 %v427_v34, %v550_v16  ;;  %260 = vst.msk [vmem:[%s703_s3 + $0x48] sm:$0xff] %vm250_vm0, %v593_v35  ;;  %v616_v52 = vadd.f32 %v435_v36, %v550_v16 }
  0xec   :  { %v269_v42 = vadd.f32 %v268_v38, %v267_v37  ;;  %v203_v43 = vpop.f32.mrf.mxu0  ;;  %v235_v44 = vpop.f32.mrf.mxu1  ;;  %v327_v61 = vsel %vm250_vm0, %v309_v46, 0.0  ;;  %v315_v26 = vmul.f32 %v593_v35, %v593_v35  ;;  %v284_v32 = vsel %vm250_vm0, %v593_v35, 0.0 }
  0xed   :  { %v323_v47 = vsel %vm250_vm0, %v307_v39, 0.0  ;;  %257 = vst.msk [vmem:[%s703_s3 + $0x30] sm:$0xff] %vm250_vm0, %v212_v40  ;;  %v204_v48 = vadd.f32 %v550_v16, %v203_v43  ;;  %265 = vst.msk [vmem:[%s703_s3 + $0x70] sm:$0xff] %vm250_vm0, %v616_v52  ;;  %v312_v0 = vmul.f32 %v212_v40, %v212_v40  ;;  %v236_v3 = vadd.f32 %v550_v16, %v235_v44 }
  0xee   :  { %v271_v49 = vadd.f32 %v270_v41, %v269_v42  ;;  %v324_v50 = vadd.f32 %v323_v47, %v322_v45  ;;  %v428_v51 = vpop.f32.mrf.mxu0  ;;  %v436_v53 = vpop.f32.mrf.mxu1  ;;  %v278_v11 = vsel %vm250_vm0, %v212_v40, 0.0  ;;  %v286_v36 = vsel %vm250_vm0, %v554_v20, 0.0 }
  0xef   :  { %255 = vst.msk [vmem:[%s703_s3 + $0x20] sm:$0xff] %vm250_vm0, %v204_v48  ;;  %v310_v56 = vmul.f32 %v204_v48, %v204_v48  ;;  %v215_v57 = vadd.f32 %v428_v51, %v550_v16  ;;  %v274_v62 = vsel %vm250_vm0, %v204_v48, 0.0  ;;  %v247_v8 = vadd.f32 %v436_v53, %v550_v16  ;;  %263 = vst.msk [vmem:[%s703_s3 + $0x60] sm:$0xff] %vm250_vm0, %v236_v3 }
  0xf0   :  { %v326_v58 = vadd.f32 %v325_v54, %v324_v50  ;;  %v273_v59 = vadd.f32 %v272_v55, %v271_v49  ;;  %v206_v60 = vpop.f32.mrf.mxu0  ;;  %v238_v4 = vpop.f32.mrf.mxu1  ;;  %v333_v18 = vsel %vm250_vm0, %v312_v0, 0.0  ;;  %v339_v37 = vsel %vm250_vm0, %v315_v26, 0.0 }
  0xf1   :  { %258 = vst.msk [vmem:[%s703_s3 + $0x38] sm:$0xff] %vm250_vm0, %v215_v57  ;;  %v207_v63 = vadd.f32 %v550_v16, %v206_v60  ;;  %v329_v5 = vsel %vm250_vm0, %v310_v56, 0.0  ;;  %v313_v12 = vmul.f32 %v215_v57, %v215_v57  ;;  %266 = vst.msk [vmem:[%s703_s3 + $0x78] sm:$0xff] %vm250_vm0, %v247_v8  ;;  %v239_v14 = vadd.f32 %v550_v16, %v238_v4 }
  0xf2   :  { %v275_v1 = vadd.f32 %v274_v62, %v273_v59  ;;  %v328_v2 = vadd.f32 %v327_v61, %v326_v58  ;;  %v280_v19 = vsel %vm250_vm0, %v215_v57, 0.0  ;;  %v282_v16 = vsel %vm250_vm0, %v567_v25, 0.0 }
  0xf3   :  { %256 = vst.msk [vmem:[%s703_s3 + $0x28] sm:$0xff] %vm250_vm0, %v207_v63  ;;  %v276_v6 = vsel %vm250_vm0, %v207_v63, 0.0  ;;  %v311_v7 = vmul.f32 %v207_v63, %v207_v63  ;;  %264 = vst.msk [vmem:[%s703_s3 + $0x68] sm:$0xff] %vm250_vm0, %v239_v14  ;;  %v335_v24 = vsel %vm250_vm0, %v313_v12, 0.0  ;;  %v317_v25 = vmul.f32 %v580_v29, %v580_v29 }
  0xf4   :  { %v330_v9 = vadd.f32 %v329_v5, %v328_v2  ;;  %v277_v10 = vadd.f32 %v276_v6, %v275_v1  ;;  %v341_v40 = vsel %vm250_vm0, %v316_v30, 0.0  ;;  %v288_v41 = vsel %vm250_vm0, %v580_v29, 0.0 }
  0xf5   :  { %v331_v13 = vsel %vm250_vm0, %v311_v7, 0.0  ;;  %v318_v42 = vmul.f32 %v236_v3, %v236_v3  ;;  %v343_v44 = vsel %vm250_vm0, %v317_v25, 0.0  ;;  %v290_v45 = vsel %vm250_vm0, %v236_v3, 0.0 }
  0xf6   :  { %v279_v15 = vadd.f32 %v278_v11, %v277_v10  ;;  %v332_v17 = vadd.f32 %v331_v13, %v330_v9  ;;  %v319_v20 = vmul.f32 %v239_v14, %v239_v14  ;;  %v320_v48 = vmul.f32 %v616_v52, %v616_v52 }
  0xf7   :  { %v345_v49 = vsel %vm250_vm0, %v318_v42, 0.0  ;;  %v292_v50 = vsel %vm250_vm0, %v239_v14, 0.0  ;;  %v294_v29 = vsel %vm250_vm0, %v616_v52, 0.0  ;;  %v321_v54 = vmul.f32 %v247_v8, %v247_v8 }
  0xf8   :  { %v334_v22 = vadd.f32 %v333_v18, %v332_v17  ;;  %v281_v23 = vadd.f32 %v280_v19, %v279_v15  ;;  %v347_v55 = vsel %vm250_vm0, %v319_v20, 0.0  ;;  %v349_v58 = vsel %vm250_vm0, %v320_v48, 0.0 }
  0xf9   :  { %v296_v59 = vsel %vm250_vm0, %v247_v8, 0.0  ;;  %v351_v62 = vsel %vm250_vm0, %v321_v54, 0.0 }
  0xfa   :  { %v283_v27 = vadd.f32 %v282_v16, %v281_v23  ;;  %v336_v28 = vadd.f32 %v335_v24, %v334_v22 }
  0xfc   :  { %v285_v33 = vadd.f32 %v284_v32, %v283_v27  ;;  %v338_v34 = vadd.f32 %v337_v31, %v336_v28 }
  0xfe   :  { %v287_v38 = vadd.f32 %v286_v36, %v285_v33  ;;  %v340_v39 = vadd.f32 %v339_v37, %v338_v34 }
 0x100   :  { %v342_v43 = vadd.f32 %v341_v40, %v340_v39  ;;  %v289_v35 = vadd.f32 %v288_v41, %v287_v38 }
 0x102   :  { %v291_v46 = vadd.f32 %v290_v45, %v289_v35  ;;  %v344_v47 = vadd.f32 %v343_v44, %v342_v43 }
 0x104   :  { %v346_v51 = vadd.f32 %v345_v49, %v344_v47  ;;  %v293_v53 = vadd.f32 %v292_v50, %v291_v46 }
 0x106   :  { %v295_v56 = vadd.f32 %v294_v29, %v293_v53  ;;  %v348_v57 = vadd.f32 %v347_v55, %v346_v51 }
 0x108   :  { %v297_v60 = vadd.f32 %v296_v59, %v295_v56  ;;  %v350_v61 = vadd.f32 %v349_v58, %v348_v57 }
 0x10a   :  { %v298_v63 = vrot.slane %v297_v60, 4  ;;  %v352_v0 = vadd.f32 %v351_v62, %v350_v61 }
 0x10c   :  { %v299_v1 = vadd.f32 %v298_v63, %v297_v60  ;;  %v353_v2 = vrot.slane %v352_v0, 4 }
 0x10e   :  { %v300_v3 = vrot.slane %v299_v1, 2  ;;  %v354_v4 = vadd.f32 %v353_v2, %v352_v0 }
 0x110   :  { %v301_v52 = vadd.f32 %v300_v3, %v299_v1  ;;  %v355_v5 = vrot.slane %v354_v4, 2 }
 0x112   :  { %v302_v6 = vrot.slane %v301_v52, 1  ;;  %v356_v7 = vadd.f32 %v355_v5, %v354_v4 }
 0x114   :  { %v303_v9 = vadd.f32 %v302_v6, %v301_v52  ;;  %v357_v10 = vrot.slane %v356_v7, 1 }
 0x116   :  { %305 = vst.msk [vmem:[%s704_s4] sm:$0x1] %vm304_vm1, %v303_v9  ;;  %v358_v8 = vadd.f32 %v357_v10, %v356_v7 }
 0x118   :  { %359 = vst.msk [vmem:[%s705_s5] sm:$0x1] %vm304_vm1, %v358_v8 }

// kernel: _lambda_.58
= control target key start
LH: loop header
LB: loop body
LE: loop exit
PB: predicated region body
PF: predicated region fallthrough
CT: control target
= control target key end

     0   :  { %v24_v0 = vlaneseq  ;;  %s192_s1 = inlined_call_operand.vmem [shape: f32[1,512], index: 1, kind: input, shape index: {}]   ;;  %s193_s2 = inlined_call_operand.vmem [shape: f32[1,512], index: 2, kind: input, shape index: {}]   ;;  %s194_s0 = inlined_call_operand.vmem [shape: f32[16,512], index: 0, kind: input, shape index: {}]   ;;  %s195_s3 = inlined_call_operand.vmem [shape: bf16[16,512], index: 3, kind: output, shape index: {}]  }
   0x1   :  { %v22_v2 = vld [vmem:[%s192_s1] sm:$0xf]  ;;  %v15_v5 = vld [vmem:[%s194_s0 + $0x8] sm:$0xff]  ;;  %v16_v10 = vld [vmem:[%s194_s0 + $0x10] sm:$0xff] }
   0x2   :  { %v25_v1 = vshrl.u32 %v24_v0, 7  ;;  %v52_v3 = vld [vmem:[%s193_s2] sm:$0xf]  ;;  %v19_v12 = vld [vmem:[%s194_s0 + $0x28] sm:$0xff]  ;;  %v17_v17 = vld [vmem:[%s194_s0 + $0x18] sm:$0xff] }
   0x3   :  { %v14_v4 = vld [vmem:[%s194_s0] sm:$0xff]  ;;  %v20_v18 = vld [vmem:[%s194_s0 + $0x30] sm:$0xff]  ;;  %v21_v19 = vld [vmem:[%s194_s0 + $0x38] sm:$0xff] }
   0x4   :  { %v26_v6 = vsub.s32 0, %v25_v1  ;;  %v30_v7 = vsub.s32 1, %v25_v1  ;;  %v34_v8 = vsub.s32 2, %v25_v1  ;;  %v38_v9 = vsub.s32 3, %v25_v1  ;;  %v18_v11 = vld [vmem:[%s194_s0 + $0x20] sm:$0xff] }
   0x6   :  { %v27_v13 = vrot.slane %v22_v2, %v26_v6  ;;  %v31_v14 = vrot.slane %v22_v2, %v30_v7  ;;  %v57_v15 = vrot.slane %v52_v3, %v26_v6  ;;  %v61_v16 = vrot.slane %v52_v3, %v30_v7 }
   0x7   :  { %v35_v20 = vrot.slane %v22_v2, %v34_v8  ;;  %v39_v21 = vrot.slane %v22_v2, %v38_v9  ;;  %v65_v22 = vrot.slane %v52_v3, %v34_v8  ;;  %v69_v23 = vrot.slane %v52_v3, %v38_v9 }
   0x8   :  { %v44_v24 = vmul.f32 %v27_v13, %v14_v4  ;;  %v45_v25 = vmul.f32 %v31_v14, %v15_v5  ;;  %v48_v26 = vmul.f32 %v27_v13, %v18_v11  ;;  %v49_v27 = vmul.f32 %v31_v14, %v19_v12 }
   0x9   :  { %v46_v28 = vmul.f32 %v35_v20, %v16_v10  ;;  %v47_v29 = vmul.f32 %v39_v21, %v17_v17  ;;  %v50_v30 = vmul.f32 %v35_v20, %v20_v18  ;;  %v51_v31 = vmul.f32 %v39_v21, %v21_v19 }
   0xa   :  { %v74_v32 = vadd.f32 %v57_v15, %v44_v24  ;;  %v75_v33 = vadd.f32 %v61_v16, %v45_v25  ;;  %v78_v34 = vadd.f32 %v57_v15, %v48_v26  ;;  %v79_v35 = vadd.f32 %v61_v16, %v49_v27 }
   0xb   :  { %v76_v36 = vadd.f32 %v65_v22, %v46_v28  ;;  %v77_v37 = vadd.f32 %v69_v23, %v47_v29  ;;  %v80_v38 = vadd.f32 %v65_v22, %v50_v30  ;;  %v81_v39 = vadd.f32 %v69_v23, %v51_v31 }
   0xc   :  { %v82_v40 = vmax.f32 %v74_v32, 0.0  ;;  %v83_v41 = vmax.f32 %v75_v33, 0.0  ;;  %v86_v42 = vmax.f32 %v78_v34, 0.0  ;;  %v87_v43 = vmax.f32 %v79_v35, 0.0 }
   0xd   :  { %v84_v44 = vmax.f32 %v76_v36, 0.0  ;;  %v85_v45 = vmax.f32 %v77_v37, 0.0  ;;  %v88_v46 = vmax.f32 %v80_v38, 0.0  ;;  %v89_v47 = vmax.f32 %v81_v39, 0.0 }
   0xe   :  { %v126_v48 = vpack.c.bf16 %v83_v41, %v82_v40  ;;  %v128_v49 = vpack.c.bf16 %v87_v43, %v86_v42 }
   0xf   :  { %v127_v50 = vpack.c.bf16 %v85_v45, %v84_v44  ;;  %v129_v51 = vpack.c.bf16 %v89_v47, %v88_v46 }
  0x10   :  { %114 = vst [vmem:[%s195_s3] sm:$0xff] %v126_v48  ;;  %116 = vst [vmem:[%s195_s3 + $0x10] sm:$0xff] %v128_v49 }
  0x11   :  { %115 = vst [vmem:[%s195_s3 + $0x8] sm:$0xff] %v127_v50  ;;  %117 = vst [vmem:[%s195_s3 + $0x18] sm:$0xff] %v129_v51 }

// kernel: _lambda_.59
= control target key start
LH: loop header
LB: loop body
LE: loop exit
PB: predicated region body
PF: predicated region fallthrough
CT: control target
= control target key end

     0   :  { %v1474_v0 = vmov 0   ;;  %vm449_vm0 = vcmask 130048   ;;  %vm1032_vm1 = vcmask 122880   ;;  %s2551_s1 = inlined_call_operand.vmem [shape: bf16[144,16], index: 1, kind: input, shape index: {}]   ;;  %s2552_s0 = inlined_call_operand.vmem [shape: bf16[512,144], index: 0, kind: input, shape index: {}]   ;;  %s2553_s2 = inlined_call_operand.vmem [shape: f32[1,16], index: 2, kind: input, shape index: {}]   ;;  %s2554_s3 = inlined_call_operand.vmem [shape: f32[512,16], index: 3, kind: output, shape index: {0}]   ;;  %s2555_s4 = inlined_call_operand.vmem [shape: f32[1,1,16], index: 4, kind: output, shape index: {1}]   ;;  %s2556_s5 = inlined_call_operand.vmem [shape: f32[1,1,16], index: 5, kind: output, shape index: {2}]  }
   0x1   :  { %546 = vmatprep.subr.bf16.mxu0 %v1474_v0  ;;  %v1369_v1 = vld [vmem:[%s2551_s1 + $0x38] sm:$0xff]   ;;  %1350 = vmatprep.subr.bf16.mxu1 %v1474_v0  ;;  %v1370_v2 = vld [vmem:[%s2551_s1 + $0x30] sm:$0xff]   ;;  %v1371_v3 = vld [vmem:[%s2551_s1 + $0x28] sm:$0xff]  }
   0x2   :  { %547 = vmatpush1.bf16.msra.mxu0 %v1369_v1  ;;  %1359 = vmatpush1.bf16.msra.mxu1 %v1369_v1  ;;  %v1372_v4 = vld [vmem:[%s2551_s1 + $0x20] sm:$0xff]   ;;  %v1373_v6 = vld [vmem:[%s2551_s1 + $0x18] sm:$0xff]   ;;  %v1374_v7 = vld [vmem:[%s2551_s1 + $0x10] sm:$0xff]  }
   0x3   :  { %548 = vmatprep.subr.bf16.mxu0 %v1474_v0  ;;  %1351 = vmatprep.subr.bf16.mxu1 %v1474_v0  ;;  %v1380_v5 = vld [vmem:[%s2552_s0 + $0x4] ss:$8 sps:$4 sm:$0xff]   ;;  %v1378_v12 = vld [vmem:[%s2552_s0] ss:$8 sps:$4 sm:$0xff]   ;;  %v1381_v13 = vld [vmem:[%s2552_s0 + $0x14] ss:$8 sps:$4 sm:$0xff]  }
   0x4   :  { %1318 = vmatprep.mubr.msk.bf16.mxu0 %vm449_vm0, %v1380_v5  ;;  %v1404_v8 = vld [vmem:[%s2552_s0 + $0x104] ss:$8 sps:$4 sm:$0xff]   ;;  %v1402_v14 = vld [vmem:[%s2552_s0 + $0x100] ss:$8 sps:$4 sm:$0xff]   ;;  %v1408_v15 = vld [vmem:[%s2552_s0 + $0x114] ss:$8 sps:$4 sm:$0xff]  }
   0x5   :  { %v1375_v9 = vld [vmem:[%s2551_s1 + $0x8] sm:$0xff]   ;;  %1334 = vmatprep.mubr.msk.bf16.mxu1 %vm449_vm0, %v1404_v8  ;;  %v1376_v10 = vld [vmem:[%s2551_s1] sm:$0xff]   ;;  %v1383_v16 = vld [vmem:[%s2552_s0 + $0x10] ss:$8 sps:$4 sm:$0xff]  }
   0x6   :  { %549 = vmatpush1.bf16.msra.mxu0 %v1370_v2  ;;  %1360 = vmatpush1.bf16.msra.mxu1 %v1370_v2  ;;  %v1377_v11 = vld [vmem:[%s2551_s1 + $0x40] sm:$0xff]   ;;  %v1410_v18 = vld [vmem:[%s2552_s0 + $0x110] ss:$8 sps:$4 sm:$0xff]   ;;  %v1387_v21 = vld [vmem:[%s2552_s0 + $0x34] ss:$8 sps:$4 sm:$0xff]  }
   0x7   :  { %550 = vmatprep.subr.bf16.mxu0 %v1474_v0  ;;  %1352 = vmatprep.subr.bf16.mxu1 %v1474_v0  ;;  %v1384_v17 = vld [vmem:[%s2552_s0 + $0x24] ss:$8 sps:$4 sm:$0xff]   ;;  %v1386_v20 = vld [vmem:[%s2552_s0 + $0x20] ss:$8 sps:$4 sm:$0xff]   ;;  %v1420_v23 = vld [vmem:[%s2552_s0 + $0x134] ss:$8 sps:$4 sm:$0xff]  }
   0x8   :  { %v1414_v19 = vld [vmem:[%s2552_s0 + $0x124] ss:$8 sps:$4 sm:$0xff]   ;;  %v1416_v22 = vld [vmem:[%s2552_s0 + $0x120] ss:$8 sps:$4 sm:$0xff]   ;;  %v1389_v24 = vld [vmem:[%s2552_s0 + $0x30] ss:$8 sps:$4 sm:$0xff]  }
   0x9   :  { %v1422_v25 = vld [vmem:[%s2552_s0 + $0x130] ss:$8 sps:$4 sm:$0xff]   ;;  %v1390_v26 = vld [vmem:[%s2552_s0 + $0x44] ss:$8 sps:$4 sm:$0xff]   ;;  %v1392_v28 = vld [vmem:[%s2552_s0 + $0x40] ss:$8 sps:$4 sm:$0xff]  }
   0xa   :  { %551 = vmatpush1.bf16.msra.mxu0 %v1371_v3  ;;  %1361 = vmatpush1.bf16.msra.mxu1 %v1371_v3  ;;  %v1426_v27 = vld [vmem:[%s2552_s0 + $0x144] ss:$8 sps:$4 sm:$0xff]   ;;  %v1428_v29 = vld [vmem:[%s2552_s0 + $0x140] ss:$8 sps:$4 sm:$0xff]   ;;  %v1393_v30 = vld [vmem:[%s2552_s0 + $0x54] ss:$8 sps:$4 sm:$0xff]  }
   0xb   :  { %552 = vmatprep.subr.bf16.mxu0 %v1474_v0  ;;  %1353 = vmatprep.subr.bf16.mxu1 %v1474_v0  ;;  %v1432_v31 = vld [vmem:[%s2552_s0 + $0x154] ss:$8 sps:$4 sm:$0xff]   ;;  %v1395_v32 = vld [vmem:[%s2552_s0 + $0x50] ss:$8 sps:$4 sm:$0xff]   ;;  %v1396_v34 = vld [vmem:[%s2552_s0 + $0x64] ss:$8 sps:$4 sm:$0xff]  }
   0xc   :  { %v1434_v33 = vld [vmem:[%s2552_s0 + $0x150] ss:$8 sps:$4 sm:$0xff]   ;;  %v1438_v35 = vld [vmem:[%s2552_s0 + $0x164] ss:$8 sps:$4 sm:$0xff]   ;;  %v1398_v36 = vld [vmem:[%s2552_s0 + $0x60] ss:$8 sps:$4 sm:$0xff]  }
   0xd   :  { %v1440_v37 = vld [vmem:[%s2552_s0 + $0x160] ss:$8 sps:$4 sm:$0xff]   ;;  %v1399_v38 = vld [vmem:[%s2552_s0 + $0x74] ss:$8 sps:$4 sm:$0xff]   ;;  %v1401_v40 = vld [vmem:[%s2552_s0 + $0x70] ss:$8 sps:$4 sm:$0xff]  }
   0xe   :  { %553 = vmatpush1.bf16.msra.mxu0 %v1372_v4  ;;  %1362 = vmatpush1.bf16.msra.mxu1 %v1372_v4  ;;  %v1444_v39 = vld [vmem:[%s2552_s0 + $0x174] ss:$8 sps:$4 sm:$0xff]   ;;  %v1446_v41 = vld [vmem:[%s2552_s0 + $0x170] ss:$8 sps:$4 sm:$0xff]   ;;  %v1405_v42 = vld [vmem:[%s2552_s0 + $0x84] ss:$8 sps:$4 sm:$0xff]  }
   0xf   :  { %554 = vmatprep.subr.bf16.mxu0 %v1474_v0  ;;  %1354 = vmatprep.subr.bf16.mxu1 %v1474_v0  ;;  %v1450_v43 = vld [vmem:[%s2552_s0 + $0x184] ss:$8 sps:$4 sm:$0xff]   ;;  %v1407_v44 = vld [vmem:[%s2552_s0 + $0x80] ss:$8 sps:$4 sm:$0xff]   ;;  %v1411_v46 = vld [vmem:[%s2552_s0 + $0x94] ss:$8 sps:$4 sm:$0xff]  }
  0x10   :  { %v1452_v45 = vld [vmem:[%s2552_s0 + $0x180] ss:$8 sps:$4 sm:$0xff]   ;;  %v1453_v47 = vld [vmem:[%s2552_s0 + $0x194] ss:$8 sps:$4 sm:$0xff]   ;;  %v1413_v48 = vld [vmem:[%s2552_s0 + $0x90] ss:$8 sps:$4 sm:$0xff]  }
  0x11   :  { %v1455_v49 = vld [vmem:[%s2552_s0 + $0x190] ss:$8 sps:$4 sm:$0xff]   ;;  %v1417_v50 = vld [vmem:[%s2552_s0 + $0xa4] ss:$8 sps:$4 sm:$0xff]   ;;  %v1419_v52 = vld [vmem:[%s2552_s0 + $0xa0] ss:$8 sps:$4 sm:$0xff]  }
  0x12   :  { %555 = vmatpush1.bf16.msra.mxu0 %v1373_v6  ;;  %1363 = vmatpush1.bf16.msra.mxu1 %v1373_v6  ;;  %v1456_v51 = vld [vmem:[%s2552_s0 + $0x1a4] ss:$8 sps:$4 sm:$0xff]   ;;  %v1458_v53 = vld [vmem:[%s2552_s0 + $0x1a0] ss:$8 sps:$4 sm:$0xff]   ;;  %v1423_v54 = vld [vmem:[%s2552_s0 + $0xb4] ss:$8 sps:$4 sm:$0xff]  }
  0x13   :  { %556 = vmatprep.subr.bf16.mxu0 %v1474_v0  ;;  %1355 = vmatprep.subr.bf16.mxu1 %v1474_v0  ;;  %v1459_v55 = vld [vmem:[%s2552_s0 + $0x1b4] ss:$8 sps:$4 sm:$0xff]   ;;  %v1425_v56 = vld [vmem:[%s2552_s0 + $0xb0] ss:$8 sps:$4 sm:$0xff]   ;;  %v1429_v58 = vld [vmem:[%s2552_s0 + $0xc4] ss:$8 sps:$4 sm:$0xff]  }
  0x14   :  { %v1461_v57 = vld [vmem:[%s2552_s0 + $0x1b0] ss:$8 sps:$4 sm:$0xff]   ;;  %v1462_v59 = vld [vmem:[%s2552_s0 + $0x1c4] ss:$8 sps:$4 sm:$0xff]   ;;  %v1431_v60 = vld [vmem:[%s2552_s0 + $0xc0] ss:$8 sps:$4 sm:$0xff]  }
  0x15   :  { %v1464_v61 = vld [vmem:[%s2552_s0 + $0x1c0] ss:$8 sps:$4 sm:$0xff]   ;;  %v1435_v62 = vld [vmem:[%s2552_s0 + $0xd4] ss:$8 sps:$4 sm:$0xff]   ;;  %v1467_v1 = vld [vmem:[%s2552_s0 + $0x1d0] ss:$8 sps:$4 sm:$0xff]  }
  0x16   :  { %557 = vmatpush1.bf16.msra.mxu0 %v1374_v7  ;;  %1364 = vmatpush1.bf16.msra.mxu1 %v1374_v7  ;;  %v1465_v63 = vld [vmem:[%s2552_s0 + $0x1d4] ss:$8 sps:$4 sm:$0xff]   ;;  %v1441_v2 = vld [vmem:[%s2552_s0 + $0xe4] ss:$8 sps:$4 sm:$0xff]   ;;  %v1443_v4 = vld [vmem:[%s2552_s0 + $0xe0] ss:$8 sps:$4 sm:$0xff]  }
  0x17   :  { %558 = vmatprep.subr.bf16.mxu0 %v1474_v0  ;;  %1356 = vmatprep.subr.bf16.mxu1 %v1474_v0  ;;  %v1468_v3 = vld [vmem:[%s2552_s0 + $0x1e4] ss:$8 sps:$4 sm:$0xff]   ;;  %v1470_v5 = vld [vmem:[%s2552_s0 + $0x1e0] ss:$8 sps:$4 sm:$0xff]   ;;  %v1447_v6 = vld [vmem:[%s2552_s0 + $0xf4] ss:$8 sps:$4 sm:$0xff]  }
  0x18   :  { %v1471_v7 = vld [vmem:[%s2552_s0 + $0x1f4] ss:$8 sps:$4 sm:$0xff]   ;;  %v1449_v8 = vld [vmem:[%s2552_s0 + $0xf0] ss:$8 sps:$4 sm:$0xff]  }
  0x1a   :  { %559 = vmatpush1.bf16.msra.mxu0 %v1375_v9  ;;  %1365 = vmatpush1.bf16.msra.mxu1 %v1375_v9  ;;  %v1473_v9 = vld [vmem:[%s2552_s0 + $0x1f0] ss:$8 sps:$4 sm:$0xff]  }
  0x1b   :  { %560 = vmatprep.subr.bf16.mxu0 %v1474_v0  ;;  %1357 = vmatprep.subr.bf16.mxu1 %v1474_v0 }
  0x1e   :  { %561 = vmatpush1.bf16.msra.mxu0 %v1376_v10  ;;  %1366 = vmatpush1.bf16.msra.mxu1 %v1376_v10  ;;  %v1759_v10 = vld [vmem:[%s2553_s2] ss:$0 sm:$0xff] }
  0x1f   :  { %576 = vmatprep.subr.bf16.mxu0 %v1474_v0  ;;  %1358 = vmatprep.subr.bf16.mxu1 %v1474_v0  ;;  %v1437_v0 = vld [vmem:[%s2552_s0 + $0xd0] ss:$8 sps:$4 sm:$0xff]  }
  0x22   :  { %577 = vmatpush2.bf16.msra.mxu0 %v1377_v11  ;;  %1367 = vmatpush2.bf16.msra.mxu1 %v1377_v11 }
  0x25   :  { %579 = vmatmul.mubr.bf16.vlgmr.msra.gmra.mxu0 %v1378_v12  ;;  %707 = vmatmul.mubr.bf16.vlgmr.msra.gmra.mxu1 %v1402_v14 }
  0x26   :  { %1319 = vmatprep.mubr.msk.bf16.mxu0 %vm449_vm0, %v1381_v13  ;;  %1335 = vmatprep.mubr.msk.bf16.mxu1 %vm449_vm0, %v1408_v15 }
  0x2d   :  { %587 = vmatmul.mubr.bf16.gmra.mxu0 %v1383_v16  ;;  %715 = vmatmul.mubr.bf16.gmra.mxu1 %v1410_v18 }
  0x2e   :  { %1320 = vmatprep.mubr.msk.bf16.mxu0 %vm449_vm0, %v1384_v17  ;;  %1336 = vmatprep.mubr.msk.bf16.mxu1 %vm449_vm0, %v1414_v19 }
  0x35   :  { %595 = vmatmul.mubr.bf16.gmra.mxu0 %v1386_v20  ;;  %723 = vmatmul.mubr.bf16.gmra.mxu1 %v1416_v22 }
  0x36   :  { %1321 = vmatprep.mubr.msk.bf16.mxu0 %vm449_vm0, %v1387_v21  ;;  %1337 = vmatprep.mubr.msk.bf16.mxu1 %vm449_vm0, %v1420_v23 }
  0x3d   :  { %603 = vmatmul.mubr.bf16.gmra.mxu0 %v1389_v24  ;;  %731 = vmatmul.mubr.bf16.gmra.mxu1 %v1422_v25 }
  0x3e   :  { %1322 = vmatprep.mubr.msk.bf16.mxu0 %vm449_vm0, %v1390_v26  ;;  %1338 = vmatprep.mubr.msk.bf16.mxu1 %vm449_vm0, %v1426_v27 }
  0x45   :  { %611 = vmatmul.mubr.bf16.gmra.mxu0 %v1392_v28  ;;  %739 = vmatmul.mubr.bf16.gmra.mxu1 %v1428_v29 }
  0x46   :  { %1323 = vmatprep.mubr.msk.bf16.mxu0 %vm449_vm0, %v1393_v30  ;;  %1339 = vmatprep.mubr.msk.bf16.mxu1 %vm449_vm0, %v1432_v31 }
  0x4d   :  { %619 = vmatmul.mubr.bf16.gmra.mxu0 %v1395_v32  ;;  %747 = vmatmul.mubr.bf16.gmra.mxu1 %v1434_v33 }
  0x4e   :  { %1324 = vmatprep.mubr.msk.bf16.mxu0 %vm449_vm0, %v1396_v34  ;;  %1340 = vmatprep.mubr.msk.bf16.mxu1 %vm449_vm0, %v1438_v35 }
  0x55   :  { %627 = vmatmul.mubr.bf16.gmra.mxu0 %v1398_v36  ;;  %755 = vmatmul.mubr.bf16.gmra.mxu1 %v1440_v37 }
  0x56   :  { %1325 = vmatprep.mubr.msk.bf16.mxu0 %vm449_vm0, %v1399_v38  ;;  %1341 = vmatprep.mubr.msk.bf16.mxu1 %vm449_vm0, %v1444_v39 }
  0x5d   :  { %635 = vmatmul.mubr.bf16.gmra.mxu0 %v1401_v40  ;;  %763 = vmatmul.mubr.bf16.gmra.mxu1 %v1446_v41 }
  0x5e   :  { %1326 = vmatprep.mubr.msk.bf16.mxu0 %vm449_vm0, %v1405_v42  ;;  %1342 = vmatprep.mubr.msk.bf16.mxu1 %vm449_vm0, %v1450_v43 }
  0x65   :  { %643 = vmatmul.mubr.bf16.gmra.mxu0 %v1407_v44  ;;  %771 = vmatmul.mubr.bf16.gmra.mxu1 %v1452_v45 }
  0x66   :  { %1327 = vmatprep.mubr.msk.bf16.mxu0 %vm449_vm0, %v1411_v46  ;;  %1343 = vmatprep.mubr.msk.bf16.mxu1 %vm449_vm0, %v1453_v47 }
  0x6d   :  { %651 = vmatmul.mubr.bf16.gmra.mxu0 %v1413_v48  ;;  %779 = vmatmul.mubr.bf16.gmra.mxu1 %v1455_v49 }
  0x6e   :  { %1328 = vmatprep.mubr.msk.bf16.mxu0 %vm449_vm0, %v1417_v50  ;;  %1344 = vmatprep.mubr.msk.bf16.mxu1 %vm449_vm0, %v1456_v51 }
  0x75   :  { %659 = vmatmul.mubr.bf16.gmra.mxu0 %v1419_v52  ;;  %787 = vmatmul.mubr.bf16.gmra.mxu1 %v1458_v53 }
  0x76   :  { %1329 = vmatprep.mubr.msk.bf16.mxu0 %vm449_vm0, %v1423_v54  ;;  %1345 = vmatprep.mubr.msk.bf16.mxu1 %vm449_vm0, %v1459_v55 }
  0x7d   :  { %667 = vmatmul.mubr.bf16.gmra.mxu0 %v1425_v56  ;;  %795 = vmatmul.mubr.bf16.gmra.mxu1 %v1461_v57 }
  0x7e   :  { %1330 = vmatprep.mubr.msk.bf16.mxu0 %vm449_vm0, %v1429_v58  ;;  %1346 = vmatprep.mubr.msk.bf16.mxu1 %vm449_vm0, %v1462_v59 }
  0x85   :  { %675 = vmatmul.mubr.bf16.gmra.mxu0 %v1431_v60  ;;  %803 = vmatmul.mubr.bf16.gmra.mxu1 %v1464_v61 }
  0x86   :  { %1331 = vmatprep.mubr.msk.bf16.mxu0 %vm449_vm0, %v1435_v62  ;;  %1347 = vmatprep.mubr.msk.bf16.mxu1 %vm449_vm0, %v1465_v63 }
  0x8d   :  { %683 = vmatmul.mubr.bf16.gmra.mxu0 %v1437_v0  ;;  %811 = vmatmul.mubr.bf16.gmra.mxu1 %v1467_v1 }
  0x8e   :  { %1332 = vmatprep.mubr.msk.bf16.mxu0 %vm449_vm0, %v1441_v2  ;;  %1348 = vmatprep.mubr.msk.bf16.mxu1 %vm449_vm0, %v1468_v3 }
  0x95   :  { %691 = vmatmul.mubr.bf16.gmra.mxu0 %v1443_v4  ;;  %819 = vmatmul.mubr.bf16.gmra.mxu1 %v1470_v5 }
  0x96   :  { %1333 = vmatprep.mubr.msk.bf16.mxu0 %vm449_vm0, %v1447_v6  ;;  %1349 = vmatprep.mubr.msk.bf16.mxu1 %vm449_vm0, %v1471_v7 }
  0x9d   :  { %699 = vmatmul.mubr.bf16.gmra.mxu0 %v1449_v8  ;;  %827 = vmatmul.mubr.bf16.gmra.mxu1 %v1473_v9 }
  0xe5   :  { %v580_v11 = vpop.f32.mrf.mxu0  ;;  %v708_v12 = vpop.f32.mrf.mxu1 }
  0xe6   :  { %v1762_v13 = vadd.f32 %v1759_v10, %v580_v11  ;;  %v1765_v14 = vadd.f32 %v1759_v10, %v708_v12 }
  0xe7   :  { %v582_v15 = vpop.f32.mrf.mxu0  ;;  %v710_v16 = vpop.f32.mrf.mxu1 }
  0xe8   :  { %835 = vst.msk [vmem:[%s2554_s3] sm:$0xff] %vm449_vm0, %v1762_v13  ;;  %867 = vst.msk [vmem:[%s2554_s3 + $0x100] sm:$0xff] %vm449_vm0, %v1765_v14 }
  0xe9   :  { %v583_v17 = vpop.f32.mrf.mxu0  ;;  %v711_v18 = vpop.f32.mrf.mxu1 }
  0xea   :  { %v1778_v19 = vadd.f32 %v1759_v10, %v583_v17  ;;  %v1781_v20 = vadd.f32 %v1759_v10, %v711_v18 }
  0xeb   :  { %v585_v21 = vpop.f32.mrf.mxu0  ;;  %v713_v22 = vpop.f32.mrf.mxu1 }
  0xec   :  { %836 = vst.msk [vmem:[%s2554_s3 + $0x8] sm:$0xff] %vm449_vm0, %v1778_v19  ;;  %868 = vst.msk [vmem:[%s2554_s3 + $0x108] sm:$0xff] %vm449_vm0, %v1781_v20 }
  0xed   :  { %v588_v23 = vpop.f32.mrf.mxu0  ;;  %v716_v24 = vpop.f32.mrf.mxu1 }
  0xee   :  { %v1794_v25 = vadd.f32 %v1759_v10, %v588_v23  ;;  %v1797_v26 = vadd.f32 %v1759_v10, %v716_v24 }
  0xef   :  { %v590_v27 = vpop.f32.mrf.mxu0  ;;  %v718_v28 = vpop.f32.mrf.mxu1 }
  0xf0   :  { %837 = vst.msk [vmem:[%s2554_s3 + $0x10] sm:$0xff] %vm449_vm0, %v1794_v25  ;;  %869 = vst.msk [vmem:[%s2554_s3 + $0x110] sm:$0xff] %vm449_vm0, %v1797_v26 }
  0xf1   :  { %v591_v29 = vpop.f32.mrf.mxu0  ;;  %v719_v30 = vpop.f32.mrf.mxu1 }
  0xf2   :  { %v1810_v31 = vadd.f32 %v1759_v10, %v591_v29  ;;  %v1813_v32 = vadd.f32 %v1759_v10, %v719_v30 }
  0xf3   :  { %v593_v33 = vpop.f32.mrf.mxu0  ;;  %v721_v34 = vpop.f32.mrf.mxu1 }
  0xf4   :  { %838 = vst.msk [vmem:[%s2554_s3 + $0x18] sm:$0xff] %vm449_vm0, %v1810_v31  ;;  %870 = vst.msk [vmem:[%s2554_s3 + $0x118] sm:$0xff] %vm449_vm0, %v1813_v32 }
  0xf5   :  { %v596_v35 = vpop.f32.mrf.mxu0  ;;  %v724_v36 = vpop.f32.mrf.mxu1 }
  0xf6   :  { %v1826_v37 = vadd.f32 %v1759_v10, %v596_v35  ;;  %v1829_v38 = vadd.f32 %v1759_v10, %v724_v36 }
  0xf7   :  { %v598_v39 = vpop.f32.mrf.mxu0  ;;  %v726_v40 = vpop.f32.mrf.mxu1 }
  0xf8   :  { %839 = vst.msk [vmem:[%s2554_s3 + $0x20] sm:$0xff] %vm449_vm0, %v1826_v37  ;;  %871 = vst.msk [vmem:[%s2554_s3 + $0x120] sm:$0xff] %vm449_vm0, %v1829_v38 }
  0xf9   :  { %v599_v41 = vpop.f32.mrf.mxu0  ;;  %v727_v42 = vpop.f32.mrf.mxu1 }
  0xfa   :  { %v1842_v43 = vadd.f32 %v1759_v10, %v599_v41  ;;  %v1845_v44 = vadd.f32 %v1759_v10, %v727_v42 }
  0xfb   :  { %v601_v45 = vpop.f32.mrf.mxu0  ;;  %v729_v46 = vpop.f32.mrf.mxu1 }
  0xfc   :  { %840 = vst.msk [vmem:[%s2554_s3 + $0x28] sm:$0xff] %vm449_vm0, %v1842_v43  ;;  %872 = vst.msk [vmem:[%s2554_s3 + $0x128] sm:$0xff] %vm449_vm0, %v1845_v44 }
  0xfd   :  { %v604_v47 = vpop.f32.mrf.mxu0  ;;  %v732_v48 = vpop.f32.mrf.mxu1 }
  0xfe   :  { %v1858_v49 = vadd.f32 %v1759_v10, %v604_v47  ;;  %v1861_v50 = vadd.f32 %v1759_v10, %v732_v48 }
  0xff   :  { %v606_v51 = vpop.f32.mrf.mxu0  ;;  %v734_v52 = vpop.f32.mrf.mxu1 }
 0x100   :  { %841 = vst.msk [vmem:[%s2554_s3 + $0x30] sm:$0xff] %vm449_vm0, %v1858_v49  ;;  %873 = vst.msk [vmem:[%s2554_s3 + $0x130] sm:$0xff] %vm449_vm0, %v1861_v50 }
 0x101   :  { %v607_v53 = vpop.f32.mrf.mxu0  ;;  %v735_v54 = vpop.f32.mrf.mxu1 }
 0x102   :  { %v1874_v55 = vadd.f32 %v1759_v10, %v607_v53  ;;  %v1877_v56 = vadd.f32 %v1759_v10, %v735_v54 }
 0x103   :  { %v609_v57 = vpop.f32.mrf.mxu0  ;;  %v737_v58 = vpop.f32.mrf.mxu1 }
 0x104   :  { %842 = vst.msk [vmem:[%s2554_s3 + $0x38] sm:$0xff] %vm449_vm0, %v1874_v55  ;;  %874 = vst.msk [vmem:[%s2554_s3 + $0x138] sm:$0xff] %vm449_vm0, %v1877_v56 }
 0x105   :  { %v612_v59 = vpop.f32.mrf.mxu0  ;;  %v740_v60 = vpop.f32.mrf.mxu1 }
 0x106   :  { %v1890_v61 = vadd.f32 %v1759_v10, %v612_v59  ;;  %v1893_v62 = vadd.f32 %v1759_v10, %v740_v60  ;;  %v1035_v60 = vmul.f32 %v1778_v19, %v1778_v19 }
 0x107   :  { %v614_v63 = vpop.f32.mrf.mxu0  ;;  %v742_v0 = vpop.f32.mrf.mxu1 }
 0x108   :  { %843 = vst.msk [vmem:[%s2554_s3 + $0x40] sm:$0xff] %vm449_vm0, %v1890_v61  ;;  %875 = vst.msk [vmem:[%s2554_s3 + $0x140] sm:$0xff] %vm449_vm0, %v1893_v62  ;;  %v1034_v63 = vmul.f32 %v1762_v13, %v1762_v13  ;;  %v1036_v0 = vmul.f32 %v1794_v25, %v1794_v25 }
 0x109   :  { %v615_v1 = vpop.f32.mrf.mxu0  ;;  %v743_v2 = vpop.f32.mrf.mxu1 }
 0x10a   :  { %v1906_v3 = vadd.f32 %v1759_v10, %v615_v1  ;;  %v1909_v4 = vadd.f32 %v1759_v10, %v743_v2 }
 0x10b   :  { %v617_v5 = vpop.f32.mrf.mxu0  ;;  %v745_v6 = vpop.f32.mrf.mxu1 }
 0x10c   :  { %844 = vst.msk [vmem:[%s2554_s3 + $0x48] sm:$0xff] %vm449_vm0, %v1906_v3  ;;  %876 = vst.msk [vmem:[%s2554_s3 + $0x148] sm:$0xff] %vm449_vm0, %v1909_v4  ;;  %v900_v5 = vsel %vm449_vm0, %v1778_v19, 0.0 }
 0x10d   :  { %v620_v7 = vpop.f32.mrf.mxu0  ;;  %v748_v8 = vpop.f32.mrf.mxu1 }
 0x10e   :  { %v1922_v9 = vadd.f32 %v1759_v10, %v620_v7  ;;  %v1925_v11 = vadd.f32 %v1759_v10, %v748_v8 }
 0x10f   :  { %v622_v12 = vpop.f32.mrf.mxu0  ;;  %v750_v15 = vpop.f32.mrf.mxu1 }
 0x110   :  { %845 = vst.msk [vmem:[%s2554_s3 + $0x50] sm:$0xff] %vm449_vm0, %v1922_v9  ;;  %877 = vst.msk [vmem:[%s2554_s3 + $0x150] sm:$0xff] %vm449_vm0, %v1925_v11  ;;  %v899_v15 = vsel %vm449_vm0, %v1762_v13, 0.0  ;;  %v1098_v13 = vsel %vm449_vm0, %v1034_v63, 0.0 }
 0x111   :  { %v623_v16 = vpop.f32.mrf.mxu0  ;;  %v751_v17 = vpop.f32.mrf.mxu1  ;;  %v901_v19 = vadd.f32 %v900_v5, %v899_v15  ;;  %v910_v15 = vsel %vm449_vm0, %v1858_v49, 0.0 }
 0x112   :  { %v1938_v18 = vadd.f32 %v1759_v10, %v623_v16  ;;  %v1941_v21 = vadd.f32 %v1759_v10, %v751_v17  ;;  %v1099_v16 = vsel %vm449_vm0, %v1035_v60, 0.0  ;;  %v902_v17 = vsel %vm449_vm0, %v1794_v25, 0.0 }
 0x113   :  { %v625_v22 = vpop.f32.mrf.mxu0  ;;  %v753_v23 = vpop.f32.mrf.mxu1  ;;  %v1101_v25 = vsel %vm449_vm0, %v1036_v0, 0.0  ;;  %v908_v60 = vsel %vm449_vm0, %v1842_v43, 0.0 }
 0x114   :  { %846 = vst.msk [vmem:[%s2554_s3 + $0x58] sm:$0xff] %vm449_vm0, %v1938_v18  ;;  %878 = vst.msk [vmem:[%s2554_s3 + $0x158] sm:$0xff] %vm449_vm0, %v1941_v21  ;;  %v1037_v22 = vmul.f32 %v1810_v31, %v1810_v31 }
 0x115   :  { %v628_v24 = vpop.f32.mrf.mxu0  ;;  %v756_v27 = vpop.f32.mrf.mxu1 }
 0x116   :  { %v1954_v28 = vadd.f32 %v1759_v10, %v628_v24  ;;  %v1957_v29 = vadd.f32 %v1759_v10, %v756_v27  ;;  %v904_v27 = vsel %vm449_vm0, %v1810_v31, 0.0  ;;  %v1039_v31 = vmul.f32 %v1842_v43, %v1842_v43 }
 0x117   :  { %v630_v30 = vpop.f32.mrf.mxu0  ;;  %v758_v33 = vpop.f32.mrf.mxu1 }
 0x118   :  { %847 = vst.msk [vmem:[%s2554_s3 + $0x60] sm:$0xff] %vm449_vm0, %v1954_v28  ;;  %879 = vst.msk [vmem:[%s2554_s3 + $0x160] sm:$0xff] %vm449_vm0, %v1957_v29  ;;  %v1038_v30 = vmul.f32 %v1826_v37, %v1826_v37 }
 0x119   :  { %v631_v34 = vpop.f32.mrf.mxu0  ;;  %v759_v35 = vpop.f32.mrf.mxu1 }
 0x11a   :  { %v1970_v36 = vadd.f32 %v1759_v10, %v631_v34  ;;  %v1973_v39 = vadd.f32 %v1759_v10, %v759_v35  ;;  %v1100_v35 = vadd.f32 %v1099_v16, %v1098_v13  ;;  %v1041_v16 = vmul.f32 %v1874_v55, %v1874_v55 }
 0x11b   :  { %v633_v40 = vpop.f32.mrf.mxu0  ;;  %v761_v41 = vpop.f32.mrf.mxu1 }
 0x11c   :  { %848 = vst.msk [vmem:[%s2554_s3 + $0x68] sm:$0xff] %vm449_vm0, %v1970_v36  ;;  %880 = vst.msk [vmem:[%s2554_s3 + $0x168] sm:$0xff] %vm449_vm0, %v1973_v39  ;;  %v903_v40 = vadd.f32 %v902_v17, %v901_v19  ;;  %v912_v19 = vsel %vm449_vm0, %v1874_v55, 0.0  ;;  %v1043_v55 = vmul.f32 %v1906_v3, %v1906_v3 }
 0x11d   :  { %v636_v42 = vpop.f32.mrf.mxu0  ;;  %v764_v45 = vpop.f32.mrf.mxu1 }
 0x11e   :  { %v1986_v46 = vadd.f32 %v1759_v10, %v636_v42  ;;  %v1989_v47 = vadd.f32 %v1759_v10, %v764_v45  ;;  %v1103_v45 = vsel %vm449_vm0, %v1037_v22, 0.0 }
 0x11f   :  { %v638_v48 = vpop.f32.mrf.mxu0  ;;  %v766_v51 = vpop.f32.mrf.mxu1 }
 0x120   :  { %849 = vst.msk [vmem:[%s2554_s3 + $0x70] sm:$0xff] %vm449_vm0, %v1986_v46  ;;  %881 = vst.msk [vmem:[%s2554_s3 + $0x170] sm:$0xff] %vm449_vm0, %v1989_v47  ;;  %v906_v48 = vsel %vm449_vm0, %v1826_v37, 0.0  ;;  %v1102_v51 = vadd.f32 %v1101_v25, %v1100_v35  ;;  %v1040_v37 = vmul.f32 %v1858_v49, %v1858_v49  ;;  %v1042_v25 = vmul.f32 %v1890_v61, %v1890_v61 }
 0x121   :  { %v639_v52 = vpop.f32.mrf.mxu0  ;;  %v767_v53 = vpop.f32.mrf.mxu1 }
 0x122   :  { %v2002_v54 = vadd.f32 %v1759_v10, %v639_v52  ;;  %v2005_v57 = vadd.f32 %v1759_v10, %v767_v53  ;;  %v905_v52 = vadd.f32 %v904_v27, %v903_v40  ;;  %v1109_v22 = vsel %vm449_vm0, %v1040_v37, 0.0 }
 0x123   :  { %v641_v58 = vpop.f32.mrf.mxu0  ;;  %v769_v59 = vpop.f32.mrf.mxu1  ;;  %v916_v37 = vsel %vm449_vm0, %v1906_v3, 0.0 }
 0x124   :  { %850 = vst.msk [vmem:[%s2554_s3 + $0x78] sm:$0xff] %vm449_vm0, %v2002_v54  ;;  %882 = vst.msk [vmem:[%s2554_s3 + $0x178] sm:$0xff] %vm449_vm0, %v2005_v57  ;;  %v1105_v59 = vsel %vm449_vm0, %v1038_v30, 0.0 }
 0x125   :  { %v644_v1 = vpop.f32.mrf.mxu0  ;;  %v772_v2 = vpop.f32.mrf.mxu1 }
 0x126   :  { %v2026_v6 = vadd.f32 %v1759_v10, %v644_v1  ;;  %v2029_v7 = vadd.f32 %v1759_v10, %v772_v2  ;;  %v1104_v1 = vadd.f32 %v1103_v45, %v1102_v51  ;;  %v907_v2 = vadd.f32 %v906_v48, %v905_v52 }
 0x127   :  { %v646_v8 = vpop.f32.mrf.mxu0  ;;  %v774_v12 = vpop.f32.mrf.mxu1  ;;  %v1113_v52 = vsel %vm449_vm0, %v1042_v25, 0.0 }
 0x128   :  { %851 = vst.msk [vmem:[%s2554_s3 + $0x80] sm:$0xff] %vm449_vm0, %v2026_v6  ;;  %883 = vst.msk [vmem:[%s2554_s3 + $0x180] sm:$0xff] %vm449_vm0, %v2029_v7  ;;  %v1107_v12 = vsel %vm449_vm0, %v1039_v31, 0.0  ;;  %v1106_v43 = vadd.f32 %v1105_v59, %v1104_v1  ;;  %v909_v17 = vadd.f32 %v908_v60, %v907_v2 }
 0x129   :  { %v647_v23 = vpop.f32.mrf.mxu0  ;;  %v775_v24 = vpop.f32.mrf.mxu1 }
 0x12a   :  { %v2055_v33 = vadd.f32 %v1759_v10, %v647_v23  ;;  %v2058_v34 = vadd.f32 %v1759_v10, %v775_v24  ;;  %v1108_v27 = vadd.f32 %v1107_v12, %v1106_v43  ;;  %v911_v30 = vadd.f32 %v910_v15, %v909_v17 }
 0x12b   :  { %v649_v41 = vpop.f32.mrf.mxu0  ;;  %v777_v42 = vpop.f32.mrf.mxu1  ;;  %v1045_v12 = vmul.f32 %v1938_v18, %v1938_v18  ;;  %v920_v17 = vsel %vm449_vm0, %v1938_v18, 0.0  ;;  %v1047_v18 = vmul.f32 %v1970_v36, %v1970_v36 }
 0x12c   :  { %852 = vst.msk [vmem:[%s2554_s3 + $0x88] sm:$0xff] %vm449_vm0, %v2055_v33  ;;  %884 = vst.msk [vmem:[%s2554_s3 + $0x188] sm:$0xff] %vm449_vm0, %v2058_v34  ;;  %v1111_v41 = vsel %vm449_vm0, %v1041_v16, 0.0  ;;  %v914_v42 = vsel %vm449_vm0, %v1890_v61, 0.0  ;;  %v1110_v45 = vadd.f32 %v1109_v22, %v1108_v27  ;;  %v913_v48 = vadd.f32 %v912_v19, %v911_v30 }
 0x12d   :  { %v652_v53 = vpop.f32.mrf.mxu0  ;;  %v780_v58 = vpop.f32.mrf.mxu1  ;;  %v1044_v61 = vmul.f32 %v1922_v9, %v1922_v9  ;;  %v1046_v22 = vmul.f32 %v1954_v28, %v1954_v28 }
 0x12e   :  { %v2081_v63 = vadd.f32 %v1759_v10, %v652_v53  ;;  %v2084_v0 = vadd.f32 %v1759_v10, %v780_v58  ;;  %v1112_v59 = vadd.f32 %v1111_v41, %v1110_v45  ;;  %v915_v60 = vadd.f32 %v914_v42, %v913_v48 }
 0x12f   :  { %v654_v5 = vpop.f32.mrf.mxu0  ;;  %v782_v8 = vpop.f32.mrf.mxu1  ;;  %v1117_v16 = vsel %vm449_vm0, %v1044_v61, 0.0  ;;  %v1121_v48 = vsel %vm449_vm0, %v1046_v22, 0.0  ;;  %v924_v61 = vsel %vm449_vm0, %v1970_v36, 0.0 }
 0x130   :  { %853 = vst.msk [vmem:[%s2554_s3 + $0x90] sm:$0xff] %vm449_vm0, %v2081_v63  ;;  %885 = vst.msk [vmem:[%s2554_s3 + $0x190] sm:$0xff] %vm449_vm0, %v2084_v0  ;;  %v1115_v5 = vsel %vm449_vm0, %v1043_v55, 0.0  ;;  %v918_v8 = vsel %vm449_vm0, %v1922_v9, 0.0  ;;  %v1114_v3 = vadd.f32 %v1113_v52, %v1112_v59  ;;  %v917_v15 = vadd.f32 %v916_v37, %v915_v60 }
 0x131   :  { %v655_v49 = vpop.f32.mrf.mxu0  ;;  %v783_v13 = vpop.f32.mrf.mxu1 }
 0x132   :  { %v2107_v23 = vadd.f32 %v1759_v10, %v655_v49  ;;  %v2110_v24 = vadd.f32 %v1759_v10, %v783_v13  ;;  %v1116_v19 = vadd.f32 %v1115_v5, %v1114_v3  ;;  %v919_v25 = vadd.f32 %v918_v8, %v917_v15 }
 0x133   :  { %v657_v35 = vpop.f32.mrf.mxu0  ;;  %v785_v40 = vpop.f32.mrf.mxu1  ;;  %v1049_v5 = vmul.f32 %v2002_v54, %v2002_v54  ;;  %v928_v15 = vsel %vm449_vm0, %v2002_v54, 0.0  ;;  %v1051_v54 = vmul.f32 %v2055_v33, %v2055_v33 }
 0x134   :  { %854 = vst.msk [vmem:[%s2554_s3 + $0x98] sm:$0xff] %vm449_vm0, %v2107_v23  ;;  %886 = vst.msk [vmem:[%s2554_s3 + $0x198] sm:$0xff] %vm449_vm0, %v2110_v24  ;;  %v1119_v35 = vsel %vm449_vm0, %v1045_v12, 0.0  ;;  %v922_v40 = vsel %vm449_vm0, %v1954_v28, 0.0  ;;  %v1118_v41 = vadd.f32 %v1117_v16, %v1116_v19  ;;  %v921_v42 = vadd.f32 %v920_v17, %v919_v25 }
 0x135   :  { %v660_v31 = vpop.f32.mrf.mxu0  ;;  %v788_v51 = vpop.f32.mrf.mxu1  ;;  %v1048_v28 = vmul.f32 %v1986_v46, %v1986_v46  ;;  %v1050_v16 = vmul.f32 %v2026_v6, %v2026_v6 }
 0x136   :  { %v2133_v53 = vadd.f32 %v1759_v10, %v660_v31  ;;  %v2136_v58 = vadd.f32 %v1759_v10, %v788_v51  ;;  %v1120_v52 = vadd.f32 %v1119_v35, %v1118_v41  ;;  %v923_v37 = vadd.f32 %v922_v40, %v921_v42 }
 0x137   :  { %v662_v1 = vpop.f32.mrf.mxu0  ;;  %v790_v2 = vpop.f32.mrf.mxu1  ;;  %v1125_v12 = vsel %vm449_vm0, %v1048_v28, 0.0  ;;  %v1129_v42 = vsel %vm449_vm0, %v1050_v16, 0.0  ;;  %v932_v28 = vsel %vm449_vm0, %v2055_v33, 0.0 }
 0x138   :  { %855 = vst.msk [vmem:[%s2554_s3 + $0xa0] sm:$0xff] %vm449_vm0, %v2133_v53  ;;  %887 = vst.msk [vmem:[%s2554_s3 + $0x1a0] sm:$0xff] %vm449_vm0, %v2136_v58  ;;  %v1123_v1 = vsel %vm449_vm0, %v1047_v18, 0.0  ;;  %v926_v2 = vsel %vm449_vm0, %v1986_v46, 0.0  ;;  %v1122_v36 = vadd.f32 %v1121_v48, %v1120_v52  ;;  %v925_v8 = vadd.f32 %v924_v61, %v923_v37 }
 0x139   :  { %v663_v9 = vpop.f32.mrf.mxu0  ;;  %v791_v43 = vpop.f32.mrf.mxu1 }
 0x13a   :  { %v2159_v49 = vadd.f32 %v1759_v10, %v663_v9  ;;  %v2162_v13 = vadd.f32 %v1759_v10, %v791_v43  ;;  %v1124_v17 = vadd.f32 %v1123_v1, %v1122_v36  ;;  %v927_v22 = vadd.f32 %v926_v2, %v925_v8 }
 0x13b   :  { %v665_v27 = vpop.f32.mrf.mxu0  ;;  %v793_v30 = vpop.f32.mrf.mxu1  ;;  %v1053_v1 = vmul.f32 %v2107_v23, %v2107_v23  ;;  %v936_v8 = vsel %vm449_vm0, %v2107_v23, 0.0 }
 0x13c   :  { %856 = vst.msk [vmem:[%s2554_s3 + $0xa8] sm:$0xff] %vm449_vm0, %v2159_v49  ;;  %888 = vst.msk [vmem:[%s2554_s3 + $0x1a8] sm:$0xff] %vm449_vm0, %v2162_v13  ;;  %v1127_v27 = vsel %vm449_vm0, %v1049_v5, 0.0  ;;  %v930_v30 = vsel %vm449_vm0, %v2026_v6, 0.0  ;;  %v1126_v35 = vadd.f32 %v1125_v12, %v1124_v17  ;;  %v929_v40 = vadd.f32 %v928_v15, %v927_v22 }
 0x13d   :  { %v668_v55 = vpop.f32.mrf.mxu0  ;;  %v796_v45 = vpop.f32.mrf.mxu1  ;;  %v1052_v6 = vmul.f32 %v2081_v63, %v2081_v63  ;;  %v1054_v12 = vmul.f32 %v2133_v53, %v2133_v53  ;;  %v1055_v23 = vmul.f32 %v2159_v49, %v2159_v49 }
 0x13e   :  { %v2185_v31 = vadd.f32 %v1759_v10, %v668_v55  ;;  %v2188_v51 = vadd.f32 %v1759_v10, %v796_v45  ;;  %v1128_v48 = vadd.f32 %v1127_v27, %v1126_v35  ;;  %v931_v61 = vadd.f32 %v930_v30, %v929_v40 }
 0x13f   :  { %v670_v59 = vpop.f32.mrf.mxu0  ;;  %v798_v60 = vpop.f32.mrf.mxu1  ;;  %v1133_v5 = vsel %vm449_vm0, %v1052_v6, 0.0  ;;  %v1137_v40 = vsel %vm449_vm0, %v1054_v12, 0.0  ;;  %v940_v6 = vsel %vm449_vm0, %v2159_v49, 0.0 }
 0x140   :  { %857 = vst.msk [vmem:[%s2554_s3 + $0xb0] sm:$0xff] %vm449_vm0, %v2185_v31  ;;  %889 = vst.msk [vmem:[%s2554_s3 + $0x1b0] sm:$0xff] %vm449_vm0, %v2188_v51  ;;  %v1131_v59 = vsel %vm449_vm0, %v1051_v54, 0.0  ;;  %v934_v60 = vsel %vm449_vm0, %v2081_v63, 0.0  ;;  %v1130_v33 = vadd.f32 %v1129_v42, %v1128_v48  ;;  %v933_v2 = vadd.f32 %v932_v28, %v931_v61 }
 0x141   :  { %v671_v46 = vpop.f32.mrf.mxu0  ;;  %v799_v3 = vpop.f32.mrf.mxu1  ;;  %v1056_v54 = vmul.f32 %v2185_v31, %v2185_v31 }
 0x142   :  { %v2211_v9 = vadd.f32 %v1759_v10, %v671_v46  ;;  %v2214_v43 = vadd.f32 %v1759_v10, %v799_v3  ;;  %v1132_v15 = vadd.f32 %v1131_v59, %v1130_v33  ;;  %v935_v16 = vadd.f32 %v934_v60, %v933_v2 }
 0x143   :  { %v673_v19 = vpop.f32.mrf.mxu0  ;;  %v801_v25 = vpop.f32.mrf.mxu1 }
 0x144   :  { %858 = vst.msk [vmem:[%s2554_s3 + $0xb8] sm:$0xff] %vm449_vm0, %v2211_v9  ;;  %890 = vst.msk [vmem:[%s2554_s3 + $0x1b8] sm:$0xff] %vm449_vm0, %v2214_v43  ;;  %v1135_v19 = vsel %vm449_vm0, %v1053_v1, 0.0  ;;  %v938_v25 = vsel %vm449_vm0, %v2133_v53, 0.0  ;;  %v1134_v27 = vadd.f32 %v1133_v5, %v1132_v15  ;;  %v937_v30 = vadd.f32 %v936_v8, %v935_v16 }
 0x145   :  { %v676_v18 = vpop.f32.mrf.mxu0  ;;  %v804_v41 = vpop.f32.mrf.mxu1  ;;  %v1057_v59 = vmul.f32 %v2211_v9, %v2211_v9  ;;  %v1141_v1 = vsel %vm449_vm0, %v1056_v54, 0.0  ;;  %v944_v2 = vsel %vm449_vm0, %v2211_v9, 0.0 }
 0x146   :  { %v677_v55 = vadd.f32 %v1759_v10, %v676_v18  ;;  %v2238_v45 = vadd.f32 %v1759_v10, %v804_v41  ;;  %v1136_v42 = vadd.f32 %v1135_v19, %v1134_v27  ;;  %v939_v28 = vadd.f32 %v938_v25, %v937_v30 }
 0x147   :  { %v678_v52 = vpop.f32.mrf.mxu0  ;;  %v806_v37 = vpop.f32.mrf.mxu1 }
 0x148   :  { %859 = vst.msk [vmem:[%s2554_s3 + $0xc0] sm:$0xff] %vm449_vm0, %v677_v55  ;;  %891 = vst.msk [vmem:[%s2554_s3 + $0x1c0] sm:$0xff] %vm449_vm0, %v2238_v45  ;;  %v1139_v52 = vsel %vm449_vm0, %v1055_v23, 0.0  ;;  %v942_v37 = vsel %vm449_vm0, %v2185_v31, 0.0  ;;  %v1138_v49 = vadd.f32 %v1137_v40, %v1136_v42  ;;  %v941_v60 = vadd.f32 %v940_v6, %v939_v28 }
 0x149   :  { %v679_v36 = vpop.f32.mrf.mxu0  ;;  %v807_v63 = vpop.f32.mrf.mxu1  ;;  %v1058_v5 = vmul.f32 %v677_v55, %v677_v55 }
 0x14a   :  { %v680_v46 = vadd.f32 %v1759_v10, %v679_v36  ;;  %v2261_v3 = vadd.f32 %v1759_v10, %v807_v63  ;;  %v1140_v8 = vadd.f32 %v1139_v52, %v1138_v49  ;;  %v943_v12 = vadd.f32 %v942_v37, %v941_v60 }
 0x14b   :  { %v681_v17 = vpop.f32.mrf.mxu0  ;;  %v809_v22 = vpop.f32.mrf.mxu1  ;;  %v1145_v54 = vsel %vm449_vm0, %v1058_v5, 0.0 }
 0x14c   :  { %860 = vst.msk [vmem:[%s2554_s3 + $0xc8] sm:$0xff] %vm449_vm0, %v680_v46  ;;  %892 = vst.msk [vmem:[%s2554_s3 + $0x1c8] sm:$0xff] %vm449_vm0, %v2261_v3  ;;  %v1143_v17 = vsel %vm449_vm0, %v1057_v59, 0.0  ;;  %v946_v22 = vsel %vm449_vm0, %v677_v55, 0.0  ;;  %v1059_v19 = vmul.f32 %v680_v46, %v680_v46  ;;  %v1142_v9 = vadd.f32 %v1141_v1, %v1140_v8 }
 0x14d   :  { %v684_v53 = vpop.f32.mrf.mxu0  ;;  %v812_v35 = vpop.f32.mrf.mxu1  ;;  %v945_v25 = vadd.f32 %v944_v2, %v943_v12  ;;  %v948_v55 = vsel %vm449_vm0, %v680_v46, 0.0 }
 0x14e   :  { %v685_v18 = vadd.f32 %v1759_v10, %v684_v53  ;;  %v2284_v41 = vadd.f32 %v1759_v10, %v812_v35  ;;  %v1144_v40 = vadd.f32 %v1143_v17, %v1142_v9 }
 0x14f   :  { %v686_v48 = vpop.f32.mrf.mxu0  ;;  %v814_v61 = vpop.f32.mrf.mxu1  ;;  %v947_v6 = vadd.f32 %v946_v22, %v945_v25 }
 0x150   :  { %861 = vst.msk [vmem:[%s2554_s3 + $0xd0] sm:$0xff] %vm449_vm0, %v685_v18  ;;  %893 = vst.msk [vmem:[%s2554_s3 + $0x1d0] sm:$0xff] %vm449_vm0, %v2284_v41  ;;  %v1060_v23 = vmul.f32 %v685_v18, %v685_v18  ;;  %v1147_v48 = vsel %vm449_vm0, %v1059_v19, 0.0  ;;  %v950_v61 = vsel %vm449_vm0, %v685_v18, 0.0  ;;  %v1146_v46 = vadd.f32 %v1145_v54, %v1144_v40 }
 0x151   :  { %v687_v33 = vpop.f32.mrf.mxu0  ;;  %v815_v31 = vpop.f32.mrf.mxu1  ;;  %v949_v37 = vadd.f32 %v948_v55, %v947_v6 }
 0x152   :  { %v688_v36 = vadd.f32 %v1759_v10, %v687_v33  ;;  %v2305_v63 = vadd.f32 %v1759_v10, %v815_v31  ;;  %v1149_v59 = vsel %vm449_vm0, %v1060_v23, 0.0  ;;  %v1148_v2 = vadd.f32 %v1147_v48, %v1146_v46 }
 0x153   :  { %v689_v15 = vpop.f32.mrf.mxu0  ;;  %v817_v16 = vpop.f32.mrf.mxu1  ;;  %v951_v5 = vadd.f32 %v950_v61, %v949_v37 }
 0x154   :  { %862 = vst.msk [vmem:[%s2554_s3 + $0xd8] sm:$0xff] %vm449_vm0, %v688_v36  ;;  %894 = vst.msk [vmem:[%s2554_s3 + $0x1d8] sm:$0xff] %vm449_vm0, %v2305_v63  ;;  %v1061_v52 = vmul.f32 %v688_v36, %v688_v36  ;;  %v952_v18 = vsel %vm449_vm0, %v688_v36, 0.0  ;;  %v1150_v17 = vadd.f32 %v1149_v59, %v1148_v2  ;;  %v1066_v2 = vmul.f32 %v1765_v14, %v1765_v14 }
 0x155   :  { %v692_v27 = vpop.f32.mrf.mxu0  ;;  %v820_v30 = vpop.f32.mrf.mxu1  ;;  %v953_v22 = vadd.f32 %v952_v18, %v951_v5 }
 0x156   :  { %v693_v53 = vadd.f32 %v1759_v10, %v692_v27  ;;  %v2322_v35 = vadd.f32 %v1759_v10, %v820_v30  ;;  %v1151_v15 = vsel %vm449_vm0, %v1061_v52, 0.0 }
 0x157   :  { %v694_v42 = vpop.f32.mrf.mxu0  ;;  %v822_v28 = vpop.f32.mrf.mxu1  ;;  %v1152_v54 = vadd.f32 %v1151_v15, %v1150_v17  ;;  %v962_v15 = vsel %vm449_vm0, %v1765_v14, 0.0  ;;  %v966_v14 = vsel %vm449_vm0, %v1797_v26, 0.0 }
 0x158   :  { %863 = vst.msk [vmem:[%s2554_s3 + $0xe0] sm:$0xff] %vm449_vm0, %v693_v53  ;;  %895 = vst.msk [vmem:[%s2554_s3 + $0x1e0] sm:$0xff] %vm449_vm0, %v2322_v35  ;;  %v1062_v1 = vmul.f32 %v693_v53, %v693_v53  ;;  %v954_v16 = vsel %vm449_vm0, %v693_v53, 0.0 }
 0x159   :  { %v695_v49 = vpop.f32.mrf.mxu0  ;;  %v823_v60 = vpop.f32.mrf.mxu1  ;;  %v955_v55 = vadd.f32 %v954_v16, %v953_v22  ;;  %v1067_v16 = vmul.f32 %v1781_v20, %v1781_v20 }
 0x15a   :  { %v696_v33 = vadd.f32 %v1759_v10, %v695_v49  ;;  %v2339_v31 = vadd.f32 %v1759_v10, %v823_v60  ;;  %v1153_v25 = vsel %vm449_vm0, %v1062_v1, 0.0 }
 0x15b   :  { %v697_v8 = vpop.f32.mrf.mxu0  ;;  %v825_v12 = vpop.f32.mrf.mxu1  ;;  %v1154_v48 = vadd.f32 %v1153_v25, %v1152_v54  ;;  %v1068_v25 = vmul.f32 %v1797_v26, %v1797_v26  ;;  %v1163_v54 = vsel %vm449_vm0, %v1067_v16, 0.0  ;;  %v970_v26 = vsel %vm449_vm0, %v1829_v38, 0.0 }
 0x15c   :  { %864 = vst.msk [vmem:[%s2554_s3 + $0xe8] sm:$0xff] %vm449_vm0, %v696_v33  ;;  %v1063_v36 = vmul.f32 %v696_v33, %v696_v33  ;;  %896 = vst.msk [vmem:[%s2554_s3 + $0x1e8] sm:$0xff] %vm449_vm0, %v2339_v31  ;;  %v956_v23 = vsel %vm449_vm0, %v696_v33, 0.0 }
 0x15d   :  { %v700_v19 = vpop.f32.mrf.mxu0  ;;  %v828_v9 = vpop.f32.mrf.mxu1  ;;  %v957_v61 = vadd.f32 %v956_v23, %v955_v55  ;;  %v1069_v55 = vmul.f32 %v1813_v32, %v1813_v32 }
 0x15e   :  { %v701_v27 = vadd.f32 %v1759_v10, %v700_v19  ;;  %v2356_v30 = vadd.f32 %v1759_v10, %v828_v9  ;;  %v1155_v6 = vsel %vm449_vm0, %v1063_v36, 0.0  ;;  %v1161_v19 = vsel %vm449_vm0, %v1066_v2, 0.0 }
 0x15f   :  { %v702_v53 = vpop.f32.mrf.mxu0  ;;  %v830_v40 = vpop.f32.mrf.mxu1  ;;  %v1156_v60 = vadd.f32 %v1155_v6, %v1154_v48  ;;  %v964_v9 = vsel %vm449_vm0, %v1781_v20, 0.0  ;;  %v1165_v6 = vsel %vm449_vm0, %v1068_v25, 0.0  ;;  %v968_v20 = vsel %vm449_vm0, %v1813_v32, 0.0 }
 0x160   :  { %865 = vst.msk [vmem:[%s2554_s3 + $0xf0] sm:$0xff] %vm449_vm0, %v701_v27  ;;  %v958_v42 = vsel %vm449_vm0, %v701_v27, 0.0  ;;  %v1064_v28 = vmul.f32 %v701_v27, %v701_v27  ;;  %897 = vst.msk [vmem:[%s2554_s3 + $0x1f0] sm:$0xff] %vm449_vm0, %v2356_v30  ;;  %v972_v32 = vsel %vm449_vm0, %v1845_v44, 0.0  ;;  %v1073_v2 = vmul.f32 %v1877_v56, %v1877_v56 }
 0x161   :  { %v703_v52 = vpop.f32.mrf.mxu0  ;;  %v831_v46 = vpop.f32.mrf.mxu1  ;;  %v959_v18 = vadd.f32 %v958_v42, %v957_v61  ;;  %v1070_v42 = vmul.f32 %v1829_v38, %v1829_v38  ;;  %v1167_v61 = vsel %vm449_vm0, %v1069_v55, 0.0  ;;  %v974_v38 = vsel %vm449_vm0, %v1861_v50, 0.0 }
 0x162   :  { %v1157_v37 = vsel %vm449_vm0, %v1064_v28, 0.0  ;;  %v704_v59 = vadd.f32 %v1759_v10, %v703_v52  ;;  %v2372_v49 = vadd.f32 %v1759_v10, %v831_v46  ;;  %v1071_v52 = vmul.f32 %v1845_v44, %v1845_v44 }
 0x163   :  { %v705_v1 = vpop.f32.mrf.mxu0  ;;  %v833_v33 = vpop.f32.mrf.mxu1  ;;  %v1158_v10 = vadd.f32 %v1157_v37, %v1156_v60  ;;  %v1072_v60 = vmul.f32 %v1861_v50, %v1861_v50  ;;  %v976_v44 = vsel %vm449_vm0, %v1877_v56, 0.0  ;;  %v978_v50 = vsel %vm449_vm0, %v1893_v62, 0.0 }
 0x164   :  { %866 = vst.msk [vmem:[%s2554_s3 + $0xf8] sm:$0xff] %vm449_vm0, %v704_v59  ;;  %v960_v5 = vsel %vm449_vm0, %v704_v59, 0.0  ;;  %v1065_v8 = vmul.f32 %v704_v59, %v704_v59  ;;  %898 = vst.msk [vmem:[%s2554_s3 + $0x1f8] sm:$0xff] %vm449_vm0, %v2372_v49  ;;  %v1169_v59 = vsel %vm449_vm0, %v1070_v42, 0.0  ;;  %v1171_v33 = vsel %vm449_vm0, %v1071_v52, 0.0 }
 0x165   :  { %v961_v12 = vadd.f32 %v960_v5, %v959_v18  ;;  %v980_v56 = vsel %vm449_vm0, %v1909_v4, 0.0  ;;  %v1076_v25 = vmul.f32 %v1925_v11, %v1925_v11 }
 0x166   :  { %v1159_v36 = vsel %vm449_vm0, %v1065_v8, 0.0 }
 0x167   :  { %v963_v17 = vadd.f32 %v962_v15, %v961_v12  ;;  %v1160_v22 = vadd.f32 %v1159_v36, %v1158_v10  ;;  %v1173_v10 = vsel %vm449_vm0, %v1072_v60, 0.0  ;;  %v1074_v12 = vmul.f32 %v1893_v62, %v1893_v62 }
 0x168   :  { %v1175_v36 = vsel %vm449_vm0, %v1073_v2, 0.0  ;;  %v982_v62 = vsel %vm449_vm0, %v1925_v11, 0.0  ;;  %v986_v11 = vsel %vm449_vm0, %v1957_v29, 0.0  ;;  %v1081_v60 = vmul.f32 %v2005_v57, %v2005_v57 }
 0x169   :  { %v965_v23 = vadd.f32 %v964_v9, %v963_v17  ;;  %v1162_v27 = vadd.f32 %v1161_v19, %v1160_v22  ;;  %v1075_v17 = vmul.f32 %v1909_v4, %v1909_v4  ;;  %v1177_v9 = vsel %vm449_vm0, %v1074_v12, 0.0 }
 0x16a   :  { %v984_v4 = vsel %vm449_vm0, %v1941_v21, 0.0 }
 0x16b   :  { %v967_v53 = vadd.f32 %v966_v14, %v965_v23  ;;  %v1164_v40 = vadd.f32 %v1163_v54, %v1162_v27  ;;  %v1179_v54 = vsel %vm449_vm0, %v1075_v17, 0.0  ;;  %v1077_v14 = vmul.f32 %v1941_v21, %v1941_v21 }
 0x16c   :  { %v988_v21 = vsel %vm449_vm0, %v1973_v39, 0.0 }
 0x16d   :  { %v969_v28 = vadd.f32 %v968_v20, %v967_v53  ;;  %v1166_v48 = vadd.f32 %v1165_v6, %v1164_v40  ;;  %v1181_v40 = vsel %vm449_vm0, %v1076_v25, 0.0  ;;  %v1078_v6 = vmul.f32 %v1957_v29, %v1957_v29 }
 0x16e   :  { %v990_v29 = vsel %vm449_vm0, %v1989_v47, 0.0  ;;  %v1086_v25 = vmul.f32 %v2136_v58, %v2136_v58 }
 0x16f   :  { %v971_v46 = vadd.f32 %v970_v26, %v969_v28  ;;  %v1168_v37 = vadd.f32 %v1167_v61, %v1166_v48  ;;  %v1183_v28 = vsel %vm449_vm0, %v1077_v14, 0.0  ;;  %v1079_v48 = vmul.f32 %v1973_v39, %v1973_v39 }
 0x170   :  { %v1185_v52 = vsel %vm449_vm0, %v1078_v6, 0.0  ;;  %v992_v39 = vsel %vm449_vm0, %v2005_v57, 0.0  ;;  %v996_v57 = vsel %vm449_vm0, %v2058_v34, 0.0 }
 0x171   :  { %v973_v18 = vadd.f32 %v972_v32, %v971_v46  ;;  %v1170_v1 = vadd.f32 %v1169_v59, %v1168_v37  ;;  %v1080_v46 = vmul.f32 %v1989_v47, %v1989_v47  ;;  %v1187_v32 = vsel %vm449_vm0, %v1079_v48, 0.0 }
 0x172   :  { %v994_v47 = vsel %vm449_vm0, %v2029_v7, 0.0 }
 0x173   :  { %v975_v5 = vadd.f32 %v974_v38, %v973_v18  ;;  %v1172_v8 = vadd.f32 %v1171_v33, %v1170_v1  ;;  %v1189_v33 = vsel %vm449_vm0, %v1080_v46, 0.0  ;;  %v1082_v38 = vmul.f32 %v2029_v7, %v2029_v7 }
 0x174   :  { %v998_v7 = vsel %vm449_vm0, %v2084_v0, 0.0  ;;  %v1091_v46 = vmul.f32 %v2261_v3, %v2261_v3 }
 0x175   :  { %v977_v15 = vadd.f32 %v976_v44, %v975_v5  ;;  %v1174_v16 = vadd.f32 %v1173_v10, %v1172_v8  ;;  %v1191_v8 = vsel %vm449_vm0, %v1081_v60, 0.0  ;;  %v1083_v10 = vmul.f32 %v2058_v34, %v2058_v34 }
 0x176   :  { %v1000_v34 = vsel %vm449_vm0, %v2110_v24, 0.0 }
 0x177   :  { %v1176_v22 = vadd.f32 %v1175_v36, %v1174_v16  ;;  %v979_v19 = vadd.f32 %v978_v50, %v977_v15  ;;  %v1193_v15 = vsel %vm449_vm0, %v1082_v38, 0.0  ;;  %v1084_v16 = vmul.f32 %v2084_v0, %v2084_v0 }
 0x178   :  { %v1195_v17 = vsel %vm449_vm0, %v1083_v10, 0.0  ;;  %v1002_v0 = vsel %vm449_vm0, %v2136_v58, 0.0  ;;  %v1006_v58 = vsel %vm449_vm0, %v2188_v51, 0.0 }
 0x179   :  { %v981_v23 = vadd.f32 %v980_v56, %v979_v19  ;;  %v1178_v27 = vadd.f32 %v1177_v9, %v1176_v22  ;;  %v1085_v22 = vmul.f32 %v2110_v24, %v2110_v24  ;;  %v1197_v56 = vsel %vm449_vm0, %v1084_v16, 0.0 }
 0x17a   :  { %v1004_v24 = vsel %vm449_vm0, %v2162_v13, 0.0  ;;  %v1096_v16 = vmul.f32 %v2356_v30, %v2356_v30 }
 0x17b   :  { %v983_v55 = vadd.f32 %v982_v62, %v981_v23  ;;  %v1180_v53 = vadd.f32 %v1179_v54, %v1178_v27  ;;  %v1199_v54 = vsel %vm449_vm0, %v1085_v22, 0.0  ;;  %v1087_v62 = vmul.f32 %v2162_v13, %v2162_v13 }
 0x17c   :  { %v1008_v13 = vsel %vm449_vm0, %v2214_v43, 0.0 }
 0x17d   :  { %v985_v20 = vadd.f32 %v984_v4, %v983_v55  ;;  %v1182_v42 = vadd.f32 %v1181_v40, %v1180_v53  ;;  %v1201_v53 = vsel %vm449_vm0, %v1086_v25, 0.0  ;;  %v1088_v40 = vmul.f32 %v2188_v51, %v2188_v51 }
 0x17e   :  { %v1010_v51 = vsel %vm449_vm0, %v2238_v45, 0.0 }
 0x17f   :  { %v987_v61 = vadd.f32 %v986_v11, %v985_v20  ;;  %v1184_v26 = vadd.f32 %v1183_v28, %v1182_v42  ;;  %v1203_v20 = vsel %vm449_vm0, %v1087_v62, 0.0  ;;  %v1089_v42 = vmul.f32 %v2214_v43, %v2214_v43 }
 0x180   :  { %v1205_v48 = vsel %vm449_vm0, %v1088_v40, 0.0  ;;  %v1012_v43 = vsel %vm449_vm0, %v2261_v3, 0.0  ;;  %v1016_v3 = vsel %vm449_vm0, %v2305_v63, 0.0 }
 0x181   :  { %v989_v37 = vadd.f32 %v988_v21, %v987_v61  ;;  %v1186_v59 = vadd.f32 %v1185_v52, %v1184_v26  ;;  %v1090_v61 = vmul.f32 %v2238_v45, %v2238_v45  ;;  %v1207_v21 = vsel %vm449_vm0, %v1089_v42, 0.0 }
 0x182   :  { %v1014_v45 = vsel %vm449_vm0, %v2284_v41, 0.0 }
 0x183   :  { %v991_v18 = vadd.f32 %v990_v29, %v989_v37  ;;  %v1188_v1 = vadd.f32 %v1187_v32, %v1186_v59  ;;  %v1209_v32 = vsel %vm449_vm0, %v1090_v61, 0.0  ;;  %v1092_v29 = vmul.f32 %v2284_v41, %v2284_v41 }
 0x184   :  { %v1018_v41 = vsel %vm449_vm0, %v2322_v35, 0.0 }
 0x185   :  { %v993_v2 = vadd.f32 %v992_v39, %v991_v18  ;;  %v1190_v5 = vadd.f32 %v1189_v33, %v1188_v1  ;;  %v1211_v1 = vsel %vm449_vm0, %v1091_v46, 0.0  ;;  %v1093_v33 = vmul.f32 %v2305_v63, %v2305_v63 }
 0x186   :  { %v1020_v63 = vsel %vm449_vm0, %v2339_v31, 0.0 }
 0x187   :  { %v995_v44 = vadd.f32 %v994_v47, %v993_v2  ;;  %v1192_v12 = vadd.f32 %v1191_v8, %v1190_v5  ;;  %v1213_v2 = vsel %vm449_vm0, %v1092_v29, 0.0  ;;  %v1094_v5 = vmul.f32 %v2322_v35, %v2322_v35 }
 0x188   :  { %v1215_v10 = vsel %vm449_vm0, %v1093_v33, 0.0  ;;  %v1022_v35 = vsel %vm449_vm0, %v2356_v30, 0.0 }
 0x189   :  { %v997_v36 = vadd.f32 %v996_v57, %v995_v44  ;;  %v1194_v50 = vadd.f32 %v1193_v15, %v1192_v12  ;;  %v1095_v44 = vmul.f32 %v2339_v31, %v2339_v31  ;;  %v1217_v57 = vsel %vm449_vm0, %v1094_v5, 0.0 }
 0x18a   :  { %v1024_v31 = vsel %vm449_vm0, %v2372_v49, 0.0 }
 0x18b   :  { %v1196_v19 = vadd.f32 %v1195_v17, %v1194_v50  ;;  %v999_v9 = vadd.f32 %v998_v7, %v997_v36  ;;  %v1219_v17 = vsel %vm449_vm0, %v1095_v44, 0.0  ;;  %v1097_v7 = vmul.f32 %v2372_v49, %v2372_v49 }
 0x18d   :  { %v1198_v23 = vadd.f32 %v1197_v56, %v1196_v19  ;;  %v1001_v27 = vadd.f32 %v1000_v34, %v999_v9  ;;  %v1221_v9 = vsel %vm449_vm0, %v1096_v16, 0.0  ;;  %v1223_v25 = vsel %vm449_vm0, %v1097_v7, 0.0 }
 0x18f   :  { %v1200_v14 = vadd.f32 %v1199_v54, %v1198_v23  ;;  %v1003_v55 = vadd.f32 %v1002_v0, %v1001_v27 }
 0x191   :  { %v1202_v4 = vadd.f32 %v1201_v53, %v1200_v14  ;;  %v1005_v6 = vadd.f32 %v1004_v24, %v1003_v55 }
 0x193   :  { %v1204_v28 = vadd.f32 %v1203_v20, %v1202_v4  ;;  %v1007_v11 = vadd.f32 %v1006_v58, %v1005_v6 }
 0x195   :  { %v1206_v26 = vadd.f32 %v1205_v48, %v1204_v28  ;;  %v1009_v52 = vadd.f32 %v1008_v13, %v1007_v11 }
 0x197   :  { %v1208_v37 = vadd.f32 %v1207_v21, %v1206_v26  ;;  %v1011_v59 = vadd.f32 %v1010_v51, %v1009_v52 }
 0x199   :  { %v1210_v60 = vadd.f32 %v1209_v32, %v1208_v37  ;;  %v1013_v18 = vadd.f32 %v1012_v43, %v1011_v59 }
 0x19b   :  { %v1212_v39 = vadd.f32 %v1211_v1, %v1210_v60  ;;  %v1015_v38 = vadd.f32 %v1014_v45, %v1013_v18 }
 0x19d   :  { %v1214_v8 = vadd.f32 %v1213_v2, %v1212_v39  ;;  %v1017_v47 = vadd.f32 %v1016_v3, %v1015_v38 }
 0x19f   :  { %v1216_v12 = vadd.f32 %v1215_v10, %v1214_v8  ;;  %v1019_v15 = vadd.f32 %v1018_v41, %v1017_v47 }
 0x1a1   :  { %v1218_v36 = vadd.f32 %v1217_v57, %v1216_v12  ;;  %v1021_v50 = vadd.f32 %v1020_v63, %v1019_v15 }
 0x1a3   :  { %v1220_v22 = vadd.f32 %v1219_v17, %v1218_v36  ;;  %v1023_v19 = vadd.f32 %v1022_v35, %v1021_v50 }
 0x1a5   :  { %v1222_v56 = vadd.f32 %v1221_v9, %v1220_v22  ;;  %v1025_v34 = vadd.f32 %v1024_v31, %v1023_v19 }
 0x1a7   :  { %v1026_v23 = vrot.slane %v1025_v34, 4  ;;  %v1224_v27 = vadd.f32 %v1223_v25, %v1222_v56 }
 0x1a9   :  { %v1027_v54 = vadd.f32 %v1026_v23, %v1025_v34  ;;  %v1225_v0 = vrot.slane %v1224_v27, 4 }
 0x1ab   :  { %v1028_v62 = vrot.slane %v1027_v54, 2  ;;  %v1226_v30 = vadd.f32 %v1225_v0, %v1224_v27 }
 0x1ad   :  { %v1029_v14 = vadd.f32 %v1028_v62, %v1027_v54  ;;  %v1227_v55 = vrot.slane %v1226_v30, 2 }
 0x1af   :  { %v1030_v53 = vrot.slane %v1029_v14, 1  ;;  %v1228_v24 = vadd.f32 %v1227_v55, %v1226_v30 }
 0x1b1   :  { %v1031_v40 = vadd.f32 %v1030_v53, %v1029_v14  ;;  %v1229_v4 = vrot.slane %v1228_v24, 1 }
 0x1b3   :  { %1033 = vst.msk [vmem:[%s2555_s4] sm:$0x1] %vm1032_vm1, %v1031_v40  ;;  %v1230_v49 = vadd.f32 %v1229_v4, %v1228_v24 }
 0x1b5   :  { %1231 = vst.msk [vmem:[%s2556_s5] sm:$0x1] %vm1032_vm1, %v1230_v49 }

// kernel: tile.378
= control target key start
LH: loop header
LB: loop body
LE: loop exit
PB: predicated region body
PF: predicated region fallthrough
CT: control target
= control target key end

     0   :  { %s22_s0 = inlined_call_operand.vmem [shape: f32[2], index: 0, kind: input, shape index: {}]   ;;  %s23_s1 = inlined_call_operand.vmem [shape: f32[4,2], index: 1, kind: output, shape index: {}]  }
   0x1   :  { %v4_v0 = vld [vmem:[%s22_s0] ss:$0 sm:$0xff] }
   0x2   :  { %5 = vst [vmem:[%s23_s1] sm:$0xf] %v4_v0 }

// kernel: tile.379
= control target key start
LH: loop header
LB: loop body
LE: loop exit
PB: predicated region body
PF: predicated region fallthrough
CT: control target
= control target key end

     0   :  { %vm8_vm0 = vcmask 15360   ;;  %s40_s8 = smov 2   ;;  %s41_s9 = smov 4   ;;  %vm14_vm1 = vcmask 64560   ;;  %vm20_vm2 = vcmask 48160   ;;  %vm26_vm3 = vcmask 31760   ;;  %s58_s0 = inlined_call_operand.vmem [shape: f32[4,2], index: 0, kind: input, shape index: {}]   ;;  %s59_s1 = inlined_call_operand.vmem [shape: f32[1,8], index: 1, kind: output, shape index: {}]  }
   0x1   :  { %v5_v0 = vld [vmem:[%s58_s0] sm:$0xf]  ;;  %s39_s0 = smov 6  }
   0x2   :  { %6 = vst [vmem:[#allocation1] sm:$0xf] %v5_v0 }
   0x9   :  { %v11_v1 = vld [vmem:[#allocation1 + $0x3] sm:$0x1]   ;;  %v23_v2 = vld [vmem:[#allocation1 + $0x1] sm:$0x1]   ;;  %v7_v3 = vld [vmem:[#allocation1] sm:$0x1]  }
   0xa   :  { %12 = vrot.lane.b32.xlu0 %v11_v1, %s39_s0  ;;  %24 = vrot.lane.b32.xlu1 %v23_v2, %s40_s8  ;;  %v17_v4 = vld [vmem:[#allocation1 + $0x2] sm:$0x1]   ;;  %9 = vst.msk [vmem:[#allocation0] sm:$0x1] %vm8_vm0, %v7_v3  }
   0xe   :  { %18 = vrot.lane.b32.xlu0 %v17_v4, %s41_s9 }
  0x7c   :  { %v13_v5 = vpop.permute.xlu0 %12   ;;  %v25_v6 = vpop.permute.xlu1 %24  }
  0x7d   :  { %15 = vst.msk [vmem:[#allocation0] sm:$0x1] %vm14_vm1, %v13_v5  }
  0x80   :  { %v19_v7 = vpop.permute.xlu0 %18  }
  0x81   :  { %21 = vst.msk [vmem:[#allocation0] sm:$0x1] %vm20_vm2, %v19_v7  }
  0x82   :  { %27 = vst.msk [vmem:[#allocation0] sm:$0x1] %vm26_vm3, %v25_v6  }
  0x89   :  { %v32_v8 = vld [vmem:[#allocation0] sm:$0x1] }
  0x8a   :  { %35 = vst [vmem:[%s59_s1] sm:$0x1] %v32_v8 }

// kernel: _lambda_.61
= control target key start
LH: loop header
LB: loop body
LE: loop exit
PB: predicated region body
PF: predicated region fallthrough
CT: control target
= control target key end

     0   :  { %vm278_vm0 = vcmask 523264   ;;  %vm664_vm1 = vcmask 64512   ;;  %s1439_s1 = inlined_call_operand.vmem [shape: bf16[64,8], index: 1, kind: input, shape index: {}]   ;;  %s1440_s0 = inlined_call_operand.vmem [shape: bf16[512,64], index: 0, kind: input, shape index: {}]   ;;  %s1441_s2 = inlined_call_operand.vmem [shape: f32[1,8], index: 2, kind: input, shape index: {}]   ;;  %s1442_s3 = inlined_call_operand.vmem [shape: f32[512,8], index: 3, kind: output, shape index: {}]  }
   0x1   :  { %v918_v0 = vld [vmem:[%s1439_s1 + $0x18] sm:$0xff]   ;;  %v919_v1 = vld [vmem:[%s1439_s1 + $0x10] sm:$0xff]   ;;  %v920_v2 = vld [vmem:[%s1439_s1 + $0x8] sm:$0xff]  }
   0x2   :  { %838 = vmatprep.subr.bf16.mxu0 %v918_v0  ;;  %910 = vmatprep.subr.bf16.mxu1 %v918_v0  ;;  %v922_v3 = vld [vmem:[%s1440_s0] sm:$0xff]   ;;  %v924_v6 = vld [vmem:[%s1440_s0 + $0x8] sm:$0xff]   ;;  %v926_v8 = vld [vmem:[%s1440_s0 + $0x10] sm:$0xff]  }
   0x3   :  { %839 = vmatpush3.bf16.msra.mxu0 %v918_v0  ;;  %914 = vmatpush3.bf16.msra.mxu1 %v918_v0  ;;  %v923_v4 = vld [vmem:[%s1440_s0 + $0x80] sm:$0xff]   ;;  %v925_v7 = vld [vmem:[%s1440_s0 + $0x88] sm:$0xff]   ;;  %v927_v9 = vld [vmem:[%s1440_s0 + $0x90] sm:$0xff]  }
   0x4   :  { %840 = vmatprep.subr.bf16.mxu0 %v919_v1  ;;  %911 = vmatprep.subr.bf16.mxu1 %v919_v1  ;;  %v921_v5 = vld [vmem:[%s1439_s1] sm:$0xff]   ;;  %v928_v10 = vld [vmem:[%s1440_s0 + $0x18] sm:$0xff]   ;;  %v932_v14 = vld [vmem:[%s1440_s0 + $0x28] sm:$0xff]  }
   0x5   :  { %846 = vmatprep.mubr.msk.bf16.mxu0 %vm278_vm0, %v922_v3  ;;  %878 = vmatprep.mubr.msk.bf16.mxu1 %vm278_vm0, %v923_v4  ;;  %v929_v11 = vld [vmem:[%s1440_s0 + $0x98] sm:$0xff]   ;;  %v930_v12 = vld [vmem:[%s1440_s0 + $0x20] sm:$0xff]   ;;  %v933_v15 = vld [vmem:[%s1440_s0 + $0xa8] sm:$0xff]  }
   0x6   :  { %v931_v13 = vld [vmem:[%s1440_s0 + $0xa0] sm:$0xff]   ;;  %v934_v16 = vld [vmem:[%s1440_s0 + $0x30] sm:$0xff]   ;;  %v936_v18 = vld [vmem:[%s1440_s0 + $0x38] sm:$0xff]  }
   0x7   :  { %841 = vmatpush3.bf16.msra.mxu0 %v919_v1  ;;  %915 = vmatpush3.bf16.msra.mxu1 %v919_v1  ;;  %v935_v17 = vld [vmem:[%s1440_s0 + $0xb0] sm:$0xff]   ;;  %v937_v19 = vld [vmem:[%s1440_s0 + $0xb8] sm:$0xff]   ;;  %v938_v20 = vld [vmem:[%s1440_s0 + $0x40] sm:$0xff]  }
   0x8   :  { %842 = vmatprep.subr.bf16.mxu0 %v920_v2  ;;  %912 = vmatprep.subr.bf16.mxu1 %v920_v2  ;;  %v939_v21 = vld [vmem:[%s1440_s0 + $0xc0] sm:$0xff]   ;;  %v940_v22 = vld [vmem:[%s1440_s0 + $0x48] sm:$0xff]   ;;  %v942_v24 = vld [vmem:[%s1440_s0 + $0x50] sm:$0xff]  }
   0x9   :  { %v941_v23 = vld [vmem:[%s1440_s0 + $0xc8] sm:$0xff]   ;;  %v943_v25 = vld [vmem:[%s1440_s0 + $0xd0] sm:$0xff]   ;;  %v944_v26 = vld [vmem:[%s1440_s0 + $0x58] sm:$0xff]  }
   0xa   :  { %v945_v27 = vld [vmem:[%s1440_s0 + $0xd8] sm:$0xff]   ;;  %v946_v28 = vld [vmem:[%s1440_s0 + $0x60] sm:$0xff]   ;;  %v948_v30 = vld [vmem:[%s1440_s0 + $0x68] sm:$0xff]  }
   0xb   :  { %843 = vmatpush3.bf16.msra.mxu0 %v920_v2  ;;  %916 = vmatpush3.bf16.msra.mxu1 %v920_v2  ;;  %v947_v29 = vld [vmem:[%s1440_s0 + $0xe0] sm:$0xff]   ;;  %v949_v31 = vld [vmem:[%s1440_s0 + $0xe8] sm:$0xff]   ;;  %v950_v32 = vld [vmem:[%s1440_s0 + $0x70] sm:$0xff]  }
   0xc   :  { %844 = vmatprep.subr.bf16.mxu0 %v921_v5  ;;  %913 = vmatprep.subr.bf16.mxu1 %v921_v5  ;;  %v951_v33 = vld [vmem:[%s1440_s0 + $0xf0] sm:$0xff]   ;;  %v952_v34 = vld [vmem:[%s1440_s0 + $0x78] sm:$0xff]   ;;  %v1117_v36 = vld [vmem:[%s1441_s2] ss:$0 sm:$0xff] }
   0xd   :  { %v953_v35 = vld [vmem:[%s1440_s0 + $0xf8] sm:$0xff]  }
   0xf   :  { %845 = vmatpush3.bf16.msra.mxu0 %v921_v5  ;;  %917 = vmatpush3.bf16.msra.mxu1 %v921_v5 }
  0x12   :  { %847 = vmatmul.mubr.msk.bf16.vlgmr.msra.gmra.mxu0 %vm278_vm0, %v924_v6  ;;  %879 = vmatmul.mubr.msk.bf16.vlgmr.msra.gmra.mxu1 %vm278_vm0, %v925_v7 }
  0x13   :  { %850 = vmatprep.mubr.msk.bf16.mxu0 %vm278_vm0, %v926_v8  ;;  %882 = vmatprep.mubr.msk.bf16.mxu1 %vm278_vm0, %v927_v9 }
  0x1a   :  { %851 = vmatmul.mubr.msk.bf16.gmra.mxu0 %vm278_vm0, %v928_v10  ;;  %883 = vmatmul.mubr.msk.bf16.gmra.mxu1 %vm278_vm0, %v929_v11 }
  0x1b   :  { %854 = vmatprep.mubr.msk.bf16.mxu0 %vm278_vm0, %v930_v12  ;;  %886 = vmatprep.mubr.msk.bf16.mxu1 %vm278_vm0, %v931_v13 }
  0x22   :  { %855 = vmatmul.mubr.msk.bf16.gmra.mxu0 %vm278_vm0, %v932_v14  ;;  %887 = vmatmul.mubr.msk.bf16.gmra.mxu1 %vm278_vm0, %v933_v15 }
  0x23   :  { %858 = vmatprep.mubr.msk.bf16.mxu0 %vm278_vm0, %v934_v16  ;;  %890 = vmatprep.mubr.msk.bf16.mxu1 %vm278_vm0, %v935_v17 }
  0x2a   :  { %859 = vmatmul.mubr.msk.bf16.gmra.mxu0 %vm278_vm0, %v936_v18  ;;  %891 = vmatmul.mubr.msk.bf16.gmra.mxu1 %vm278_vm0, %v937_v19 }
  0x2b   :  { %862 = vmatprep.mubr.msk.bf16.mxu0 %vm278_vm0, %v938_v20  ;;  %894 = vmatprep.mubr.msk.bf16.mxu1 %vm278_vm0, %v939_v21 }
  0x32   :  { %863 = vmatmul.mubr.msk.bf16.gmra.mxu0 %vm278_vm0, %v940_v22  ;;  %895 = vmatmul.mubr.msk.bf16.gmra.mxu1 %vm278_vm0, %v941_v23 }
  0x33   :  { %866 = vmatprep.mubr.msk.bf16.mxu0 %vm278_vm0, %v942_v24  ;;  %898 = vmatprep.mubr.msk.bf16.mxu1 %vm278_vm0, %v943_v25 }
  0x3a   :  { %867 = vmatmul.mubr.msk.bf16.gmra.mxu0 %vm278_vm0, %v944_v26  ;;  %899 = vmatmul.mubr.msk.bf16.gmra.mxu1 %vm278_vm0, %v945_v27 }
  0x3b   :  { %870 = vmatprep.mubr.msk.bf16.mxu0 %vm278_vm0, %v946_v28  ;;  %902 = vmatprep.mubr.msk.bf16.mxu1 %vm278_vm0, %v947_v29 }
  0x42   :  { %871 = vmatmul.mubr.msk.bf16.gmra.mxu0 %vm278_vm0, %v948_v30  ;;  %903 = vmatmul.mubr.msk.bf16.gmra.mxu1 %vm278_vm0, %v949_v31 }
  0x43   :  { %874 = vmatprep.mubr.msk.bf16.mxu0 %vm278_vm0, %v950_v32  ;;  %906 = vmatprep.mubr.msk.bf16.mxu1 %vm278_vm0, %v951_v33 }
  0x4a   :  { %875 = vmatmul.mubr.msk.bf16.gmra.mxu0 %vm278_vm0, %v952_v34  ;;  %907 = vmatmul.mubr.msk.bf16.gmra.mxu1 %vm278_vm0, %v953_v35 }
  0xd2   :  { %v848_v37 = vpop.f32.mrf.mxu0  ;;  %v880_v38 = vpop.f32.mrf.mxu1 }
  0xd3   :  { %v418_v39 = vadd.f32 %v848_v37, %v1117_v36  ;;  %v546_v40 = vadd.f32 %v880_v38, %v1117_v36 }
  0xd4   :  { %v409_v41 = vpop.f32.mrf.mxu0  ;;  %v537_v42 = vpop.f32.mrf.mxu1 }
  0xd5   :  { %667 = vst.msk [vmem:[%s1442_s3 + $0x10] sm:$0xff] %vm664_vm1, %v418_v39  ;;  %699 = vst.msk [vmem:[%s1442_s3 + $0x110] sm:$0xff] %vm664_vm1, %v546_v40  ;;  %v410_v43 = vadd.f32 %v1117_v36, %v409_v41  ;;  %v538_v44 = vadd.f32 %v1117_v36, %v537_v42 }
  0xd6   :  { %v849_v45 = vpop.f32.mrf.mxu0  ;;  %v881_v46 = vpop.f32.mrf.mxu1 }
  0xd7   :  { %665 = vst.msk [vmem:[%s1442_s3] sm:$0xff] %vm664_vm1, %v410_v43  ;;  %697 = vst.msk [vmem:[%s1442_s3 + $0x100] sm:$0xff] %vm664_vm1, %v538_v44  ;;  %v421_v47 = vadd.f32 %v849_v45, %v1117_v36  ;;  %v549_v48 = vadd.f32 %v881_v46, %v1117_v36 }
  0xd8   :  { %v412_v49 = vpop.f32.mrf.mxu0  ;;  %v540_v50 = vpop.f32.mrf.mxu1 }
  0xd9   :  { %668 = vst.msk [vmem:[%s1442_s3 + $0x18] sm:$0xff] %vm664_vm1, %v421_v47  ;;  %700 = vst.msk [vmem:[%s1442_s3 + $0x118] sm:$0xff] %vm664_vm1, %v549_v48  ;;  %v413_v51 = vadd.f32 %v1117_v36, %v412_v49  ;;  %v541_v52 = vadd.f32 %v1117_v36, %v540_v50 }
  0xda   :  { %v852_v53 = vpop.f32.mrf.mxu0  ;;  %v884_v54 = vpop.f32.mrf.mxu1 }
  0xdb   :  { %666 = vst.msk [vmem:[%s1442_s3 + $0x8] sm:$0xff] %vm664_vm1, %v413_v51  ;;  %698 = vst.msk [vmem:[%s1442_s3 + $0x108] sm:$0xff] %vm664_vm1, %v541_v52  ;;  %v434_v55 = vadd.f32 %v852_v53, %v1117_v36  ;;  %v562_v56 = vadd.f32 %v884_v54, %v1117_v36 }
  0xdc   :  { %v425_v57 = vpop.f32.mrf.mxu0  ;;  %v553_v58 = vpop.f32.mrf.mxu1 }
  0xdd   :  { %671 = vst.msk [vmem:[%s1442_s3 + $0x30] sm:$0xff] %vm664_vm1, %v434_v55  ;;  %703 = vst.msk [vmem:[%s1442_s3 + $0x130] sm:$0xff] %vm664_vm1, %v562_v56  ;;  %v426_v59 = vadd.f32 %v1117_v36, %v425_v57  ;;  %v554_v60 = vadd.f32 %v1117_v36, %v553_v58 }
  0xde   :  { %v853_v61 = vpop.f32.mrf.mxu0  ;;  %v885_v62 = vpop.f32.mrf.mxu1 }
  0xdf   :  { %669 = vst.msk [vmem:[%s1442_s3 + $0x20] sm:$0xff] %vm664_vm1, %v426_v59  ;;  %701 = vst.msk [vmem:[%s1442_s3 + $0x120] sm:$0xff] %vm664_vm1, %v554_v60  ;;  %v437_v63 = vadd.f32 %v853_v61, %v1117_v36  ;;  %v565_v0 = vadd.f32 %v885_v62, %v1117_v36 }
  0xe0   :  { %v428_v1 = vpop.f32.mrf.mxu0  ;;  %v556_v2 = vpop.f32.mrf.mxu1 }
  0xe1   :  { %672 = vst.msk [vmem:[%s1442_s3 + $0x38] sm:$0xff] %vm664_vm1, %v437_v63  ;;  %704 = vst.msk [vmem:[%s1442_s3 + $0x138] sm:$0xff] %vm664_vm1, %v565_v0  ;;  %v429_v3 = vadd.f32 %v1117_v36, %v428_v1  ;;  %v557_v4 = vadd.f32 %v1117_v36, %v556_v2 }
  0xe2   :  { %v856_v5 = vpop.f32.mrf.mxu0  ;;  %v888_v6 = vpop.f32.mrf.mxu1 }
  0xe3   :  { %670 = vst.msk [vmem:[%s1442_s3 + $0x28] sm:$0xff] %vm664_vm1, %v429_v3  ;;  %702 = vst.msk [vmem:[%s1442_s3 + $0x128] sm:$0xff] %vm664_vm1, %v557_v4  ;;  %v450_v7 = vadd.f32 %v856_v5, %v1117_v36  ;;  %v578_v8 = vadd.f32 %v888_v6, %v1117_v36 }
  0xe4   :  { %v441_v9 = vpop.f32.mrf.mxu0  ;;  %v569_v10 = vpop.f32.mrf.mxu1 }
  0xe5   :  { %675 = vst.msk [vmem:[%s1442_s3 + $0x50] sm:$0xff] %vm664_vm1, %v450_v7  ;;  %707 = vst.msk [vmem:[%s1442_s3 + $0x150] sm:$0xff] %vm664_vm1, %v578_v8  ;;  %v442_v11 = vadd.f32 %v1117_v36, %v441_v9  ;;  %v570_v12 = vadd.f32 %v1117_v36, %v569_v10 }
  0xe6   :  { %v857_v13 = vpop.f32.mrf.mxu0  ;;  %v889_v14 = vpop.f32.mrf.mxu1 }
  0xe7   :  { %673 = vst.msk [vmem:[%s1442_s3 + $0x40] sm:$0xff] %vm664_vm1, %v442_v11  ;;  %705 = vst.msk [vmem:[%s1442_s3 + $0x140] sm:$0xff] %vm664_vm1, %v570_v12  ;;  %v453_v15 = vadd.f32 %v857_v13, %v1117_v36  ;;  %v581_v16 = vadd.f32 %v889_v14, %v1117_v36 }
  0xe8   :  { %v444_v17 = vpop.f32.mrf.mxu0  ;;  %v572_v18 = vpop.f32.mrf.mxu1 }
  0xe9   :  { %676 = vst.msk [vmem:[%s1442_s3 + $0x58] sm:$0xff] %vm664_vm1, %v453_v15  ;;  %708 = vst.msk [vmem:[%s1442_s3 + $0x158] sm:$0xff] %vm664_vm1, %v581_v16  ;;  %v445_v19 = vadd.f32 %v1117_v36, %v444_v17  ;;  %v573_v20 = vadd.f32 %v1117_v36, %v572_v18 }
  0xea   :  { %v860_v21 = vpop.f32.mrf.mxu0  ;;  %v892_v22 = vpop.f32.mrf.mxu1 }
  0xeb   :  { %674 = vst.msk [vmem:[%s1442_s3 + $0x48] sm:$0xff] %vm664_vm1, %v445_v19  ;;  %706 = vst.msk [vmem:[%s1442_s3 + $0x148] sm:$0xff] %vm664_vm1, %v573_v20  ;;  %v466_v23 = vadd.f32 %v860_v21, %v1117_v36  ;;  %v594_v24 = vadd.f32 %v892_v22, %v1117_v36 }
  0xec   :  { %v457_v25 = vpop.f32.mrf.mxu0  ;;  %v585_v26 = vpop.f32.mrf.mxu1 }
  0xed   :  { %679 = vst.msk [vmem:[%s1442_s3 + $0x70] sm:$0xff] %vm664_vm1, %v466_v23  ;;  %711 = vst.msk [vmem:[%s1442_s3 + $0x170] sm:$0xff] %vm664_vm1, %v594_v24  ;;  %v458_v27 = vadd.f32 %v1117_v36, %v457_v25  ;;  %v586_v28 = vadd.f32 %v1117_v36, %v585_v26 }
  0xee   :  { %v861_v29 = vpop.f32.mrf.mxu0  ;;  %v893_v30 = vpop.f32.mrf.mxu1 }
  0xef   :  { %677 = vst.msk [vmem:[%s1442_s3 + $0x60] sm:$0xff] %vm664_vm1, %v458_v27  ;;  %709 = vst.msk [vmem:[%s1442_s3 + $0x160] sm:$0xff] %vm664_vm1, %v586_v28  ;;  %v469_v31 = vadd.f32 %v861_v29, %v1117_v36  ;;  %v597_v32 = vadd.f32 %v893_v30, %v1117_v36 }
  0xf0   :  { %v460_v33 = vpop.f32.mrf.mxu0  ;;  %v588_v34 = vpop.f32.mrf.mxu1 }
  0xf1   :  { %680 = vst.msk [vmem:[%s1442_s3 + $0x78] sm:$0xff] %vm664_vm1, %v469_v31  ;;  %712 = vst.msk [vmem:[%s1442_s3 + $0x178] sm:$0xff] %vm664_vm1, %v597_v32  ;;  %v461_v35 = vadd.f32 %v1117_v36, %v460_v33  ;;  %v589_v37 = vadd.f32 %v1117_v36, %v588_v34 }
  0xf2   :  { %v864_v38 = vpop.f32.mrf.mxu0  ;;  %v896_v39 = vpop.f32.mrf.mxu1 }
  0xf3   :  { %678 = vst.msk [vmem:[%s1442_s3 + $0x68] sm:$0xff] %vm664_vm1, %v461_v35  ;;  %710 = vst.msk [vmem:[%s1442_s3 + $0x168] sm:$0xff] %vm664_vm1, %v589_v37  ;;  %v482_v40 = vadd.f32 %v864_v38, %v1117_v36  ;;  %v610_v41 = vadd.f32 %v896_v39, %v1117_v36 }
  0xf4   :  { %v473_v42 = vpop.f32.mrf.mxu0  ;;  %v601_v43 = vpop.f32.mrf.mxu1 }
  0xf5   :  { %683 = vst.msk [vmem:[%s1442_s3 + $0x90] sm:$0xff] %vm664_vm1, %v482_v40  ;;  %715 = vst.msk [vmem:[%s1442_s3 + $0x190] sm:$0xff] %vm664_vm1, %v610_v41  ;;  %v474_v44 = vadd.f32 %v1117_v36, %v473_v42  ;;  %v602_v45 = vadd.f32 %v1117_v36, %v601_v43 }
  0xf6   :  { %v865_v46 = vpop.f32.mrf.mxu0  ;;  %v897_v47 = vpop.f32.mrf.mxu1 }
  0xf7   :  { %681 = vst.msk [vmem:[%s1442_s3 + $0x80] sm:$0xff] %vm664_vm1, %v474_v44  ;;  %713 = vst.msk [vmem:[%s1442_s3 + $0x180] sm:$0xff] %vm664_vm1, %v602_v45  ;;  %v485_v48 = vadd.f32 %v865_v46, %v1117_v36  ;;  %v613_v49 = vadd.f32 %v897_v47, %v1117_v36 }
  0xf8   :  { %v476_v50 = vpop.f32.mrf.mxu0  ;;  %v604_v51 = vpop.f32.mrf.mxu1 }
  0xf9   :  { %684 = vst.msk [vmem:[%s1442_s3 + $0x98] sm:$0xff] %vm664_vm1, %v485_v48  ;;  %716 = vst.msk [vmem:[%s1442_s3 + $0x198] sm:$0xff] %vm664_vm1, %v613_v49  ;;  %v477_v52 = vadd.f32 %v1117_v36, %v476_v50  ;;  %v605_v53 = vadd.f32 %v1117_v36, %v604_v51 }
  0xfa   :  { %v868_v54 = vpop.f32.mrf.mxu0  ;;  %v900_v55 = vpop.f32.mrf.mxu1 }
  0xfb   :  { %682 = vst.msk [vmem:[%s1442_s3 + $0x88] sm:$0xff] %vm664_vm1, %v477_v52  ;;  %714 = vst.msk [vmem:[%s1442_s3 + $0x188] sm:$0xff] %vm664_vm1, %v605_v53  ;;  %v498_v56 = vadd.f32 %v868_v54, %v1117_v36  ;;  %v626_v57 = vadd.f32 %v900_v55, %v1117_v36 }
  0xfc   :  { %v489_v58 = vpop.f32.mrf.mxu0  ;;  %v617_v59 = vpop.f32.mrf.mxu1 }
  0xfd   :  { %687 = vst.msk [vmem:[%s1442_s3 + $0xb0] sm:$0xff] %vm664_vm1, %v498_v56  ;;  %719 = vst.msk [vmem:[%s1442_s3 + $0x1b0] sm:$0xff] %vm664_vm1, %v626_v57  ;;  %v490_v60 = vadd.f32 %v1117_v36, %v489_v58  ;;  %v618_v61 = vadd.f32 %v1117_v36, %v617_v59 }
  0xfe   :  { %v869_v62 = vpop.f32.mrf.mxu0  ;;  %v901_v63 = vpop.f32.mrf.mxu1 }
  0xff   :  { %685 = vst.msk [vmem:[%s1442_s3 + $0xa0] sm:$0xff] %vm664_vm1, %v490_v60  ;;  %717 = vst.msk [vmem:[%s1442_s3 + $0x1a0] sm:$0xff] %vm664_vm1, %v618_v61  ;;  %v501_v0 = vadd.f32 %v869_v62, %v1117_v36  ;;  %v629_v1 = vadd.f32 %v901_v63, %v1117_v36 }
 0x100   :  { %v492_v2 = vpop.f32.mrf.mxu0  ;;  %v620_v3 = vpop.f32.mrf.mxu1 }
 0x101   :  { %688 = vst.msk [vmem:[%s1442_s3 + $0xb8] sm:$0xff] %vm664_vm1, %v501_v0  ;;  %720 = vst.msk [vmem:[%s1442_s3 + $0x1b8] sm:$0xff] %vm664_vm1, %v629_v1  ;;  %v493_v4 = vadd.f32 %v1117_v36, %v492_v2  ;;  %v621_v5 = vadd.f32 %v1117_v36, %v620_v3 }
 0x102   :  { %v872_v6 = vpop.f32.mrf.mxu0  ;;  %v904_v7 = vpop.f32.mrf.mxu1 }
 0x103   :  { %686 = vst.msk [vmem:[%s1442_s3 + $0xa8] sm:$0xff] %vm664_vm1, %v493_v4  ;;  %718 = vst.msk [vmem:[%s1442_s3 + $0x1a8] sm:$0xff] %vm664_vm1, %v621_v5  ;;  %v514_v8 = vadd.f32 %v872_v6, %v1117_v36  ;;  %v642_v9 = vadd.f32 %v904_v7, %v1117_v36 }
 0x104   :  { %v505_v10 = vpop.f32.mrf.mxu0  ;;  %v633_v11 = vpop.f32.mrf.mxu1 }
 0x105   :  { %691 = vst.msk [vmem:[%s1442_s3 + $0xd0] sm:$0xff] %vm664_vm1, %v514_v8  ;;  %723 = vst.msk [vmem:[%s1442_s3 + $0x1d0] sm:$0xff] %vm664_vm1, %v642_v9  ;;  %v506_v12 = vadd.f32 %v1117_v36, %v505_v10  ;;  %v634_v13 = vadd.f32 %v1117_v36, %v633_v11 }
 0x106   :  { %v873_v14 = vpop.f32.mrf.mxu0  ;;  %v905_v15 = vpop.f32.mrf.mxu1 }
 0x107   :  { %689 = vst.msk [vmem:[%s1442_s3 + $0xc0] sm:$0xff] %vm664_vm1, %v506_v12  ;;  %721 = vst.msk [vmem:[%s1442_s3 + $0x1c0] sm:$0xff] %vm664_vm1, %v634_v13  ;;  %v517_v16 = vadd.f32 %v873_v14, %v1117_v36  ;;  %v645_v17 = vadd.f32 %v905_v15, %v1117_v36 }
 0x108   :  { %v508_v18 = vpop.f32.mrf.mxu0  ;;  %v636_v19 = vpop.f32.mrf.mxu1 }
 0x109   :  { %692 = vst.msk [vmem:[%s1442_s3 + $0xd8] sm:$0xff] %vm664_vm1, %v517_v16  ;;  %724 = vst.msk [vmem:[%s1442_s3 + $0x1d8] sm:$0xff] %vm664_vm1, %v645_v17  ;;  %v509_v20 = vadd.f32 %v1117_v36, %v508_v18  ;;  %v637_v21 = vadd.f32 %v1117_v36, %v636_v19 }
 0x10a   :  { %v876_v22 = vpop.f32.mrf.mxu0  ;;  %v908_v23 = vpop.f32.mrf.mxu1 }
 0x10b   :  { %690 = vst.msk [vmem:[%s1442_s3 + $0xc8] sm:$0xff] %vm664_vm1, %v509_v20  ;;  %722 = vst.msk [vmem:[%s1442_s3 + $0x1c8] sm:$0xff] %vm664_vm1, %v637_v21  ;;  %v530_v24 = vadd.f32 %v876_v22, %v1117_v36  ;;  %v658_v25 = vadd.f32 %v908_v23, %v1117_v36 }
 0x10c   :  { %v521_v26 = vpop.f32.mrf.mxu0  ;;  %v649_v27 = vpop.f32.mrf.mxu1 }
 0x10d   :  { %695 = vst.msk [vmem:[%s1442_s3 + $0xf0] sm:$0xff] %vm664_vm1, %v530_v24  ;;  %727 = vst.msk [vmem:[%s1442_s3 + $0x1f0] sm:$0xff] %vm664_vm1, %v658_v25  ;;  %v522_v28 = vadd.f32 %v1117_v36, %v521_v26  ;;  %v650_v29 = vadd.f32 %v1117_v36, %v649_v27 }
 0x10e   :  { %v877_v30 = vpop.f32.mrf.mxu0  ;;  %v909_v31 = vpop.f32.mrf.mxu1 }
 0x10f   :  { %693 = vst.msk [vmem:[%s1442_s3 + $0xe0] sm:$0xff] %vm664_vm1, %v522_v28  ;;  %725 = vst.msk [vmem:[%s1442_s3 + $0x1e0] sm:$0xff] %vm664_vm1, %v650_v29  ;;  %v533_v32 = vadd.f32 %v877_v30, %v1117_v36  ;;  %v661_v33 = vadd.f32 %v909_v31, %v1117_v36 }
 0x110   :  { %v524_v34 = vpop.f32.mrf.mxu0  ;;  %v652_v35 = vpop.f32.mrf.mxu1 }
 0x111   :  { %696 = vst.msk [vmem:[%s1442_s3 + $0xf8] sm:$0xff] %vm664_vm1, %v533_v32  ;;  %728 = vst.msk [vmem:[%s1442_s3 + $0x1f8] sm:$0xff] %vm664_vm1, %v661_v33  ;;  %v525_v37 = vadd.f32 %v1117_v36, %v524_v34  ;;  %v653_v38 = vadd.f32 %v1117_v36, %v652_v35 }
 0x113   :  { %694 = vst.msk [vmem:[%s1442_s3 + $0xe8] sm:$0xff] %vm664_vm1, %v525_v37  ;;  %726 = vst.msk [vmem:[%s1442_s3 + $0x1e8] sm:$0xff] %vm664_vm1, %v653_v38 }

</bundles_post_ra>
